<compile_context>
chip_gen: v7x
topology: tpu7x:2x2x1
jax: 0.10.0
libtpu: 0.0.40
codegen_flags: <defaults>
</compile_context>

<pallas_src>
import functools

import jax
import jax.numpy as jnp
from jax import lax
from jax.experimental import pallas as pl
from jax.experimental.pallas import tpu as pltpu

EPS = 1e-5


# ----------------------------------------------------------------------------
# In-kernel helpers
# ----------------------------------------------------------------------------
def _bn_rows(x, gamma=None, beta=None):
    """BatchNorm1d (training mode, biased variance) over axis 0 of x [B, C]."""
    mean = jnp.mean(x, axis=0, keepdims=True)
    d = x - mean
    var = jnp.mean(d * d, axis=0, keepdims=True)
    inv = lax.rsqrt(var + EPS)
    if gamma is None:
        return d * inv
    scale = gamma * inv
    return x * scale + (beta - mean * scale)


def _compact_stats(src_ref, rows, c, chunk):
    """Mean / biased variance over ALL rows of src_ref[0:rows, :c].

    Row-chunked (fori_loop, unroll=True) so only `chunk` rows are live at a
    time; used for stage 1 where every row is a valid pixel.
    """
    nch = rows // chunk

    def body(k, carry):
        s, ss = carry
        off = pl.multiple_of(k * chunk, chunk)
        t = src_ref[pl.ds(off, chunk), :]
        return (s + jnp.sum(t, axis=0, keepdims=True),
                ss + jnp.sum(t * t, axis=0, keepdims=True))

    s, ss = lax.fori_loop(
        0, nch, body,
        (jnp.zeros((1, c), jnp.float32), jnp.zeros((1, c), jnp.float32)),
        unroll=True)
    inv_n = 1.0 / float(rows)
    mean = s * inv_n
    return mean, ss * inv_n - mean * mean


def _padded_valid_stats(src_ref, *, batch, hp, h, c):
    """Mean / biased variance over the VALID rows of a padded (b, i, j) raster.

    Image b occupies rows [b*hp*hp, (b+1)*hp*hp); the valid (non-border) rows of
    image-row i are the h contiguous rows starting at b*hp*hp + (1+i)*hp + 1.
    Partial sums are accumulated as [h, c] slabs (VPU adds) and reduced once.
    """
    ps = jnp.zeros((h, c), jnp.float32)
    pq = jnp.zeros((h, c), jnp.float32)
    for b in range(batch):
        for i in range(h):
            start = b * hp * hp + (1 + i) * hp + 1
            t = src_ref[start:start + h, :]
            ps = ps + t
            pq = pq + t * t
    inv_n = 1.0 / float(batch * h * h)
    mean = jnp.sum(ps, axis=0, keepdims=True) * inv_n
    msq = jnp.sum(pq, axis=0, keepdims=True) * inv_n
    return mean, msq - mean * mean


def _affine(bn_ref, mean, var):
    """BatchNorm affine folded into (scale, shift): y = x*scale + shift."""
    scale = bn_ref[0:1, :] * lax.rsqrt(var + EPS)
    shift = bn_ref[1:2, :] - mean * scale
    return scale, shift


def _bn_relu_pool_scatter(src_ref, dst_ref, scale, shift, *, batch, img_rows,
                          anchor0, rstride, ho, wo, cin, dst_hp):
    """Fused BN-affine + ReLU + 2x2/stride-2 max-pool + scatter.

    src_ref holds raw conv outputs in a flat (b, i, j) raster: image b occupies
    rows [b*img_rows, (b+1)*img_rows), pixel (i, j) sits at
    b*img_rows + anchor0 + i*rstride + j (anchor0=0, rstride=W for the compact
    stage-1 raster; anchor0=hp+1, rstride=hp for padded rasters).

    Per image, the 4 pool-window corners are 4 whole-image stride-2 reads
    shifted by {0, 1, rstride, rstride+1}; BN affine + ReLU is applied to each
    corner read and the elementwise max of the 4 gives every window's value at
    local index io*rstride + jo (junk values at the other indices are never
    read).  The wo valid columns of each output row io are then stored (3x)
    into the next stage's "dy-stacked" padded conv input dst_ref, where
        dst_ref[m, g*cin:(g+1)*cin] == padded_input_row[m - 1 + (g-1)*dst_hp]
    so conv taps (dy=g, dx) become plain row shifts by dx of dst_ref.
    """
    length = (ho - 1) * rstride + wo
    for b in range(batch):
        base = b * img_rows + anchor0

        def corner(d, _base=base):
            t = src_ref[pl.ds(_base + d, length, 2), :]
            return jnp.maximum(t * scale + shift, 0.0)

        m = jnp.maximum(corner(0), corner(1))
        m = jnp.maximum(m, corner(rstride))
        m = jnp.maximum(m, corner(rstride + 1))

        for io in range(ho):
            blk = m[io * rstride: io * rstride + wo, :]          # [wo, cin]
            rho0 = b * dst_hp * dst_hp + (1 + io) * dst_hp + 1   # padded row
            for g in range(3):                                   # g == dy
                m0 = rho0 + 1 - (g - 1) * dst_hp
                dst_ref[m0:m0 + wo, g * cin:(g + 1) * cin] = blk


def _bn_relu_pool_avg(src_ref, scale, shift, *, batch, hp, h):
    """Fused BN-affine + ReLU + MaxPool2d(2) + AdaptiveAvgPool2d((1,1)).

    Same corner-read max as _bn_relu_pool_scatter on a padded raster, followed
    by averaging the (h/2)^2 valid pooled rows of each image.  Returns the
    [batch, C] encoder feature as an in-register value.
    """
    ho = h // 2
    length = (ho - 1) * hp + ho
    inv = 1.0 / float(ho * ho)
    rows = []
    for b in range(batch):
        base = b * hp * hp + hp + 1

        def corner(d, _base=base):
            t = src_ref[pl.ds(_base + d, length, 2), :]
            return jnp.maximum(t * scale + shift, 0.0)

        m = jnp.maximum(corner(0), corner(1))
        m = jnp.maximum(m, corner(hp))
        m = jnp.maximum(m, corner(hp + 1))

        acc = None
        for io in range(ho):
            part = jnp.sum(m[io * hp: io * hp + ho, :], axis=0, keepdims=True)
            acc = part if acc is None else acc + part
        rows.append(acc * inv)
    return jnp.concatenate(rows, axis=0)


# ----------------------------------------------------------------------------
# Kernel
# ----------------------------------------------------------------------------
def _simsiam_kernel(
        # inputs ------------------------------------------------------------
        x9_ref,                      # [r1, 9]  per-branch valid-pixel im2col
        w1_ref, bn1_ref,             # [9, 32], [2, 32]
        w2s_ref, bn2_ref,            # [3, 96, 64]  (dx, dy*Cin+cin, cout), [2, 64]
        w3s_ref, bn3_ref,            # [3, 192, 128], [2, 128]
        wp1_ref, bnp1_ref, wp2_ref, bnp2_ref, wp3_ref, bp3_ref,   # projector
        wq1_ref, bq1_ref, bnq1_ref, wq2_ref, bq2_ref,             # predictor
        # outputs -----------------------------------------------------------
        z_out_ref,                   # [B, 128] encoder feature (detached output)
        p_out_ref,                   # [B, 256] predictor output
        # scratch -----------------------------------------------------------
        z1_ref,                      # [r1, 32]       stage-1 raw conv output
        a2w_ref,                     # [R2+2, 3*32]   dy-stacked stage-2 input
        y2_ref,                      # [R2, 64]       stage-2 raw conv output
        a3w_ref,                     # [R3+2, 3*64]   dy-stacked stage-3 input
        y3_ref,                      # [R3, 128]      stage-3 raw conv output
        *, batch, img):
    H = img
    h2, h3 = H // 2, H // 4
    hp2, hp3 = h2 + 2, h3 + 2
    r1 = batch * H * H
    R2 = batch * hp2 * hp2
    R3 = batch * hp3 * hp3
    c1 = w1_ref.shape[1]
    c2 = w2s_ref.shape[2]
    c3 = w3s_ref.shape[2]

    # Zero the dy-stacked conv-input buffers with aligned full-tile stores.
    # The zero-padding border cells are interleaved with the interior in the
    # flat raster, so border-only zeroing would need per-row masked stores;
    # and per-core scratch under the "parallel" split forbids a program_id==0
    # guard.  These buffers are small (< 140 KiB raw), so this is cheap.
    a2w_ref[...] = jnp.zeros(a2w_ref.shape, jnp.float32)
    a3w_ref[...] = jnp.zeros(a3w_ref.shape, jnp.float32)

    # ---- stage 1: Conv2d(1, 32, 3, pad=1) as a single K=9 matmul ----------
    ch1 = max(8, (H * H) // 4)          # row chunk; divides r1, multiple of 8
    nch1 = r1 // ch1

    @pl.loop(0, nch1)
    def _conv1(k):
        off = pl.multiple_of(k * ch1, ch1)
        z1_ref[pl.ds(off, ch1), :] = jnp.dot(
            x9_ref[pl.ds(off, ch1), :], w1_ref[...],
            preferred_element_type=jnp.float32)

    mean1, var1 = _compact_stats(z1_ref, r1, c1, ch1)
    scale1, shift1 = _affine(bn1_ref, mean1, var1)
    # BN + ReLU + MaxPool2d(2), scattered into the dy-stacked stage-2 input.
    _bn_relu_pool_scatter(z1_ref, a2w_ref, scale1, shift1,
                          batch=batch, img_rows=H * H, anchor0=0, rstride=H,
                          ho=h2, wo=h2, cin=c1, dst_hp=hp2)

    # ---- stage 2: Conv2d(32, 64, 3, pad=1) = 3 dots with K=3*32 ------------
    y = jnp.dot(a2w_ref[pl.ds(0, R2), :], w2s_ref[0],
                preferred_element_type=jnp.float32)
    y = y + jnp.dot(a2w_ref[pl.ds(1, R2), :], w2s_ref[1],
                    preferred_element_type=jnp.float32)
    y = y + jnp.dot(a2w_ref[pl.ds(2, R2), :], w2s_ref[2],
                    preferred_element_type=jnp.float32)
    y2_ref[...] = y

    mean2, var2 = _padded_valid_stats(y2_ref, batch=batch, hp=hp2, h=h2, c=c2)
    scale2, shift2 = _affine(bn2_ref, mean2, var2)
    _bn_relu_pool_scatter(y2_ref, a3w_ref, scale2, shift2,
                          batch=batch, img_rows=hp2 * hp2, anchor0=hp2 + 1,
                          rstride=hp2, ho=h3, wo=h3, cin=c2, dst_hp=hp3)

    # ---- stage 3: Conv2d(64, 128, 3, pad=1) = 3 dots with K=3*64 ------------
    y = jnp.dot(a3w_ref[pl.ds(0, R3), :], w3s_ref[0],
                preferred_element_type=jnp.float32)
    y = y + jnp.dot(a3w_ref[pl.ds(1, R3), :], w3s_ref[1],
                    preferred_element_type=jnp.float32)
    y = y + jnp.dot(a3w_ref[pl.ds(2, R3), :], w3s_ref[2],
                    preferred_element_type=jnp.float32)
    y3_ref[...] = y

    mean3, var3 = _padded_valid_stats(y3_ref, batch=batch, hp=hp3, h=h3, c=c3)
    scale3, shift3 = _affine(bn3_ref, mean3, var3)

    # BN + ReLU + MaxPool2d(2) + AdaptiveAvgPool2d -> encoder feature [B, 128].
    feat = _bn_relu_pool_avg(y3_ref, scale3, shift3, batch=batch, hp=hp3, h=h3)
    z_out_ref[...] = feat                    # .detach() is identity in forward

    # ---- projector + predictor (per-branch BatchNorm1d, training mode) -----
    h = jnp.dot(feat, wp1_ref[...], preferred_element_type=jnp.float32)
    h = jnp.maximum(_bn_rows(h, bnp1_ref[0:1, :], bnp1_ref[1:2, :]), 0.0)
    h = jnp.dot(h, wp2_ref[...], preferred_element_type=jnp.float32)
    h = jnp.maximum(_bn_rows(h, bnp2_ref[0:1, :], bnp2_ref[1:2, :]), 0.0)
    zp = jnp.dot(h, wp3_ref[...], preferred_element_type=jnp.float32) + bp3_ref[...]
    zp = _bn_rows(zp)                        # BatchNorm1d(affine=False)
    q = jnp.dot(zp, wq1_ref[...], preferred_element_type=jnp.float32) + bq1_ref[...]
    q = jnp.maximum(_bn_rows(q, bnq1_ref[0:1, :], bnq1_ref[1:2, :]), 0.0)
    p = jnp.dot(q, wq2_ref[...], preferred_element_type=jnp.float32) + bq2_ref[...]
    p_out_ref[...] = p


# ----------------------------------------------------------------------------
# Wrapper
# ----------------------------------------------------------------------------
def small_simsiam_forward(params, orig, aug, anom):
    """Returns (p_orig, p_aug, p_anom, z_orig, z_aug, z_anom) like the PyTorch module."""
    batch, cin, img, img_w = orig.shape
    assert cin == 1 and img == img_w and img % 8 == 0

    H = img
    h2, h3 = H // 2, H // 4
    hp2, hp3 = h2 + 2, h3 + 2
    r1 = batch * H * H
    R2 = batch * hp2 * hp2
    R3 = batch * hp3 * hp3

    c1 = params["w1"].shape[1]
    c2 = params["w2s"].shape[2]
    c3 = params["w3s"].shape[2]
    enc_dim = params["wp1"].shape[0]
    feat_dim = params["wp3"].shape[1]

    # Wrapper-side glue: stack branches and build the lane-dense stage-1 im2col
    # over valid pixels only, tap order t = 3*dy + dx (matches params["w1"]).
    x3 = jnp.stack([orig, aug, anom], axis=0).astype(jnp.float32)
    x3 = x3.reshape(3, batch, H, H)
    xp = jnp.pad(x3, ((0, 0), (0, 0), (1, 1), (1, 1)))
    cols = jnp.stack([xp[:, :, dy:dy + H, dx:dx + H]
                      for dy in range(3) for dx in range(3)], axis=-1)
    x9 = cols.reshape(3, r1, 9)

    ordered = (params["w1"], params["bn1"],
               params["w2s"], params["bn2"],
               params["w3s"], params["bn3"],
               params["wp1"], params["bnp1"], params["wp2"], params["bnp2"],
               params["wp3"], params["bp3"],
               params["wq1"], params["bq1"], params["bnq1"],
               params["wq2"], params["bq2"])

    def _const_spec(a):
        nd = a.ndim
        return pl.BlockSpec(a.shape, lambda i, _nd=nd: (0,) * _nd)

    in_specs = [pl.BlockSpec((None, r1, 9), lambda i: (i, 0, 0))]
    in_specs += [_const_spec(a) for a in ordered]
    out_specs = (pl.BlockSpec((None, batch, enc_dim), lambda i: (i, 0, 0)),
                 pl.BlockSpec((None, batch, feat_dim), lambda i: (i, 0, 0)))
    out_shape = (jax.ShapeDtypeStruct((3, batch, enc_dim), jnp.float32),
                 jax.ShapeDtypeStruct((3, batch, feat_dim), jnp.float32))
    scratch = [
        pltpu.VMEM((r1, c1), jnp.float32),          # stage-1 raw conv output
        pltpu.VMEM((R2 + 2, 3 * c1), jnp.float32),  # dy-stacked stage-2 input
        pltpu.VMEM((R2, c2), jnp.float32),          # stage-2 raw conv output
        pltpu.VMEM((R3 + 2, 3 * c2), jnp.float32),  # dy-stacked stage-3 input
        pltpu.VMEM((R3, c3), jnp.float32),          # stage-3 raw conv output
    ]

    kernel = functools.partial(_simsiam_kernel, batch=batch, img=img)
    z_all, p_all = pl.pallas_call(
        kernel,
        grid=(3,),
        in_specs=in_specs,
        out_specs=out_specs,
        out_shape=out_shape,
        scratch_shapes=scratch,
        # v7x megacore splits the 3 branches 2+1 across the two TensorCores
        # (accepted ~1.5x ceiling); v5e/v6e run the grid serially on one core.
        compiler_params=pltpu.CompilerParams(
            dimension_semantics=("parallel",)),
    )(x9, *ordered)

    return p_all[0], p_all[1], p_all[2], z_all[0], z_all[1], z_all[2]


# ----------------------------------------------------------------------------
# Parameters (kernel layout)
# ----------------------------------------------------------------------------
def init_params(key, feature_dim=256, pred_dim=64):
    prev_dim = 128
    c1, c2, c3 = 32, 64, prev_dim
    ks = jax.random.split(key, 9)

    def w(k, shape, scale=0.1):
        return (scale * jax.random.normal(k, shape)).astype(jnp.float32)

    def bn_rows(c):   # row 0 = gamma, row 1 = beta
        return jnp.concatenate([jnp.ones((1, c), jnp.float32),
                                jnp.zeros((1, c), jnp.float32)], axis=0)

    # Conv weights are stored in kernel layout:
    #   w1[t, cout]                 == Conv1.weight[cout, 0, dy, dx], t = 3*dy+dx
    #   w2s[dx, dy*32 + cin, cout]  == Conv2.weight[cout, cin, dy, dx]
    #   w3s[dx, dy*64 + cin, cout]  == Conv3.weight[cout, cin, dy, dx]
    # Conv biases are omitted: they cancel exactly under the following
    # training-mode BatchNorm2d mean subtraction, so the forward is unchanged.
    return {
        "w1": w(ks[0], (9, c1)),
        "bn1": bn_rows(c1),
        "w2s": w(ks[1], (3, 3 * c1, c2)),
        "bn2": bn_rows(c2),
        "w3s": w(ks[2], (3, 3 * c2, c3)),
        "bn3": bn_rows(c3),
        # projector: Linear(128,128,no bias)+BN+ReLU x2, Linear(128,256)+BN(affine=False)
        "wp1": w(ks[3], (prev_dim, prev_dim)),
        "bnp1": bn_rows(prev_dim),
        "wp2": w(ks[4], (prev_dim, prev_dim)),
        "bnp2": bn_rows(prev_dim),
        "wp3": w(ks[5], (prev_dim, feature_dim)),
        "bp3": jnp.zeros((1, feature_dim), jnp.float32),
        # predictor: Linear(256,64)+BN+ReLU, Linear(64,256)
        "wq1": w(ks[6], (feature_dim, pred_dim)),
        "bq1": jnp.zeros((1, pred_dim), jnp.float32),
        "bnq1": bn_rows(pred_dim),
        "wq2": w(ks[7], (pred_dim, feature_dim)),
        "bq2": w(ks[8], (1, feature_dim), scale=0.01),
    }


if __name__ == "__main__":
    key = jax.random.PRNGKey(0)
    pkey, k1, k2, k3 = jax.random.split(key, 4)
    params = init_params(pkey)

    B = 2
    orig = jax.random.normal(k1, (B, 1, 16, 16), jnp.float32)
    aug = jax.random.normal(k2, (B, 1, 16, 16), jnp.float32)
    anom = jax.random.normal(k3, (B, 1, 16, 16), jnp.float32)

    fwd = jax.jit(functools.partial(small_simsiam_forward, params))
    outs = fwd(orig, aug, anom)
    jax.block_until_ready(outs)

    p_orig, p_aug, p_anom, z_orig, z_aug, z_anom = outs
    assert p_orig.shape == (B, 256) and p_aug.shape == (B, 256) and p_anom.shape == (B, 256)
    assert z_orig.shape == (B, 128) and z_aug.shape == (B, 128) and z_anom.shape == (B, 128)
    assert all(bool(jnp.all(jnp.isfinite(t))) for t in outs)
    print("KERNEL_OK")
</pallas_src>

<mosaic_0001>
module attributes {stable_mosaic.version = 11 : i64} {
  func.func @_simsiam_kernel(%arg0: i32, %arg1: memref<1x512x9xf32, #tpu.memory_space<vmem>>, %arg2: memref<9x32xf32, #tpu.memory_space<vmem>>, %arg3: memref<2x32xf32, #tpu.memory_space<vmem>>, %arg4: memref<3x96x64xf32, #tpu.memory_space<vmem>>, %arg5: memref<2x64xf32, #tpu.memory_space<vmem>>, %arg6: memref<3x192x128xf32, #tpu.memory_space<vmem>>, %arg7: memref<2x128xf32, #tpu.memory_space<vmem>>, %arg8: memref<128x128xf32, #tpu.memory_space<vmem>>, %arg9: memref<2x128xf32, #tpu.memory_space<vmem>>, %arg10: memref<128x128xf32, #tpu.memory_space<vmem>>, %arg11: memref<2x128xf32, #tpu.memory_space<vmem>>, %arg12: memref<128x256xf32, #tpu.memory_space<vmem>>, %arg13: memref<1x256xf32, #tpu.memory_space<vmem>>, %arg14: memref<256x64xf32, #tpu.memory_space<vmem>>, %arg15: memref<1x64xf32, #tpu.memory_space<vmem>>, %arg16: memref<2x64xf32, #tpu.memory_space<vmem>>, %arg17: memref<64x256xf32, #tpu.memory_space<vmem>>, %arg18: memref<1x256xf32, #tpu.memory_space<vmem>>, %arg19: memref<1x2x128xf32, #tpu.memory_space<vmem>>, %arg20: memref<1x2x256xf32, #tpu.memory_space<vmem>>, %arg21: memref<512x32xf32, #tpu.memory_space<vmem>>, %arg22: memref<202x96xf32, #tpu.memory_space<vmem>>, %arg23: memref<200x64xf32, #tpu.memory_space<vmem>>, %arg24: memref<74x192xf32, #tpu.memory_space<vmem>>, %arg25: memref<72x128xf32, #tpu.memory_space<vmem>>) attributes {dimension_semantics = [#tpu.dimension_semantics<parallel>], iteration_bounds = array<i64: 3>, scalar_prefetch = 0 : i64, scratch_operands = 5 : i64, tpu.core_type = #tpu.core_type<tc>, window_params = [{transform_indices = @transform_0, window_bounds = array<i64: 1, 512, 9>}, {pipeline_mode = #tpu.pipeline_mode<synchronous>, transform_indices = @transform_1, window_bounds = array<i64: 9, 32>}, {pipeline_mode = #tpu.pipeline_mode<synchronous>, transform_indices = @transform_2, window_bounds = array<i64: 2, 32>}, {pipeline_mode = #tpu.pipeline_mode<synchronous>, transform_indices = @transform_3, window_bounds = array<i64: 3, 96, 64>}, {pipeline_mode = #tpu.pipeline_mode<synchronous>, transform_indices = @transform_4, window_bounds = array<i64: 2, 64>}, {pipeline_mode = #tpu.pipeline_mode<synchronous>, transform_indices = @transform_5, window_bounds = array<i64: 3, 192, 128>}, {pipeline_mode = #tpu.pipeline_mode<synchronous>, transform_indices = @transform_6, window_bounds = array<i64: 2, 128>}, {pipeline_mode = #tpu.pipeline_mode<synchronous>, transform_indices = @transform_7, window_bounds = array<i64: 128, 128>}, {pipeline_mode = #tpu.pipeline_mode<synchronous>, transform_indices = @transform_8, window_bounds = array<i64: 2, 128>}, {pipeline_mode = #tpu.pipeline_mode<synchronous>, transform_indices = @transform_9, window_bounds = array<i64: 128, 128>}, {pipeline_mode = #tpu.pipeline_mode<synchronous>, transform_indices = @transform_10, window_bounds = array<i64: 2, 128>}, {pipeline_mode = #tpu.pipeline_mode<synchronous>, transform_indices = @transform_11, window_bounds = array<i64: 128, 256>}, {pipeline_mode = #tpu.pipeline_mode<synchronous>, transform_indices = @transform_12, window_bounds = array<i64: 1, 256>}, {pipeline_mode = #tpu.pipeline_mode<synchronous>, transform_indices = @transform_13, window_bounds = array<i64: 256, 64>}, {pipeline_mode = #tpu.pipeline_mode<synchronous>, transform_indices = @transform_14, window_bounds = array<i64: 1, 64>}, {pipeline_mode = #tpu.pipeline_mode<synchronous>, transform_indices = @transform_15, window_bounds = array<i64: 2, 64>}, {pipeline_mode = #tpu.pipeline_mode<synchronous>, transform_indices = @transform_16, window_bounds = array<i64: 64, 256>}, {pipeline_mode = #tpu.pipeline_mode<synchronous>, transform_indices = @transform_17, window_bounds = array<i64: 1, 256>}, {transform_indices = @transform_18, window_bounds = array<i64: 1, 2, 128>}, {transform_indices = @transform_19, window_bounds = array<i64: 1, 2, 256>}]} {
    %cst = arith.constant 0.000000e+00 : f32
    %0 = vector.broadcast %cst : f32 to vector<202x96xf32>
    %c0 = arith.constant 0 : index
    %c0_0 = arith.constant 0 : index
    %1 = vector.load %arg22[%c0, %c0_0] : memref<202x96xf32, #tpu.memory_space<vmem>>, vector<202x96xf32>
    tpu.vector_store %arg22[%c0, %c0_0], %0 {strides = array<i32>} : memref<202x96xf32, #tpu.memory_space<vmem>>, vector<202x96xf32>,
    %cst_1 = arith.constant 0.000000e+00 : f32
    %2 = vector.broadcast %cst_1 : f32 to vector<74x192xf32>
    %c0_2 = arith.constant 0 : index
    %c0_3 = arith.constant 0 : index
    %3 = vector.load %arg24[%c0_2, %c0_3] : memref<74x192xf32, #tpu.memory_space<vmem>>, vector<74x192xf32>
    tpu.vector_store %arg24[%c0_2, %c0_3], %2 {strides = array<i32>} : memref<74x192xf32, #tpu.memory_space<vmem>>, vector<74x192xf32>,
    %c0_i32 = arith.constant 0 : i32
    %c8_i32 = arith.constant 8 : i32
    %4 = arith.addi %c0_i32, %c8_i32 : i32
    %c1_i32 = arith.constant 1 : i32
    scf.for %arg26 = %c0_i32 to %4 step %c1_i32  : i32 {
      %c1_i32_381 = arith.constant 1 : i32
      %692 = arith.muli %arg26, %c1_i32_381 : i32
      %c0_i32_382 = arith.constant 0 : i32
      %693 = arith.addi %c0_i32_382, %692 : i32
      %c64_i32_383 = arith.constant 64 : i32
      %694 = arith.muli %693, %c64_i32_383 : i32
      %695 = tpu.assume_multiple %694, 64 : i32
      %c0_384 = arith.constant 0 : index
      %696 = arith.index_cast %695 : i32 to index
      %c0_385 = arith.constant 0 : index
      %697 = vector.load %arg1[%c0_384, %696, %c0_385] : memref<1x512x9xf32, #tpu.memory_space<vmem>>, vector<1x64x9xf32>
      %698 = vector.shape_cast %697 : vector<1x64x9xf32> to vector<64x9xf32>
      %c0_386 = arith.constant 0 : index
      %c0_387 = arith.constant 0 : index
      %699 = vector.load %arg2[%c0_386, %c0_387] : memref<9x32xf32, #tpu.memory_space<vmem>>, vector<9x32xf32>
      %cst_388 = arith.constant dense<0.000000e+00> : vector<64x32xf32>
      %700 = tpu.matmul %698, %699, %cst_388 {dimension_numbers = #tpu.dot_dimension_numbers<[1], [0], [0], [1], [0, 0, 1, 1], [], []>} : vector<64x9xf32>, vector<9x32xf32>, vector<64x32xf32> -> vector<64x32xf32>
      %701 = arith.index_cast %695 : i32 to index
      %c0_389 = arith.constant 0 : index
      %702 = vector.load %arg21[%701, %c0_389] : memref<512x32xf32, #tpu.memory_space<vmem>>, vector<64x32xf32>
      tpu.vector_store %arg21[%701, %c0_389], %700 {strides = array<i32>} : memref<512x32xf32, #tpu.memory_space<vmem>>, vector<64x32xf32>,
    }
    %c8_i32_4 = arith.constant 8 : i32
    %cst_5 = arith.constant 0.000000e+00 : f32
    %5 = vector.broadcast %cst_5 : f32 to vector<1x32xf32>
    %cst_6 = arith.constant 0.000000e+00 : f32
    %6 = vector.broadcast %cst_6 : f32 to vector<1x32xf32>
    %c0_i32_7 = arith.constant 0 : i32
    %c64_i32 = arith.constant 64 : i32
    %7 = arith.muli %c0_i32_7, %c64_i32 : i32
    %8 = tpu.assume_multiple %7, 64 : i32
    %9 = arith.index_cast %8 : i32 to index
    %c0_8 = arith.constant 0 : index
    %10 = vector.load %arg21[%9, %c0_8] : memref<512x32xf32, #tpu.memory_space<vmem>>, vector<64x32xf32>
    %cst_9 = arith.constant dense<0.000000e+00> : vector<32xf32>
    %11 = vector.multi_reduction <add>, %10, %cst_9 [0] : vector<64x32xf32> to vector<32xf32>
    %12 = vector.shape_cast %11 : vector<32xf32> to vector<1x32xf32>
    %13 = arith.addf %5, %12 : vector<1x32xf32>
    %14 = arith.mulf %10, %10 : vector<64x32xf32>
    %cst_10 = arith.constant dense<0.000000e+00> : vector<32xf32>
    %15 = vector.multi_reduction <add>, %14, %cst_10 [0] : vector<64x32xf32> to vector<32xf32>
    %16 = vector.shape_cast %15 : vector<32xf32> to vector<1x32xf32>
    %17 = arith.addf %6, %16 : vector<1x32xf32>
    %c1_i32_11 = arith.constant 1 : i32
    %c64_i32_12 = arith.constant 64 : i32
    %18 = arith.muli %c1_i32_11, %c64_i32_12 : i32
    %19 = tpu.assume_multiple %18, 64 : i32
    %20 = arith.index_cast %19 : i32 to index
    %c0_13 = arith.constant 0 : index
    %21 = vector.load %arg21[%20, %c0_13] : memref<512x32xf32, #tpu.memory_space<vmem>>, vector<64x32xf32>
    %cst_14 = arith.constant dense<0.000000e+00> : vector<32xf32>
    %22 = vector.multi_reduction <add>, %21, %cst_14 [0] : vector<64x32xf32> to vector<32xf32>
    %23 = vector.shape_cast %22 : vector<32xf32> to vector<1x32xf32>
    %24 = arith.addf %13, %23 : vector<1x32xf32>
    %25 = arith.mulf %21, %21 : vector<64x32xf32>
    %cst_15 = arith.constant dense<0.000000e+00> : vector<32xf32>
    %26 = vector.multi_reduction <add>, %25, %cst_15 [0] : vector<64x32xf32> to vector<32xf32>
    %27 = vector.shape_cast %26 : vector<32xf32> to vector<1x32xf32>
    %28 = arith.addf %17, %27 : vector<1x32xf32>
    %c2_i32 = arith.constant 2 : i32
    %c64_i32_16 = arith.constant 64 : i32
    %29 = arith.muli %c2_i32, %c64_i32_16 : i32
    %30 = tpu.assume_multiple %29, 64 : i32
    %31 = arith.index_cast %30 : i32 to index
    %c0_17 = arith.constant 0 : index
    %32 = vector.load %arg21[%31, %c0_17] : memref<512x32xf32, #tpu.memory_space<vmem>>, vector<64x32xf32>
    %cst_18 = arith.constant dense<0.000000e+00> : vector<32xf32>
    %33 = vector.multi_reduction <add>, %32, %cst_18 [0] : vector<64x32xf32> to vector<32xf32>
    %34 = vector.shape_cast %33 : vector<32xf32> to vector<1x32xf32>
    %35 = arith.addf %24, %34 : vector<1x32xf32>
    %36 = arith.mulf %32, %32 : vector<64x32xf32>
    %cst_19 = arith.constant dense<0.000000e+00> : vector<32xf32>
    %37 = vector.multi_reduction <add>, %36, %cst_19 [0] : vector<64x32xf32> to vector<32xf32>
    %38 = vector.shape_cast %37 : vector<32xf32> to vector<1x32xf32>
    %39 = arith.addf %28, %38 : vector<1x32xf32>
    %c3_i32 = arith.constant 3 : i32
    %c64_i32_20 = arith.constant 64 : i32
    %40 = arith.muli %c3_i32, %c64_i32_20 : i32
    %41 = tpu.assume_multiple %40, 64 : i32
    %42 = arith.index_cast %41 : i32 to index
    %c0_21 = arith.constant 0 : index
    %43 = vector.load %arg21[%42, %c0_21] : memref<512x32xf32, #tpu.memory_space<vmem>>, vector<64x32xf32>
    %cst_22 = arith.constant dense<0.000000e+00> : vector<32xf32>
    %44 = vector.multi_reduction <add>, %43, %cst_22 [0] : vector<64x32xf32> to vector<32xf32>
    %45 = vector.shape_cast %44 : vector<32xf32> to vector<1x32xf32>
    %46 = arith.addf %35, %45 : vector<1x32xf32>
    %47 = arith.mulf %43, %43 : vector<64x32xf32>
    %cst_23 = arith.constant dense<0.000000e+00> : vector<32xf32>
    %48 = vector.multi_reduction <add>, %47, %cst_23 [0] : vector<64x32xf32> to vector<32xf32>
    %49 = vector.shape_cast %48 : vector<32xf32> to vector<1x32xf32>
    %50 = arith.addf %39, %49 : vector<1x32xf32>
    %c4_i32 = arith.constant 4 : i32
    %c64_i32_24 = arith.constant 64 : i32
    %51 = arith.muli %c4_i32, %c64_i32_24 : i32
    %52 = tpu.assume_multiple %51, 64 : i32
    %53 = arith.index_cast %52 : i32 to index
    %c0_25 = arith.constant 0 : index
    %54 = vector.load %arg21[%53, %c0_25] : memref<512x32xf32, #tpu.memory_space<vmem>>, vector<64x32xf32>
    %cst_26 = arith.constant dense<0.000000e+00> : vector<32xf32>
    %55 = vector.multi_reduction <add>, %54, %cst_26 [0] : vector<64x32xf32> to vector<32xf32>
    %56 = vector.shape_cast %55 : vector<32xf32> to vector<1x32xf32>
    %57 = arith.addf %46, %56 : vector<1x32xf32>
    %58 = arith.mulf %54, %54 : vector<64x32xf32>
    %cst_27 = arith.constant dense<0.000000e+00> : vector<32xf32>
    %59 = vector.multi_reduction <add>, %58, %cst_27 [0] : vector<64x32xf32> to vector<32xf32>
    %60 = vector.shape_cast %59 : vector<32xf32> to vector<1x32xf32>
    %61 = arith.addf %50, %60 : vector<1x32xf32>
    %c5_i32 = arith.constant 5 : i32
    %c64_i32_28 = arith.constant 64 : i32
    %62 = arith.muli %c5_i32, %c64_i32_28 : i32
    %63 = tpu.assume_multiple %62, 64 : i32
    %64 = arith.index_cast %63 : i32 to index
    %c0_29 = arith.constant 0 : index
    %65 = vector.load %arg21[%64, %c0_29] : memref<512x32xf32, #tpu.memory_space<vmem>>, vector<64x32xf32>
    %cst_30 = arith.constant dense<0.000000e+00> : vector<32xf32>
    %66 = vector.multi_reduction <add>, %65, %cst_30 [0] : vector<64x32xf32> to vector<32xf32>
    %67 = vector.shape_cast %66 : vector<32xf32> to vector<1x32xf32>
    %68 = arith.addf %57, %67 : vector<1x32xf32>
    %69 = arith.mulf %65, %65 : vector<64x32xf32>
    %cst_31 = arith.constant dense<0.000000e+00> : vector<32xf32>
    %70 = vector.multi_reduction <add>, %69, %cst_31 [0] : vector<64x32xf32> to vector<32xf32>
    %71 = vector.shape_cast %70 : vector<32xf32> to vector<1x32xf32>
    %72 = arith.addf %61, %71 : vector<1x32xf32>
    %c6_i32 = arith.constant 6 : i32
    %c64_i32_32 = arith.constant 64 : i32
    %73 = arith.muli %c6_i32, %c64_i32_32 : i32
    %74 = tpu.assume_multiple %73, 64 : i32
    %75 = arith.index_cast %74 : i32 to index
    %c0_33 = arith.constant 0 : index
    %76 = vector.load %arg21[%75, %c0_33] : memref<512x32xf32, #tpu.memory_space<vmem>>, vector<64x32xf32>
    %cst_34 = arith.constant dense<0.000000e+00> : vector<32xf32>
    %77 = vector.multi_reduction <add>, %76, %cst_34 [0] : vector<64x32xf32> to vector<32xf32>
    %78 = vector.shape_cast %77 : vector<32xf32> to vector<1x32xf32>
    %79 = arith.addf %68, %78 : vector<1x32xf32>
    %80 = arith.mulf %76, %76 : vector<64x32xf32>
    %cst_35 = arith.constant dense<0.000000e+00> : vector<32xf32>
    %81 = vector.multi_reduction <add>, %80, %cst_35 [0] : vector<64x32xf32> to vector<32xf32>
    %82 = vector.shape_cast %81 : vector<32xf32> to vector<1x32xf32>
    %83 = arith.addf %72, %82 : vector<1x32xf32>
    %c7_i32 = arith.constant 7 : i32
    %c64_i32_36 = arith.constant 64 : i32
    %84 = arith.muli %c7_i32, %c64_i32_36 : i32
    %85 = tpu.assume_multiple %84, 64 : i32
    %86 = arith.index_cast %85 : i32 to index
    %c0_37 = arith.constant 0 : index
    %87 = vector.load %arg21[%86, %c0_37] : memref<512x32xf32, #tpu.memory_space<vmem>>, vector<64x32xf32>
    %cst_38 = arith.constant dense<0.000000e+00> : vector<32xf32>
    %88 = vector.multi_reduction <add>, %87, %cst_38 [0] : vector<64x32xf32> to vector<32xf32>
    %89 = vector.shape_cast %88 : vector<32xf32> to vector<1x32xf32>
    %90 = arith.addf %79, %89 : vector<1x32xf32>
    %91 = arith.mulf %87, %87 : vector<64x32xf32>
    %cst_39 = arith.constant dense<0.000000e+00> : vector<32xf32>
    %92 = vector.multi_reduction <add>, %91, %cst_39 [0] : vector<64x32xf32> to vector<32xf32>
    %93 = vector.shape_cast %92 : vector<32xf32> to vector<1x32xf32>
    %94 = arith.addf %83, %93 : vector<1x32xf32>
    %c8_i32_40 = arith.constant 8 : i32
    %cst_41 = arith.constant 0.001953125 : f32
    %95 = vector.broadcast %cst_41 : f32 to vector<1x32xf32>
    %96 = arith.mulf %90, %95 : vector<1x32xf32>
    %cst_42 = arith.constant 0.001953125 : f32
    %97 = vector.broadcast %cst_42 : f32 to vector<1x32xf32>
    %98 = arith.mulf %94, %97 : vector<1x32xf32>
    %99 = arith.mulf %96, %96 : vector<1x32xf32>
    %100 = arith.subf %98, %99 : vector<1x32xf32>
    %c0_43 = arith.constant 0 : index
    %c0_44 = arith.constant 0 : index
    %101 = vector.load %arg3[%c0_43, %c0_44] : memref<2x32xf32, #tpu.memory_space<vmem>>, vector<1x32xf32>
    %cst_45 = arith.constant 9.99999974E-6 : f32
    %102 = vector.broadcast %cst_45 : f32 to vector<1x32xf32>
    %103 = arith.addf %100, %102 : vector<1x32xf32>
    %104 = math.rsqrt %103 : vector<1x32xf32>
    %105 = arith.mulf %101, %104 : vector<1x32xf32>
    %c1 = arith.constant 1 : index
    %c0_46 = arith.constant 0 : index
    %106 = vector.load %arg3[%c1, %c0_46] : memref<2x32xf32, #tpu.memory_space<vmem>>, vector<1x32xf32>
    %107 = arith.mulf %96, %105 : vector<1x32xf32>
    %108 = arith.subf %106, %107 : vector<1x32xf32>
    %c0_47 = arith.constant 0 : index
    %c0_48 = arith.constant 0 : index
    %109 = tpu.strided_load %arg21[%c0_47, %c0_48] {strides = array<i32: 2, 1>} : memref<512x32xf32, #tpu.memory_space<vmem>>, vector<120x32xf32>
    %110 = vector.broadcast %105 : vector<1x32xf32> to vector<120x32xf32>
    %111 = arith.mulf %109, %110 : vector<120x32xf32>
    %112 = vector.broadcast %108 : vector<1x32xf32> to vector<120x32xf32>
    %113 = arith.addf %111, %112 : vector<120x32xf32>
    %cst_49 = arith.constant 0.000000e+00 : f32
    %114 = vector.broadcast %cst_49 : f32 to vector<120x32xf32>
    %115 = arith.maximumf %113, %114 : vector<120x32xf32>
    %c1_50 = arith.constant 1 : index
    %c0_51 = arith.constant 0 : index
    %116 = tpu.strided_load %arg21[%c1_50, %c0_51] {strides = array<i32: 2, 1>} : memref<512x32xf32, #tpu.memory_space<vmem>>, vector<120x32xf32>
    %117 = vector.broadcast %105 : vector<1x32xf32> to vector<120x32xf32>
    %118 = arith.mulf %116, %117 : vector<120x32xf32>
    %119 = vector.broadcast %108 : vector<1x32xf32> to vector<120x32xf32>
    %120 = arith.addf %118, %119 : vector<120x32xf32>
    %cst_52 = arith.constant 0.000000e+00 : f32
    %121 = vector.broadcast %cst_52 : f32 to vector<120x32xf32>
    %122 = arith.maximumf %120, %121 : vector<120x32xf32>
    %123 = arith.maximumf %115, %122 : vector<120x32xf32>
    %c16 = arith.constant 16 : index
    %c0_53 = arith.constant 0 : index
    %124 = tpu.strided_load %arg21[%c16, %c0_53] {strides = array<i32: 2, 1>} : memref<512x32xf32, #tpu.memory_space<vmem>>, vector<120x32xf32>
    %125 = vector.broadcast %105 : vector<1x32xf32> to vector<120x32xf32>
    %126 = arith.mulf %124, %125 : vector<120x32xf32>
    %127 = vector.broadcast %108 : vector<1x32xf32> to vector<120x32xf32>
    %128 = arith.addf %126, %127 : vector<120x32xf32>
    %cst_54 = arith.constant 0.000000e+00 : f32
    %129 = vector.broadcast %cst_54 : f32 to vector<120x32xf32>
    %130 = arith.maximumf %128, %129 : vector<120x32xf32>
    %131 = arith.maximumf %123, %130 : vector<120x32xf32>
    %c17 = arith.constant 17 : index
    %c0_55 = arith.constant 0 : index
    %132 = tpu.strided_load %arg21[%c17, %c0_55] {strides = array<i32: 2, 1>} : memref<512x32xf32, #tpu.memory_space<vmem>>, vector<120x32xf32>
    %133 = vector.broadcast %105 : vector<1x32xf32> to vector<120x32xf32>
    %134 = arith.mulf %132, %133 : vector<120x32xf32>
    %135 = vector.broadcast %108 : vector<1x32xf32> to vector<120x32xf32>
    %136 = arith.addf %134, %135 : vector<120x32xf32>
    %cst_56 = arith.constant 0.000000e+00 : f32
    %137 = vector.broadcast %cst_56 : f32 to vector<120x32xf32>
    %138 = arith.maximumf %136, %137 : vector<120x32xf32>
    %139 = arith.maximumf %131, %138 : vector<120x32xf32>
    %140 = vector.extract_strided_slice %139 {offsets = [0, 0], sizes = [8, 32], strides = [1, 1]} : vector<120x32xf32> to vector<8x32xf32>
    %c22 = arith.constant 22 : index
    %c0_57 = arith.constant 0 : index
    %141 = vector.load %arg22[%c22, %c0_57] : memref<202x96xf32, #tpu.memory_space<vmem>>, vector<8x32xf32>
    tpu.vector_store %arg22[%c22, %c0_57], %140 {strides = array<i32>} : memref<202x96xf32, #tpu.memory_space<vmem>>, vector<8x32xf32>,
    %c12 = arith.constant 12 : index
    %c32 = arith.constant 32 : index
    %142 = vector.load %arg22[%c12, %c32] : memref<202x96xf32, #tpu.memory_space<vmem>>, vector<8x32xf32>
    tpu.vector_store %arg22[%c12, %c32], %140 {strides = array<i32>} : memref<202x96xf32, #tpu.memory_space<vmem>>, vector<8x32xf32>,
    %c2 = arith.constant 2 : index
    %c64 = arith.constant 64 : index
    %143 = vector.load %arg22[%c2, %c64] : memref<202x96xf32, #tpu.memory_space<vmem>>, vector<8x32xf32>
    tpu.vector_store %arg22[%c2, %c64], %140 {strides = array<i32>} : memref<202x96xf32, #tpu.memory_space<vmem>>, vector<8x32xf32>,
    %144 = vector.extract_strided_slice %139 {offsets = [16, 0], sizes = [8, 32], strides = [1, 1]} : vector<120x32xf32> to vector<8x32xf32>
    %c32_58 = arith.constant 32 : index
    %c0_59 = arith.constant 0 : index
    %145 = vector.load %arg22[%c32_58, %c0_59] : memref<202x96xf32, #tpu.memory_space<vmem>>, vector<8x32xf32>
    tpu.vector_store %arg22[%c32_58, %c0_59], %144 {strides = array<i32>} : memref<202x96xf32, #tpu.memory_space<vmem>>, vector<8x32xf32>,
    %c22_60 = arith.constant 22 : index
    %c32_61 = arith.constant 32 : index
    %146 = vector.load %arg22[%c22_60, %c32_61] : memref<202x96xf32, #tpu.memory_space<vmem>>, vector<8x32xf32>
    tpu.vector_store %arg22[%c22_60, %c32_61], %144 {strides = array<i32>} : memref<202x96xf32, #tpu.memory_space<vmem>>, vector<8x32xf32>,
    %c12_62 = arith.constant 12 : index
    %c64_63 = arith.constant 64 : index
    %147 = vector.load %arg22[%c12_62, %c64_63] : memref<202x96xf32, #tpu.memory_space<vmem>>, vector<8x32xf32>
    tpu.vector_store %arg22[%c12_62, %c64_63], %144 {strides = array<i32>} : memref<202x96xf32, #tpu.memory_space<vmem>>, vector<8x32xf32>,
    %148 = vector.extract_strided_slice %139 {offsets = [32, 0], sizes = [8, 32], strides = [1, 1]} : vector<120x32xf32> to vector<8x32xf32>
    %c42 = arith.constant 42 : index
    %c0_64 = arith.constant 0 : index
    %149 = vector.load %arg22[%c42, %c0_64] : memref<202x96xf32, #tpu.memory_space<vmem>>, vector<8x32xf32>
    tpu.vector_store %arg22[%c42, %c0_64], %148 {strides = array<i32>} : memref<202x96xf32, #tpu.memory_space<vmem>>, vector<8x32xf32>,
    %c32_65 = arith.constant 32 : index
    %c32_66 = arith.constant 32 : index
    %150 = vector.load %arg22[%c32_65, %c32_66] : memref<202x96xf32, #tpu.memory_space<vmem>>, vector<8x32xf32>
    tpu.vector_store %arg22[%c32_65, %c32_66], %148 {strides = array<i32>} : memref<202x96xf32, #tpu.memory_space<vmem>>, vector<8x32xf32>,
    %c22_67 = arith.constant 22 : index
    %c64_68 = arith.constant 64 : index
    %151 = vector.load %arg22[%c22_67, %c64_68] : memref<202x96xf32, #tpu.memory_space<vmem>>, vector<8x32xf32>
    tpu.vector_store %arg22[%c22_67, %c64_68], %148 {strides = array<i32>} : memref<202x96xf32, #tpu.memory_space<vmem>>, vector<8x32xf32>,
    %152 = vector.extract_strided_slice %139 {offsets = [48, 0], sizes = [8, 32], strides = [1, 1]} : vector<120x32xf32> to vector<8x32xf32>
    %c52 = arith.constant 52 : index
    %c0_69 = arith.constant 0 : index
    %153 = vector.load %arg22[%c52, %c0_69] : memref<202x96xf32, #tpu.memory_space<vmem>>, vector<8x32xf32>
    tpu.vector_store %arg22[%c52, %c0_69], %152 {strides = array<i32>} : memref<202x96xf32, #tpu.memory_space<vmem>>, vector<8x32xf32>,
    %c42_70 = arith.constant 42 : index
    %c32_71 = arith.constant 32 : index
    %154 = vector.load %arg22[%c42_70, %c32_71] : memref<202x96xf32, #tpu.memory_space<vmem>>, vector<8x32xf32>
    tpu.vector_store %arg22[%c42_70, %c32_71], %152 {strides = array<i32>} : memref<202x96xf32, #tpu.memory_space<vmem>>, vector<8x32xf32>,
    %c32_72 = arith.constant 32 : index
    %c64_73 = arith.constant 64 : index
    %155 = vector.load %arg22[%c32_72, %c64_73] : memref<202x96xf32, #tpu.memory_space<vmem>>, vector<8x32xf32>
    tpu.vector_store %arg22[%c32_72, %c64_73], %152 {strides = array<i32>} : memref<202x96xf32, #tpu.memory_space<vmem>>, vector<8x32xf32>,
    %156 = vector.extract_strided_slice %139 {offsets = [64, 0], sizes = [8, 32], strides = [1, 1]} : vector<120x32xf32> to vector<8x32xf32>
    %c62 = arith.constant 62 : index
    %c0_74 = arith.constant 0 : index
    %157 = vector.load %arg22[%c62, %c0_74] : memref<202x96xf32, #tpu.memory_space<vmem>>, vector<8x32xf32>
    tpu.vector_store %arg22[%c62, %c0_74], %156 {strides = array<i32>} : memref<202x96xf32, #tpu.memory_space<vmem>>, vector<8x32xf32>,
    %c52_75 = arith.constant 52 : index
    %c32_76 = arith.constant 32 : index
    %158 = vector.load %arg22[%c52_75, %c32_76] : memref<202x96xf32, #tpu.memory_space<vmem>>, vector<8x32xf32>
    tpu.vector_store %arg22[%c52_75, %c32_76], %156 {strides = array<i32>} : memref<202x96xf32, #tpu.memory_space<vmem>>, vector<8x32xf32>,
    %c42_77 = arith.constant 42 : index
    %c64_78 = arith.constant 64 : index
    %159 = vector.load %arg22[%c42_77, %c64_78] : memref<202x96xf32, #tpu.memory_space<vmem>>, vector<8x32xf32>
    tpu.vector_store %arg22[%c42_77, %c64_78], %156 {strides = array<i32>} : memref<202x96xf32, #tpu.memory_space<vmem>>, vector<8x32xf32>,
    %160 = vector.extract_strided_slice %139 {offsets = [80, 0], sizes = [8, 32], strides = [1, 1]} : vector<120x32xf32> to vector<8x32xf32>
    %c72 = arith.constant 72 : index
    %c0_79 = arith.constant 0 : index
    %161 = vector.load %arg22[%c72, %c0_79] : memref<202x96xf32, #tpu.memory_space<vmem>>, vector<8x32xf32>
    tpu.vector_store %arg22[%c72, %c0_79], %160 {strides = array<i32>} : memref<202x96xf32, #tpu.memory_space<vmem>>, vector<8x32xf32>,
    %c62_80 = arith.constant 62 : index
    %c32_81 = arith.constant 32 : index
    %162 = vector.load %arg22[%c62_80, %c32_81] : memref<202x96xf32, #tpu.memory_space<vmem>>, vector<8x32xf32>
    tpu.vector_store %arg22[%c62_80, %c32_81], %160 {strides = array<i32>} : memref<202x96xf32, #tpu.memory_space<vmem>>, vector<8x32xf32>,
    %c52_82 = arith.constant 52 : index
    %c64_83 = arith.constant 64 : index
    %163 = vector.load %arg22[%c52_82, %c64_83] : memref<202x96xf32, #tpu.memory_space<vmem>>, vector<8x32xf32>
    tpu.vector_store %arg22[%c52_82, %c64_83], %160 {strides = array<i32>} : memref<202x96xf32, #tpu.memory_space<vmem>>, vector<8x32xf32>,
    %164 = vector.extract_strided_slice %139 {offsets = [96, 0], sizes = [8, 32], strides = [1, 1]} : vector<120x32xf32> to vector<8x32xf32>
    %c82 = arith.constant 82 : index
    %c0_84 = arith.constant 0 : index
    %165 = vector.load %arg22[%c82, %c0_84] : memref<202x96xf32, #tpu.memory_space<vmem>>, vector<8x32xf32>
    tpu.vector_store %arg22[%c82, %c0_84], %164 {strides = array<i32>} : memref<202x96xf32, #tpu.memory_space<vmem>>, vector<8x32xf32>,
    %c72_85 = arith.constant 72 : index
    %c32_86 = arith.constant 32 : index
    %166 = vector.load %arg22[%c72_85, %c32_86] : memref<202x96xf32, #tpu.memory_space<vmem>>, vector<8x32xf32>
    tpu.vector_store %arg22[%c72_85, %c32_86], %164 {strides = array<i32>} : memref<202x96xf32, #tpu.memory_space<vmem>>, vector<8x32xf32>,
    %c62_87 = arith.constant 62 : index
    %c64_88 = arith.constant 64 : index
    %167 = vector.load %arg22[%c62_87, %c64_88] : memref<202x96xf32, #tpu.memory_space<vmem>>, vector<8x32xf32>
    tpu.vector_store %arg22[%c62_87, %c64_88], %164 {strides = array<i32>} : memref<202x96xf32, #tpu.memory_space<vmem>>, vector<8x32xf32>,
    %168 = vector.extract_strided_slice %139 {offsets = [112, 0], sizes = [8, 32], strides = [1, 1]} : vector<120x32xf32> to vector<8x32xf32>
    %c92 = arith.constant 92 : index
    %c0_89 = arith.constant 0 : index
    %169 = vector.load %arg22[%c92, %c0_89] : memref<202x96xf32, #tpu.memory_space<vmem>>, vector<8x32xf32>
    tpu.vector_store %arg22[%c92, %c0_89], %168 {strides = array<i32>} : memref<202x96xf32, #tpu.memory_space<vmem>>, vector<8x32xf32>,
    %c82_90 = arith.constant 82 : index
    %c32_91 = arith.constant 32 : index
    %170 = vector.load %arg22[%c82_90, %c32_91] : memref<202x96xf32, #tpu.memory_space<vmem>>, vector<8x32xf32>
    tpu.vector_store %arg22[%c82_90, %c32_91], %168 {strides = array<i32>} : memref<202x96xf32, #tpu.memory_space<vmem>>, vector<8x32xf32>,
    %c72_92 = arith.constant 72 : index
    %c64_93 = arith.constant 64 : index
    %171 = vector.load %arg22[%c72_92, %c64_93] : memref<202x96xf32, #tpu.memory_space<vmem>>, vector<8x32xf32>
    tpu.vector_store %arg22[%c72_92, %c64_93], %168 {strides = array<i32>} : memref<202x96xf32, #tpu.memory_space<vmem>>, vector<8x32xf32>,
    %c256 = arith.constant 256 : index
    %c0_94 = arith.constant 0 : index
    %172 = tpu.strided_load %arg21[%c256, %c0_94] {strides = array<i32: 2, 1>} : memref<512x32xf32, #tpu.memory_space<vmem>>, vector<120x32xf32>
    %173 = vector.broadcast %105 : vector<1x32xf32> to vector<120x32xf32>
    %174 = arith.mulf %172, %173 : vector<120x32xf32>
    %175 = vector.broadcast %108 : vector<1x32xf32> to vector<120x32xf32>
    %176 = arith.addf %174, %175 : vector<120x32xf32>
    %cst_95 = arith.constant 0.000000e+00 : f32
    %177 = vector.broadcast %cst_95 : f32 to vector<120x32xf32>
    %178 = arith.maximumf %176, %177 : vector<120x32xf32>
    %c257 = arith.constant 257 : index
    %c0_96 = arith.constant 0 : index
    %179 = tpu.strided_load %arg21[%c257, %c0_96] {strides = array<i32: 2, 1>} : memref<512x32xf32, #tpu.memory_space<vmem>>, vector<120x32xf32>
    %180 = vector.broadcast %105 : vector<1x32xf32> to vector<120x32xf32>
    %181 = arith.mulf %179, %180 : vector<120x32xf32>
    %182 = vector.broadcast %108 : vector<1x32xf32> to vector<120x32xf32>
    %183 = arith.addf %181, %182 : vector<120x32xf32>
    %cst_97 = arith.constant 0.000000e+00 : f32
    %184 = vector.broadcast %cst_97 : f32 to vector<120x32xf32>
    %185 = arith.maximumf %183, %184 : vector<120x32xf32>
    %186 = arith.maximumf %178, %185 : vector<120x32xf32>
    %c272 = arith.constant 272 : index
    %c0_98 = arith.constant 0 : index
    %187 = tpu.strided_load %arg21[%c272, %c0_98] {strides = array<i32: 2, 1>} : memref<512x32xf32, #tpu.memory_space<vmem>>, vector<120x32xf32>
    %188 = vector.broadcast %105 : vector<1x32xf32> to vector<120x32xf32>
    %189 = arith.mulf %187, %188 : vector<120x32xf32>
    %190 = vector.broadcast %108 : vector<1x32xf32> to vector<120x32xf32>
    %191 = arith.addf %189, %190 : vector<120x32xf32>
    %cst_99 = arith.constant 0.000000e+00 : f32
    %192 = vector.broadcast %cst_99 : f32 to vector<120x32xf32>
    %193 = arith.maximumf %191, %192 : vector<120x32xf32>
    %194 = arith.maximumf %186, %193 : vector<120x32xf32>
    %c273 = arith.constant 273 : index
    %c0_100 = arith.constant 0 : index
    %195 = tpu.strided_load %arg21[%c273, %c0_100] {strides = array<i32: 2, 1>} : memref<512x32xf32, #tpu.memory_space<vmem>>, vector<120x32xf32>
    %196 = vector.broadcast %105 : vector<1x32xf32> to vector<120x32xf32>
    %197 = arith.mulf %195, %196 : vector<120x32xf32>
    %198 = vector.broadcast %108 : vector<1x32xf32> to vector<120x32xf32>
    %199 = arith.addf %197, %198 : vector<120x32xf32>
    %cst_101 = arith.constant 0.000000e+00 : f32
    %200 = vector.broadcast %cst_101 : f32 to vector<120x32xf32>
    %201 = arith.maximumf %199, %200 : vector<120x32xf32>
    %202 = arith.maximumf %194, %201 : vector<120x32xf32>
    %203 = vector.extract_strided_slice %202 {offsets = [0, 0], sizes = [8, 32], strides = [1, 1]} : vector<120x32xf32> to vector<8x32xf32>
    %c122 = arith.constant 122 : index
    %c0_102 = arith.constant 0 : index
    %204 = vector.load %arg22[%c122, %c0_102] : memref<202x96xf32, #tpu.memory_space<vmem>>, vector<8x32xf32>
    tpu.vector_store %arg22[%c122, %c0_102], %203 {strides = array<i32>} : memref<202x96xf32, #tpu.memory_space<vmem>>, vector<8x32xf32>,
    %c112 = arith.constant 112 : index
    %c32_103 = arith.constant 32 : index
    %205 = vector.load %arg22[%c112, %c32_103] : memref<202x96xf32, #tpu.memory_space<vmem>>, vector<8x32xf32>
    tpu.vector_store %arg22[%c112, %c32_103], %203 {strides = array<i32>} : memref<202x96xf32, #tpu.memory_space<vmem>>, vector<8x32xf32>,
    %c102 = arith.constant 102 : index
    %c64_104 = arith.constant 64 : index
    %206 = vector.load %arg22[%c102, %c64_104] : memref<202x96xf32, #tpu.memory_space<vmem>>, vector<8x32xf32>
    tpu.vector_store %arg22[%c102, %c64_104], %203 {strides = array<i32>} : memref<202x96xf32, #tpu.memory_space<vmem>>, vector<8x32xf32>,
    %207 = vector.extract_strided_slice %202 {offsets = [16, 0], sizes = [8, 32], strides = [1, 1]} : vector<120x32xf32> to vector<8x32xf32>
    %c132 = arith.constant 132 : index
    %c0_105 = arith.constant 0 : index
    %208 = vector.load %arg22[%c132, %c0_105] : memref<202x96xf32, #tpu.memory_space<vmem>>, vector<8x32xf32>
    tpu.vector_store %arg22[%c132, %c0_105], %207 {strides = array<i32>} : memref<202x96xf32, #tpu.memory_space<vmem>>, vector<8x32xf32>,
    %c122_106 = arith.constant 122 : index
    %c32_107 = arith.constant 32 : index
    %209 = vector.load %arg22[%c122_106, %c32_107] : memref<202x96xf32, #tpu.memory_space<vmem>>, vector<8x32xf32>
    tpu.vector_store %arg22[%c122_106, %c32_107], %207 {strides = array<i32>} : memref<202x96xf32, #tpu.memory_space<vmem>>, vector<8x32xf32>,
    %c112_108 = arith.constant 112 : index
    %c64_109 = arith.constant 64 : index
    %210 = vector.load %arg22[%c112_108, %c64_109] : memref<202x96xf32, #tpu.memory_space<vmem>>, vector<8x32xf32>
    tpu.vector_store %arg22[%c112_108, %c64_109], %207 {strides = array<i32>} : memref<202x96xf32, #tpu.memory_space<vmem>>, vector<8x32xf32>,
    %211 = vector.extract_strided_slice %202 {offsets = [32, 0], sizes = [8, 32], strides = [1, 1]} : vector<120x32xf32> to vector<8x32xf32>
    %c142 = arith.constant 142 : index
    %c0_110 = arith.constant 0 : index
    %212 = vector.load %arg22[%c142, %c0_110] : memref<202x96xf32, #tpu.memory_space<vmem>>, vector<8x32xf32>
    tpu.vector_store %arg22[%c142, %c0_110], %211 {strides = array<i32>} : memref<202x96xf32, #tpu.memory_space<vmem>>, vector<8x32xf32>,
    %c132_111 = arith.constant 132 : index
    %c32_112 = arith.constant 32 : index
    %213 = vector.load %arg22[%c132_111, %c32_112] : memref<202x96xf32, #tpu.memory_space<vmem>>, vector<8x32xf32>
    tpu.vector_store %arg22[%c132_111, %c32_112], %211 {strides = array<i32>} : memref<202x96xf32, #tpu.memory_space<vmem>>, vector<8x32xf32>,
    %c122_113 = arith.constant 122 : index
    %c64_114 = arith.constant 64 : index
    %214 = vector.load %arg22[%c122_113, %c64_114] : memref<202x96xf32, #tpu.memory_space<vmem>>, vector<8x32xf32>
    tpu.vector_store %arg22[%c122_113, %c64_114], %211 {strides = array<i32>} : memref<202x96xf32, #tpu.memory_space<vmem>>, vector<8x32xf32>,
    %215 = vector.extract_strided_slice %202 {offsets = [48, 0], sizes = [8, 32], strides = [1, 1]} : vector<120x32xf32> to vector<8x32xf32>
    %c152 = arith.constant 152 : index
    %c0_115 = arith.constant 0 : index
    %216 = vector.load %arg22[%c152, %c0_115] : memref<202x96xf32, #tpu.memory_space<vmem>>, vector<8x32xf32>
    tpu.vector_store %arg22[%c152, %c0_115], %215 {strides = array<i32>} : memref<202x96xf32, #tpu.memory_space<vmem>>, vector<8x32xf32>,
    %c142_116 = arith.constant 142 : index
    %c32_117 = arith.constant 32 : index
    %217 = vector.load %arg22[%c142_116, %c32_117] : memref<202x96xf32, #tpu.memory_space<vmem>>, vector<8x32xf32>
    tpu.vector_store %arg22[%c142_116, %c32_117], %215 {strides = array<i32>} : memref<202x96xf32, #tpu.memory_space<vmem>>, vector<8x32xf32>,
    %c132_118 = arith.constant 132 : index
    %c64_119 = arith.constant 64 : index
    %218 = vector.load %arg22[%c132_118, %c64_119] : memref<202x96xf32, #tpu.memory_space<vmem>>, vector<8x32xf32>
    tpu.vector_store %arg22[%c132_118, %c64_119], %215 {strides = array<i32>} : memref<202x96xf32, #tpu.memory_space<vmem>>, vector<8x32xf32>,
    %219 = vector.extract_strided_slice %202 {offsets = [64, 0], sizes = [8, 32], strides = [1, 1]} : vector<120x32xf32> to vector<8x32xf32>
    %c162 = arith.constant 162 : index
    %c0_120 = arith.constant 0 : index
    %220 = vector.load %arg22[%c162, %c0_120] : memref<202x96xf32, #tpu.memory_space<vmem>>, vector<8x32xf32>
    tpu.vector_store %arg22[%c162, %c0_120], %219 {strides = array<i32>} : memref<202x96xf32, #tpu.memory_space<vmem>>, vector<8x32xf32>,
    %c152_121 = arith.constant 152 : index
    %c32_122 = arith.constant 32 : index
    %221 = vector.load %arg22[%c152_121, %c32_122] : memref<202x96xf32, #tpu.memory_space<vmem>>, vector<8x32xf32>
    tpu.vector_store %arg22[%c152_121, %c32_122], %219 {strides = array<i32>} : memref<202x96xf32, #tpu.memory_space<vmem>>, vector<8x32xf32>,
    %c142_123 = arith.constant 142 : index
    %c64_124 = arith.constant 64 : index
    %222 = vector.load %arg22[%c142_123, %c64_124] : memref<202x96xf32, #tpu.memory_space<vmem>>, vector<8x32xf32>
    tpu.vector_store %arg22[%c142_123, %c64_124], %219 {strides = array<i32>} : memref<202x96xf32, #tpu.memory_space<vmem>>, vector<8x32xf32>,
    %223 = vector.extract_strided_slice %202 {offsets = [80, 0], sizes = [8, 32], strides = [1, 1]} : vector<120x32xf32> to vector<8x32xf32>
    %c172 = arith.constant 172 : index
    %c0_125 = arith.constant 0 : index
    %224 = vector.load %arg22[%c172, %c0_125] : memref<202x96xf32, #tpu.memory_space<vmem>>, vector<8x32xf32>
    tpu.vector_store %arg22[%c172, %c0_125], %223 {strides = array<i32>} : memref<202x96xf32, #tpu.memory_space<vmem>>, vector<8x32xf32>,
    %c162_126 = arith.constant 162 : index
    %c32_127 = arith.constant 32 : index
    %225 = vector.load %arg22[%c162_126, %c32_127] : memref<202x96xf32, #tpu.memory_space<vmem>>, vector<8x32xf32>
    tpu.vector_store %arg22[%c162_126, %c32_127], %223 {strides = array<i32>} : memref<202x96xf32, #tpu.memory_space<vmem>>, vector<8x32xf32>,
    %c152_128 = arith.constant 152 : index
    %c64_129 = arith.constant 64 : index
    %226 = vector.load %arg22[%c152_128, %c64_129] : memref<202x96xf32, #tpu.memory_space<vmem>>, vector<8x32xf32>
    tpu.vector_store %arg22[%c152_128, %c64_129], %223 {strides = array<i32>} : memref<202x96xf32, #tpu.memory_space<vmem>>, vector<8x32xf32>,
    %227 = vector.extract_strided_slice %202 {offsets = [96, 0], sizes = [8, 32], strides = [1, 1]} : vector<120x32xf32> to vector<8x32xf32>
    %c182 = arith.constant 182 : index
    %c0_130 = arith.constant 0 : index
    %228 = vector.load %arg22[%c182, %c0_130] : memref<202x96xf32, #tpu.memory_space<vmem>>, vector<8x32xf32>
    tpu.vector_store %arg22[%c182, %c0_130], %227 {strides = array<i32>} : memref<202x96xf32, #tpu.memory_space<vmem>>, vector<8x32xf32>,
    %c172_131 = arith.constant 172 : index
    %c32_132 = arith.constant 32 : index
    %229 = vector.load %arg22[%c172_131, %c32_132] : memref<202x96xf32, #tpu.memory_space<vmem>>, vector<8x32xf32>
    tpu.vector_store %arg22[%c172_131, %c32_132], %227 {strides = array<i32>} : memref<202x96xf32, #tpu.memory_space<vmem>>, vector<8x32xf32>,
    %c162_133 = arith.constant 162 : index
    %c64_134 = arith.constant 64 : index
    %230 = vector.load %arg22[%c162_133, %c64_134] : memref<202x96xf32, #tpu.memory_space<vmem>>, vector<8x32xf32>
    tpu.vector_store %arg22[%c162_133, %c64_134], %227 {strides = array<i32>} : memref<202x96xf32, #tpu.memory_space<vmem>>, vector<8x32xf32>,
    %231 = vector.extract_strided_slice %202 {offsets = [112, 0], sizes = [8, 32], strides = [1, 1]} : vector<120x32xf32> to vector<8x32xf32>
    %c192 = arith.constant 192 : index
    %c0_135 = arith.constant 0 : index
    %232 = vector.load %arg22[%c192, %c0_135] : memref<202x96xf32, #tpu.memory_space<vmem>>, vector<8x32xf32>
    tpu.vector_store %arg22[%c192, %c0_135], %231 {strides = array<i32>} : memref<202x96xf32, #tpu.memory_space<vmem>>, vector<8x32xf32>,
    %c182_136 = arith.constant 182 : index
    %c32_137 = arith.constant 32 : index
    %233 = vector.load %arg22[%c182_136, %c32_137] : memref<202x96xf32, #tpu.memory_space<vmem>>, vector<8x32xf32>
    tpu.vector_store %arg22[%c182_136, %c32_137], %231 {strides = array<i32>} : memref<202x96xf32, #tpu.memory_space<vmem>>, vector<8x32xf32>,
    %c172_138 = arith.constant 172 : index
    %c64_139 = arith.constant 64 : index
    %234 = vector.load %arg22[%c172_138, %c64_139] : memref<202x96xf32, #tpu.memory_space<vmem>>, vector<8x32xf32>
    tpu.vector_store %arg22[%c172_138, %c64_139], %231 {strides = array<i32>} : memref<202x96xf32, #tpu.memory_space<vmem>>, vector<8x32xf32>,
    %c0_140 = arith.constant 0 : index
    %c0_141 = arith.constant 0 : index
    %235 = vector.load %arg22[%c0_140, %c0_141] : memref<202x96xf32, #tpu.memory_space<vmem>>, vector<200x96xf32>
    %c0_142 = arith.constant 0 : index
    %c0_143 = arith.constant 0 : index
    %c0_144 = arith.constant 0 : index
    %236 = vector.load %arg4[%c0_142, %c0_143, %c0_144] : memref<3x96x64xf32, #tpu.memory_space<vmem>>, vector<1x96x64xf32>
    %237 = vector.shape_cast %236 : vector<1x96x64xf32> to vector<96x64xf32>
    %cst_145 = arith.constant dense<0.000000e+00> : vector<200x64xf32>
    %238 = tpu.matmul %235, %237, %cst_145 {dimension_numbers = #tpu.dot_dimension_numbers<[1], [0], [0], [1], [0, 0, 1, 1], [], []>} : vector<200x96xf32>, vector<96x64xf32>, vector<200x64xf32> -> vector<200x64xf32>
    %c1_146 = arith.constant 1 : index
    %c0_147 = arith.constant 0 : index
    %239 = vector.load %arg22[%c1_146, %c0_147] : memref<202x96xf32, #tpu.memory_space<vmem>>, vector<200x96xf32>
    %c1_148 = arith.constant 1 : index
    %c0_149 = arith.constant 0 : index
    %c0_150 = arith.constant 0 : index
    %240 = vector.load %arg4[%c1_148, %c0_149, %c0_150] : memref<3x96x64xf32, #tpu.memory_space<vmem>>, vector<1x96x64xf32>
    %241 = vector.shape_cast %240 : vector<1x96x64xf32> to vector<96x64xf32>
    %cst_151 = arith.constant dense<0.000000e+00> : vector<200x64xf32>
    %242 = tpu.matmul %239, %241, %cst_151 {dimension_numbers = #tpu.dot_dimension_numbers<[1], [0], [0], [1], [0, 0, 1, 1], [], []>} : vector<200x96xf32>, vector<96x64xf32>, vector<200x64xf32> -> vector<200x64xf32>
    %243 = arith.addf %238, %242 : vector<200x64xf32>
    %c2_152 = arith.constant 2 : index
    %c0_153 = arith.constant 0 : index
    %244 = vector.load %arg22[%c2_152, %c0_153] : memref<202x96xf32, #tpu.memory_space<vmem>>, vector<200x96xf32>
    %c2_154 = arith.constant 2 : index
    %c0_155 = arith.constant 0 : index
    %c0_156 = arith.constant 0 : index
    %245 = vector.load %arg4[%c2_154, %c0_155, %c0_156] : memref<3x96x64xf32, #tpu.memory_space<vmem>>, vector<1x96x64xf32>
    %246 = vector.shape_cast %245 : vector<1x96x64xf32> to vector<96x64xf32>
    %cst_157 = arith.constant dense<0.000000e+00> : vector<200x64xf32>
    %247 = tpu.matmul %244, %246, %cst_157 {dimension_numbers = #tpu.dot_dimension_numbers<[1], [0], [0], [1], [0, 0, 1, 1], [], []>} : vector<200x96xf32>, vector<96x64xf32>, vector<200x64xf32> -> vector<200x64xf32>
    %248 = arith.addf %243, %247 : vector<200x64xf32>
    %c0_158 = arith.constant 0 : index
    %c0_159 = arith.constant 0 : index
    %249 = vector.load %arg23[%c0_158, %c0_159] : memref<200x64xf32, #tpu.memory_space<vmem>>, vector<200x64xf32>
    tpu.vector_store %arg23[%c0_158, %c0_159], %248 {strides = array<i32>} : memref<200x64xf32, #tpu.memory_space<vmem>>, vector<200x64xf32>,
    %cst_160 = arith.constant 0.000000e+00 : f32
    %250 = vector.broadcast %cst_160 : f32 to vector<8x64xf32>
    %cst_161 = arith.constant 0.000000e+00 : f32
    %251 = vector.broadcast %cst_161 : f32 to vector<8x64xf32>
    %c11 = arith.constant 11 : index
    %c0_162 = arith.constant 0 : index
    %252 = vector.load %arg23[%c11, %c0_162] : memref<200x64xf32, #tpu.memory_space<vmem>>, vector<8x64xf32>
    %253 = arith.addf %250, %252 : vector<8x64xf32>
    %254 = arith.mulf %252, %252 : vector<8x64xf32>
    %255 = arith.addf %251, %254 : vector<8x64xf32>
    %c21 = arith.constant 21 : index
    %c0_163 = arith.constant 0 : index
    %256 = vector.load %arg23[%c21, %c0_163] : memref<200x64xf32, #tpu.memory_space<vmem>>, vector<8x64xf32>
    %257 = arith.addf %253, %256 : vector<8x64xf32>
    %258 = arith.mulf %256, %256 : vector<8x64xf32>
    %259 = arith.addf %255, %258 : vector<8x64xf32>
    %c31 = arith.constant 31 : index
    %c0_164 = arith.constant 0 : index
    %260 = vector.load %arg23[%c31, %c0_164] : memref<200x64xf32, #tpu.memory_space<vmem>>, vector<8x64xf32>
    %261 = arith.addf %257, %260 : vector<8x64xf32>
    %262 = arith.mulf %260, %260 : vector<8x64xf32>
    %263 = arith.addf %259, %262 : vector<8x64xf32>
    %c41 = arith.constant 41 : index
    %c0_165 = arith.constant 0 : index
    %264 = vector.load %arg23[%c41, %c0_165] : memref<200x64xf32, #tpu.memory_space<vmem>>, vector<8x64xf32>
    %265 = arith.addf %261, %264 : vector<8x64xf32>
    %266 = arith.mulf %264, %264 : vector<8x64xf32>
    %267 = arith.addf %263, %266 : vector<8x64xf32>
    %c51 = arith.constant 51 : index
    %c0_166 = arith.constant 0 : index
    %268 = vector.load %arg23[%c51, %c0_166] : memref<200x64xf32, #tpu.memory_space<vmem>>, vector<8x64xf32>
    %269 = arith.addf %265, %268 : vector<8x64xf32>
    %270 = arith.mulf %268, %268 : vector<8x64xf32>
    %271 = arith.addf %267, %270 : vector<8x64xf32>
    %c61 = arith.constant 61 : index
    %c0_167 = arith.constant 0 : index
    %272 = vector.load %arg23[%c61, %c0_167] : memref<200x64xf32, #tpu.memory_space<vmem>>, vector<8x64xf32>
    %273 = arith.addf %269, %272 : vector<8x64xf32>
    %274 = arith.mulf %272, %272 : vector<8x64xf32>
    %275 = arith.addf %271, %274 : vector<8x64xf32>
    %c71 = arith.constant 71 : index
    %c0_168 = arith.constant 0 : index
    %276 = vector.load %arg23[%c71, %c0_168] : memref<200x64xf32, #tpu.memory_space<vmem>>, vector<8x64xf32>
    %277 = arith.addf %273, %276 : vector<8x64xf32>
    %278 = arith.mulf %276, %276 : vector<8x64xf32>
    %279 = arith.addf %275, %278 : vector<8x64xf32>
    %c81 = arith.constant 81 : index
    %c0_169 = arith.constant 0 : index
    %280 = vector.load %arg23[%c81, %c0_169] : memref<200x64xf32, #tpu.memory_space<vmem>>, vector<8x64xf32>
    %281 = arith.addf %277, %280 : vector<8x64xf32>
    %282 = arith.mulf %280, %280 : vector<8x64xf32>
    %283 = arith.addf %279, %282 : vector<8x64xf32>
    %c111 = arith.constant 111 : index
    %c0_170 = arith.constant 0 : index
    %284 = vector.load %arg23[%c111, %c0_170] : memref<200x64xf32, #tpu.memory_space<vmem>>, vector<8x64xf32>
    %285 = arith.addf %281, %284 : vector<8x64xf32>
    %286 = arith.mulf %284, %284 : vector<8x64xf32>
    %287 = arith.addf %283, %286 : vector<8x64xf32>
    %c121 = arith.constant 121 : index
    %c0_171 = arith.constant 0 : index
    %288 = vector.load %arg23[%c121, %c0_171] : memref<200x64xf32, #tpu.memory_space<vmem>>, vector<8x64xf32>
    %289 = arith.addf %285, %288 : vector<8x64xf32>
    %290 = arith.mulf %288, %288 : vector<8x64xf32>
    %291 = arith.addf %287, %290 : vector<8x64xf32>
    %c131 = arith.constant 131 : index
    %c0_172 = arith.constant 0 : index
    %292 = vector.load %arg23[%c131, %c0_172] : memref<200x64xf32, #tpu.memory_space<vmem>>, vector<8x64xf32>
    %293 = arith.addf %289, %292 : vector<8x64xf32>
    %294 = arith.mulf %292, %292 : vector<8x64xf32>
    %295 = arith.addf %291, %294 : vector<8x64xf32>
    %c141 = arith.constant 141 : index
    %c0_173 = arith.constant 0 : index
    %296 = vector.load %arg23[%c141, %c0_173] : memref<200x64xf32, #tpu.memory_space<vmem>>, vector<8x64xf32>
    %297 = arith.addf %293, %296 : vector<8x64xf32>
    %298 = arith.mulf %296, %296 : vector<8x64xf32>
    %299 = arith.addf %295, %298 : vector<8x64xf32>
    %c151 = arith.constant 151 : index
    %c0_174 = arith.constant 0 : index
    %300 = vector.load %arg23[%c151, %c0_174] : memref<200x64xf32, #tpu.memory_space<vmem>>, vector<8x64xf32>
    %301 = arith.addf %297, %300 : vector<8x64xf32>
    %302 = arith.mulf %300, %300 : vector<8x64xf32>
    %303 = arith.addf %299, %302 : vector<8x64xf32>
    %c161 = arith.constant 161 : index
    %c0_175 = arith.constant 0 : index
    %304 = vector.load %arg23[%c161, %c0_175] : memref<200x64xf32, #tpu.memory_space<vmem>>, vector<8x64xf32>
    %305 = arith.addf %301, %304 : vector<8x64xf32>
    %306 = arith.mulf %304, %304 : vector<8x64xf32>
    %307 = arith.addf %303, %306 : vector<8x64xf32>
    %c171 = arith.constant 171 : index
    %c0_176 = arith.constant 0 : index
    %308 = vector.load %arg23[%c171, %c0_176] : memref<200x64xf32, #tpu.memory_space<vmem>>, vector<8x64xf32>
    %309 = arith.addf %305, %308 : vector<8x64xf32>
    %310 = arith.mulf %308, %308 : vector<8x64xf32>
    %311 = arith.addf %307, %310 : vector<8x64xf32>
    %c181 = arith.constant 181 : index
    %c0_177 = arith.constant 0 : index
    %312 = vector.load %arg23[%c181, %c0_177] : memref<200x64xf32, #tpu.memory_space<vmem>>, vector<8x64xf32>
    %313 = arith.addf %309, %312 : vector<8x64xf32>
    %314 = arith.mulf %312, %312 : vector<8x64xf32>
    %315 = arith.addf %311, %314 : vector<8x64xf32>
    %cst_178 = arith.constant dense<0.000000e+00> : vector<64xf32>
    %316 = vector.multi_reduction <add>, %313, %cst_178 [0] : vector<8x64xf32> to vector<64xf32>
    %317 = vector.shape_cast %316 : vector<64xf32> to vector<1x64xf32>
    %cst_179 = arith.constant 7.812500e-03 : f32
    %318 = vector.broadcast %cst_179 : f32 to vector<1x64xf32>
    %319 = arith.mulf %317, %318 : vector<1x64xf32>
    %cst_180 = arith.constant dense<0.000000e+00> : vector<64xf32>
    %320 = vector.multi_reduction <add>, %315, %cst_180 [0] : vector<8x64xf32> to vector<64xf32>
    %321 = vector.shape_cast %320 : vector<64xf32> to vector<1x64xf32>
    %cst_181 = arith.constant 7.812500e-03 : f32
    %322 = vector.broadcast %cst_181 : f32 to vector<1x64xf32>
    %323 = arith.mulf %321, %322 : vector<1x64xf32>
    %324 = arith.mulf %319, %319 : vector<1x64xf32>
    %325 = arith.subf %323, %324 : vector<1x64xf32>
    %c0_182 = arith.constant 0 : index
    %c0_183 = arith.constant 0 : index
    %326 = vector.load %arg5[%c0_182, %c0_183] : memref<2x64xf32, #tpu.memory_space<vmem>>, vector<1x64xf32>
    %cst_184 = arith.constant 9.99999974E-6 : f32
    %327 = vector.broadcast %cst_184 : f32 to vector<1x64xf32>
    %328 = arith.addf %325, %327 : vector<1x64xf32>
    %329 = math.rsqrt %328 : vector<1x64xf32>
    %330 = arith.mulf %326, %329 : vector<1x64xf32>
    %c1_185 = arith.constant 1 : index
    %c0_186 = arith.constant 0 : index
    %331 = vector.load %arg5[%c1_185, %c0_186] : memref<2x64xf32, #tpu.memory_space<vmem>>, vector<1x64xf32>
    %332 = arith.mulf %319, %330 : vector<1x64xf32>
    %333 = arith.subf %331, %332 : vector<1x64xf32>
    %c11_187 = arith.constant 11 : index
    %c0_188 = arith.constant 0 : index
    %334 = tpu.strided_load %arg23[%c11_187, %c0_188] {strides = array<i32: 2, 1>} : memref<200x64xf32, #tpu.memory_space<vmem>>, vector<34x64xf32>
    %335 = vector.broadcast %330 : vector<1x64xf32> to vector<34x64xf32>
    %336 = arith.mulf %334, %335 : vector<34x64xf32>
    %337 = vector.broadcast %333 : vector<1x64xf32> to vector<34x64xf32>
    %338 = arith.addf %336, %337 : vector<34x64xf32>
    %cst_189 = arith.constant 0.000000e+00 : f32
    %339 = vector.broadcast %cst_189 : f32 to vector<34x64xf32>
    %340 = arith.maximumf %338, %339 : vector<34x64xf32>
    %c12_190 = arith.constant 12 : index
    %c0_191 = arith.constant 0 : index
    %341 = tpu.strided_load %arg23[%c12_190, %c0_191] {strides = array<i32: 2, 1>} : memref<200x64xf32, #tpu.memory_space<vmem>>, vector<34x64xf32>
    %342 = vector.broadcast %330 : vector<1x64xf32> to vector<34x64xf32>
    %343 = arith.mulf %341, %342 : vector<34x64xf32>
    %344 = vector.broadcast %333 : vector<1x64xf32> to vector<34x64xf32>
    %345 = arith.addf %343, %344 : vector<34x64xf32>
    %cst_192 = arith.constant 0.000000e+00 : f32
    %346 = vector.broadcast %cst_192 : f32 to vector<34x64xf32>
    %347 = arith.maximumf %345, %346 : vector<34x64xf32>
    %348 = arith.maximumf %340, %347 : vector<34x64xf32>
    %c21_193 = arith.constant 21 : index
    %c0_194 = arith.constant 0 : index
    %349 = tpu.strided_load %arg23[%c21_193, %c0_194] {strides = array<i32: 2, 1>} : memref<200x64xf32, #tpu.memory_space<vmem>>, vector<34x64xf32>
    %350 = vector.broadcast %330 : vector<1x64xf32> to vector<34x64xf32>
    %351 = arith.mulf %349, %350 : vector<34x64xf32>
    %352 = vector.broadcast %333 : vector<1x64xf32> to vector<34x64xf32>
    %353 = arith.addf %351, %352 : vector<34x64xf32>
    %cst_195 = arith.constant 0.000000e+00 : f32
    %354 = vector.broadcast %cst_195 : f32 to vector<34x64xf32>
    %355 = arith.maximumf %353, %354 : vector<34x64xf32>
    %356 = arith.maximumf %348, %355 : vector<34x64xf32>
    %c22_196 = arith.constant 22 : index
    %c0_197 = arith.constant 0 : index
    %357 = tpu.strided_load %arg23[%c22_196, %c0_197] {strides = array<i32: 2, 1>} : memref<200x64xf32, #tpu.memory_space<vmem>>, vector<34x64xf32>
    %358 = vector.broadcast %330 : vector<1x64xf32> to vector<34x64xf32>
    %359 = arith.mulf %357, %358 : vector<34x64xf32>
    %360 = vector.broadcast %333 : vector<1x64xf32> to vector<34x64xf32>
    %361 = arith.addf %359, %360 : vector<34x64xf32>
    %cst_198 = arith.constant 0.000000e+00 : f32
    %362 = vector.broadcast %cst_198 : f32 to vector<34x64xf32>
    %363 = arith.maximumf %361, %362 : vector<34x64xf32>
    %364 = arith.maximumf %356, %363 : vector<34x64xf32>
    %365 = vector.extract_strided_slice %364 {offsets = [0, 0], sizes = [4, 64], strides = [1, 1]} : vector<34x64xf32> to vector<4x64xf32>
    %c14 = arith.constant 14 : index
    %c0_199 = arith.constant 0 : index
    %366 = vector.load %arg24[%c14, %c0_199] : memref<74x192xf32, #tpu.memory_space<vmem>>, vector<4x64xf32>
    tpu.vector_store %arg24[%c14, %c0_199], %365 {strides = array<i32>} : memref<74x192xf32, #tpu.memory_space<vmem>>, vector<4x64xf32>,
    %c8 = arith.constant 8 : index
    %c64_200 = arith.constant 64 : index
    %367 = vector.load %arg24[%c8, %c64_200] : memref<74x192xf32, #tpu.memory_space<vmem>>, vector<4x64xf32>
    tpu.vector_store %arg24[%c8, %c64_200], %365 {strides = array<i32>} : memref<74x192xf32, #tpu.memory_space<vmem>>, vector<4x64xf32>,
    %c2_201 = arith.constant 2 : index
    %c128 = arith.constant 128 : index
    %368 = vector.load %arg24[%c2_201, %c128] : memref<74x192xf32, #tpu.memory_space<vmem>>, vector<4x64xf32>
    tpu.vector_store %arg24[%c2_201, %c128], %365 {strides = array<i32>} : memref<74x192xf32, #tpu.memory_space<vmem>>, vector<4x64xf32>,
    %369 = vector.extract_strided_slice %364 {offsets = [10, 0], sizes = [4, 64], strides = [1, 1]} : vector<34x64xf32> to vector<4x64xf32>
    %c20 = arith.constant 20 : index
    %c0_202 = arith.constant 0 : index
    %370 = vector.load %arg24[%c20, %c0_202] : memref<74x192xf32, #tpu.memory_space<vmem>>, vector<4x64xf32>
    tpu.vector_store %arg24[%c20, %c0_202], %369 {strides = array<i32>} : memref<74x192xf32, #tpu.memory_space<vmem>>, vector<4x64xf32>,
    %c14_203 = arith.constant 14 : index
    %c64_204 = arith.constant 64 : index
    %371 = vector.load %arg24[%c14_203, %c64_204] : memref<74x192xf32, #tpu.memory_space<vmem>>, vector<4x64xf32>
    tpu.vector_store %arg24[%c14_203, %c64_204], %369 {strides = array<i32>} : memref<74x192xf32, #tpu.memory_space<vmem>>, vector<4x64xf32>,
    %c8_205 = arith.constant 8 : index
    %c128_206 = arith.constant 128 : index
    %372 = vector.load %arg24[%c8_205, %c128_206] : memref<74x192xf32, #tpu.memory_space<vmem>>, vector<4x64xf32>
    tpu.vector_store %arg24[%c8_205, %c128_206], %369 {strides = array<i32>} : memref<74x192xf32, #tpu.memory_space<vmem>>, vector<4x64xf32>,
    %373 = vector.extract_strided_slice %364 {offsets = [20, 0], sizes = [4, 64], strides = [1, 1]} : vector<34x64xf32> to vector<4x64xf32>
    %c26 = arith.constant 26 : index
    %c0_207 = arith.constant 0 : index
    %374 = vector.load %arg24[%c26, %c0_207] : memref<74x192xf32, #tpu.memory_space<vmem>>, vector<4x64xf32>
    tpu.vector_store %arg24[%c26, %c0_207], %373 {strides = array<i32>} : memref<74x192xf32, #tpu.memory_space<vmem>>, vector<4x64xf32>,
    %c20_208 = arith.constant 20 : index
    %c64_209 = arith.constant 64 : index
    %375 = vector.load %arg24[%c20_208, %c64_209] : memref<74x192xf32, #tpu.memory_space<vmem>>, vector<4x64xf32>
    tpu.vector_store %arg24[%c20_208, %c64_209], %373 {strides = array<i32>} : memref<74x192xf32, #tpu.memory_space<vmem>>, vector<4x64xf32>,
    %c14_210 = arith.constant 14 : index
    %c128_211 = arith.constant 128 : index
    %376 = vector.load %arg24[%c14_210, %c128_211] : memref<74x192xf32, #tpu.memory_space<vmem>>, vector<4x64xf32>
    tpu.vector_store %arg24[%c14_210, %c128_211], %373 {strides = array<i32>} : memref<74x192xf32, #tpu.memory_space<vmem>>, vector<4x64xf32>,
    %377 = vector.extract_strided_slice %364 {offsets = [30, 0], sizes = [4, 64], strides = [1, 1]} : vector<34x64xf32> to vector<4x64xf32>
    %c32_212 = arith.constant 32 : index
    %c0_213 = arith.constant 0 : index
    %378 = vector.load %arg24[%c32_212, %c0_213] : memref<74x192xf32, #tpu.memory_space<vmem>>, vector<4x64xf32>
    tpu.vector_store %arg24[%c32_212, %c0_213], %377 {strides = array<i32>} : memref<74x192xf32, #tpu.memory_space<vmem>>, vector<4x64xf32>,
    %c26_214 = arith.constant 26 : index
    %c64_215 = arith.constant 64 : index
    %379 = vector.load %arg24[%c26_214, %c64_215] : memref<74x192xf32, #tpu.memory_space<vmem>>, vector<4x64xf32>
    tpu.vector_store %arg24[%c26_214, %c64_215], %377 {strides = array<i32>} : memref<74x192xf32, #tpu.memory_space<vmem>>, vector<4x64xf32>,
    %c20_216 = arith.constant 20 : index
    %c128_217 = arith.constant 128 : index
    %380 = vector.load %arg24[%c20_216, %c128_217] : memref<74x192xf32, #tpu.memory_space<vmem>>, vector<4x64xf32>
    tpu.vector_store %arg24[%c20_216, %c128_217], %377 {strides = array<i32>} : memref<74x192xf32, #tpu.memory_space<vmem>>, vector<4x64xf32>,
    %c111_218 = arith.constant 111 : index
    %c0_219 = arith.constant 0 : index
    %381 = tpu.strided_load %arg23[%c111_218, %c0_219] {strides = array<i32: 2, 1>} : memref<200x64xf32, #tpu.memory_space<vmem>>, vector<34x64xf32>
    %382 = vector.broadcast %330 : vector<1x64xf32> to vector<34x64xf32>
    %383 = arith.mulf %381, %382 : vector<34x64xf32>
    %384 = vector.broadcast %333 : vector<1x64xf32> to vector<34x64xf32>
    %385 = arith.addf %383, %384 : vector<34x64xf32>
    %cst_220 = arith.constant 0.000000e+00 : f32
    %386 = vector.broadcast %cst_220 : f32 to vector<34x64xf32>
    %387 = arith.maximumf %385, %386 : vector<34x64xf32>
    %c112_221 = arith.constant 112 : index
    %c0_222 = arith.constant 0 : index
    %388 = tpu.strided_load %arg23[%c112_221, %c0_222] {strides = array<i32: 2, 1>} : memref<200x64xf32, #tpu.memory_space<vmem>>, vector<34x64xf32>
    %389 = vector.broadcast %330 : vector<1x64xf32> to vector<34x64xf32>
    %390 = arith.mulf %388, %389 : vector<34x64xf32>
    %391 = vector.broadcast %333 : vector<1x64xf32> to vector<34x64xf32>
    %392 = arith.addf %390, %391 : vector<34x64xf32>
    %cst_223 = arith.constant 0.000000e+00 : f32
    %393 = vector.broadcast %cst_223 : f32 to vector<34x64xf32>
    %394 = arith.maximumf %392, %393 : vector<34x64xf32>
    %395 = arith.maximumf %387, %394 : vector<34x64xf32>
    %c121_224 = arith.constant 121 : index
    %c0_225 = arith.constant 0 : index
    %396 = tpu.strided_load %arg23[%c121_224, %c0_225] {strides = array<i32: 2, 1>} : memref<200x64xf32, #tpu.memory_space<vmem>>, vector<34x64xf32>
    %397 = vector.broadcast %330 : vector<1x64xf32> to vector<34x64xf32>
    %398 = arith.mulf %396, %397 : vector<34x64xf32>
    %399 = vector.broadcast %333 : vector<1x64xf32> to vector<34x64xf32>
    %400 = arith.addf %398, %399 : vector<34x64xf32>
    %cst_226 = arith.constant 0.000000e+00 : f32
    %401 = vector.broadcast %cst_226 : f32 to vector<34x64xf32>
    %402 = arith.maximumf %400, %401 : vector<34x64xf32>
    %403 = arith.maximumf %395, %402 : vector<34x64xf32>
    %c122_227 = arith.constant 122 : index
    %c0_228 = arith.constant 0 : index
    %404 = tpu.strided_load %arg23[%c122_227, %c0_228] {strides = array<i32: 2, 1>} : memref<200x64xf32, #tpu.memory_space<vmem>>, vector<34x64xf32>
    %405 = vector.broadcast %330 : vector<1x64xf32> to vector<34x64xf32>
    %406 = arith.mulf %404, %405 : vector<34x64xf32>
    %407 = vector.broadcast %333 : vector<1x64xf32> to vector<34x64xf32>
    %408 = arith.addf %406, %407 : vector<34x64xf32>
    %cst_229 = arith.constant 0.000000e+00 : f32
    %409 = vector.broadcast %cst_229 : f32 to vector<34x64xf32>
    %410 = arith.maximumf %408, %409 : vector<34x64xf32>
    %411 = arith.maximumf %403, %410 : vector<34x64xf32>
    %412 = vector.extract_strided_slice %411 {offsets = [0, 0], sizes = [4, 64], strides = [1, 1]} : vector<34x64xf32> to vector<4x64xf32>
    %c50 = arith.constant 50 : index
    %c0_230 = arith.constant 0 : index
    %413 = vector.load %arg24[%c50, %c0_230] : memref<74x192xf32, #tpu.memory_space<vmem>>, vector<4x64xf32>
    tpu.vector_store %arg24[%c50, %c0_230], %412 {strides = array<i32>} : memref<74x192xf32, #tpu.memory_space<vmem>>, vector<4x64xf32>,
    %c44 = arith.constant 44 : index
    %c64_231 = arith.constant 64 : index
    %414 = vector.load %arg24[%c44, %c64_231] : memref<74x192xf32, #tpu.memory_space<vmem>>, vector<4x64xf32>
    tpu.vector_store %arg24[%c44, %c64_231], %412 {strides = array<i32>} : memref<74x192xf32, #tpu.memory_space<vmem>>, vector<4x64xf32>,
    %c38 = arith.constant 38 : index
    %c128_232 = arith.constant 128 : index
    %415 = vector.load %arg24[%c38, %c128_232] : memref<74x192xf32, #tpu.memory_space<vmem>>, vector<4x64xf32>
    tpu.vector_store %arg24[%c38, %c128_232], %412 {strides = array<i32>} : memref<74x192xf32, #tpu.memory_space<vmem>>, vector<4x64xf32>,
    %416 = vector.extract_strided_slice %411 {offsets = [10, 0], sizes = [4, 64], strides = [1, 1]} : vector<34x64xf32> to vector<4x64xf32>
    %c56 = arith.constant 56 : index
    %c0_233 = arith.constant 0 : index
    %417 = vector.load %arg24[%c56, %c0_233] : memref<74x192xf32, #tpu.memory_space<vmem>>, vector<4x64xf32>
    tpu.vector_store %arg24[%c56, %c0_233], %416 {strides = array<i32>} : memref<74x192xf32, #tpu.memory_space<vmem>>, vector<4x64xf32>,
    %c50_234 = arith.constant 50 : index
    %c64_235 = arith.constant 64 : index
    %418 = vector.load %arg24[%c50_234, %c64_235] : memref<74x192xf32, #tpu.memory_space<vmem>>, vector<4x64xf32>
    tpu.vector_store %arg24[%c50_234, %c64_235], %416 {strides = array<i32>} : memref<74x192xf32, #tpu.memory_space<vmem>>, vector<4x64xf32>,
    %c44_236 = arith.constant 44 : index
    %c128_237 = arith.constant 128 : index
    %419 = vector.load %arg24[%c44_236, %c128_237] : memref<74x192xf32, #tpu.memory_space<vmem>>, vector<4x64xf32>
    tpu.vector_store %arg24[%c44_236, %c128_237], %416 {strides = array<i32>} : memref<74x192xf32, #tpu.memory_space<vmem>>, vector<4x64xf32>,
    %420 = vector.extract_strided_slice %411 {offsets = [20, 0], sizes = [4, 64], strides = [1, 1]} : vector<34x64xf32> to vector<4x64xf32>
    %c62_238 = arith.constant 62 : index
    %c0_239 = arith.constant 0 : index
    %421 = vector.load %arg24[%c62_238, %c0_239] : memref<74x192xf32, #tpu.memory_space<vmem>>, vector<4x64xf32>
    tpu.vector_store %arg24[%c62_238, %c0_239], %420 {strides = array<i32>} : memref<74x192xf32, #tpu.memory_space<vmem>>, vector<4x64xf32>,
    %c56_240 = arith.constant 56 : index
    %c64_241 = arith.constant 64 : index
    %422 = vector.load %arg24[%c56_240, %c64_241] : memref<74x192xf32, #tpu.memory_space<vmem>>, vector<4x64xf32>
    tpu.vector_store %arg24[%c56_240, %c64_241], %420 {strides = array<i32>} : memref<74x192xf32, #tpu.memory_space<vmem>>, vector<4x64xf32>,
    %c50_242 = arith.constant 50 : index
    %c128_243 = arith.constant 128 : index
    %423 = vector.load %arg24[%c50_242, %c128_243] : memref<74x192xf32, #tpu.memory_space<vmem>>, vector<4x64xf32>
    tpu.vector_store %arg24[%c50_242, %c128_243], %420 {strides = array<i32>} : memref<74x192xf32, #tpu.memory_space<vmem>>, vector<4x64xf32>,
    %424 = vector.extract_strided_slice %411 {offsets = [30, 0], sizes = [4, 64], strides = [1, 1]} : vector<34x64xf32> to vector<4x64xf32>
    %c68 = arith.constant 68 : index
    %c0_244 = arith.constant 0 : index
    %425 = vector.load %arg24[%c68, %c0_244] : memref<74x192xf32, #tpu.memory_space<vmem>>, vector<4x64xf32>
    tpu.vector_store %arg24[%c68, %c0_244], %424 {strides = array<i32>} : memref<74x192xf32, #tpu.memory_space<vmem>>, vector<4x64xf32>,
    %c62_245 = arith.constant 62 : index
    %c64_246 = arith.constant 64 : index
    %426 = vector.load %arg24[%c62_245, %c64_246] : memref<74x192xf32, #tpu.memory_space<vmem>>, vector<4x64xf32>
    tpu.vector_store %arg24[%c62_245, %c64_246], %424 {strides = array<i32>} : memref<74x192xf32, #tpu.memory_space<vmem>>, vector<4x64xf32>,
    %c56_247 = arith.constant 56 : index
    %c128_248 = arith.constant 128 : index
    %427 = vector.load %arg24[%c56_247, %c128_248] : memref<74x192xf32, #tpu.memory_space<vmem>>, vector<4x64xf32>
    tpu.vector_store %arg24[%c56_247, %c128_248], %424 {strides = array<i32>} : memref<74x192xf32, #tpu.memory_space<vmem>>, vector<4x64xf32>,
    %c0_249 = arith.constant 0 : index
    %c0_250 = arith.constant 0 : index
    %428 = vector.load %arg24[%c0_249, %c0_250] : memref<74x192xf32, #tpu.memory_space<vmem>>, vector<72x192xf32>
    %c0_251 = arith.constant 0 : index
    %c0_252 = arith.constant 0 : index
    %c0_253 = arith.constant 0 : index
    %429 = vector.load %arg6[%c0_251, %c0_252, %c0_253] : memref<3x192x128xf32, #tpu.memory_space<vmem>>, vector<1x192x128xf32>
    %430 = vector.shape_cast %429 : vector<1x192x128xf32> to vector<192x128xf32>
    %cst_254 = arith.constant dense<0.000000e+00> : vector<72x128xf32>
    %431 = tpu.matmul %428, %430, %cst_254 {dimension_numbers = #tpu.dot_dimension_numbers<[1], [0], [0], [1], [0, 0, 1, 1], [], []>} : vector<72x192xf32>, vector<192x128xf32>, vector<72x128xf32> -> vector<72x128xf32>
    %c1_255 = arith.constant 1 : index
    %c0_256 = arith.constant 0 : index
    %432 = vector.load %arg24[%c1_255, %c0_256] : memref<74x192xf32, #tpu.memory_space<vmem>>, vector<72x192xf32>
    %c1_257 = arith.constant 1 : index
    %c0_258 = arith.constant 0 : index
    %c0_259 = arith.constant 0 : index
    %433 = vector.load %arg6[%c1_257, %c0_258, %c0_259] : memref<3x192x128xf32, #tpu.memory_space<vmem>>, vector<1x192x128xf32>
    %434 = vector.shape_cast %433 : vector<1x192x128xf32> to vector<192x128xf32>
    %cst_260 = arith.constant dense<0.000000e+00> : vector<72x128xf32>
    %435 = tpu.matmul %432, %434, %cst_260 {dimension_numbers = #tpu.dot_dimension_numbers<[1], [0], [0], [1], [0, 0, 1, 1], [], []>} : vector<72x192xf32>, vector<192x128xf32>, vector<72x128xf32> -> vector<72x128xf32>
    %436 = arith.addf %431, %435 : vector<72x128xf32>
    %c2_261 = arith.constant 2 : index
    %c0_262 = arith.constant 0 : index
    %437 = vector.load %arg24[%c2_261, %c0_262] : memref<74x192xf32, #tpu.memory_space<vmem>>, vector<72x192xf32>
    %c2_263 = arith.constant 2 : index
    %c0_264 = arith.constant 0 : index
    %c0_265 = arith.constant 0 : index
    %438 = vector.load %arg6[%c2_263, %c0_264, %c0_265] : memref<3x192x128xf32, #tpu.memory_space<vmem>>, vector<1x192x128xf32>
    %439 = vector.shape_cast %438 : vector<1x192x128xf32> to vector<192x128xf32>
    %cst_266 = arith.constant dense<0.000000e+00> : vector<72x128xf32>
    %440 = tpu.matmul %437, %439, %cst_266 {dimension_numbers = #tpu.dot_dimension_numbers<[1], [0], [0], [1], [0, 0, 1, 1], [], []>} : vector<72x192xf32>, vector<192x128xf32>, vector<72x128xf32> -> vector<72x128xf32>
    %441 = arith.addf %436, %440 : vector<72x128xf32>
    %c0_267 = arith.constant 0 : index
    %c0_268 = arith.constant 0 : index
    %442 = vector.load %arg25[%c0_267, %c0_268] : memref<72x128xf32, #tpu.memory_space<vmem>>, vector<72x128xf32>
    tpu.vector_store %arg25[%c0_267, %c0_268], %441 {strides = array<i32>} : memref<72x128xf32, #tpu.memory_space<vmem>>, vector<72x128xf32>,
    %cst_269 = arith.constant 0.000000e+00 : f32
    %443 = vector.broadcast %cst_269 : f32 to vector<4x128xf32>
    %cst_270 = arith.constant 0.000000e+00 : f32
    %444 = vector.broadcast %cst_270 : f32 to vector<4x128xf32>
    %c7 = arith.constant 7 : index
    %c0_271 = arith.constant 0 : index
    %445 = vector.load %arg25[%c7, %c0_271] : memref<72x128xf32, #tpu.memory_space<vmem>>, vector<4x128xf32>
    %446 = arith.addf %443, %445 : vector<4x128xf32>
    %447 = arith.mulf %445, %445 : vector<4x128xf32>
    %448 = arith.addf %444, %447 : vector<4x128xf32>
    %c13 = arith.constant 13 : index
    %c0_272 = arith.constant 0 : index
    %449 = vector.load %arg25[%c13, %c0_272] : memref<72x128xf32, #tpu.memory_space<vmem>>, vector<4x128xf32>
    %450 = arith.addf %446, %449 : vector<4x128xf32>
    %451 = arith.mulf %449, %449 : vector<4x128xf32>
    %452 = arith.addf %448, %451 : vector<4x128xf32>
    %c19 = arith.constant 19 : index
    %c0_273 = arith.constant 0 : index
    %453 = vector.load %arg25[%c19, %c0_273] : memref<72x128xf32, #tpu.memory_space<vmem>>, vector<4x128xf32>
    %454 = arith.addf %450, %453 : vector<4x128xf32>
    %455 = arith.mulf %453, %453 : vector<4x128xf32>
    %456 = arith.addf %452, %455 : vector<4x128xf32>
    %c25 = arith.constant 25 : index
    %c0_274 = arith.constant 0 : index
    %457 = vector.load %arg25[%c25, %c0_274] : memref<72x128xf32, #tpu.memory_space<vmem>>, vector<4x128xf32>
    %458 = arith.addf %454, %457 : vector<4x128xf32>
    %459 = arith.mulf %457, %457 : vector<4x128xf32>
    %460 = arith.addf %456, %459 : vector<4x128xf32>
    %c43 = arith.constant 43 : index
    %c0_275 = arith.constant 0 : index
    %461 = vector.load %arg25[%c43, %c0_275] : memref<72x128xf32, #tpu.memory_space<vmem>>, vector<4x128xf32>
    %462 = arith.addf %458, %461 : vector<4x128xf32>
    %463 = arith.mulf %461, %461 : vector<4x128xf32>
    %464 = arith.addf %460, %463 : vector<4x128xf32>
    %c49 = arith.constant 49 : index
    %c0_276 = arith.constant 0 : index
    %465 = vector.load %arg25[%c49, %c0_276] : memref<72x128xf32, #tpu.memory_space<vmem>>, vector<4x128xf32>
    %466 = arith.addf %462, %465 : vector<4x128xf32>
    %467 = arith.mulf %465, %465 : vector<4x128xf32>
    %468 = arith.addf %464, %467 : vector<4x128xf32>
    %c55 = arith.constant 55 : index
    %c0_277 = arith.constant 0 : index
    %469 = vector.load %arg25[%c55, %c0_277] : memref<72x128xf32, #tpu.memory_space<vmem>>, vector<4x128xf32>
    %470 = arith.addf %466, %469 : vector<4x128xf32>
    %471 = arith.mulf %469, %469 : vector<4x128xf32>
    %472 = arith.addf %468, %471 : vector<4x128xf32>
    %c61_278 = arith.constant 61 : index
    %c0_279 = arith.constant 0 : index
    %473 = vector.load %arg25[%c61_278, %c0_279] : memref<72x128xf32, #tpu.memory_space<vmem>>, vector<4x128xf32>
    %474 = arith.addf %470, %473 : vector<4x128xf32>
    %475 = arith.mulf %473, %473 : vector<4x128xf32>
    %476 = arith.addf %472, %475 : vector<4x128xf32>
    %cst_280 = arith.constant dense<0.000000e+00> : vector<128xf32>
    %477 = vector.multi_reduction <add>, %474, %cst_280 [0] : vector<4x128xf32> to vector<128xf32>
    %478 = vector.shape_cast %477 : vector<128xf32> to vector<1x128xf32>
    %cst_281 = arith.constant 3.125000e-02 : f32
    %479 = vector.broadcast %cst_281 : f32 to vector<1x128xf32>
    %480 = arith.mulf %478, %479 : vector<1x128xf32>
    %cst_282 = arith.constant dense<0.000000e+00> : vector<128xf32>
    %481 = vector.multi_reduction <add>, %476, %cst_282 [0] : vector<4x128xf32> to vector<128xf32>
    %482 = vector.shape_cast %481 : vector<128xf32> to vector<1x128xf32>
    %cst_283 = arith.constant 3.125000e-02 : f32
    %483 = vector.broadcast %cst_283 : f32 to vector<1x128xf32>
    %484 = arith.mulf %482, %483 : vector<1x128xf32>
    %485 = arith.mulf %480, %480 : vector<1x128xf32>
    %486 = arith.subf %484, %485 : vector<1x128xf32>
    %c0_284 = arith.constant 0 : index
    %c0_285 = arith.constant 0 : index
    %487 = vector.load %arg7[%c0_284, %c0_285] : memref<2x128xf32, #tpu.memory_space<vmem>>, vector<1x128xf32>
    %cst_286 = arith.constant 9.99999974E-6 : f32
    %488 = vector.broadcast %cst_286 : f32 to vector<1x128xf32>
    %489 = arith.addf %486, %488 : vector<1x128xf32>
    %490 = math.rsqrt %489 : vector<1x128xf32>
    %491 = arith.mulf %487, %490 : vector<1x128xf32>
    %c1_287 = arith.constant 1 : index
    %c0_288 = arith.constant 0 : index
    %492 = vector.load %arg7[%c1_287, %c0_288] : memref<2x128xf32, #tpu.memory_space<vmem>>, vector<1x128xf32>
    %493 = arith.mulf %480, %491 : vector<1x128xf32>
    %494 = arith.subf %492, %493 : vector<1x128xf32>
    %c7_289 = arith.constant 7 : index
    %c0_290 = arith.constant 0 : index
    %495 = tpu.strided_load %arg25[%c7_289, %c0_290] {strides = array<i32: 2, 1>} : memref<72x128xf32, #tpu.memory_space<vmem>>, vector<8x128xf32>
    %496 = vector.broadcast %491 : vector<1x128xf32> to vector<8x128xf32>
    %497 = arith.mulf %495, %496 : vector<8x128xf32>
    %498 = vector.broadcast %494 : vector<1x128xf32> to vector<8x128xf32>
    %499 = arith.addf %497, %498 : vector<8x128xf32>
    %cst_291 = arith.constant 0.000000e+00 : f32
    %500 = vector.broadcast %cst_291 : f32 to vector<8x128xf32>
    %501 = arith.maximumf %499, %500 : vector<8x128xf32>
    %c8_292 = arith.constant 8 : index
    %c0_293 = arith.constant 0 : index
    %502 = tpu.strided_load %arg25[%c8_292, %c0_293] {strides = array<i32: 2, 1>} : memref<72x128xf32, #tpu.memory_space<vmem>>, vector<8x128xf32>
    %503 = vector.broadcast %491 : vector<1x128xf32> to vector<8x128xf32>
    %504 = arith.mulf %502, %503 : vector<8x128xf32>
    %505 = vector.broadcast %494 : vector<1x128xf32> to vector<8x128xf32>
    %506 = arith.addf %504, %505 : vector<8x128xf32>
    %cst_294 = arith.constant 0.000000e+00 : f32
    %507 = vector.broadcast %cst_294 : f32 to vector<8x128xf32>
    %508 = arith.maximumf %506, %507 : vector<8x128xf32>
    %509 = arith.maximumf %501, %508 : vector<8x128xf32>
    %c13_295 = arith.constant 13 : index
    %c0_296 = arith.constant 0 : index
    %510 = tpu.strided_load %arg25[%c13_295, %c0_296] {strides = array<i32: 2, 1>} : memref<72x128xf32, #tpu.memory_space<vmem>>, vector<8x128xf32>
    %511 = vector.broadcast %491 : vector<1x128xf32> to vector<8x128xf32>
    %512 = arith.mulf %510, %511 : vector<8x128xf32>
    %513 = vector.broadcast %494 : vector<1x128xf32> to vector<8x128xf32>
    %514 = arith.addf %512, %513 : vector<8x128xf32>
    %cst_297 = arith.constant 0.000000e+00 : f32
    %515 = vector.broadcast %cst_297 : f32 to vector<8x128xf32>
    %516 = arith.maximumf %514, %515 : vector<8x128xf32>
    %517 = arith.maximumf %509, %516 : vector<8x128xf32>
    %c14_298 = arith.constant 14 : index
    %c0_299 = arith.constant 0 : index
    %518 = tpu.strided_load %arg25[%c14_298, %c0_299] {strides = array<i32: 2, 1>} : memref<72x128xf32, #tpu.memory_space<vmem>>, vector<8x128xf32>
    %519 = vector.broadcast %491 : vector<1x128xf32> to vector<8x128xf32>
    %520 = arith.mulf %518, %519 : vector<8x128xf32>
    %521 = vector.broadcast %494 : vector<1x128xf32> to vector<8x128xf32>
    %522 = arith.addf %520, %521 : vector<8x128xf32>
    %cst_300 = arith.constant 0.000000e+00 : f32
    %523 = vector.broadcast %cst_300 : f32 to vector<8x128xf32>
    %524 = arith.maximumf %522, %523 : vector<8x128xf32>
    %525 = arith.maximumf %517, %524 : vector<8x128xf32>
    %526 = vector.extract_strided_slice %525 {offsets = [0, 0], sizes = [2, 128], strides = [1, 1]} : vector<8x128xf32> to vector<2x128xf32>
    %cst_301 = arith.constant dense<0.000000e+00> : vector<128xf32>
    %527 = vector.multi_reduction <add>, %526, %cst_301 [0] : vector<2x128xf32> to vector<128xf32>
    %528 = vector.shape_cast %527 : vector<128xf32> to vector<1x128xf32>
    %529 = vector.extract_strided_slice %525 {offsets = [6, 0], sizes = [2, 128], strides = [1, 1]} : vector<8x128xf32> to vector<2x128xf32>
    %cst_302 = arith.constant dense<0.000000e+00> : vector<128xf32>
    %530 = vector.multi_reduction <add>, %529, %cst_302 [0] : vector<2x128xf32> to vector<128xf32>
    %531 = vector.shape_cast %530 : vector<128xf32> to vector<1x128xf32>
    %532 = arith.addf %528, %531 : vector<1x128xf32>
    %cst_303 = arith.constant 2.500000e-01 : f32
    %533 = vector.broadcast %cst_303 : f32 to vector<1x128xf32>
    %534 = arith.mulf %532, %533 : vector<1x128xf32>
    %c43_304 = arith.constant 43 : index
    %c0_305 = arith.constant 0 : index
    %535 = tpu.strided_load %arg25[%c43_304, %c0_305] {strides = array<i32: 2, 1>} : memref<72x128xf32, #tpu.memory_space<vmem>>, vector<8x128xf32>
    %536 = vector.broadcast %491 : vector<1x128xf32> to vector<8x128xf32>
    %537 = arith.mulf %535, %536 : vector<8x128xf32>
    %538 = vector.broadcast %494 : vector<1x128xf32> to vector<8x128xf32>
    %539 = arith.addf %537, %538 : vector<8x128xf32>
    %cst_306 = arith.constant 0.000000e+00 : f32
    %540 = vector.broadcast %cst_306 : f32 to vector<8x128xf32>
    %541 = arith.maximumf %539, %540 : vector<8x128xf32>
    %c44_307 = arith.constant 44 : index
    %c0_308 = arith.constant 0 : index
    %542 = tpu.strided_load %arg25[%c44_307, %c0_308] {strides = array<i32: 2, 1>} : memref<72x128xf32, #tpu.memory_space<vmem>>, vector<8x128xf32>
    %543 = vector.broadcast %491 : vector<1x128xf32> to vector<8x128xf32>
    %544 = arith.mulf %542, %543 : vector<8x128xf32>
    %545 = vector.broadcast %494 : vector<1x128xf32> to vector<8x128xf32>
    %546 = arith.addf %544, %545 : vector<8x128xf32>
    %cst_309 = arith.constant 0.000000e+00 : f32
    %547 = vector.broadcast %cst_309 : f32 to vector<8x128xf32>
    %548 = arith.maximumf %546, %547 : vector<8x128xf32>
    %549 = arith.maximumf %541, %548 : vector<8x128xf32>
    %c49_310 = arith.constant 49 : index
    %c0_311 = arith.constant 0 : index
    %550 = tpu.strided_load %arg25[%c49_310, %c0_311] {strides = array<i32: 2, 1>} : memref<72x128xf32, #tpu.memory_space<vmem>>, vector<8x128xf32>
    %551 = vector.broadcast %491 : vector<1x128xf32> to vector<8x128xf32>
    %552 = arith.mulf %550, %551 : vector<8x128xf32>
    %553 = vector.broadcast %494 : vector<1x128xf32> to vector<8x128xf32>
    %554 = arith.addf %552, %553 : vector<8x128xf32>
    %cst_312 = arith.constant 0.000000e+00 : f32
    %555 = vector.broadcast %cst_312 : f32 to vector<8x128xf32>
    %556 = arith.maximumf %554, %555 : vector<8x128xf32>
    %557 = arith.maximumf %549, %556 : vector<8x128xf32>
    %c50_313 = arith.constant 50 : index
    %c0_314 = arith.constant 0 : index
    %558 = tpu.strided_load %arg25[%c50_313, %c0_314] {strides = array<i32: 2, 1>} : memref<72x128xf32, #tpu.memory_space<vmem>>, vector<8x128xf32>
    %559 = vector.broadcast %491 : vector<1x128xf32> to vector<8x128xf32>
    %560 = arith.mulf %558, %559 : vector<8x128xf32>
    %561 = vector.broadcast %494 : vector<1x128xf32> to vector<8x128xf32>
    %562 = arith.addf %560, %561 : vector<8x128xf32>
    %cst_315 = arith.constant 0.000000e+00 : f32
    %563 = vector.broadcast %cst_315 : f32 to vector<8x128xf32>
    %564 = arith.maximumf %562, %563 : vector<8x128xf32>
    %565 = arith.maximumf %557, %564 : vector<8x128xf32>
    %566 = vector.extract_strided_slice %565 {offsets = [0, 0], sizes = [2, 128], strides = [1, 1]} : vector<8x128xf32> to vector<2x128xf32>
    %cst_316 = arith.constant dense<0.000000e+00> : vector<128xf32>
    %567 = vector.multi_reduction <add>, %566, %cst_316 [0] : vector<2x128xf32> to vector<128xf32>
    %568 = vector.shape_cast %567 : vector<128xf32> to vector<1x128xf32>
    %569 = vector.extract_strided_slice %565 {offsets = [6, 0], sizes = [2, 128], strides = [1, 1]} : vector<8x128xf32> to vector<2x128xf32>
    %cst_317 = arith.constant dense<0.000000e+00> : vector<128xf32>
    %570 = vector.multi_reduction <add>, %569, %cst_317 [0] : vector<2x128xf32> to vector<128xf32>
    %571 = vector.shape_cast %570 : vector<128xf32> to vector<1x128xf32>
    %572 = arith.addf %568, %571 : vector<1x128xf32>
    %cst_318 = arith.constant 2.500000e-01 : f32
    %573 = vector.broadcast %cst_318 : f32 to vector<1x128xf32>
    %574 = arith.mulf %572, %573 : vector<1x128xf32>
    %575 = tpu.concatenate %534, %574 in 0 : vector<1x128xf32>, vector<1x128xf32> -> vector<2x128xf32>
    %c0_319 = arith.constant 0 : index
    %c0_320 = arith.constant 0 : index
    %c0_321 = arith.constant 0 : index
    %576 = vector.load %arg19[%c0_319, %c0_320, %c0_321] : memref<1x2x128xf32, #tpu.memory_space<vmem>>, vector<1x2x128xf32>
    %577 = vector.shape_cast %576 : vector<1x2x128xf32> to vector<2x128xf32>
    %578 = vector.shape_cast %575 : vector<2x128xf32> to vector<1x2x128xf32>
    tpu.vector_store %arg19[%c0_319, %c0_320, %c0_321], %578 {strides = array<i32>} : memref<1x2x128xf32, #tpu.memory_space<vmem>>, vector<1x2x128xf32>,
    %c0_322 = arith.constant 0 : index
    %c0_323 = arith.constant 0 : index
    %579 = vector.load %arg8[%c0_322, %c0_323] : memref<128x128xf32, #tpu.memory_space<vmem>>, vector<128x128xf32>
    %cst_324 = arith.constant dense<0.000000e+00> : vector<2x128xf32>
    %580 = tpu.matmul %575, %579, %cst_324 {dimension_numbers = #tpu.dot_dimension_numbers<[1], [0], [0], [1], [0, 0, 1, 1], [], []>} : vector<2x128xf32>, vector<128x128xf32>, vector<2x128xf32> -> vector<2x128xf32>
    %c0_325 = arith.constant 0 : index
    %c0_326 = arith.constant 0 : index
    %581 = vector.load %arg9[%c0_325, %c0_326] : memref<2x128xf32, #tpu.memory_space<vmem>>, vector<1x128xf32>
    %c1_327 = arith.constant 1 : index
    %c0_328 = arith.constant 0 : index
    %582 = vector.load %arg9[%c1_327, %c0_328] : memref<2x128xf32, #tpu.memory_space<vmem>>, vector<1x128xf32>
    %cst_329 = arith.constant dense<0.000000e+00> : vector<128xf32>
    %583 = vector.multi_reduction <add>, %580, %cst_329 [0] : vector<2x128xf32> to vector<128xf32>
    %584 = vector.shape_cast %583 : vector<128xf32> to vector<1x128xf32>
    %cst_330 = arith.constant 2.000000e+00 : f32
    %585 = vector.broadcast %cst_330 : f32 to vector<1x128xf32>
    %586 = arith.divf %584, %585 : vector<1x128xf32>
    %587 = vector.broadcast %586 : vector<1x128xf32> to vector<2x128xf32>
    %588 = arith.subf %580, %587 : vector<2x128xf32>
    %589 = arith.mulf %588, %588 : vector<2x128xf32>
    %cst_331 = arith.constant dense<0.000000e+00> : vector<128xf32>
    %590 = vector.multi_reduction <add>, %589, %cst_331 [0] : vector<2x128xf32> to vector<128xf32>
    %591 = vector.shape_cast %590 : vector<128xf32> to vector<1x128xf32>
    %cst_332 = arith.constant 2.000000e+00 : f32
    %592 = vector.broadcast %cst_332 : f32 to vector<1x128xf32>
    %593 = arith.divf %591, %592 : vector<1x128xf32>
    %cst_333 = arith.constant 9.99999974E-6 : f32
    %594 = vector.broadcast %cst_333 : f32 to vector<1x128xf32>
    %595 = arith.addf %593, %594 : vector<1x128xf32>
    %596 = math.rsqrt %595 : vector<1x128xf32>
    %597 = arith.mulf %581, %596 : vector<1x128xf32>
    %598 = vector.broadcast %597 : vector<1x128xf32> to vector<2x128xf32>
    %599 = arith.mulf %580, %598 : vector<2x128xf32>
    %600 = arith.mulf %586, %597 : vector<1x128xf32>
    %601 = arith.subf %582, %600 : vector<1x128xf32>
    %602 = vector.broadcast %601 : vector<1x128xf32> to vector<2x128xf32>
    %603 = arith.addf %599, %602 : vector<2x128xf32>
    %cst_334 = arith.constant 0.000000e+00 : f32
    %604 = vector.broadcast %cst_334 : f32 to vector<2x128xf32>
    %605 = arith.maximumf %603, %604 : vector<2x128xf32>
    %c0_335 = arith.constant 0 : index
    %c0_336 = arith.constant 0 : index
    %606 = vector.load %arg10[%c0_335, %c0_336] : memref<128x128xf32, #tpu.memory_space<vmem>>, vector<128x128xf32>
    %cst_337 = arith.constant dense<0.000000e+00> : vector<2x128xf32>
    %607 = tpu.matmul %605, %606, %cst_337 {dimension_numbers = #tpu.dot_dimension_numbers<[1], [0], [0], [1], [0, 0, 1, 1], [], []>} : vector<2x128xf32>, vector<128x128xf32>, vector<2x128xf32> -> vector<2x128xf32>
    %c0_338 = arith.constant 0 : index
    %c0_339 = arith.constant 0 : index
    %608 = vector.load %arg11[%c0_338, %c0_339] : memref<2x128xf32, #tpu.memory_space<vmem>>, vector<1x128xf32>
    %c1_340 = arith.constant 1 : index
    %c0_341 = arith.constant 0 : index
    %609 = vector.load %arg11[%c1_340, %c0_341] : memref<2x128xf32, #tpu.memory_space<vmem>>, vector<1x128xf32>
    %cst_342 = arith.constant dense<0.000000e+00> : vector<128xf32>
    %610 = vector.multi_reduction <add>, %607, %cst_342 [0] : vector<2x128xf32> to vector<128xf32>
    %611 = vector.shape_cast %610 : vector<128xf32> to vector<1x128xf32>
    %cst_343 = arith.constant 2.000000e+00 : f32
    %612 = vector.broadcast %cst_343 : f32 to vector<1x128xf32>
    %613 = arith.divf %611, %612 : vector<1x128xf32>
    %614 = vector.broadcast %613 : vector<1x128xf32> to vector<2x128xf32>
    %615 = arith.subf %607, %614 : vector<2x128xf32>
    %616 = arith.mulf %615, %615 : vector<2x128xf32>
    %cst_344 = arith.constant dense<0.000000e+00> : vector<128xf32>
    %617 = vector.multi_reduction <add>, %616, %cst_344 [0] : vector<2x128xf32> to vector<128xf32>
    %618 = vector.shape_cast %617 : vector<128xf32> to vector<1x128xf32>
    %cst_345 = arith.constant 2.000000e+00 : f32
    %619 = vector.broadcast %cst_345 : f32 to vector<1x128xf32>
    %620 = arith.divf %618, %619 : vector<1x128xf32>
    %cst_346 = arith.constant 9.99999974E-6 : f32
    %621 = vector.broadcast %cst_346 : f32 to vector<1x128xf32>
    %622 = arith.addf %620, %621 : vector<1x128xf32>
    %623 = math.rsqrt %622 : vector<1x128xf32>
    %624 = arith.mulf %608, %623 : vector<1x128xf32>
    %625 = vector.broadcast %624 : vector<1x128xf32> to vector<2x128xf32>
    %626 = arith.mulf %607, %625 : vector<2x128xf32>
    %627 = arith.mulf %613, %624 : vector<1x128xf32>
    %628 = arith.subf %609, %627 : vector<1x128xf32>
    %629 = vector.broadcast %628 : vector<1x128xf32> to vector<2x128xf32>
    %630 = arith.addf %626, %629 : vector<2x128xf32>
    %cst_347 = arith.constant 0.000000e+00 : f32
    %631 = vector.broadcast %cst_347 : f32 to vector<2x128xf32>
    %632 = arith.maximumf %630, %631 : vector<2x128xf32>
    %c0_348 = arith.constant 0 : index
    %c0_349 = arith.constant 0 : index
    %633 = vector.load %arg12[%c0_348, %c0_349] : memref<128x256xf32, #tpu.memory_space<vmem>>, vector<128x256xf32>
    %cst_350 = arith.constant dense<0.000000e+00> : vector<2x256xf32>
    %634 = tpu.matmul %632, %633, %cst_350 {dimension_numbers = #tpu.dot_dimension_numbers<[1], [0], [0], [1], [0, 0, 1, 1], [], []>} : vector<2x128xf32>, vector<128x256xf32>, vector<2x256xf32> -> vector<2x256xf32>
    %c0_351 = arith.constant 0 : index
    %c0_352 = arith.constant 0 : index
    %635 = vector.load %arg13[%c0_351, %c0_352] : memref<1x256xf32, #tpu.memory_space<vmem>>, vector<1x256xf32>
    %636 = vector.broadcast %635 : vector<1x256xf32> to vector<2x256xf32>
    %637 = arith.addf %634, %636 : vector<2x256xf32>
    %cst_353 = arith.constant dense<0.000000e+00> : vector<256xf32>
    %638 = vector.multi_reduction <add>, %637, %cst_353 [0] : vector<2x256xf32> to vector<256xf32>
    %639 = vector.shape_cast %638 : vector<256xf32> to vector<1x256xf32>
    %cst_354 = arith.constant 2.000000e+00 : f32
    %640 = vector.broadcast %cst_354 : f32 to vector<1x256xf32>
    %641 = arith.divf %639, %640 : vector<1x256xf32>
    %642 = vector.broadcast %641 : vector<1x256xf32> to vector<2x256xf32>
    %643 = arith.subf %637, %642 : vector<2x256xf32>
    %644 = arith.mulf %643, %643 : vector<2x256xf32>
    %cst_355 = arith.constant dense<0.000000e+00> : vector<256xf32>
    %645 = vector.multi_reduction <add>, %644, %cst_355 [0] : vector<2x256xf32> to vector<256xf32>
    %646 = vector.shape_cast %645 : vector<256xf32> to vector<1x256xf32>
    %cst_356 = arith.constant 2.000000e+00 : f32
    %647 = vector.broadcast %cst_356 : f32 to vector<1x256xf32>
    %648 = arith.divf %646, %647 : vector<1x256xf32>
    %cst_357 = arith.constant 9.99999974E-6 : f32
    %649 = vector.broadcast %cst_357 : f32 to vector<1x256xf32>
    %650 = arith.addf %648, %649 : vector<1x256xf32>
    %651 = math.rsqrt %650 : vector<1x256xf32>
    %652 = vector.broadcast %651 : vector<1x256xf32> to vector<2x256xf32>
    %653 = arith.mulf %643, %652 : vector<2x256xf32>
    %c0_358 = arith.constant 0 : index
    %c0_359 = arith.constant 0 : index
    %654 = vector.load %arg14[%c0_358, %c0_359] : memref<256x64xf32, #tpu.memory_space<vmem>>, vector<256x64xf32>
    %cst_360 = arith.constant dense<0.000000e+00> : vector<2x64xf32>
    %655 = tpu.matmul %653, %654, %cst_360 {dimension_numbers = #tpu.dot_dimension_numbers<[1], [0], [0], [1], [0, 0, 1, 1], [], []>} : vector<2x256xf32>, vector<256x64xf32>, vector<2x64xf32> -> vector<2x64xf32>
    %c0_361 = arith.constant 0 : index
    %c0_362 = arith.constant 0 : index
    %656 = vector.load %arg15[%c0_361, %c0_362] : memref<1x64xf32, #tpu.memory_space<vmem>>, vector<1x64xf32>
    %657 = vector.broadcast %656 : vector<1x64xf32> to vector<2x64xf32>
    %658 = arith.addf %655, %657 : vector<2x64xf32>
    %c0_363 = arith.constant 0 : index
    %c0_364 = arith.constant 0 : index
    %659 = vector.load %arg16[%c0_363, %c0_364] : memref<2x64xf32, #tpu.memory_space<vmem>>, vector<1x64xf32>
    %c1_365 = arith.constant 1 : index
    %c0_366 = arith.constant 0 : index
    %660 = vector.load %arg16[%c1_365, %c0_366] : memref<2x64xf32, #tpu.memory_space<vmem>>, vector<1x64xf32>
    %cst_367 = arith.constant dense<0.000000e+00> : vector<64xf32>
    %661 = vector.multi_reduction <add>, %658, %cst_367 [0] : vector<2x64xf32> to vector<64xf32>
    %662 = vector.shape_cast %661 : vector<64xf32> to vector<1x64xf32>
    %cst_368 = arith.constant 2.000000e+00 : f32
    %663 = vector.broadcast %cst_368 : f32 to vector<1x64xf32>
    %664 = arith.divf %662, %663 : vector<1x64xf32>
    %665 = vector.broadcast %664 : vector<1x64xf32> to vector<2x64xf32>
    %666 = arith.subf %658, %665 : vector<2x64xf32>
    %667 = arith.mulf %666, %666 : vector<2x64xf32>
    %cst_369 = arith.constant dense<0.000000e+00> : vector<64xf32>
    %668 = vector.multi_reduction <add>, %667, %cst_369 [0] : vector<2x64xf32> to vector<64xf32>
    %669 = vector.shape_cast %668 : vector<64xf32> to vector<1x64xf32>
    %cst_370 = arith.constant 2.000000e+00 : f32
    %670 = vector.broadcast %cst_370 : f32 to vector<1x64xf32>
    %671 = arith.divf %669, %670 : vector<1x64xf32>
    %cst_371 = arith.constant 9.99999974E-6 : f32
    %672 = vector.broadcast %cst_371 : f32 to vector<1x64xf32>
    %673 = arith.addf %671, %672 : vector<1x64xf32>
    %674 = math.rsqrt %673 : vector<1x64xf32>
    %675 = arith.mulf %659, %674 : vector<1x64xf32>
    %676 = vector.broadcast %675 : vector<1x64xf32> to vector<2x64xf32>
    %677 = arith.mulf %658, %676 : vector<2x64xf32>
    %678 = arith.mulf %664, %675 : vector<1x64xf32>
    %679 = arith.subf %660, %678 : vector<1x64xf32>
    %680 = vector.broadcast %679 : vector<1x64xf32> to vector<2x64xf32>
    %681 = arith.addf %677, %680 : vector<2x64xf32>
    %cst_372 = arith.constant 0.000000e+00 : f32
    %682 = vector.broadcast %cst_372 : f32 to vector<2x64xf32>
    %683 = arith.maximumf %681, %682 : vector<2x64xf32>
    %c0_373 = arith.constant 0 : index
    %c0_374 = arith.constant 0 : index
    %684 = vector.load %arg17[%c0_373, %c0_374] : memref<64x256xf32, #tpu.memory_space<vmem>>, vector<64x256xf32>
    %cst_375 = arith.constant dense<0.000000e+00> : vector<2x256xf32>
    %685 = tpu.matmul %683, %684, %cst_375 {dimension_numbers = #tpu.dot_dimension_numbers<[1], [0], [0], [1], [0, 0, 1, 1], [], []>} : vector<2x64xf32>, vector<64x256xf32>, vector<2x256xf32> -> vector<2x256xf32>
    %c0_376 = arith.constant 0 : index
    %c0_377 = arith.constant 0 : index
    %686 = vector.load %arg18[%c0_376, %c0_377] : memref<1x256xf32, #tpu.memory_space<vmem>>, vector<1x256xf32>
    %687 = vector.broadcast %686 : vector<1x256xf32> to vector<2x256xf32>
    %688 = arith.addf %685, %687 : vector<2x256xf32>
    %c0_378 = arith.constant 0 : index
    %c0_379 = arith.constant 0 : index
    %c0_380 = arith.constant 0 : index
    %689 = vector.load %arg20[%c0_378, %c0_379, %c0_380] : memref<1x2x256xf32, #tpu.memory_space<vmem>>, vector<1x2x256xf32>
    %690 = vector.shape_cast %689 : vector<1x2x256xf32> to vector<2x256xf32>
    %691 = vector.shape_cast %688 : vector<2x256xf32> to vector<1x2x256xf32>
    tpu.vector_store %arg20[%c0_378, %c0_379, %c0_380], %691 {strides = array<i32>} : memref<1x2x256xf32, #tpu.memory_space<vmem>>, vector<1x2x256xf32>,
    return
  }
  func.func @transform_0(%arg0: i32) -> (i32, i32, i32) {
    %c0_i32 = arith.constant 0 : i32
    %c0_i32_0 = arith.constant 0 : i32
    %c0_i32_1 = arith.constant 0 : i32
    return %arg0, %c0_i32, %c0_i32_0 : i32, i32, i32
  }
  func.func @transform_1(%arg0: i32) -> (i32, i32) {
    %c0_i32 = arith.constant 0 : i32
    %c0_i32_0 = arith.constant 0 : i32
    %c0_i32_1 = arith.constant 0 : i32
    return %c0_i32, %c0_i32_0 : i32, i32
  }
  func.func @transform_2(%arg0: i32) -> (i32, i32) {
    %c0_i32 = arith.constant 0 : i32
    %c0_i32_0 = arith.constant 0 : i32
    %c0_i32_1 = arith.constant 0 : i32
    return %c0_i32, %c0_i32_0 : i32, i32
  }
  func.func @transform_3(%arg0: i32) -> (i32, i32, i32) {
    %c0_i32 = arith.constant 0 : i32
    %c0_i32_0 = arith.constant 0 : i32
    %c0_i32_1 = arith.constant 0 : i32
    %c0_i32_2 = arith.constant 0 : i32
    return %c0_i32, %c0_i32_0, %c0_i32_1 : i32, i32, i32
  }
  func.func @transform_4(%arg0: i32) -> (i32, i32) {
    %c0_i32 = arith.constant 0 : i32
    %c0_i32_0 = arith.constant 0 : i32
    %c0_i32_1 = arith.constant 0 : i32
    return %c0_i32, %c0_i32_0 : i32, i32
  }
  func.func @transform_5(%arg0: i32) -> (i32, i32, i32) {
    %c0_i32 = arith.constant 0 : i32
    %c0_i32_0 = arith.constant 0 : i32
    %c0_i32_1 = arith.constant 0 : i32
    %c0_i32_2 = arith.constant 0 : i32
    return %c0_i32, %c0_i32_0, %c0_i32_1 : i32, i32, i32
  }
  func.func @transform_6(%arg0: i32) -> (i32, i32) {
    %c0_i32 = arith.constant 0 : i32
    %c0_i32_0 = arith.constant 0 : i32
    %c0_i32_1 = arith.constant 0 : i32
    return %c0_i32, %c0_i32_0 : i32, i32
  }
  func.func @transform_7(%arg0: i32) -> (i32, i32) {
    %c0_i32 = arith.constant 0 : i32
    %c0_i32_0 = arith.constant 0 : i32
    %c0_i32_1 = arith.constant 0 : i32
    return %c0_i32, %c0_i32_0 : i32, i32
  }
  func.func @transform_8(%arg0: i32) -> (i32, i32) {
    %c0_i32 = arith.constant 0 : i32
    %c0_i32_0 = arith.constant 0 : i32
    %c0_i32_1 = arith.constant 0 : i32
    return %c0_i32, %c0_i32_0 : i32, i32
  }
  func.func @transform_9(%arg0: i32) -> (i32, i32) {
    %c0_i32 = arith.constant 0 : i32
    %c0_i32_0 = arith.constant 0 : i32
    %c0_i32_1 = arith.constant 0 : i32
    return %c0_i32, %c0_i32_0 : i32, i32
  }
  func.func @transform_10(%arg0: i32) -> (i32, i32) {
    %c0_i32 = arith.constant 0 : i32
    %c0_i32_0 = arith.constant 0 : i32
    %c0_i32_1 = arith.constant 0 : i32
    return %c0_i32, %c0_i32_0 : i32, i32
  }
  func.func @transform_11(%arg0: i32) -> (i32, i32) {
    %c0_i32 = arith.constant 0 : i32
    %c0_i32_0 = arith.constant 0 : i32
    %c0_i32_1 = arith.constant 0 : i32
    return %c0_i32, %c0_i32_0 : i32, i32
  }
  func.func @transform_12(%arg0: i32) -> (i32, i32) {
    %c0_i32 = arith.constant 0 : i32
    %c0_i32_0 = arith.constant 0 : i32
    %c0_i32_1 = arith.constant 0 : i32
    return %c0_i32, %c0_i32_0 : i32, i32
  }
  func.func @transform_13(%arg0: i32) -> (i32, i32) {
    %c0_i32 = arith.constant 0 : i32
    %c0_i32_0 = arith.constant 0 : i32
    %c0_i32_1 = arith.constant 0 : i32
    return %c0_i32, %c0_i32_0 : i32, i32
  }
  func.func @transform_14(%arg0: i32) -> (i32, i32) {
    %c0_i32 = arith.constant 0 : i32
    %c0_i32_0 = arith.constant 0 : i32
    %c0_i32_1 = arith.constant 0 : i32
    return %c0_i32, %c0_i32_0 : i32, i32
  }
  func.func @transform_15(%arg0: i32) -> (i32, i32) {
    %c0_i32 = arith.constant 0 : i32
    %c0_i32_0 = arith.constant 0 : i32
    %c0_i32_1 = arith.constant 0 : i32
    return %c0_i32, %c0_i32_0 : i32, i32
  }
  func.func @transform_16(%arg0: i32) -> (i32, i32) {
    %c0_i32 = arith.constant 0 : i32
    %c0_i32_0 = arith.constant 0 : i32
    %c0_i32_1 = arith.constant 0 : i32
    return %c0_i32, %c0_i32_0 : i32, i32
  }
  func.func @transform_17(%arg0: i32) -> (i32, i32) {
    %c0_i32 = arith.constant 0 : i32
    %c0_i32_0 = arith.constant 0 : i32
    %c0_i32_1 = arith.constant 0 : i32
    return %c0_i32, %c0_i32_0 : i32, i32
  }
  func.func @transform_18(%arg0: i32) -> (i32, i32, i32) {
    %c0_i32 = arith.constant 0 : i32
    %c0_i32_0 = arith.constant 0 : i32
    %c0_i32_1 = arith.constant 0 : i32
    return %arg0, %c0_i32, %c0_i32_0 : i32, i32, i32
  }
  func.func @transform_19(%arg0: i32) -> (i32, i32, i32) {
    %c0_i32 = arith.constant 0 : i32
    %c0_i32_0 = arith.constant 0 : i32
    %c0_i32_1 = arith.constant 0 : i32
    return %arg0, %c0_i32, %c0_i32_0 : i32, i32, i32
  }
}

</mosaic_0001>

<bundles_post_ra>
// kernel: small_simsiam_forward.1
= control target key start
LH: loop header
LB: loop body
LE: loop exit
PB: predicated region body
PF: predicated region fallthrough
CT: control target
= control target key end

     0   :  { %s8098_s0 = inlined_call_operand.vmem [shape: f32[3,512,9], index: 0, kind: input, shape index: {}]   ;;  %s8099_s1 = inlined_call_operand.vmem [shape: f32[9,32], index: 1, kind: input, shape index: {}]   ;;  %s8100_s2 = inlined_call_operand.vmem [shape: f32[2,32], index: 2, kind: input, shape index: {}]   ;;  %s8101_s3 = inlined_call_operand.vmem [shape: f32[3,96,64], index: 3, kind: input, shape index: {}]   ;;  %s8102_s4 = inlined_call_operand.vmem [shape: f32[2,64], index: 4, kind: input, shape index: {}, may-alias: {4,15}]   ;;  %s8103_s5 = inlined_call_operand.vmem [shape: f32[3,192,128], index: 5, kind: input, shape index: {}]   ;;  %s8104_s6 = inlined_call_operand.vmem [shape: f32[2,128], index: 6, kind: input, shape index: {}, may-alias: {6,8,10}]   ;;  %s8105_s7 = inlined_call_operand.vmem [shape: f32[128,128], index: 7, kind: input, shape index: {}]   ;;  %s8106_s8 = inlined_call_operand.vmem [shape: f32[2,128], index: 8, kind: input, shape index: {}, may-alias: {6,8,10}]   ;;  %s8107_s9 = inlined_call_operand.vmem [shape: f32[128,128], index: 9, kind: input, shape index: {}]   ;;  %s8108_s10 = inlined_call_operand.vmem [shape: f32[2,128], index: 10, kind: input, shape index: {}, may-alias: {6,8,10}]   ;;  %s8109_s11 = inlined_call_operand.vmem [shape: f32[128,256], index: 11, kind: input, shape index: {}]   ;;  %s8110_s12 = inlined_call_operand.vmem [shape: f32[1,256], index: 12, kind: input, shape index: {}]   ;;  %s8111_s13 = inlined_call_operand.vmem [shape: f32[256,64], index: 13, kind: input, shape index: {}]   ;;  %s8112_s14 = inlined_call_operand.vmem [shape: f32[1,64], index: 14, kind: input, shape index: {}]   ;;  %s8113_s15 = inlined_call_operand.vmem [shape: f32[2,64], index: 15, kind: input, shape index: {}, may-alias: {4,15}]   ;;  %s8114_s16 = inlined_call_operand.vmem [shape: f32[64,256], index: 16, kind: input, shape index: {}]   ;;  %s8115_s17 = inlined_call_operand.vmem [shape: f32[1,256], index: 17, kind: input, shape index: {}]   ;;  %s8116_s18 = inlined_call_operand.vmem [shape: f32[3,2,128], index: 18, kind: output, shape index: {0}]   ;;  %s8117_s19 = inlined_call_operand.vmem [shape: f32[3,2,256], index: 19, kind: output, shape index: {1}]  }
   0x1   :  { %8122 = sst [smem:[#allocation8_spill]] %s8098_s0  ;;  %s6170_s0 = smov 0  }
   0x2   :  { %8123 = sst [smem:[#allocation9_spill]] %s8099_s1 }
   0x3   :  { %8124 = sst [smem:[#allocation10_spill]] %s8100_s2 }
   0x4   :  { %8125 = sst [smem:[#allocation11_spill]] %s8101_s3 }
   0x5 LB: > { %8126 = sst [smem:[#allocation7_spill]] %s6058_s0  ;;  %s4802_s30 = sadd.s32 4294967295, %s6058_s0   ;;  %s6058_s0 = sphi %s6170_s0, %s30_s0  }
   0x6   : > { %p4806_p0 = scmp.ge.s32.totalorder %s6058_s0, 1  ;;  %p540_p1 = scmp.lt.s32.totalorder %s6058_s0, 4 }
   0x8   : > { %p541_p2 = pnand %p4806_p0, %p540_p1 }
   0x9   : > { %p6180_p3 = scmp.lt.s32.totalorder (!%p541_p2), %s4802_s30, 2  ;;  %vm614_vm0 = vcmask (!%p541_p2), 785408   ;;  %vm640_vm1 = vcmask (!%p541_p2), 779264   ;;  %vm643_vm2 = vcmask (!%p541_p2), 523264   ;;  %v6064_v0 = vmov (!%p541_p2), 0.0   ;;  %s8128_s23 = sld [smem:[#allocation8_spill]] (!%p541_p2) }
   0xa   : > { %544 = sbr.rel (%p541_p2) target bundleno = 2964 (0xb94), region = 92  ;;  %615 = vst.msk [vmem:[#allocation3] sm:$0xff] (!%p541_p2), %vm614_vm0, %v6064_v0  ;;  %616 = vst.msk [vmem:[#allocation3 + $0x8] sm:$0xff] (!%p541_p2), %vm614_vm0, %v6064_v0  ;;  %vm662_vm3 = vcmask (!%p541_p2), 517120   ;;  %s6285_s0 = smov (!%p541_p2), 0  }
   0xb   : > { %617 = vst.msk [vmem:[#allocation3 + $0x10] sm:$0xff] (!%p541_p2), %vm614_vm0, %v6064_v0  ;;  %618 = vst.msk [vmem:[#allocation3 + $0x18] sm:$0xff] (!%p541_p2), %vm614_vm0, %v6064_v0 }
   0xc   : > { %619 = vst.msk [vmem:[#allocation3 + $0x20] sm:$0xff] (!%p541_p2), %vm614_vm0, %v6064_v0  ;;  %620 = vst.msk [vmem:[#allocation3 + $0x28] sm:$0xff] (!%p541_p2), %vm614_vm0, %v6064_v0 }
   0xd   : > { %621 = vst.msk [vmem:[#allocation3 + $0x30] sm:$0xff] (!%p541_p2), %vm614_vm0, %v6064_v0  ;;  %622 = vst.msk [vmem:[#allocation3 + $0x38] sm:$0xff] (!%p541_p2), %vm614_vm0, %v6064_v0 }
   0xe   : > { %623 = vst.msk [vmem:[#allocation3 + $0x40] sm:$0xff] (!%p541_p2), %vm614_vm0, %v6064_v0  ;;  %624 = vst.msk [vmem:[#allocation3 + $0x48] sm:$0xff] (!%p541_p2), %vm614_vm0, %v6064_v0 }
   0xf   : > { %625 = vst.msk [vmem:[#allocation3 + $0x50] sm:$0xff] (!%p541_p2), %vm614_vm0, %v6064_v0  ;;  %626 = vst.msk [vmem:[#allocation3 + $0x58] sm:$0xff] (!%p541_p2), %vm614_vm0, %v6064_v0 }
  0x10   : > { %627 = vst.msk [vmem:[#allocation3 + $0x60] sm:$0xff] (!%p541_p2), %vm614_vm0, %v6064_v0  ;;  %628 = vst.msk [vmem:[#allocation3 + $0x68] sm:$0xff] (!%p541_p2), %vm614_vm0, %v6064_v0 }
  0x11   : > { %629 = vst.msk [vmem:[#allocation3 + $0x70] sm:$0xff] %vm614_vm0, %v6064_v0  ;;  %630 = vst.msk [vmem:[#allocation3 + $0x78] sm:$0xff] %vm614_vm0, %v6064_v0  ;;  %s8134_s30 = smov (!%p6180_p3, %s4802_s30), 2 }
  0x12   : > { %631 = vst.msk [vmem:[#allocation3 + $0x80] sm:$0xff] %vm614_vm0, %v6064_v0  ;;  %632 = vst.msk [vmem:[#allocation3 + $0x88] sm:$0xff] %vm614_vm0, %v6064_v0  ;;  %s5001_s21 = sshll.u32 %s8134_s30, 9  ;;  %s4809_s1 = sshll.u32 %s8134_s30, 1 }
  0x13   : > { %633 = vst.msk [vmem:[#allocation3 + $0x90] sm:$0xff] %vm614_vm0, %v6064_v0  ;;  %634 = vst.msk [vmem:[#allocation3 + $0x98] sm:$0xff] %vm614_vm0, %v6064_v0  ;;  %s6273_s24 = scalar_lea.vmem %s8128_s23, %s5001_s21  ;;  %s6278_s26 = scalar_lea.vmem %s8116_s18, %s4809_s1 }
  0x14   : > { %635 = vst.msk [vmem:[#allocation3 + $0xa0] sm:$0xff] %vm614_vm0, %v6064_v0  ;;  %636 = vst.msk [vmem:[#allocation3 + $0xa8] sm:$0xff] %vm614_vm0, %v6064_v0  ;;  %s5002_s27 = sshll.u32 %s8134_s30, 2 }
  0x15   : > { %637 = vst.msk [vmem:[#allocation3 + $0xb0] sm:$0xff] %vm614_vm0, %v6064_v0  ;;  %638 = vst.msk [vmem:[#allocation3 + $0xb8] sm:$0xff] %vm614_vm0, %v6064_v0  ;;  %s6283_s20 = scalar_lea.vmem %s8117_s19, %s5002_s27 }
  0x16   : > { %639 = vst.msk [vmem:[#allocation3 + $0xc0] sm:$0xff] %vm614_vm0, %v6064_v0  ;;  %642 = vst [vmem:[#allocation5] sm:$0xff] %v6064_v0 }
  0x17   : > { %645 = vst [vmem:[#allocation5 + $0x10] sm:$0xff] %v6064_v0  ;;  %647 = vst [vmem:[#allocation5 + $0x20] sm:$0xff] %v6064_v0 }
  0x18   : > { %649 = vst [vmem:[#allocation5 + $0x30] sm:$0xff] %v6064_v0  ;;  %651 = vst [vmem:[#allocation5 + $0x40] sm:$0xff] %v6064_v0 }
  0x19   : > { %653 = vst [vmem:[#allocation5 + $0x50] sm:$0xff] %v6064_v0  ;;  %655 = vst [vmem:[#allocation5 + $0x60] sm:$0xff] %v6064_v0 }
  0x1a   : > { %657 = vst [vmem:[#allocation5 + $0x70] sm:$0xff] %v6064_v0  ;;  %659 = vst [vmem:[#allocation5 + $0x80] sm:$0xff] %v6064_v0 }
  0x1b   : > { %661 = vst [vmem:[#allocation5 + $0x90] sm:$0x3] %v6064_v0  ;;  %641 = vst.msk [vmem:[#allocation3 + $0xc8] sm:$0x3] %vm640_vm1, %v6064_v0 }
  0x1c   : > { %644 = vst.msk [vmem:[#allocation5 + $0x8] sm:$0xff] %vm643_vm2, %v6064_v0  ;;  %646 = vst.msk [vmem:[#allocation5 + $0x18] sm:$0xff] %vm643_vm2, %v6064_v0 }
  0x1d   : > { %648 = vst.msk [vmem:[#allocation5 + $0x28] sm:$0xff] %vm643_vm2, %v6064_v0  ;;  %650 = vst.msk [vmem:[#allocation5 + $0x38] sm:$0xff] %vm643_vm2, %v6064_v0 }
  0x1e   : > { %652 = vst.msk [vmem:[#allocation5 + $0x48] sm:$0xff] %vm643_vm2, %v6064_v0  ;;  %654 = vst.msk [vmem:[#allocation5 + $0x58] sm:$0xff] %vm643_vm2, %v6064_v0 }
  0x1f   : > { %656 = vst.msk [vmem:[#allocation5 + $0x68] sm:$0xff] %vm643_vm2, %v6064_v0  ;;  %658 = vst.msk [vmem:[#allocation5 + $0x78] sm:$0xff] %vm643_vm2, %v6064_v0 }
  0x20   : > { %660 = vst.msk [vmem:[#allocation5 + $0x88] sm:$0xff] %vm643_vm2, %v6064_v0 }
  0x21   : > { %663 = vst.msk [vmem:[#allocation5 + $0x98] sm:$0x3] %vm662_vm3, %v6064_v0 }
  0x22 LB: >> { %s8129_s2 = sld [smem:[#allocation9_spill]]  ;;  %vm707_vm4 = vcmask 1040384   ;;  %vm6065_vm5 = vmmov 1   ;;  %s4812_s23 = sshll.u32 %s6062_s0, 6  ;;  %vm682_vm7 = vcmask 72704   ;;  %vm817_vm8 = vcmask 261120   ;;  %s6062_s0 = sphi %s6285_s0, %s669_s0  }
  0x23   : >> { %vm5577_vm6 = vmpackc.low %vm707_vm4, %vm6065_vm5  ;;  %s671_s25 = scalar_lea.vmem %s6273_s24, %s4812_s23  ;;  %s816_s3 = scalar_lea.vmem [#allocation2], %s4812_s23 }
  0x24   : >> { %v672_v4 = vld [vmem:[%s671_s25] sm:$0xff]  ;;  %v673_v6 = vld [vmem:[%s671_s25 + $0x8] sm:$0xff]  ;;  %v674_v8 = vld [vmem:[%s671_s25 + $0x10] sm:$0xff]  ;;  %s669_s0 = sadd.s32 1, %s6062_s0  }
  0x25   : >> { %v676_v5 = vld [vmem:[%s671_s25 + $0x20] sm:$0xff]  ;;  %5197 = vmatprep.mubr.msk.f32.mxu0 %vm682_vm7, %v672_v4  ;;  %v677_v7 = vld [vmem:[%s671_s25 + $0x28] sm:$0xff]  ;;  %v678_v9 = vld [vmem:[%s671_s25 + $0x30] sm:$0xff]  ;;  %p666_p4 = scmp.ge.s32.totalorder %s669_s0, 8  }
  0x26   : >> { %5203 = vmatprep.mubr.msk.f32.mxu1 %vm682_vm7, %v676_v5  ;;  %v675_v10 = vld [vmem:[%s671_s25 + $0x18] sm:$0xff]  ;;  %s8130_s27 = sld [smem:[#allocation11_spill]] (%p666_p4)  ;;  %s8131_s30 = sld [smem:[#allocation10_spill]] (%p666_p4)  ;;  %vm6069_vm9 = vmmov (%p666_p4), 0   ;;  %vm1526_vm10 = vcmask (%p666_p4), 785920   ;;  %vm1521_vm11 = vcmask (%p666_p4), 523520  }
  0x27   : >> { %v679_v11 = vld [vmem:[%s671_s25 + $0x38] sm:$0xff]  ;;  %s6068_s0 = smov (%p666_p4), 32   ;;  %vm3045_vm12 = vcmask (%p666_p4), 521218   ;;  %vm3062_vm13 = vcmask (%p666_p4), 519168   ;;  %vm3035_vm14 = vcmask (%p666_p4), 523270   ;;  %vm3079_vm15 = vcmask (%p666_p4), 1041408  }
  0x28   : >> { %v680_v1 = vld [vmem:[%s8129_s2] sm:$0xff]  ;;  %v681_v2 = vld [vmem:[%s8129_s2 + $0x8] sm:$0x1]  ;;  %vm3363_vm1 = vcmask (%p666_p4), 1046528   ;;  %vm3050_vm5 = vcmask (%p666_p4), 523268  }
  0x29   : >> { %v5576_v3 = vpack.c.bf16 %v681_v2, %v680_v1 }
  0x2b   : >> { %5578 = vmatprep.subr.msk.bf16.mxu0 %vm5577_vm6, %v5576_v3  ;;  %5872 = vmatprep.subr.msk.bf16.mxu1 %vm5577_vm6, %v5576_v3 }
  0x2c   : >> { %5581 = vmatpush3.bf16.msk.msra.mxu0 %vm5577_vm6, %v5576_v3  ;;  %5873 = vmatpush3.bf16.msk.msra.mxu1 %vm5577_vm6, %v5576_v3  ;;  %vm3094_vm6 = vcmask (%p666_p4), 1045504  }
  0x2f   : >> { %5198 = vmatmul.mubr.msk.f32.vlgmr.msra.gmra.mrb[0].mxu0 %vm682_vm7, %v673_v6  ;;  %5204 = vmatmul.mubr.msk.f32.vlgmr.msra.gmra.mrb[0].mxu1 %vm682_vm7, %v677_v7 }
  0x30   : >> { %5200 = vmatprep.mubr.msk.f32.mxu0 %vm682_vm7, %v674_v8  ;;  %5206 = vmatprep.mubr.msk.f32.mxu1 %vm682_vm7, %v678_v9 }
  0x33   : >> { %5201 = vmatmul.mubr.msk.f32.gmra.mrb[2].mxu0 %vm682_vm7, %v675_v10  ;;  %5207 = vmatmul.mubr.msk.f32.gmra.mrb[2].mxu1 %vm682_vm7, %v679_v11  ;;  %vm3041_vm7 = vcmask (%p666_p4), 1043968  }
  0x34   : > { %5233 = vmatprep.mubr.msk.f32.mxu0 (%p666_p4), %vm6069_vm9, %v6064_v0 }
 0x102   : >> { %v5199_v12 = vpop.f32.mrb[0].mxu0  ;;  %v5205_v13 = vpop.f32.mrb[0].mxu1  ;;  %668 = sbr.rel (!%p666_p4) target bundleno = 34 (0x22), region = 265 }
 0x103   : >> { %819 = vst.msk [vmem:[%s816_s3 + $0x8] sm:$0xff] %vm817_vm8, %v5199_v12  ;;  %823 = vst.msk [vmem:[%s816_s3 + $0x28] sm:$0xff] %vm817_vm8, %v5205_v13  ;;  %v777_v14 = vpop.f32.mrb[1].mxu0  ;;  %v797_v15 = vpop.f32.mrb[1].mxu1 }
 0x104   : >> { %818 = vst.msk [vmem:[%s816_s3] sm:$0xff] %vm817_vm8, %v777_v14  ;;  %822 = vst.msk [vmem:[%s816_s3 + $0x20] sm:$0xff] %vm817_vm8, %v797_v15 }
 0x106   : >> { %v5202_v16 = vpop.f32.mrb[2].mxu0  ;;  %v5208_v17 = vpop.f32.mrb[2].mxu1 }
 0x107   : >> { %821 = vst.msk [vmem:[%s816_s3 + $0x18] sm:$0xff] %vm817_vm8, %v5202_v16  ;;  %825 = vst.msk [vmem:[%s816_s3 + $0x38] sm:$0xff] %vm817_vm8, %v5208_v17  ;;  %v787_v18 = vpop.f32.mrb[3].mxu0  ;;  %v807_v19 = vpop.f32.mrb[3].mxu1 }
 0x108   : >> { %820 = vst.msk [vmem:[%s816_s3 + $0x10] sm:$0xff] %vm817_vm8, %v787_v18  ;;  %824 = vst.msk [vmem:[%s816_s3 + $0x30] sm:$0xff] %vm817_vm8, %v807_v19  ;;  %s6067_s3 = smov (%p666_p4), 64  }
 0x10f   : > { %v826_v20 = vld [vmem:[#allocation2] sm:$0xff]  ;;  %v827_v21 = vld [vmem:[#allocation2 + $0x8] sm:$0xff]  ;;  %v828_v22 = vld [vmem:[#allocation2 + $0x10] sm:$0xff] }
 0x110   : > { %v829_v23 = vld [vmem:[#allocation2 + $0x18] sm:$0xff]  ;;  %v835_v24 = vsel %vm817_vm8, %v826_v20, 0.0  ;;  %v836_v25 = vsel %vm817_vm8, %v827_v21, 0.0  ;;  %v838_v26 = vsel %vm817_vm8, %v828_v22, 0.0  ;;  %v857_v27 = vmul.f32 %v826_v20, %v826_v20  ;;  %v830_v28 = vld [vmem:[#allocation2 + $0x20] sm:$0xff]  ;;  %v831_v33 = vld [vmem:[#allocation2 + $0x28] sm:$0xff] }
 0x111   : > { %v837_v29 = vadd.f32 %v836_v25, %v835_v24  ;;  %v840_v30 = vsel %vm817_vm8, %v829_v23, 0.0  ;;  %v858_v31 = vmul.f32 %v827_v21, %v827_v21  ;;  %v859_v32 = vmul.f32 %v828_v22, %v828_v22  ;;  %v832_v34 = vld [vmem:[#allocation2 + $0x30] sm:$0xff]  ;;  %v888_v41 = vld [vmem:[#allocation2 + $0x40] sm:$0xff]  ;;  %v889_v42 = vld [vmem:[#allocation2 + $0x48] sm:$0xff] }
 0x112   : > { %v860_v36 = vmul.f32 %v829_v23, %v829_v23  ;;  %v842_v37 = vsel %vm817_vm8, %v830_v28, 0.0  ;;  %v861_v38 = vmul.f32 %v830_v28, %v830_v28  ;;  %v865_v39 = vsel %vm817_vm8, %v857_v27, 0.0  ;;  %v833_v43 = vld [vmem:[#allocation2 + $0x38] sm:$0xff]  ;;  %v890_v47 = vld [vmem:[#allocation2 + $0x50] sm:$0xff]  ;;  %v892_v59 = vld [vmem:[#allocation2 + $0x60] sm:$0xff] }
 0x113   : > { %v839_v35 = vadd.f32 %v838_v26, %v837_v29  ;;  %v866_v40 = vsel %vm817_vm8, %v858_v31, 0.0  ;;  %v868_v46 = vsel %vm817_vm8, %v859_v32, 0.0  ;;  %v844_v48 = vsel %vm817_vm8, %v831_v33, 0.0  ;;  %v891_v52 = vld [vmem:[#allocation2 + $0x58] sm:$0xff]  ;;  %v893_v4 = vld [vmem:[#allocation2 + $0x68] sm:$0xff]  ;;  %v894_v15 = vld [vmem:[#allocation2 + $0x70] sm:$0xff] }
 0x114   : > { %v867_v45 = vadd.f32 %v866_v40, %v865_v39  ;;  %v846_v49 = vsel %vm817_vm8, %v832_v34, 0.0  ;;  %v862_v50 = vmul.f32 %v831_v33, %v831_v33  ;;  %v870_v51 = vsel %vm817_vm8, %v860_v36, 0.0  ;;  %v949_v23 = vld [vmem:[#allocation2 + $0x80] sm:$0xff]  ;;  %v950_v27 = vld [vmem:[#allocation2 + $0x88] sm:$0xff]  ;;  %v951_v28 = vld [vmem:[#allocation2 + $0x90] sm:$0xff] }
 0x115   : > { %v841_v44 = vadd.f32 %v840_v30, %v839_v35  ;;  %v896_v55 = vsel %vm817_vm8, %v888_v41, 0.0  ;;  %v897_v56 = vsel %vm817_vm8, %v889_v42, 0.0  ;;  %v848_v57 = vsel %vm817_vm8, %v833_v43, 0.0 }
 0x116   : > { %v869_v54 = vadd.f32 %v868_v46, %v867_v45  ;;  %v872_v58 = vsel %vm817_vm8, %v861_v38, 0.0  ;;  %v898_v60 = vadd.f32 %v897_v56, %v896_v55  ;;  %v899_v61 = vsel %vm817_vm8, %v890_v47, 0.0  ;;  %v953_v46 = vld [vmem:[#allocation2 + $0xa0] sm:$0xff] }
 0x117   : > { %v843_v53 = vadd.f32 %v842_v37, %v841_v44  ;;  %v863_v63 = vmul.f32 %v832_v34, %v832_v34  ;;  %v901_v2 = vsel %vm817_vm8, %v891_v52, 0.0  ;;  %v874_v3 = vsel %vm817_vm8, %v862_v50, 0.0  ;;  %v895_v34 = vld [vmem:[#allocation2 + $0x78] sm:$0xff] }
 0x118   : > { %v871_v1 = vadd.f32 %v870_v51, %v869_v54  ;;  %v900_v5 = vadd.f32 %v899_v61, %v898_v60  ;;  %v918_v6 = vmul.f32 %v888_v41, %v888_v41  ;;  %v919_v7 = vmul.f32 %v889_v42, %v889_v42  ;;  %v952_v37 = vld [vmem:[#allocation2 + $0x98] sm:$0xff]  ;;  %v955_v61 = vld [vmem:[#allocation2 + $0xb0] sm:$0xff] }
 0x119   : > { %v845_v62 = vadd.f32 %v844_v48, %v843_v53  ;;  %v903_v10 = vsel %vm817_vm8, %v892_v59, 0.0  ;;  %v920_v11 = vmul.f32 %v890_v47, %v890_v47  ;;  %v921_v13 = vmul.f32 %v891_v52, %v891_v52  ;;  %v954_v53 = vld [vmem:[#allocation2 + $0xa8] sm:$0xff] }
 0x11a   : > { %v873_v9 = vadd.f32 %v872_v58, %v871_v1  ;;  %v902_v12 = vadd.f32 %v901_v2, %v900_v5  ;;  %v905_v16 = vsel %vm817_vm8, %v893_v4, 0.0  ;;  %v922_v17 = vmul.f32 %v892_v59, %v892_v59  ;;  %v956_v5 = vld [vmem:[#allocation2 + $0xb8] sm:$0xff] }
 0x11b   : > { %v847_v8 = vadd.f32 %v846_v49, %v845_v62  ;;  %v926_v18 = vsel %vm817_vm8, %v918_v6, 0.0  ;;  %v927_v21 = vsel %vm817_vm8, %v919_v7, 0.0  ;;  %v929_v22 = vsel %vm817_vm8, %v920_v11, 0.0 }
 0x11c   : > { %v875_v19 = vadd.f32 %v874_v3, %v873_v9  ;;  %v904_v20 = vadd.f32 %v903_v10, %v902_v12  ;;  %v864_v24 = vmul.f32 %v833_v43, %v833_v43  ;;  %v876_v25 = vsel %vm817_vm8, %v863_v63, 0.0 }
 0x11d   : > { %v849_v14 = vadd.f32 %v848_v57, %v847_v8  ;;  %v928_v26 = vadd.f32 %v927_v21, %v926_v18  ;;  %v907_v30 = vsel %vm817_vm8, %v894_v15, 0.0  ;;  %v923_v31 = vmul.f32 %v893_v4, %v893_v4  ;;  %v1010_v21 = vld [vmem:[#allocation2 + $0xc0] sm:$0xff] }
 0x11e   : > { %v906_v29 = vadd.f32 %v905_v16, %v904_v20  ;;  %v931_v32 = vsel %vm817_vm8, %v921_v13, 0.0  ;;  %v924_v35 = vmul.f32 %v894_v15, %v894_v15  ;;  %v957_v38 = vsel %vm817_vm8, %v949_v23, 0.0 }
 0x11f   : > { %v850_v33 = vrot.slane %v849_v14, 4  ;;  %v930_v36 = vadd.f32 %v929_v22, %v928_v26  ;;  %v877_v39 = vadd.f32 %v876_v25, %v875_v19  ;;  %v933_v40 = vsel %vm817_vm8, %v922_v17, 0.0  ;;  %v1011_v22 = vld [vmem:[#allocation2 + $0xc8] sm:$0xff] }
 0x120   : > { %v958_v41 = vsel %vm817_vm8, %v950_v27, 0.0  ;;  %v960_v42 = vsel %vm817_vm8, %v951_v28, 0.0  ;;  %v878_v43 = vsel %vm817_vm8, %v864_v24, 0.0  ;;  %v908_v44 = vadd.f32 %v907_v30, %v906_v29 }
 0x121   : > { %v932_v45 = vadd.f32 %v931_v32, %v930_v36  ;;  %v959_v47 = vadd.f32 %v958_v41, %v957_v38  ;;  %v909_v48 = vsel %vm817_vm8, %v895_v34, 0.0  ;;  %v935_v49 = vsel %vm817_vm8, %v923_v31, 0.0  ;;  %v1013_v32 = vld [vmem:[#allocation2 + $0xd8] sm:$0xff] }
 0x122   : > { %v962_v50 = vsel %vm817_vm8, %v952_v37, 0.0  ;;  %v925_v51 = vmul.f32 %v895_v34, %v895_v34  ;;  %v851_v55 = vadd.f32 %v850_v33, %v849_v14  ;;  %v879_v56 = vadd.f32 %v878_v43, %v877_v39  ;;  %v1014_v39 = vld [vmem:[#allocation2 + $0xe0] sm:$0xff] }
 0x123   : > { %v934_v52 = vadd.f32 %v933_v40, %v932_v45  ;;  %v961_v54 = vadd.f32 %v960_v42, %v959_v47  ;;  %v937_v57 = vsel %vm817_vm8, %v924_v35, 0.0  ;;  %v964_v58 = vsel %vm817_vm8, %v953_v46, 0.0 }
 0x124   : > { %v910_v59 = vadd.f32 %v909_v48, %v908_v44  ;;  %v979_v63 = vmul.f32 %v949_v23, %v949_v23  ;;  %v966_v1 = vsel %vm817_vm8, %v954_v53, 0.0  ;;  %v980_v2 = vmul.f32 %v950_v27, %v950_v27  ;;  %v1012_v23 = vld [vmem:[#allocation2 + $0xd0] sm:$0xff]  ;;  %v1015_v48 = vld [vmem:[#allocation2 + $0xe8] sm:$0xff] }
 0x125   : > { %v936_v60 = vadd.f32 %v935_v49, %v934_v52  ;;  %v963_v62 = vadd.f32 %v962_v50, %v961_v54  ;;  %v981_v3 = vmul.f32 %v951_v28, %v951_v28  ;;  %v939_v4 = vsel %vm817_vm8, %v925_v51, 0.0 }
 0x126   : > { %v852_v7 = vrot.slane %v851_v55, 2  ;;  %v968_v9 = vsel %vm817_vm8, %v955_v61, 0.0  ;;  %v982_v10 = vmul.f32 %v952_v37, %v952_v37  ;;  %v880_v11 = vrot.slane %v879_v56, 4 }
 0x127   : > { %v965_v6 = vadd.f32 %v964_v58, %v963_v62  ;;  %v938_v8 = vadd.f32 %v937_v57, %v936_v60  ;;  %v911_v12 = vrot.slane %v910_v59, 4  ;;  %v987_v14 = vsel %vm817_vm8, %v979_v63, 0.0  ;;  %v1016_v57 = vld [vmem:[#allocation2 + $0xf0] sm:$0xff] }
 0x128   : > { %v970_v15 = vsel %vm817_vm8, %v956_v5, 0.0  ;;  %v983_v16 = vmul.f32 %v953_v46, %v953_v46  ;;  %v988_v17 = vsel %vm817_vm8, %v980_v2, 0.0  ;;  %v990_v18 = vsel %vm817_vm8, %v981_v3, 0.0  ;;  %v1017_v2 = vld [vmem:[#allocation2 + $0xf8] sm:$0xff] }
 0x129   : > { %v967_v13 = vadd.f32 %v966_v1, %v965_v6  ;;  %v989_v20 = vadd.f32 %v988_v17, %v987_v14  ;;  %v853_v24 = vadd.f32 %v852_v7, %v851_v55  ;;  %v940_v25 = vadd.f32 %v939_v4, %v938_v8 }
 0x12a   : > { %v984_v26 = vmul.f32 %v954_v53, %v954_v53  ;;  %v992_v27 = vsel %vm817_vm8, %v982_v10, 0.0  ;;  %v881_v28 = vadd.f32 %v880_v11, %v879_v56  ;;  %v912_v29 = vadd.f32 %v911_v12, %v910_v59 }
 0x12b   : > { %v969_v19 = vadd.f32 %v968_v9, %v967_v13  ;;  %v991_v31 = vadd.f32 %v990_v18, %v989_v20  ;;  %v994_v33 = vsel %vm817_vm8, %v983_v16, 0.0  ;;  %v1018_v34 = vsel %vm817_vm8, %v1010_v21, 0.0  ;;  %v1071_v13 = vld [vmem:[#allocation2 + $0x100] sm:$0xff]  ;;  %v1072_v18 = vld [vmem:[#allocation2 + $0x108] sm:$0xff] }
 0x12c   : > { %v1019_v35 = vsel %vm817_vm8, %v1011_v22, 0.0  ;;  %v1021_v36 = vsel %vm817_vm8, %v1012_v23, 0.0  ;;  %v985_v37 = vmul.f32 %v955_v61, %v955_v61  ;;  %v854_v41 = vrot.slane %v853_v24, 1 }
 0x12d   : > { %v971_v30 = vadd.f32 %v970_v15, %v969_v19  ;;  %v993_v38 = vadd.f32 %v992_v27, %v991_v31  ;;  %v1020_v40 = vadd.f32 %v1019_v35, %v1018_v34  ;;  %v941_v42 = vrot.slane %v940_v25, 4  ;;  %v1074_v27 = vld [vmem:[#allocation2 + $0x118] sm:$0xff]  ;;  %v1075_v35 = vld [vmem:[#allocation2 + $0x120] sm:$0xff] }
 0x12e   : > { %v996_v43 = vsel %vm817_vm8, %v984_v26, 0.0  ;;  %v1023_v44 = vsel %vm817_vm8, %v1013_v32, 0.0  ;;  %v913_v45 = vrot.slane %v912_v29, 2  ;;  %v882_v50 = vrot.slane %v881_v28, 2 }
 0x12f   : > { %v972_v46 = vrot.slane %v971_v30, 4  ;;  %v995_v47 = vadd.f32 %v994_v33, %v993_v38  ;;  %v1022_v49 = vadd.f32 %v1021_v36, %v1020_v40  ;;  %v1025_v51 = vsel %vm817_vm8, %v1014_v39, 0.0 }
 0x130   : > { %v1040_v52 = vmul.f32 %v1010_v21, %v1010_v21  ;;  %v1041_v53 = vmul.f32 %v1011_v22, %v1011_v22  ;;  %v986_v54 = vmul.f32 %v956_v5, %v956_v5  ;;  %v998_v56 = vsel %vm817_vm8, %v985_v37, 0.0 }
 0x131   : > { %v997_v55 = vadd.f32 %v996_v43, %v995_v47  ;;  %v1024_v58 = vadd.f32 %v1023_v44, %v1022_v49  ;;  %v6370_v59 = vadd.f32 %v854_v41, %v853_v24  ;;  %v942_v60 = vadd.f32 %v941_v42, %v940_v25 }
 0x132   : > { %v1027_v61 = vsel %vm817_vm8, %v1015_v48, 0.0  ;;  %v1042_v62 = vmul.f32 %v1012_v23, %v1012_v23  ;;  %v6373_v63 = vadd.f32 %v913_v45, %v912_v29  ;;  %v973_v1 = vadd.f32 %v972_v46, %v971_v30  ;;  %v1073_v23 = vld [vmem:[#allocation2 + $0x110] sm:$0xff]  ;;  %v1076_v45 = vld [vmem:[#allocation2 + $0x128] sm:$0xff] }
 0x133   : > { %v1026_v3 = vadd.f32 %v1025_v51, %v1024_v58  ;;  %v1043_v4 = vmul.f32 %v1013_v32, %v1013_v32  ;;  %v999_v6 = vadd.f32 %v998_v56, %v997_v55  ;;  %v1029_v5 = vsel %vm817_vm8, %v1016_v57, 0.0 }
 0x134   : > { %v1048_v7 = vsel %vm817_vm8, %v1040_v52, 0.0  ;;  %v1049_v8 = vsel %vm817_vm8, %v1041_v53, 0.0  ;;  %v6378_v9 = vadd.f32 %v882_v50, %v881_v28  ;;  %v1000_v10 = vsel %vm817_vm8, %v986_v54, 0.0 }
 0x135   : > { %v1028_v11 = vadd.f32 %v1027_v61, %v1026_v3  ;;  %v1044_v12 = vmul.f32 %v1014_v39, %v1014_v39  ;;  %v943_v14 = vrot.slane %v942_v60, 2  ;;  %v1031_v15 = vsel %vm817_vm8, %v1017_v2, 0.0 }
 0x136   : > { %v1050_v16 = vadd.f32 %v1049_v8, %v1048_v7  ;;  %v1051_v17 = vsel %vm817_vm8, %v1042_v62, 0.0  ;;  %v974_v19 = vrot.slane %v973_v1, 2  ;;  %v1045_v21 = vmul.f32 %v1015_v48, %v1015_v48 }
 0x137   : > { %v1030_v20 = vadd.f32 %v1029_v5, %v1028_v11  ;;  %v1053_v22 = vsel %vm817_vm8, %v1043_v4, 0.0  ;;  %v915_v24 = vrot.slane %v6373_v63, 1  ;;  %v1001_v25 = vadd.f32 %v1000_v10, %v999_v6 }
 0x138   : > { %v1052_v26 = vadd.f32 %v1051_v17, %v1050_v16  ;;  %v1079_v28 = vsel %vm817_vm8, %v1071_v13, 0.0  ;;  %v1046_v30 = vmul.f32 %v1016_v57, %v1016_v57  ;;  %v1055_v31 = vsel %vm817_vm8, %v1044_v12, 0.0  ;;  %v1132_v12 = vld [vmem:[#allocation2 + $0x140] sm:$0xff] }
 0x139   : > { %v1032_v29 = vadd.f32 %v1031_v15, %v1030_v20  ;;  %v1080_v32 = vsel %vm817_vm8, %v1072_v18, 0.0  ;;  %v944_v33 = vadd.f32 %v943_v14, %v942_v60  ;;  %v1082_v37 = vsel %vm817_vm8, %v1073_v23, 0.0  ;;  %v1078_v14 = vld [vmem:[#allocation2 + $0x138] sm:$0xff] }
 0x13a   : > { %v1054_v34 = vadd.f32 %v1053_v22, %v1052_v26  ;;  %v1081_v36 = vadd.f32 %v1080_v32, %v1079_v28  ;;  %v975_v38 = vadd.f32 %v974_v19, %v973_v1  ;;  %v1047_v39 = vmul.f32 %v1017_v2, %v1017_v2  ;;  %v1077_v1 = vld [vmem:[#allocation2 + $0x130] sm:$0xff]  ;;  %v1135_v26 = vld [vmem:[#allocation2 + $0x158] sm:$0xff] }
 0x13b   : > { %v1057_v40 = vsel %vm817_vm8, %v1045_v21, 0.0  ;;  %v1084_v41 = vsel %vm817_vm8, %v1074_v27, 0.0  ;;  %v1002_v42 = vrot.slane %v1001_v25, 4  ;;  %v1033_v43 = vrot.slane %v1032_v29, 4  ;;  %v1134_v22 = vld [vmem:[#allocation2 + $0x150] sm:$0xff] }
 0x13c   : > { %v1056_v44 = vadd.f32 %v1055_v31, %v1054_v34  ;;  %v1083_v46 = vadd.f32 %v1082_v37, %v1081_v36  ;;  %v1059_v47 = vsel %vm817_vm8, %v1046_v30, 0.0  ;;  %v1086_v48 = vsel %vm817_vm8, %v1075_v35, 0.0 }
 0x13d   : > { %v1101_v49 = vmul.f32 %v1071_v13, %v1071_v13  ;;  %v1102_v50 = vmul.f32 %v1072_v18, %v1072_v18  ;;  %v884_v51 = vrot.slane %v6378_v9, 1  ;;  %v1103_v54 = vmul.f32 %v1073_v23, %v1073_v23 }
 0x13e   : > { %v1058_v52 = vadd.f32 %v1057_v40, %v1056_v44  ;;  %v1085_v53 = vadd.f32 %v1084_v41, %v1083_v46  ;;  %v945_v55 = vrot.slane %v944_v33, 1  ;;  %v1061_v56 = vsel %vm817_vm8, %v1047_v39, 0.0 }
 0x13f   : > { %v1088_v57 = vsel %vm817_vm8, %v1076_v45, 0.0  ;;  %v1104_v58 = vmul.f32 %v1074_v27, %v1074_v27  ;;  %v1003_v60 = vadd.f32 %v1002_v42, %v1001_v25  ;;  %v1034_v61 = vadd.f32 %v1033_v43, %v1032_v29  ;;  %v1137_v42 = vld [vmem:[#allocation2 + $0x168] sm:$0xff] }
 0x140   : > { %v1060_v62 = vadd.f32 %v1059_v47, %v1058_v52  ;;  %v1087_v2 = vadd.f32 %v1086_v48, %v1085_v53  ;;  %v916_v3 = vadd.f32 %v915_v24, %v6373_v63  ;;  %v976_v4 = vrot.slane %v975_v38, 1  ;;  %v1133_v63 = vld [vmem:[#allocation2 + $0x148] sm:$0xff] }
 0x141   : > { %v1109_v6 = vsel %vm817_vm8, %v1101_v49, 0.0  ;;  %v1110_v5 = vsel %vm817_vm8, %v1102_v50, 0.0  ;;  %v1112_v11 = vsel %vm817_vm8, %v1103_v54, 0.0  ;;  %v885_v13 = vadd.f32 %v884_v51, %v6378_v9  ;;  %v1138_v49 = vld [vmem:[#allocation2 + $0x170] sm:$0xff] }
 0x142   : > { %v1062_v7 = vadd.f32 %v1061_v56, %v1060_v62  ;;  %v1089_v8 = vadd.f32 %v1088_v57, %v1087_v2  ;;  %v1111_v10 = vadd.f32 %v1110_v5, %v1109_v6  ;;  %v1090_v15 = vsel %vm817_vm8, %v1077_v1, 0.0  ;;  %v1139_v2 = vld [vmem:[#allocation2 + $0x178] sm:$0xff] }
 0x143   : > { %v1105_v16 = vmul.f32 %v1075_v35, %v1075_v35  ;;  %v1114_v17 = vsel %vm817_vm8, %v1104_v58, 0.0  ;;  %v946_v18 = vadd.f32 %v945_v55, %v944_v33  ;;  %v1004_v19 = vrot.slane %v1003_v60, 2  ;;  %v1136_v33 = vld [vmem:[#allocation2 + $0x160] sm:$0xff] }
 0x144   : > { %v1035_v20 = vrot.slane %v1034_v61, 2  ;;  %v1113_v21 = vadd.f32 %v1112_v11, %v1111_v10  ;;  %v917_v23 = vadd.f32 %v916_v3, %v6370_v59  ;;  %v977_v24 = vadd.f32 %v976_v4, %v975_v38 }
 0x145   : > { %v1063_v25 = vrot.slane %v1062_v7, 4  ;;  %v1140_v27 = vsel %vm817_vm8, %v1132_v12, 0.0  ;;  %v1091_v9 = vadd.f32 %v1090_v15, %v1089_v8  ;;  %v1092_v28 = vsel %vm817_vm8, %v1078_v14, 0.0  ;;  %v1194_v15 = vld [vmem:[#allocation2 + $0x188] sm:$0xff] }
 0x146   : > { %v1115_v29 = vadd.f32 %v1114_v17, %v1113_v21  ;;  %v1141_v30 = vsel %vm817_vm8, %v1133_v63, 0.0  ;;  %v1106_v31 = vmul.f32 %v1076_v45, %v1076_v45  ;;  %v1116_v32 = vsel %vm817_vm8, %v1105_v16, 0.0  ;;  %v1195_v16 = vld [vmem:[#allocation2 + $0x190] sm:$0xff] }
 0x147   : > { %v1142_v34 = vadd.f32 %v1141_v30, %v1140_v27  ;;  %v1143_v35 = vsel %vm817_vm8, %v1134_v22, 0.0  ;;  %v947_v36 = vadd.f32 %v946_v18, %v885_v13  ;;  %v1005_v59 = vadd.f32 %v1004_v19, %v1003_v60 }
 0x148   : > { %v1036_v37 = vadd.f32 %v1035_v20, %v1034_v61  ;;  %v1145_v38 = vsel %vm817_vm8, %v1135_v26, 0.0  ;;  %v978_v39 = vadd.f32 %v977_v24, %v917_v23  ;;  %v1064_v40 = vadd.f32 %v1063_v25, %v1062_v7  ;;  %v1196_v24 = vld [vmem:[#allocation2 + $0x198] sm:$0xff] }
 0x149   : > { %v1107_v41 = vmul.f32 %v1077_v1, %v1077_v1  ;;  %v1144_v43 = vadd.f32 %v1143_v35, %v1142_v34  ;;  %v1093_v44 = vadd.f32 %v1092_v28, %v1091_v9  ;;  %v1117_v46 = vadd.f32 %v1116_v32, %v1115_v29 }
 0x14a   : > { %v1147_v45 = vsel %vm817_vm8, %v1136_v33, 0.0  ;;  %v1162_v47 = vmul.f32 %v1132_v12, %v1132_v12  ;;  %v1118_v48 = vsel %vm817_vm8, %v1106_v31, 0.0  ;;  %v1163_v51 = vmul.f32 %v1133_v63, %v1133_v63  ;;  %v1197_v31 = vld [vmem:[#allocation2 + $0x1a0] sm:$0xff] }
 0x14b   : > { %v1146_v50 = vadd.f32 %v1145_v38, %v1144_v43  ;;  %v1164_v52 = vmul.f32 %v1134_v22, %v1134_v22  ;;  %v1006_v53 = vrot.slane %v1005_v59, 1  ;;  %v1037_v54 = vrot.slane %v1036_v37, 1 }
 0x14c   : > { %v1108_v55 = vmul.f32 %v1078_v14, %v1078_v14  ;;  %v1149_v56 = vsel %vm817_vm8, %v1137_v42, 0.0  ;;  %v1065_v57 = vrot.slane %v1064_v40, 2  ;;  %v1120_v58 = vsel %vm817_vm8, %v1107_v41, 0.0  ;;  %v1193_v14 = vld [vmem:[#allocation2 + $0x180] sm:$0xff]  ;;  %v1198_v41 = vld [vmem:[#allocation2 + $0x1a8] sm:$0xff] }
 0x14d   : > { %v1148_v60 = vadd.f32 %v1147_v45, %v1146_v50  ;;  %v1165_v61 = vmul.f32 %v1135_v26, %v1135_v26  ;;  %v1094_v62 = vrot.slane %v1093_v44, 4  ;;  %v1119_v1 = vadd.f32 %v1118_v48, %v1117_v46 }
 0x14e   : > { %v1151_v3 = vsel %vm817_vm8, %v1138_v49, 0.0  ;;  %v1170_v4 = vsel %vm817_vm8, %v1162_v47, 0.0  ;;  %v1166_v5 = vmul.f32 %v1136_v33, %v1136_v33  ;;  %v1171_v7 = vsel %vm817_vm8, %v1163_v51, 0.0 }
 0x14f   : > { %v1150_v6 = vadd.f32 %v1149_v56, %v1148_v60  ;;  %v1173_v8 = vsel %vm817_vm8, %v1164_v52, 0.0  ;;  %v1007_v10 = vadd.f32 %v1006_v53, %v1005_v59  ;;  %v1038_v11 = vadd.f32 %v1037_v54, %v1036_v37  ;;  %v1200_v56 = vld [vmem:[#allocation2 + $0x1b8] sm:$0xff] }
 0x150   : > { %v1122_v12 = vsel %vm817_vm8, %v1108_v55, 0.0  ;;  %v1172_v13 = vadd.f32 %v1171_v7, %v1170_v4  ;;  %v1066_v17 = vadd.f32 %v1065_v57, %v1064_v40  ;;  %v1153_v63 = vsel %vm817_vm8, %v1139_v2, 0.0 }
 0x151   : > { %v1167_v18 = vmul.f32 %v1137_v42, %v1137_v42  ;;  %v1175_v19 = vsel %vm817_vm8, %v1165_v61, 0.0  ;;  %v1095_v20 = vadd.f32 %v1094_v62, %v1093_v44  ;;  %v1121_v21 = vadd.f32 %v1120_v58, %v1119_v1  ;;  %v1199_v44 = vld [vmem:[#allocation2 + $0x1b0] sm:$0xff] }
 0x152   : > { %v1152_v22 = vadd.f32 %v1151_v3, %v1150_v6  ;;  %v1174_v23 = vadd.f32 %v1173_v8, %v1172_v13  ;;  %v1177_v25 = vsel %vm817_vm8, %v1166_v5, 0.0  ;;  %v1201_v26 = vsel %vm817_vm8, %v1193_v14, 0.0  ;;  %v1254_v5 = vld [vmem:[#allocation2 + $0x1c0] sm:$0xff] }
 0x153   : > { %v1202_v27 = vsel %vm817_vm8, %v1194_v15, 0.0  ;;  %v1204_v9 = vsel %vm817_vm8, %v1195_v16, 0.0  ;;  %v6425_v28 = vadd.f32 %v1007_v10, %v947_v36  ;;  %v1168_v29 = vmul.f32 %v1138_v49, %v1138_v49 }
 0x154   : > { %v1176_v30 = vadd.f32 %v1175_v19, %v1174_v23  ;;  %v1203_v32 = vadd.f32 %v1202_v27, %v1201_v26  ;;  %v6427_v33 = vadd.f32 %v1038_v11, %v978_v39  ;;  %v1067_v34 = vrot.slane %v1066_v17, 1 }
 0x155   : > { %v1179_v35 = vsel %vm817_vm8, %v1167_v18, 0.0  ;;  %v1206_v59 = vsel %vm817_vm8, %v1196_v24, 0.0  ;;  %v1123_v37 = vadd.f32 %v1122_v12, %v1121_v21  ;;  %v1154_v38 = vadd.f32 %v1153_v63, %v1152_v22  ;;  %v1255_v12 = vld [vmem:[#allocation2 + $0x1c8] sm:$0xff] }
 0x156   : > { %v1178_v40 = vadd.f32 %v1177_v25, %v1176_v30  ;;  %v1205_v42 = vadd.f32 %v1204_v9, %v1203_v32  ;;  %v1096_v43 = vrot.slane %v1095_v20, 2  ;;  %v1208_v36 = vsel %vm817_vm8, %v1197_v31, 0.0  ;;  %v1258_v9 = vld [vmem:[#allocation2 + $0x1e0] sm:$0xff] }
 0x157   : > { %v1223_v46 = vmul.f32 %v1193_v14, %v1193_v14  ;;  %v1224_v45 = vmul.f32 %v1194_v15, %v1194_v15  ;;  %v1169_v47 = vmul.f32 %v1139_v2, %v1139_v2  ;;  %v1181_v39 = vsel %vm817_vm8, %v1168_v29, 0.0 }
 0x158   : > { %v1180_v48 = vadd.f32 %v1179_v35, %v1178_v40  ;;  %v1207_v49 = vadd.f32 %v1206_v59, %v1205_v42  ;;  %v6433_v50 = vadd.f32 %v1067_v34, %v1066_v17  ;;  %v1210_v51 = vsel %vm817_vm8, %v1198_v41, 0.0  ;;  %v1256_v17 = vld [vmem:[#allocation2 + $0x1d0] sm:$0xff]  ;;  %v1259_v40 = vld [vmem:[#allocation2 + $0x1e8] sm:$0xff] }
 0x159   : > { %v1225_v52 = vmul.f32 %v1195_v16, %v1195_v16  ;;  %v1226_v53 = vmul.f32 %v1196_v24, %v1196_v24  ;;  %v1124_v54 = vrot.slane %v1123_v37, 4  ;;  %v1155_v55 = vrot.slane %v1154_v38, 4 }
 0x15a   : > { %v1209_v57 = vadd.f32 %v1208_v36, %v1207_v49  ;;  %v1212_v58 = vsel %vm817_vm8, %v1199_v44, 0.0  ;;  %v1182_v60 = vadd.f32 %v1181_v39, %v1180_v48  ;;  %v1227_v61 = vmul.f32 %v1197_v31, %v1197_v31 }
 0x15b   : > { %v1231_v62 = vsel %vm817_vm8, %v1223_v46, 0.0  ;;  %v1232_v1 = vsel %vm817_vm8, %v1224_v45, 0.0  ;;  %v1097_v2 = vadd.f32 %v1096_v43, %v1095_v20  ;;  %v1183_v3 = vsel %vm817_vm8, %v1169_v47, 0.0  ;;  %v1257_v20 = vld [vmem:[#allocation2 + $0x1d8] sm:$0xff]  ;;  %v1260_v45 = vld [vmem:[#allocation2 + $0x1f0] sm:$0xff] }
 0x15c   : > { %v1211_v4 = vadd.f32 %v1210_v51, %v1209_v57  ;;  %v1233_v6 = vadd.f32 %v1232_v1, %v1231_v62  ;;  %v1214_v7 = vsel %vm817_vm8, %v1200_v56, 0.0  ;;  %v1228_v8 = vmul.f32 %v1198_v41, %v1198_v41 }
 0x15d   : > { %v1234_v10 = vsel %vm817_vm8, %v1225_v52, 0.0  ;;  %v1236_v11 = vsel %vm817_vm8, %v1226_v53, 0.0  ;;  %v1125_v13 = vadd.f32 %v1124_v54, %v1123_v37  ;;  %v1156_v14 = vadd.f32 %v1155_v55, %v1154_v38 }
 0x15e   : > { %v1213_v15 = vadd.f32 %v1212_v58, %v1211_v4  ;;  %v1235_v16 = vadd.f32 %v1234_v10, %v1233_v6  ;;  %v1184_v63 = vadd.f32 %v1183_v3, %v1182_v60  ;;  %v1229_v18 = vmul.f32 %v1199_v44, %v1199_v44 }
 0x15f   : > { %v1238_v19 = vsel %vm817_vm8, %v1227_v61, 0.0  ;;  %v1262_v21 = vsel %vm817_vm8, %v1254_v5, 0.0  ;;  %v1098_v22 = vrot.slane %v1097_v2, 1  ;;  %v1263_v25 = vsel %vm817_vm8, %v1255_v12, 0.0 }
 0x160   : > { %v1215_v23 = vadd.f32 %v1214_v7, %v1213_v15  ;;  %v1237_v24 = vadd.f32 %v1236_v11, %v1235_v16  ;;  %v1230_v26 = vmul.f32 %v1200_v56, %v1200_v56  ;;  %v1240_v27 = vsel %vm817_vm8, %v1228_v8, 0.0  ;;  %v1261_v56 = vld [vmem:[#allocation2 + $0x1f8] sm:$0xff]  ;;  %v4822_v11 = vld [vmem:[%s8130_s27 + $0x60] sm:$0xff] }
 0x161   : > { %v1264_v29 = vadd.f32 %v1263_v25, %v1262_v21  ;;  %v1265_v30 = vsel %vm817_vm8, %v1256_v17, 0.0  ;;  %v1157_v31 = vrot.slane %v1156_v14, 2  ;;  %v1267_v35 = vsel %vm817_vm8, %v1257_v20, 0.0  ;;  %v4825_v21 = vld [vmem:[%s8130_s27 + $0x78] sm:$0xff] }
 0x162   : > { %v1216_v32 = vrot.slane %v1215_v23, 4  ;;  %v1239_v34 = vadd.f32 %v1238_v19, %v1237_v24  ;;  %v1126_v59 = vrot.slane %v1125_v13, 2  ;;  %v1185_v37 = vrot.slane %v1184_v63, 4 }
 0x163   : > { %v1242_v38 = vsel %vm817_vm8, %v1229_v18, 0.0  ;;  %v1266_v41 = vadd.f32 %v1265_v30, %v1264_v29  ;;  %v1269_v44 = vsel %vm817_vm8, %v1258_v9, 0.0  ;;  %v1284_v36 = vmul.f32 %v1254_v5, %v1254_v5 }
 0x164   : > { %v1217_v42 = vadd.f32 %v1216_v32, %v1215_v23  ;;  %v1241_v43 = vadd.f32 %v1240_v27, %v1239_v34  ;;  %v1244_v46 = vsel %vm817_vm8, %v1230_v26, 0.0  ;;  %v1285_v48 = vmul.f32 %v1255_v12, %v1255_v12  ;;  %v4823_v12 = vld [vmem:[%s8130_s27 + $0x68] sm:$0xff] }
 0x165   : > { %v1268_v47 = vadd.f32 %v1267_v35, %v1266_v41  ;;  %v1286_v39 = vmul.f32 %v1256_v17, %v1256_v17  ;;  %v1099_v49 = vadd.f32 %v1098_v22, %v1097_v2  ;;  %v1158_v51 = vadd.f32 %v1157_v31, %v1156_v14 }
 0x166   : > { %v1243_v52 = vadd.f32 %v1242_v38, %v1241_v43  ;;  %v1271_v53 = vsel %vm817_vm8, %v1259_v40, 0.0  ;;  %v1127_v54 = vadd.f32 %v1126_v59, %v1125_v13  ;;  %v1186_v55 = vadd.f32 %v1185_v37, %v1184_v63 }
 0x167   : > { %v1270_v57 = vadd.f32 %v1269_v44, %v1268_v47  ;;  %v1287_v58 = vmul.f32 %v1257_v20, %v1257_v20  ;;  %v1218_v60 = vrot.slane %v1217_v42, 2  ;;  %v1273_v62 = vsel %vm817_vm8, %v1260_v45, 0.0  ;;  %v4824_v20 = vld [vmem:[%s8130_s27 + $0x70] sm:$0xff] }
 0x168   : > { %v1245_v61 = vadd.f32 %v1244_v46, %v1243_v52  ;;  %v1292_v1 = vsel %vm817_vm8, %v1284_v36, 0.0  ;;  %v1288_v4 = vmul.f32 %v1258_v9, %v1258_v9  ;;  %v1293_v6 = vsel %vm817_vm8, %v1285_v48, 0.0 }
 0x169   : > { %v1272_v3 = vadd.f32 %v1271_v53, %v1270_v57  ;;  %v1295_v2 = vsel %vm817_vm8, %v1286_v39, 0.0  ;;  %v1159_v5 = vrot.slane %v1158_v51, 1  ;;  %v1275_v8 = vsel %vm817_vm8, %v1261_v56, 0.0  ;;  %v4828_v53 = vld [vmem:[%s8130_s27 + $0x90] sm:$0xff] }
 0x16a   : > { %v1246_v7 = vrot.slane %v1245_v61, 4  ;;  %v1294_v10 = vadd.f32 %v1293_v6, %v1292_v1  ;;  %v1187_v13 = vrot.slane %v1186_v55, 2  ;;  %v1289_v15 = vmul.f32 %v1259_v40, %v1259_v40  ;;  %v4827_v40 = vld [vmem:[%s8130_s27 + $0x88] sm:$0xff] }
 0x16b   : > { %v1274_v14 = vadd.f32 %v1273_v62, %v1272_v3  ;;  %v1297_v16 = vsel %vm817_vm8, %v1287_v58, 0.0  ;;  %v1219_v17 = vadd.f32 %v1218_v60, %v1217_v42  ;;  %v1290_v18 = vmul.f32 %v1260_v45, %v1260_v45 }
 0x16c   : > { %v1247_v63 = vadd.f32 %v1246_v7, %v1245_v61  ;;  %v1296_v19 = vadd.f32 %v1295_v2, %v1294_v10  ;;  %v1299_v23 = vsel %vm817_vm8, %v1288_v4, 0.0  ;;  %v5583_v24 = vpack.c.bf16 %v4823_v12, %v4822_v11 }
 0x16d   : > { %v1276_v22 = vadd.f32 %v1275_v8, %v1274_v14  ;;  %v1100_v25 = vadd.f32 %v1099_v49, %v6427_v33  ;;  %v1128_v26 = vrot.slane %v1127_v54, 1  ;;  %v1160_v27 = vadd.f32 %v1159_v5, %v1158_v51  ;;  %v4826_v33 = vld [vmem:[%s8130_s27 + $0x80] sm:$0xff] }
 0x16e   : > { %v1298_v9 = vadd.f32 %v1297_v16, %v1296_v19  ;;  %v6066_v29 = vmov 0.0|0.0   ;;  %v1291_v31 = vmul.f32 %v1261_v56, %v1261_v56  ;;  %v1301_v32 = vsel %vm817_vm8, %v1289_v15, 0.0  ;;  %v1318_v19 = vld [vmem:[%s8131_s30] sm:$0x1] }
 0x16f   : > { %5582 = vmatprep.subr.bf16.mxu0 %v6066_v29  ;;  %5636 = vmatprep.subr.bf16.mxu1 %v6066_v29  ;;  %v1277_v30 = vrot.slane %v1276_v22, 4  ;;  %v5586_v34 = vpack.c.bf16 %v4825_v21, %v4824_v20  ;;  %v1188_v35 = vadd.f32 %v1187_v13, %v1186_v55  ;;  %v1220_v59 = vrot.slane %v1219_v17, 1 }
 0x170   : > { %5584 = vmatpush3.bf16.msra.mxu0 %v5583_v24  ;;  %v1248_v37 = vrot.slane %v1247_v63, 2  ;;  %v1300_v38 = vadd.f32 %v1299_v23, %v1298_v9  ;;  %v1303_v42 = vsel %vm817_vm8, %v1290_v18, 0.0  ;;  %v1069_v43 = vadd.f32 %v6433_v50, %v6425_v28  ;;  %v4829_v28 = vld [vmem:[%s8130_s27 + $0x98] sm:$0xff]  ;;  %v1322_v23 = vld [vmem:[%s8131_s30 + $0x1] sm:$0x1] }
 0x171   : > { %5585 = vmatprep.subr.bf16.mxu0 %v6066_v29  ;;  %v1278_v41 = vadd.f32 %v1277_v30, %v1276_v22  ;;  %v1129_v44 = vadd.f32 %v1128_v26, %v1127_v54  ;;  %v1161_v46 = vadd.f32 %v1160_v27, %v1100_v25  ;;  %v1305_v47 = vsel %vm817_vm8, %v1291_v31, 0.0  ;;  %v1325_v24 = vld [vmem:[#allocation2] ss:$2 sm:$0xff]  ;;  %v1373_v25 = vld [vmem:[#allocation2 + $0x1] ss:$2 sm:$0xff] }
 0x172   : > { %v1302_v36 = vadd.f32 %v1301_v32, %v1300_v38  ;;  %v5589_v48 = vpack.c.bf16 %v4827_v40, %v4826_v33  ;;  %v1189_v39 = vrot.slane %v1188_v35, 1  ;;  %v1221_v49 = vadd.f32 %v1220_v59, %v1219_v17  ;;  %v1421_v26 = vld [vmem:[#allocation2 + $0x10] ss:$2 sm:$0xff]  ;;  %v1469_v27 = vld [vmem:[#allocation2 + $0x11] ss:$2 sm:$0xff] }
 0x173   : > { %v1279_v45 = vrot.slane %v1278_v41, 2  ;;  %v1249_v51 = vadd.f32 %v1248_v37, %v1247_v63  ;;  %v1130_v55 = vadd.f32 %v1129_v44, %v1069_v43  ;;  %v5592_v57 = vpack.c.bf16 %v4829_v28, %v4828_v53  ;;  %v1327_v9 = vld [vmem:[#allocation2 + $0x20] ss:$2 sm:$0xff]  ;;  %v1375_v32 = vld [vmem:[#allocation2 + $0x21] ss:$2 sm:$0xff] }
 0x174   : > { %5587 = vmatpush3.bf16.msra.mxu0 %v5586_v34  ;;  %v1304_v52 = vadd.f32 %v1303_v42, %v1302_v36  ;;  %v1190_v58 = vadd.f32 %v1189_v39, %v1188_v35  ;;  %v1222_v60 = vadd.f32 %v1221_v49, %v1161_v46  ;;  %v1340_v63 = vlaneseq  ;;  %v1423_v34 = vld [vmem:[#allocation2 + $0x30] ss:$2 sm:$0xff]  ;;  %v1471_v35 = vld [vmem:[#allocation2 + $0x31] ss:$2 sm:$0xff]  ;;  %v1329_v59 = vld [vmem:[#allocation2 + $0x40] ss:$2 sm:$0xff] }
 0x175   : > { %5588 = vmatprep.subr.bf16.mxu0 %v6066_v29  ;;  %v1280_v50 = vadd.f32 %v1279_v45, %v1278_v41  ;;  %v1250_v61 = vrot.slane %v1249_v51, 1  ;;  %v1377_v37 = vld [vmem:[#allocation2 + $0x41] ss:$2 sm:$0xff]  ;;  %v1425_v38 = vld [vmem:[#allocation2 + $0x50] ss:$2 sm:$0xff] }
 0x176   : > { %v1306_v54 = vadd.f32 %v1305_v47, %v1304_v52  ;;  %v1191_v4 = vadd.f32 %v1190_v58, %v1130_v55  ;;  %v6496_v18 = vshrl.u32 %v1340_v63, 7  ;;  %v1473_v43 = vld [vmem:[#allocation2 + $0x51] ss:$2 sm:$0xff]  ;;  %v1331_v44 = vld [vmem:[#allocation2 + $0x60] ss:$2 sm:$0xff] }
 0x177   : > { %v1281_v56 = vrot.slane %v1280_v50, 1  ;;  %v1251_v6 = vadd.f32 %v1250_v61, %v1249_v51  ;;  %v1379_v36 = vld [vmem:[#allocation2 + $0x61] ss:$2 sm:$0xff] }
 0x178   : > { %5590 = vmatpush3.bf16.msra.mxu0 %v5589_v48  ;;  %v1307_v62 = vrot.slane %v1306_v54, 4  ;;  %v6502_v20 = vsub.s32 0, %v6496_v18 }
 0x179   : > { %5591 = vmatprep.subr.bf16.mxu0 %v6066_v29  ;;  %v1282_v1 = vadd.f32 %v1281_v56, %v1280_v50  ;;  %v1252_v8 = vadd.f32 %v1251_v6, %v1191_v4 }
 0x17a   : > { %v1308_v3 = vadd.f32 %v1307_v62, %v1306_v54 }
 0x17b   : > { %v1283_v2 = vadd.f32 %v1282_v1, %v1222_v60 }
 0x17c   : > { %5593 = vmatpush3.bf16.msra.mxu0 %v5592_v57  ;;  %v1309_v5 = vrot.slane %v1308_v3, 2 }
 0x17d   : > { %5594 = vmatprep.subr.bf16.mxu0 %v6066_v29  ;;  %v1314_v11 = vmul.f32 0.001953125, %v1283_v2 }
 0x17e   : > { %v1310_v7 = vadd.f32 %v1309_v5, %v1308_v3 }
 0x17f   : > { %v1316_v14 = vmul.f32 %v1314_v11, %v1314_v11 }
 0x180   : > { %v1311_v10 = vrot.slane %v1310_v7, 1 }
 0x182   : > { %v1312_v12 = vadd.f32 %v1311_v10, %v1310_v7 }
 0x184   : > { %v1313_v13 = vadd.f32 %v1312_v12, %v1252_v8 }
 0x186   : > { %v1315_v15 = vmul.f32 0.001953125, %v1313_v13 }
 0x188   : > { %v1317_v16 = vsub.f32 %v1315_v15, %v1316_v14 }
 0x18a   : > { %v1319_v17 = vadd.f32 1e-05, %v1317_v16 }
 0x18c   : > { %6032 = vrsqrt.f32 %v1319_v17 }
 0x196   : > { %v6033_v21 = vpop.eup %6032 }
 0x197   : > { %v1321_v22 = vmul.f32 %v6033_v21, %v1318_v19  ;;  %v1427_v19 = vld [vmem:[#allocation2 + $0x70] ss:$2 sm:$0xff]  ;;  %v1475_v21 = vld [vmem:[#allocation2 + $0x71] ss:$2 sm:$0xff] }
 0x199   : > { %v1323_v30 = vmul.f32 %v1321_v22, %v1314_v11  ;;  %v6508_v31 = vrot.slane %v1321_v22, %v6502_v20  ;;  %v1333_v22 = vld [vmem:[#allocation2 + $0x80] ss:$2 sm:$0xff] }
 0x19b   : > { %v1324_v33 = vsub.f32 %v1322_v23, %v1323_v30  ;;  %v1344_v40 = vmul.f32 %v6508_v31, %v1325_v24  ;;  %v1388_v41 = vmul.f32 %v1373_v25, %v6508_v31  ;;  %v1436_v42 = vmul.f32 %v1421_v26, %v6508_v31 }
 0x19c   : > { %v1484_v46 = vmul.f32 %v1469_v27, %v6508_v31  ;;  %v1345_v45 = vmul.f32 %v6508_v31, %v1327_v9  ;;  %v1389_v47 = vmul.f32 %v1375_v32, %v6508_v31  ;;  %v1437_v48 = vmul.f32 %v1423_v34, %v6508_v31  ;;  %v1381_v27 = vld [vmem:[#allocation2 + $0x81] ss:$2 sm:$0xff] }
 0x19d   : > { %v6518_v39 = vrot.slane %v1324_v33, %v6502_v20  ;;  %v1485_v49 = vmul.f32 %v1471_v35, %v6508_v31  ;;  %v1346_v51 = vmul.f32 %v6508_v31, %v1329_v59  ;;  %v1390_v52 = vmul.f32 %v1377_v37, %v6508_v31  ;;  %v1429_v35 = vld [vmem:[#allocation2 + $0x90] ss:$2 sm:$0xff] }
 0x19e   : > { %v1438_v53 = vmul.f32 %v1425_v38, %v6508_v31  ;;  %v1486_v28 = vmul.f32 %v1473_v43, %v6508_v31  ;;  %v1347_v50 = vmul.f32 %v6508_v31, %v1331_v44  ;;  %v1391_v54 = vmul.f32 %v1379_v36, %v6508_v31 }
 0x19f   : > { %v1356_v55 = vadd.f32 %v6518_v39, %v1344_v40  ;;  %v1396_v56 = vadd.f32 %v1388_v41, %v6518_v39  ;;  %v1444_v57 = vadd.f32 %v1436_v42, %v6518_v39  ;;  %v1492_v58 = vadd.f32 %v1484_v46, %v6518_v39  ;;  %v1477_v40 = vld [vmem:[#allocation2 + $0x91] ss:$2 sm:$0xff]  ;;  %v1335_v41 = vld [vmem:[#allocation2 + $0xa0] ss:$2 sm:$0xff] }
 0x1a0   : > { %v1357_v60 = vadd.f32 %v6518_v39, %v1345_v45  ;;  %v1397_v61 = vadd.f32 %v1389_v47, %v6518_v39  ;;  %v1445_v62 = vadd.f32 %v1437_v48, %v6518_v39  ;;  %v1493_v1 = vadd.f32 %v1485_v49, %v6518_v39 }
 0x1a1   : > { %v1364_v3 = vmax.f32 %v1356_v55, 0.0  ;;  %v1404_v4 = vmax.f32 %v1396_v56, 0.0  ;;  %v1452_v6 = vmax.f32 %v1444_v57, 0.0  ;;  %v1500_v2 = vmax.f32 %v1492_v58, 0.0  ;;  %v1479_v58 = vld [vmem:[#allocation2 + $0xb1] ss:$2 sm:$0xff] }
 0x1a2   : > { %v1365_v5 = vmax.f32 %v1357_v60, 0.0  ;;  %v1405_v7 = vmax.f32 %v1397_v61, 0.0  ;;  %v1453_v8 = vmax.f32 %v1445_v62, 0.0  ;;  %v1501_v10 = vmax.f32 %v1493_v1, 0.0 }
 0x1a3   : > { %v1412_v11 = vmax.f32 %v1364_v3, %v1404_v4  ;;  %v1358_v12 = vadd.f32 %v6518_v39, %v1346_v51  ;;  %v1398_v13 = vadd.f32 %v1390_v52, %v6518_v39  ;;  %v1446_v14 = vadd.f32 %v1438_v53, %v6518_v39  ;;  %v1337_v3 = vld [vmem:[#allocation2 + $0xc0] ss:$2 sm:$0xff] }
 0x1a4   : > { %v1413_v15 = vmax.f32 %v1365_v5, %v1405_v7  ;;  %v1494_v16 = vadd.f32 %v1486_v28, %v6518_v39  ;;  %v1359_v17 = vadd.f32 %v6518_v39, %v1347_v50  ;;  %v1399_v63 = vadd.f32 %v1391_v54, %v6518_v39  ;;  %v1383_v28 = vld [vmem:[#allocation2 + $0xa1] ss:$2 sm:$0xff]  ;;  %v1431_v50 = vld [vmem:[#allocation2 + $0xb0] ss:$2 sm:$0xff] }
 0x1a5   : > { %v1460_v23 = vmax.f32 %v1412_v11, %v1452_v6  ;;  %v1366_v24 = vmax.f32 %v1358_v12, 0.0  ;;  %v1406_v25 = vmax.f32 %v1398_v13, 0.0  ;;  %v1454_v26 = vmax.f32 %v1446_v14, 0.0  ;;  %v1385_v7 = vld [vmem:[#allocation2 + $0xc1] ss:$2 sm:$0xff] }
 0x1a6   : > { %v1461_v9 = vmax.f32 %v1413_v15, %v1453_v8  ;;  %v1502_v30 = vmax.f32 %v1494_v16, 0.0  ;;  %v1367_v32 = vmax.f32 %v1359_v17, 0.0  ;;  %v1407_v34 = vmax.f32 %v1399_v63, 0.0  ;;  %v1433_v8 = vld [vmem:[#allocation2 + $0xd0] ss:$2 sm:$0xff] }
 0x1a7   : > { %v1508_v59 = vmax.f32 %v1460_v23, %v1500_v2  ;;  %v1414_v37 = vmax.f32 %v1366_v24, %v1406_v25  ;;  %v1439_v38 = vmul.f32 %v1427_v19, %v6508_v31  ;;  %v1487_v33 = vmul.f32 %v1475_v21, %v6508_v31  ;;  %v1481_v14 = vld [vmem:[#allocation2 + $0xd1] ss:$2 sm:$0xff]  ;;  %v1339_v24 = vld [vmem:[#allocation2 + $0xe0] ss:$2 sm:$0xff] }
 0x1a8   : > { %v1509_v42 = vmax.f32 %v1461_v9, %v1501_v10  ;;  %v1415_v43 = vmax.f32 %v1367_v32, %v1407_v34  ;;  %v1348_v44 = vmul.f32 %v6508_v31, %v1333_v22  ;;  %v1392_v36 = vmul.f32 %v1381_v27, %v6508_v31  ;;  %v1435_v32 = vld [vmem:[#allocation2 + $0xf0] ss:$2 sm:$0xff] }
 0x1a9   : > { %1523 = vrot.lane.b32.xlu0 %v1508_v59, %s6067_s3  ;;  %1516 = vst.msk [vmem:[#allocation3 + $0x16] sm:$0xff] %vm817_vm8, %v1508_v59  ;;  %v1462_v46 = vmax.f32 %v1414_v37, %v1454_v26  ;;  %v1447_v45 = vadd.f32 %v1439_v38, %v6518_v39  ;;  %v1495_v47 = vadd.f32 %v1487_v33, %v6518_v39  ;;  %v1483_v38 = vld [vmem:[#allocation2 + $0xf1] ss:$2 sm:$0xff] }
 0x1aa   : > { %v1440_v48 = vmul.f32 %v1429_v35, %v6508_v31  ;;  %1534 = vrot.lane.b32.xlu1 %v1509_v42, %s6067_s3  ;;  %1528 = vst.msk [vmem:[#allocation3 + $0x20] sm:$0xff] %vm817_vm8, %v1509_v42  ;;  %v1360_v49 = vadd.f32 %v6518_v39, %v1348_v44  ;;  %v1400_v51 = vadd.f32 %v1392_v36, %v6518_v39 }
 0x1ab   : > { %v1488_v52 = vmul.f32 %v1477_v40, %v6508_v31  ;;  %v1349_v53 = vmul.f32 %v6508_v31, %v1335_v41  ;;  %v1510_v54 = vmax.f32 %v1462_v46, %v1502_v30  ;;  %v1455_v55 = vmax.f32 %v1447_v45, 0.0  ;;  %v1387_v30 = vld [vmem:[#allocation2 + $0xe1] ss:$2 sm:$0xff] }
 0x1ac   : > { %v1503_v56 = vmax.f32 %v1495_v47, 0.0  ;;  %v1448_v57 = vadd.f32 %v1440_v48, %v6518_v39  ;;  %v1368_v60 = vmax.f32 %v1360_v49, 0.0  ;;  %v1408_v61 = vmax.f32 %v1400_v51, 0.0  ;;  %v1639_v47 = vld [vmem:[#allocation2 + $0x101] ss:$2 sm:$0xff] }
 0x1ad   : > { %v1496_v62 = vadd.f32 %v1488_v52, %v6518_v39  ;;  %v1361_v1 = vadd.f32 %v6518_v39, %v1349_v53  ;;  %1518 = vrot.lane.b32.xlu0 %v1508_v59, %s6068_s0  ;;  %1538 = vst.msk [vmem:[#allocation3 + $0x2a] sm:$0xff] %vm817_vm8, %v1510_v54  ;;  %v1463_v4 = vmax.f32 %v1415_v43, %v1455_v55  ;;  %v1599_v43 = vld [vmem:[#allocation2 + $0x100] ss:$2 sm:$0xff]  ;;  %v1687_v55 = vld [vmem:[#allocation2 + $0x110] ss:$2 sm:$0xff] }
 0x1ae   : > { %v1456_v6 = vmax.f32 %v1448_v57, 0.0  ;;  %v1393_v2 = vmul.f32 %v1383_v28, %v6508_v31  ;;  %v1441_v5 = vmul.f32 %v1431_v50, %v6508_v31  ;;  %1530 = vrot.lane.b32.xlu1 %v1509_v42, %s6068_s0  ;;  %v1416_v10 = vmax.f32 %v1368_v60, %v1408_v61 }
 0x1af   : > { %v1504_v11 = vmax.f32 %v1496_v62, 0.0  ;;  %v1369_v12 = vmax.f32 %v1361_v1, 0.0  ;;  %v1489_v13 = vmul.f32 %v1479_v58, %v6508_v31  ;;  %v1511_v15 = vmax.f32 %v1463_v4, %v1503_v56  ;;  %v1735_v56 = vld [vmem:[#allocation2 + $0x111] ss:$2 sm:$0xff]  ;;  %v1601_v62 = vld [vmem:[#allocation2 + $0x120] ss:$2 sm:$0xff] }
 0x1b0   : > { %v1401_v16 = vadd.f32 %v1393_v2, %v6518_v39  ;;  %v1449_v17 = vadd.f32 %v1441_v5, %v6518_v39  ;;  %v1350_v63 = vmul.f32 %v6508_v31, %v1337_v3  ;;  %v1464_v19 = vmax.f32 %v1416_v10, %v1456_v6  ;;  %v1641_v2 = vld [vmem:[#allocation2 + $0x121] ss:$2 sm:$0xff] }
 0x1b1   : > { %v1497_v21 = vadd.f32 %v1489_v13, %v6518_v39  ;;  %v1394_v22 = vmul.f32 %v1385_v7, %v6508_v31  ;;  %v1442_v23 = vmul.f32 %v1433_v8, %v6508_v31  ;;  %1544 = vrot.lane.b32.xlu0 %v1510_v54, %s6067_s3  ;;  %1548 = vst.msk [vmem:[#allocation3 + $0x34] sm:$0xff] %vm817_vm8, %v1511_v15 }
 0x1b2   : > { %v1409_v25 = vmax.f32 %v1401_v16, 0.0  ;;  %v1457_v26 = vmax.f32 %v1449_v17, 0.0  ;;  %v1362_v27 = vadd.f32 %v6518_v39, %v1350_v63  ;;  %v1490_v9 = vmul.f32 %v1481_v14, %v6508_v31  ;;  %1540 = vrot.lane.b32.xlu1 %v1510_v54, %s6068_s0 }
 0x1b3   : > { %v1512_v34 = vmax.f32 %v1464_v19, %v1504_v11  ;;  %v1505_v35 = vmax.f32 %v1497_v21, 0.0  ;;  %v1402_v59 = vadd.f32 %v1394_v22, %v6518_v39  ;;  %v1450_v37 = vadd.f32 %v1442_v23, %v6518_v39  ;;  %v1689_v11 = vld [vmem:[#allocation2 + $0x130] ss:$2 sm:$0xff] }
 0x1b4   : > { %v1417_v33 = vmax.f32 %v1369_v12, %v1409_v25  ;;  %v1370_v40 = vmax.f32 %v1362_v27, 0.0  ;;  %v1498_v41 = vadd.f32 %v1490_v9, %v6518_v39  ;;  %v1351_v42 = vmul.f32 %v6508_v31, %v1339_v24  ;;  %v1737_v12 = vld [vmem:[#allocation2 + $0x131] ss:$2 sm:$0xff]  ;;  %v1643_v27 = vld [vmem:[#allocation2 + $0x141] ss:$2 sm:$0xff] }
 0x1b5   : > { %1558 = vst.msk [vmem:[#allocation3 + $0x3e] sm:$0xff] %vm817_vm8, %v1512_v34  ;;  %v1410_v44 = vmax.f32 %v1402_v59, 0.0  ;;  %v1458_v36 = vmax.f32 %v1450_v37, 0.0  ;;  %v1395_v46 = vmul.f32 %v1387_v30, %v6508_v31  ;;  %v1443_v45 = vmul.f32 %v1435_v32, %v6508_v31  ;;  %1554 = vrot.lane.b32.xlu0 %v1511_v15, %s6067_s3  ;;  %v1739_v59 = vld [vmem:[#allocation2 + $0x151] ss:$2 sm:$0xff] }
 0x1b6   : > { %v1465_v48 = vmax.f32 %v1417_v33, %v1457_v26  ;;  %v1506_v49 = vmax.f32 %v1498_v41, 0.0  ;;  %v1363_v51 = vadd.f32 %v6518_v39, %v1351_v42  ;;  %v1491_v52 = vmul.f32 %v1483_v38, %v6508_v31  ;;  %1550 = vrot.lane.b32.xlu1 %v1511_v15, %s6068_s0  ;;  %v1603_v26 = vld [vmem:[#allocation2 + $0x140] ss:$2 sm:$0xff] }
 0x1b7   : > { %v1418_v53 = vmax.f32 %v1370_v40, %v1410_v44  ;;  %v1403_v28 = vadd.f32 %v1395_v46, %v6518_v39  ;;  %v1451_v50 = vadd.f32 %v1443_v45, %v6518_v39  ;;  %v1614_v54 = vmul.f32 %v1599_v43, %v6508_v31  ;;  %v1645_v46 = vld [vmem:[#allocation2 + $0x161] ss:$2 sm:$0xff] }
 0x1b8   : > { %v1513_v57 = vmax.f32 %v1465_v48, %v1505_v35  ;;  %v1371_v58 = vmax.f32 %v1363_v51, 0.0  ;;  %v1499_v60 = vadd.f32 %v1491_v52, %v6518_v39  ;;  %v1654_v61 = vmul.f32 %v1639_v47, %v6508_v31  ;;  %v1691_v35 = vld [vmem:[#allocation2 + $0x150] ss:$2 sm:$0xff] }
 0x1b9   : > { %v1466_v1 = vmax.f32 %v1418_v53, %v1458_v36  ;;  %v1411_v3 = vmax.f32 %v1403_v28, 0.0  ;;  %v1459_v4 = vmax.f32 %v1451_v50, 0.0  ;;  %v1622_v6 = vadd.f32 %v1614_v54, %v6518_v39  ;;  %1564 = vrot.lane.b32.xlu0 %v1512_v34, %s6067_s3  ;;  %v1605_v36 = vld [vmem:[#allocation2 + $0x160] ss:$2 sm:$0xff]  ;;  %v1693_v51 = vld [vmem:[#allocation2 + $0x170] ss:$2 sm:$0xff] }
 0x1ba   : > { %1568 = vst.msk [vmem:[#allocation3 + $0x48] sm:$0xff] %vm817_vm8, %v1513_v57  ;;  %v1507_v5 = vmax.f32 %v1499_v60, 0.0  ;;  %v1662_v7 = vadd.f32 %v1654_v61, %v6518_v39  ;;  %v1702_v8 = vmul.f32 %v1687_v55, %v6508_v31  ;;  %v1750_v10 = vmul.f32 %v1735_v56, %v6508_v31  ;;  %1560 = vrot.lane.b32.xlu1 %v1512_v34, %s6068_s0 }
 0x1bb   : > { %v1514_v13 = vmax.f32 %v1466_v1, %v1506_v49  ;;  %v1419_v14 = vmax.f32 %v1371_v58, %v1411_v3  ;;  %v1630_v15 = vmax.f32 %v1622_v6, 0.0  ;;  %v1615_v16 = vmul.f32 %v1601_v62, %v6508_v31  ;;  %v1741_v58 = vld [vmem:[#allocation2 + $0x171] ss:$2 sm:$0xff]  ;;  %v1607_v3 = vld [vmem:[#allocation2 + $0x180] ss:$2 sm:$0xff] }
 0x1bc   : > { %v1670_v17 = vmax.f32 %v1662_v7, 0.0  ;;  %v1710_v63 = vadd.f32 %v1702_v8, %v6518_v39  ;;  %v1758_v19 = vadd.f32 %v1750_v10, %v6518_v39  ;;  %v1655_v21 = vmul.f32 %v1641_v2, %v6508_v31  ;;  %v1695_v8 = vld [vmem:[#allocation2 + $0x190] ss:$2 sm:$0xff] }
 0x1bd   : > { %1578 = vst.msk [vmem:[#allocation3 + $0x52] sm:$0xff] %vm817_vm8, %v1514_v13  ;;  %v1467_v22 = vmax.f32 %v1419_v14, %v1459_v4  ;;  %v1623_v23 = vadd.f32 %v1615_v16, %v6518_v39  ;;  %v1703_v24 = vmul.f32 %v1689_v11, %v6508_v31  ;;  %v1751_v25 = vmul.f32 %v1737_v12, %v6508_v31  ;;  %v1647_v4 = vld [vmem:[#allocation2 + $0x181] ss:$2 sm:$0xff]  ;;  %v1743_v14 = vld [vmem:[#allocation2 + $0x191] ss:$2 sm:$0xff] }
 0x1be   : > { %1574 = vrot.lane.b32.xlu0 %v1513_v57, %s6067_s3  ;;  %v1678_v9 = vmax.f32 %v1630_v15, %v1670_v17  ;;  %v1718_v30 = vmax.f32 %v1710_v63, 0.0  ;;  %v1766_v32 = vmax.f32 %v1758_v19, 0.0  ;;  %v1663_v34 = vadd.f32 %v1655_v21, %v6518_v39  ;;  %1570 = vrot.lane.b32.xlu1 %v1513_v57, %s6068_s0  ;;  %v1609_v19 = vld [vmem:[#allocation2 + $0x1a0] ss:$2 sm:$0xff] }
 0x1bf   : > { %v1515_v37 = vmax.f32 %v1467_v22, %v1507_v5  ;;  %v1631_v38 = vmax.f32 %v1623_v23, 0.0  ;;  %v1711_v33 = vadd.f32 %v1703_v24, %v6518_v39  ;;  %v1759_v40 = vadd.f32 %v1751_v25, %v6518_v39 }
 0x1c0   : > { %v1726_v41 = vmax.f32 %v1678_v9, %v1718_v30  ;;  %v1671_v42 = vmax.f32 %v1663_v34, 0.0  ;;  %v1616_v43 = vmul.f32 %v1603_v26, %v6508_v31  ;;  %v1656_v44 = vmul.f32 %v1643_v27, %v6508_v31  ;;  %v1649_v30 = vld [vmem:[#allocation2 + $0x1a1] ss:$2 sm:$0xff] }
 0x1c1   : > { %1588 = vst.msk [vmem:[#allocation3 + $0x5c] sm:$0xff] %vm817_vm8, %v1515_v37  ;;  %v1719_v45 = vmax.f32 %v1711_v33, 0.0  ;;  %v1767_v47 = vmax.f32 %v1759_v40, 0.0  ;;  %v1704_v48 = vmul.f32 %v1691_v35, %v6508_v31  ;;  %v1752_v49 = vmul.f32 %v1739_v59, %v6508_v31 }
 0x1c2   : > { %1584 = vrot.lane.b32.xlu0 %v1514_v13, %s6067_s3  ;;  %v1774_v52 = vmax.f32 %v1726_v41, %v1766_v32  ;;  %v1679_v53 = vmax.f32 %v1631_v38, %v1671_v42  ;;  %v1624_v28 = vadd.f32 %v1616_v43, %v6518_v39  ;;  %v1664_v50 = vadd.f32 %v1656_v44, %v6518_v39  ;;  %v1697_v32 = vld [vmem:[#allocation2 + $0x1b0] ss:$2 sm:$0xff]  ;;  %v1745_v38 = vld [vmem:[#allocation2 + $0x1b1] ss:$2 sm:$0xff]  ;;  %v1611_v43 = vld [vmem:[#allocation2 + $0x1c0] ss:$2 sm:$0xff] }
 0x1c3   : > { %1580 = vrot.lane.b32.xlu1 %v1514_v13, %s6068_s0  ;;  %v1712_v54 = vadd.f32 %v1704_v48, %v6518_v39  ;;  %v1760_v55 = vadd.f32 %v1752_v49, %v6518_v39  ;;  %v1617_v56 = vmul.f32 %v1605_v36, %v6508_v31  ;;  %v1657_v57 = vmul.f32 %v1645_v46, %v6508_v31  ;;  %v1699_v48 = vld [vmem:[#allocation2 + $0x1d0] ss:$2 sm:$0xff] }
 0x1c4   : > { %1782 = vst.msk [vmem:[#allocation3 + $0x7a] sm:$0xff] %vm817_vm8, %v1774_v52  ;;  %v1727_v60 = vmax.f32 %v1679_v53, %v1719_v45  ;;  %v1632_v61 = vmax.f32 %v1624_v28, 0.0  ;;  %v1672_v62 = vmax.f32 %v1664_v50, 0.0  ;;  %v1705_v1 = vmul.f32 %v1693_v51, %v6508_v31  ;;  %v1747_v28 = vld [vmem:[#allocation2 + $0x1d1] ss:$2 sm:$0xff] }
 0x1c5   : > { %v1720_v6 = vmax.f32 %v1712_v54, 0.0  ;;  %v1768_v2 = vmax.f32 %v1760_v55, 0.0  ;;  %v1625_v5 = vadd.f32 %v1617_v56, %v6518_v39  ;;  %v1665_v7 = vadd.f32 %v1657_v57, %v6518_v39 }
 0x1c6   : > { %1594 = vrot.lane.b32.xlu0 %v1515_v37, %s6067_s3  ;;  %v1775_v10 = vmax.f32 %v1727_v60, %v1767_v47  ;;  %v1680_v11 = vmax.f32 %v1632_v61, %v1672_v62  ;;  %v1713_v12 = vadd.f32 %v1705_v1, %v6518_v39  ;;  %v1753_v13 = vmul.f32 %v1741_v58, %v6508_v31  ;;  %v1651_v47 = vld [vmem:[#allocation2 + $0x1c1] ss:$2 sm:$0xff]  ;;  %v1613_v62 = vld [vmem:[#allocation2 + $0x1e0] ss:$2 sm:$0xff] }
 0x1c7   : > { %1590 = vrot.lane.b32.xlu1 %v1515_v37, %s6068_s0  ;;  %v1633_v15 = vmax.f32 %v1625_v5, 0.0  ;;  %v1673_v16 = vmax.f32 %v1665_v7, 0.0  ;;  %v1618_v17 = vmul.f32 %v1607_v3, %v6508_v31  ;;  %v1658_v63 = vmul.f32 %v1647_v4, %v6508_v31  ;;  %v1701_v5 = vld [vmem:[#allocation2 + $0x1f0] ss:$2 sm:$0xff] }
 0x1c8   : > { %1792 = vst.msk [vmem:[#allocation3 + $0x84] sm:$0xff] %vm817_vm8, %v1775_v10  ;;  %v1728_v21 = vmax.f32 %v1680_v11, %v1720_v6  ;;  %v1721_v22 = vmax.f32 %v1713_v12, 0.0  ;;  %v1761_v23 = vadd.f32 %v1753_v13, %v6518_v39  ;;  %v1706_v24 = vmul.f32 %v1695_v8, %v6508_v31  ;;  %v1749_v12 = vld [vmem:[#allocation2 + $0x1f1] ss:$2 sm:$0xff] }
 0x1c9   : > { %v1681_v25 = vmax.f32 %v1633_v15, %v1673_v16  ;;  %v1626_v26 = vadd.f32 %v1618_v17, %v6518_v39  ;;  %v1666_v27 = vadd.f32 %v1658_v63, %v6518_v39  ;;  %v1754_v9 = vmul.f32 %v1743_v14, %v6508_v31  ;;  %v4830_v17 = vld [vmem:[%s8130_s27 + $0xa0] sm:$0xff]  ;;  %v4831_v63 = vld [vmem:[%s8130_s27 + $0xa8] sm:$0xff] }
 0x1ca   : > { %1788 = vrot.lane.b32.xlu0 %v1774_v52, %s6067_s3  ;;  %v1776_v34 = vmax.f32 %v1728_v21, %v1768_v2  ;;  %v1769_v35 = vmax.f32 %v1761_v23, 0.0  ;;  %v1714_v59 = vadd.f32 %v1706_v24, %v6518_v39  ;;  %v1619_v37 = vmul.f32 %v1609_v19, %v6508_v31  ;;  %v1653_v2 = vld [vmem:[#allocation2 + $0x1e1] ss:$2 sm:$0xff] }
 0x1cb   : > { %1784 = vrot.lane.b32.xlu1 %v1774_v52, %s6068_s0  ;;  %v1729_v33 = vmax.f32 %v1681_v25, %v1721_v22  ;;  %v1634_v40 = vmax.f32 %v1626_v26, 0.0  ;;  %v1674_v41 = vmax.f32 %v1666_v27, 0.0  ;;  %v1762_v42 = vadd.f32 %v1754_v9, %v6518_v39  ;;  %v4832_v9 = vld [vmem:[%s8130_s27 + $0xb0] sm:$0xff] }
 0x1cc   : > { %1802 = vst.msk [vmem:[#allocation3 + $0x8e] sm:$0xff] %vm817_vm8, %v1776_v34  ;;  %v1722_v44 = vmax.f32 %v1714_v59, 0.0  ;;  %v1627_v36 = vadd.f32 %v1619_v37, %v6518_v39  ;;  %v1659_v46 = vmul.f32 %v1649_v30, %v6508_v31  ;;  %v1707_v45 = vmul.f32 %v1697_v32, %v6508_v31  ;;  %v4833_v30 = vld [vmem:[%s8130_s27 + $0xb8] sm:$0xff] }
 0x1cd   : > { %v1777_v49 = vmax.f32 %v1729_v33, %v1769_v35  ;;  %v1682_v51 = vmax.f32 %v1634_v40, %v1674_v41  ;;  %v1770_v52 = vmax.f32 %v1762_v42, 0.0  ;;  %v1755_v53 = vmul.f32 %v1745_v38, %v6508_v31 }
 0x1ce   : > { %1798 = vrot.lane.b32.xlu0 %v1775_v10, %s6067_s3  ;;  %v1635_v50 = vmax.f32 %v1627_v36, 0.0  ;;  %v1667_v54 = vadd.f32 %v1659_v46, %v6518_v39  ;;  %v1715_v55 = vadd.f32 %v1707_v45, %v6518_v39  ;;  %v1620_v56 = vmul.f32 %v1611_v43, %v6508_v31 }
 0x1cf   : > { %1794 = vrot.lane.b32.xlu1 %v1775_v10, %s6068_s0  ;;  %1812 = vst.msk [vmem:[#allocation3 + $0x98] sm:$0xff] %vm817_vm8, %v1777_v49  ;;  %v1730_v57 = vmax.f32 %v1682_v51, %v1722_v44  ;;  %v1763_v58 = vadd.f32 %v1755_v53, %v6518_v39  ;;  %v1660_v60 = vmul.f32 %v1651_v47, %v6508_v31 }
 0x1d0   : > { %v1708_v61 = vmul.f32 %v1699_v48, %v6508_v31  ;;  %v1675_v1 = vmax.f32 %v1667_v54, 0.0  ;;  %v1723_v3 = vmax.f32 %v1715_v55, 0.0  ;;  %v1628_v4 = vadd.f32 %v1620_v56, %v6518_v39  ;;  %v1887_v48 = vld [vmem:[%s8130_s27] sm:$0xff]  ;;  %v1889_v54 = vld [vmem:[%s8130_s27 + $0x10] sm:$0xff]  ;;  %v1890_v55 = vld [vmem:[%s8130_s27 + $0x18] sm:$0xff] }
 0x1d1   : > { %v1756_v6 = vmul.f32 %v1747_v28, %v6508_v31  ;;  %v1778_v7 = vmax.f32 %v1730_v57, %v1770_v52  ;;  %v1771_v8 = vmax.f32 %v1763_v58, 0.0  ;;  %v1668_v10 = vadd.f32 %v1660_v60, %v6518_v39  ;;  %v1891_v60 = vld [vmem:[%s8130_s27 + $0x20] sm:$0xff] }
 0x1d2   : > { %v1716_v11 = vadd.f32 %v1708_v61, %v6518_v39  ;;  %1808 = vrot.lane.b32.xlu0 %v1776_v34, %s6067_s3  ;;  %v1683_v13 = vmax.f32 %v1635_v50, %v1675_v1  ;;  %v1636_v14 = vmax.f32 %v1628_v4, 0.0  ;;  %v1621_v16 = vmul.f32 %v1613_v62, %v6508_v31  ;;  %v1892_v61 = vld [vmem:[%s8130_s27 + $0x28] sm:$0xff] }
 0x1d3   : > { %v1764_v15 = vadd.f32 %v1756_v6, %v6518_v39  ;;  %1804 = vrot.lane.b32.xlu1 %v1776_v34, %s6068_s0  ;;  %1822 = vst.msk [vmem:[#allocation3 + $0xa2] sm:$0xff] %vm817_vm8, %v1778_v7  ;;  %v1676_v19 = vmax.f32 %v1668_v10, 0.0  ;;  %v1661_v22 = vmul.f32 %v1653_v2, %v6508_v31  ;;  %v1709_v23 = vmul.f32 %v1701_v5, %v6508_v31  ;;  %v1893_v2 = vld [vmem:[%s8130_s27 + $0x30] sm:$0xff]  ;;  %v1894_v5 = vld [vmem:[%s8130_s27 + $0x38] sm:$0xff] }
 0x1d4   : > { %v1724_v21 = vmax.f32 %v1716_v11, 0.0  ;;  %v1731_v24 = vmax.f32 %v1683_v13, %v1723_v3  ;;  %v1629_v26 = vadd.f32 %v1621_v16, %v6518_v39  ;;  %v1757_v27 = vmul.f32 %v1749_v12, %v6508_v31  ;;  %v1895_v12 = vld [vmem:[%s8130_s27 + $0x40] sm:$0xff]  ;;  %v1896_v13 = vld [vmem:[%s8130_s27 + $0x48] sm:$0xff] }
 0x1d5   : > { %v1772_v25 = vmax.f32 %v1764_v15, 0.0  ;;  %v1684_v32 = vmax.f32 %v1636_v14, %v1676_v19  ;;  %v1669_v34 = vadd.f32 %v1661_v22, %v6518_v39  ;;  %v1717_v35 = vadd.f32 %v1709_v23, %v6518_v39 }
 0x1d6   : > { %v5595_v59 = vpack.c.bf16 %v4831_v63, %v4830_v17  ;;  %1818 = vrot.lane.b32.xlu0 %v1777_v49, %s6067_s3  ;;  %v1779_v37 = vmax.f32 %v1731_v24, %v1771_v8  ;;  %v1637_v38 = vmax.f32 %v1629_v26, 0.0  ;;  %v1765_v31 = vadd.f32 %v1757_v27, %v6518_v39  ;;  %v1897_v17 = vld [vmem:[%s8130_s27 + $0x50] sm:$0xff]  ;;  %v1898_v63 = vld [vmem:[%s8130_s27 + $0x58] sm:$0xff] }
 0x1d7   : > { %1814 = vrot.lane.b32.xlu1 %v1777_v49, %s6068_s0  ;;  %v1732_v33 = vmax.f32 %v1684_v32, %v1724_v21  ;;  %v1677_v40 = vmax.f32 %v1669_v34, 0.0  ;;  %v1725_v41 = vmax.f32 %v1717_v35, 0.0  ;;  %v5598_v42 = vpack.c.bf16 %v4833_v30, %v4832_v9  ;;  %v1888_v49 = vld [vmem:[%s8130_s27 + $0x8] sm:$0xff] }
 0x1d8   : > { %5596 = vmatpush3.bf16.msra.mxu0 %v5595_v59  ;;  %1832 = vst.msk [vmem:[#allocation3 + $0xac] sm:$0xff] %vm817_vm8, %v1779_v37  ;;  %v1773_v36 = vmax.f32 %v1765_v31, 0.0  ;;  %v5601_v53 = vpack.c.bf16 %v1888_v49, %v1887_v48  ;;  %v5604_v57 = vpack.c.bf16 %v1890_v55, %v1889_v54  ;;  %v5607_v3 = vpack.c.bf16 %v1892_v61, %v1891_v60  ;;  %v4884_v61 = vld [vmem:[%s8130_s27 + $0xc0] sm:$0xff] }
 0x1d9   : > { %5597 = vmatprep.subr.bf16.mxu0 %v6066_v29  ;;  %v1780_v43 = vmax.f32 %v1732_v33, %v1772_v25  ;;  %v1685_v44 = vmax.f32 %v1637_v38, %v1677_v40  ;;  %v5610_v8 = vpack.c.bf16 %v1894_v5, %v1893_v2  ;;  %v5613_v15 = vpack.c.bf16 %v1896_v13, %v1895_v12  ;;  %v4888_v5 = vld [vmem:[%s8130_s27 + $0xe0] sm:$0xff]  ;;  %v4891_v12 = vld [vmem:[%s8130_s27 + $0xf8] sm:$0xff] }
 0x1da   : > { %1828 = vrot.lane.b32.xlu0 %v1778_v7, %s6067_s3  ;;  %v5616_v23 = vpack.c.bf16 %v1898_v63, %v1897_v17 }
 0x1db   : > { %1824 = vrot.lane.b32.xlu1 %v1778_v7, %s6068_s0  ;;  %1842 = vst.msk [vmem:[#allocation3 + $0xb6] sm:$0xff] %vm817_vm8, %v1780_v43  ;;  %v1733_v39 = vmax.f32 %v1685_v44, %v1725_v41 }
 0x1dc   : > { %5599 = vmatpush3.bf16.msra.mxu0 %v5598_v42 }
 0x1dd   : > { %5600 = vmatprep.subr.bf16.mxu0 %v6066_v29  ;;  %v1781_v46 = vmax.f32 %v1733_v39, %v1773_v36 }
 0x1de   : > { %1838 = vrot.lane.b32.xlu0 %v1779_v37, %s6067_s3 }
 0x1df   : > { %1834 = vrot.lane.b32.xlu1 %v1779_v37, %s6068_s0  ;;  %1852 = vst.msk [vmem:[#allocation3 + $0xc0] sm:$0xff] %vm817_vm8, %v1781_v46  ;;  %vm3056_vm8 = vcmask 1048070  }
 0x1e2   : > { %1848 = vrot.lane.b32.xlu0 %v1780_v43, %s6067_s3 }
 0x1e3   : > { %1844 = vrot.lane.b32.xlu1 %v1780_v43, %s6068_s0 }
 0x1e6   : > { %1858 = vrot.lane.b32.xlu0 %v1781_v46, %s6067_s3  ;;  %v1923_v60 = vld [vmem:[#allocation3 + $0xc1] sm:$0xff] }
 0x1e7   : > { %1854 = vrot.lane.b32.xlu1 %v1781_v46, %s6068_s0 }
 0x21b   : > { %v1524_v45 = vpop.permute.xlu0 %1523 }
 0x21c   : > { %1527 = vst.msk [vmem:[#allocation3 + $0x2] sm:$0xff] %vm1526_vm10, %v1524_v45  ;;  %v1535_v47 = vpop.permute.xlu1 %1534 }
 0x21f   : > { %v1519_v51 = vpop.permute.xlu0 %1518 }
 0x220   : > { %1522 = vst.msk [vmem:[#allocation3 + $0xc] sm:$0xff] %vm1521_vm11, %v1519_v51  ;;  %v1531_v52 = vpop.permute.xlu1 %1530 }
 0x221   : > { %1537 = vst.msk [vmem:[#allocation3 + $0xc] sm:$0xff] %vm1526_vm10, %v1535_v47 }
 0x222   : > { %1533 = vst.msk [vmem:[#allocation3 + $0x16] sm:$0xff] %vm1521_vm11, %v1531_v52 }
 0x223   : > { %v1545_v28 = vpop.permute.xlu0 %1544  ;;  %v1899_v50 = vld [vmem:[#allocation3 + $0x1] sm:$0xff] }
 0x224   : > { %1547 = vst.msk [vmem:[#allocation3 + $0x16] sm:$0xff] %vm1526_vm10, %v1545_v28  ;;  %5234 = vmatmul.mubr.msk.f32.vlgmr.msra.gmra.mrb[0].mxu0 %vm614_vm0, %v1899_v50  ;;  %v1541_v56 = vpop.permute.xlu1 %1540 }
 0x225   : > { %5602 = vmatpush3.bf16.msra.mxu0 %v5601_v53  ;;  %1543 = vst.msk [vmem:[#allocation3 + $0x20] sm:$0xff] %vm1521_vm11, %v1541_v56  ;;  %5236 = vmatprep.mubr.msk.f32.mxu0 %vm6069_vm9, %v6064_v0 }
 0x226   : > { %5603 = vmatprep.subr.bf16.mxu0 %v6066_v29 }
 0x227   : > { %v1555_v58 = vpop.permute.xlu0 %1554 }
 0x228   : > { %1557 = vst.msk [vmem:[#allocation3 + $0x20] sm:$0xff] %vm1526_vm10, %v1555_v58  ;;  %v1900_v62 = vld [vmem:[#allocation3 + $0x9] sm:$0xff]  ;;  %v1551_v1 = vpop.permute.xlu1 %1550 }
 0x229   : > { %5237 = vmatmul.mubr.msk.f32.gmra.mrb[2].mxu0 %vm614_vm0, %v1900_v62  ;;  %1553 = vst.msk [vmem:[#allocation3 + $0x2a] sm:$0xff] %vm1521_vm11, %v1551_v1  ;;  %v4885_v62 = vld [vmem:[%s8130_s27 + $0xc8] sm:$0xff] }
 0x22a   : > { %5239 = vmatprep.mubr.msk.f32.mxu0 %vm6069_vm9, %v6064_v0  ;;  %5605 = vmatpush3.bf16.msra.mxu0 %v5604_v57  ;;  %v5619_v1 = vpack.c.bf16 %v4885_v62, %v4884_v61 }
 0x22b   : > { %v1565_v4 = vpop.permute.xlu0 %1564  ;;  %v1901_v6 = vld [vmem:[#allocation3 + $0x11] sm:$0xff]  ;;  %5606 = vmatprep.subr.bf16.mxu0 %v6066_v29 }
 0x22c   : > { %1567 = vst.msk [vmem:[#allocation3 + $0x2a] sm:$0xff] %vm1526_vm10, %v1565_v4  ;;  %v1561_v7 = vpop.permute.xlu1 %1560  ;;  %v4887_v4 = vld [vmem:[%s8130_s27 + $0xd8] sm:$0xff]  ;;  %v1864_v13 = vld [vmem:[#allocation3 + $0x10] sm:$0xff] }
 0x22d   : > { %5240 = vmatmul.mubr.msk.f32.gmra.mrb[4].mxu0 %vm614_vm0, %v1901_v6  ;;  %1563 = vst.msk [vmem:[#allocation3 + $0x34] sm:$0xff] %vm1521_vm11, %v1561_v7  ;;  %v1862_v6 = vld [vmem:[#allocation3] sm:$0xff]  ;;  %v4889_v7 = vld [vmem:[%s8130_s27 + $0xe8] sm:$0xff]  ;;  %v1865_v17 = vld [vmem:[#allocation3 + $0x18] sm:$0xff] }
 0x22e   : > { %5242 = vmatprep.mubr.msk.f32.mxu0 %vm6069_vm9, %v6064_v0  ;;  %5608 = vmatpush3.bf16.msra.mxu0 %v5607_v3  ;;  %v4886_v3 = vld [vmem:[%s8130_s27 + $0xd0] sm:$0xff] }
 0x22f   : > { %v1902_v11 = vld [vmem:[#allocation3 + $0x19] sm:$0xff]  ;;  %5609 = vmatprep.subr.bf16.mxu0 %v6066_v29  ;;  %v1903_v19 = vld [vmem:[#allocation3 + $0x21] sm:$0xff]  ;;  %v5622_v2 = vpack.c.bf16 %v4887_v4, %v4886_v3 }
 0x230   : > { %v1575_v10 = vpop.permute.xlu0 %1574  ;;  %v1571_v14 = vpop.permute.xlu1 %1570 }
 0x231   : > { %1577 = vst.msk [vmem:[#allocation3 + $0x34] sm:$0xff] %vm1526_vm10, %v1575_v10  ;;  %5243 = vmatmul.mubr.msk.f32.gmra.mrb[6].mxu0 %vm614_vm0, %v1902_v11  ;;  %v5625_v10 = vpack.c.bf16 %v4889_v7, %v4888_v5  ;;  %v4890_v11 = vld [vmem:[%s8130_s27 + $0xf0] sm:$0xff]  ;;  %v2491_v5 = vld [vmem:[#allocation3 + $0xc2] sm:$0xff] }
 0x232   : > { %1573 = vst.msk [vmem:[#allocation3 + $0x3e] sm:$0xff] %vm1521_vm11, %v1571_v14  ;;  %5245 = vmatprep.mubr.msk.f32.mxu0 %vm6069_vm9, %v6064_v0  ;;  %5611 = vmatpush3.bf16.msra.mxu0 %v5610_v8  ;;  %v1863_v8 = vld [vmem:[#allocation3 + $0x8] sm:$0xff]  ;;  %v5628_v14 = vpack.c.bf16 %v4891_v12, %v4890_v11 }
 0x233   : > { %5612 = vmatprep.subr.bf16.mxu0 %v6066_v29  ;;  %v1904_v22 = vld [vmem:[#allocation3 + $0x29] sm:$0xff] }
 0x234   : > { %v1585_v16 = vpop.permute.xlu0 %1584 }
 0x235   : > { %1587 = vst.msk [vmem:[#allocation3 + $0x3e] sm:$0xff] %vm1526_vm10, %v1585_v16  ;;  %v1581_v21 = vpop.permute.xlu1 %1580  ;;  %5246 = vmatmul.mubr.msk.f32.gmra.mrb[8].mxu0 %vm614_vm0, %v1903_v19  ;;  %v4893_v16 = vld [vmem:[%s8130_s27 + $0x108] sm:$0xff]  ;;  %v4894_v19 = vld [vmem:[%s8130_s27 + $0x110] sm:$0xff] }
 0x236   : > { %1583 = vst.msk [vmem:[#allocation3 + $0x48] sm:$0xff] %vm1521_vm11, %v1581_v21  ;;  %5248 = vmatprep.mubr.msk.f32.mxu0 %vm6069_vm9, %v6064_v0  ;;  %5614 = vmatpush3.bf16.msra.mxu0 %v5613_v15  ;;  %v4892_v15 = vld [vmem:[%s8130_s27 + $0x100] sm:$0xff]  ;;  %v4895_v21 = vld [vmem:[%s8130_s27 + $0x118] sm:$0xff] }
 0x237   : > { %5615 = vmatprep.subr.bf16.mxu0 %v6066_v29  ;;  %v5631_v63 = vpack.c.bf16 %v4893_v16, %v4892_v15 }
 0x238   : > { %v1595_v24 = vpop.permute.xlu0 %1594  ;;  %v1905_v27 = vld [vmem:[#allocation3 + $0x31] sm:$0xff] }
 0x239   : > { %1597 = vst.msk [vmem:[#allocation3 + $0x48] sm:$0xff] %vm1526_vm10, %v1595_v24  ;;  %v1591_v25 = vpop.permute.xlu1 %1590  ;;  %5249 = vmatmul.mubr.msk.f32.gmra.mrb[10].mxu0 %vm614_vm0, %v1904_v22  ;;  %v1866_v22 = vld [vmem:[#allocation3 + $0x20] sm:$0xff]  ;;  %v1867_v24 = vld [vmem:[#allocation3 + $0x28] sm:$0xff] }
 0x23a   : > { %1593 = vst.msk [vmem:[#allocation3 + $0x52] sm:$0xff] %vm1521_vm11, %v1591_v25  ;;  %5251 = vmatprep.mubr.msk.f32.mxu0 %vm6069_vm9, %v6064_v0  ;;  %5617 = vmatpush3.bf16.msra.mxu0 %v5616_v23  ;;  %v5634_v23 = vpack.c.bf16 %v4895_v21, %v4894_v19  ;;  %v1868_v25 = vld [vmem:[#allocation3 + $0x30] sm:$0xff] }
 0x23b   : > { %5618 = vmatprep.subr.bf16.mxu0 %v6066_v29 }
 0x23c   : > { %v1789_v26 = vpop.permute.xlu0 %1788  ;;  %v1906_v32 = vld [vmem:[#allocation3 + $0x39] sm:$0xff] }
 0x23d   : > { %1791 = vst.msk [vmem:[#allocation3 + $0x66] sm:$0xff] %vm1526_vm10, %v1789_v26  ;;  %v1785_v9 = vpop.permute.xlu1 %1784  ;;  %5252 = vmatmul.mubr.msk.f32.gmra.mrb[12].mxu0 %vm614_vm0, %v1905_v27  ;;  %v1869_v26 = vld [vmem:[#allocation3 + $0x38] sm:$0xff]  ;;  %v1870_v27 = vld [vmem:[#allocation3 + $0x40] sm:$0xff] }
 0x23e   : > { %1787 = vst.msk [vmem:[#allocation3 + $0x70] sm:$0xff] %vm1521_vm11, %v1785_v9  ;;  %5254 = vmatprep.mubr.msk.f32.mxu0 %vm6069_vm9, %v6064_v0 }
 0x240   : > { %v1799_v30 = vpop.permute.xlu0 %1798  ;;  %v1907_v59 = vld [vmem:[#allocation3 + $0x41] sm:$0xff]  ;;  %v1908_v31 = vld [vmem:[#allocation3 + $0x49] sm:$0xff] }
 0x241   : > { %1801 = vst.msk [vmem:[#allocation3 + $0x70] sm:$0xff] %vm1526_vm10, %v1799_v30  ;;  %v1795_v34 = vpop.permute.xlu1 %1794  ;;  %5255 = vmatmul.mubr.msk.f32.gmra.mrb[14].mxu0 %vm614_vm0, %v1906_v32  ;;  %v1909_v40 = vld [vmem:[#allocation3 + $0x51] sm:$0xff]  ;;  %v1910_v44 = vld [vmem:[#allocation3 + $0x59] sm:$0xff]  ;;  %v1871_v9 = vld [vmem:[#allocation3 + $0x48] sm:$0xff] }
 0x242   : > { %1797 = vst.msk [vmem:[#allocation3 + $0x7a] sm:$0xff] %vm1521_vm11, %v1795_v34  ;;  %5257 = vmatprep.mubr.msk.f32.mxu0 %vm6069_vm9, %v6064_v0  ;;  %v1872_v30 = vld [vmem:[#allocation3 + $0x50] sm:$0xff]  ;;  %v1873_v32 = vld [vmem:[#allocation3 + $0x58] sm:$0xff] }
 0x244   : > { %v1809_v35 = vpop.permute.xlu0 %1808  ;;  %v1911_v39 = vld [vmem:[#allocation3 + $0x61] sm:$0xff] }
 0x245   : > { %1811 = vst.msk [vmem:[#allocation3 + $0x7a] sm:$0xff] %vm1526_vm10, %v1809_v35  ;;  %v1805_v37 = vpop.permute.xlu1 %1804  ;;  %5258 = vmatmul.mubr.msk.f32.gmra.mrb[16].mxu0 %vm614_vm0, %v1907_v59  ;;  %v1874_v34 = vld [vmem:[#allocation3 + $0x60] sm:$0xff]  ;;  %v1875_v35 = vld [vmem:[#allocation3 + $0x68] sm:$0xff] }
 0x246   : > { %1807 = vst.msk [vmem:[#allocation3 + $0x84] sm:$0xff] %vm1521_vm11, %v1805_v37  ;;  %5260 = vmatprep.mubr.msk.f32.mxu0 %vm6069_vm9, %v6064_v0 }
 0x248   : > { %v1819_v38 = vpop.permute.xlu0 %1818  ;;  %v1912_v48 = vld [vmem:[#allocation3 + $0x69] sm:$0xff]  ;;  %v1913_v51 = vld [vmem:[#allocation3 + $0x71] sm:$0xff] }
 0x249   : > { %1821 = vst.msk [vmem:[#allocation3 + $0x84] sm:$0xff] %vm1526_vm10, %v1819_v38  ;;  %v1815_v33 = vpop.permute.xlu1 %1814  ;;  %5261 = vmatmul.mubr.msk.f32.gmra.mrb[18].mxu0 %vm614_vm0, %v1908_v31  ;;  %v1876_v59 = vld [vmem:[#allocation3 + $0x70] sm:$0xff] }
 0x24a   : > { %1817 = vst.msk [vmem:[#allocation3 + $0x8e] sm:$0xff] %vm1521_vm11, %v1815_v33  ;;  %5263 = vmatprep.mubr.msk.f32.mxu0 %vm6069_vm9, %v6064_v0 }
 0x24c   : > { %v1829_v41 = vpop.permute.xlu0 %1828  ;;  %v1914_v52 = vld [vmem:[#allocation3 + $0x79] sm:$0xff] }
 0x24d   : > { %1831 = vst.msk [vmem:[#allocation3 + $0x8e] sm:$0xff] %vm1526_vm10, %v1829_v41  ;;  %v1825_v42 = vpop.permute.xlu1 %1824  ;;  %5264 = vmatmul.mubr.msk.f32.gmra.mrb[20].mxu0 %vm614_vm0, %v1909_v40  ;;  %v1877_v37 = vld [vmem:[#allocation3 + $0x78] sm:$0xff] }
 0x24e   : > { %1827 = vst.msk [vmem:[#allocation3 + $0x98] sm:$0xff] %vm1521_vm11, %v1825_v42  ;;  %5266 = vmatprep.mubr.msk.f32.mxu0 %vm6069_vm9, %v6064_v0 }
 0x250   : > { %v1839_v43 = vpop.permute.xlu0 %1838  ;;  %v1915_v53 = vld [vmem:[#allocation3 + $0x81] sm:$0xff] }
 0x251   : > { %1841 = vst.msk [vmem:[#allocation3 + $0x98] sm:$0xff] %vm1526_vm10, %v1839_v43  ;;  %v1835_v36 = vpop.permute.xlu1 %1834  ;;  %5267 = vmatmul.mubr.msk.f32.gmra.mrb[22].mxu0 %vm614_vm0, %v1910_v44  ;;  %v1878_v38 = vld [vmem:[#allocation3 + $0x80] sm:$0xff] }
 0x252   : > { %1837 = vst.msk [vmem:[#allocation3 + $0xa2] sm:$0xff] %vm1521_vm11, %v1835_v36  ;;  %5269 = vmatprep.mubr.msk.f32.mxu0 %vm6069_vm9, %v6064_v0  ;;  %v1886_v36 = vld [vmem:[#allocation3 + $0xc0] sm:$0xff] }
 0x254   : > { %v1849_v46 = vpop.permute.xlu0 %1848  ;;  %v1916_v28 = vld [vmem:[#allocation3 + $0x89] sm:$0xff] }
 0x255   : > { %1851 = vst.msk [vmem:[#allocation3 + $0xa2] sm:$0xff] %vm1526_vm10, %v1849_v46  ;;  %v1845_v45 = vpop.permute.xlu1 %1844  ;;  %5270 = vmatmul.mubr.msk.f32.gmra.mrb[24].mxu0 %vm614_vm0, %v1911_v39  ;;  %v1879_v31 = vld [vmem:[#allocation3 + $0x88] sm:$0xff]  ;;  %v1880_v33 = vld [vmem:[#allocation3 + $0x90] sm:$0xff] }
 0x256   : > { %1847 = vst.msk [vmem:[#allocation3 + $0xac] sm:$0xff] %vm1521_vm11, %v1845_v45  ;;  %5272 = vmatprep.mubr.msk.f32.mxu0 %vm6069_vm9, %v6064_v0  ;;  %v2467_v39 = vld [vmem:[#allocation3 + $0x2] sm:$0xff]  ;;  %v2468_v46 = vld [vmem:[#allocation3 + $0xa] sm:$0xff]  ;;  %v2469_v45 = vld [vmem:[#allocation3 + $0x12] sm:$0xff] }
 0x257   : > { %v2484_v61 = vld [vmem:[#allocation3 + $0x8a] sm:$0xff] }
 0x258   : > { %v1859_v47 = vpop.permute.xlu0 %1858  ;;  %v1917_v50 = vld [vmem:[#allocation3 + $0x91] sm:$0xff]  ;;  %v1918_v54 = vld [vmem:[#allocation3 + $0x99] sm:$0xff] }
 0x259   : > { %1861 = vst.msk [vmem:[#allocation3 + $0xac] sm:$0xff] %vm1526_vm10, %v1859_v47  ;;  %v1855_v49 = vpop.permute.xlu1 %1854  ;;  %5273 = vmatmul.mubr.msk.f32.gmra.mrb[26].mxu0 %vm614_vm0, %v1912_v48  ;;  %v1881_v40 = vld [vmem:[#allocation3 + $0x98] sm:$0xff]  ;;  %v2471_v48 = vld [vmem:[#allocation3 + $0x22] sm:$0xff]  ;;  %vm3058_vm10 = vcmask 1041920  }
 0x25a   : > { %1857 = vst.msk [vmem:[#allocation3 + $0xb6] sm:$0xff] %vm1521_vm11, %v1855_v49  ;;  %5275 = vmatprep.mubr.msk.f32.mxu0 %vm6069_vm9, %v6064_v0  ;;  %v2470_v47 = vld [vmem:[#allocation3 + $0x1a] sm:$0xff]  ;;  %v2472_v49 = vld [vmem:[#allocation3 + $0x2a] sm:$0xff]  ;;  %v2485_v62 = vld [vmem:[#allocation3 + $0x92] sm:$0xff]  ;;  %vm3071_vm11 = vcmask 1048068  }
 0x25c   : > { %v1919_v55 = vld [vmem:[#allocation3 + $0xa1] sm:$0xff] }
 0x25d   : > { %5276 = vmatmul.mubr.msk.f32.gmra.mrb[28].mxu0 %vm614_vm0, %v1913_v51  ;;  %v1882_v41 = vld [vmem:[#allocation3 + $0xa0] sm:$0xff]  ;;  %v2473_v51 = vld [vmem:[#allocation3 + $0x32] sm:$0xff] }
 0x25e   : > { %5278 = vmatprep.mubr.msk.f32.mxu0 %vm6069_vm9, %v6064_v0  ;;  %v2487_v3 = vld [vmem:[#allocation3 + $0xa2] sm:$0xff] }
 0x260   : > { %v1920_v56 = vld [vmem:[#allocation3 + $0xa9] sm:$0xff] }
 0x261   : > { %5279 = vmatmul.mubr.msk.f32.gmra.mrb[30].mxu0 %vm614_vm0, %v1914_v52  ;;  %v1921_v57 = vld [vmem:[#allocation3 + $0xb1] sm:$0xff]  ;;  %v1922_v58 = vld [vmem:[#allocation3 + $0xb9] sm:$0xff]  ;;  %v1883_v42 = vld [vmem:[#allocation3 + $0xa8] sm:$0xff] }
 0x262   : > { %5281 = vmatprep.mubr.msk.f32.mxu0 %vm6069_vm9, %v6064_v0  ;;  %v1884_v43 = vld [vmem:[#allocation3 + $0xb0] sm:$0xff]  ;;  %v1885_v44 = vld [vmem:[#allocation3 + $0xb8] sm:$0xff] }
 0x263   : > { %v2474_v52 = vld [vmem:[#allocation3 + $0x3a] sm:$0xff]  ;;  %v2488_v4 = vld [vmem:[#allocation3 + $0xaa] sm:$0xff] }
 0x265   : > { %5282 = vmatmul.mubr.msk.f32.gmra.mrb[32].mxu0 %vm614_vm0, %v1915_v53  ;;  %v2475_v53 = vld [vmem:[#allocation3 + $0x42] sm:$0xff] }
 0x266   : > { %5284 = vmatprep.mubr.msk.f32.mxu0 %vm6069_vm9, %v6064_v0 }
 0x269   : > { %5285 = vmatmul.mubr.msk.f32.gmra.mrb[34].mxu0 %vm614_vm0, %v1916_v28  ;;  %v2476_v28 = vld [vmem:[#allocation3 + $0x4a] sm:$0xff] }
 0x26a   : > { %5287 = vmatprep.mubr.msk.f32.mxu0 %vm6069_vm9, %v6064_v0 }
 0x26d   : > { %5288 = vmatmul.mubr.msk.f32.gmra.mrb[36].mxu0 %vm614_vm0, %v1917_v50  ;;  %v2477_v50 = vld [vmem:[#allocation3 + $0x52] sm:$0xff] }
 0x26e   : > { %5290 = vmatprep.mubr.msk.f32.mxu0 %vm6069_vm9, %v6064_v0 }
 0x271   : > { %5291 = vmatmul.mubr.msk.f32.gmra.mrb[38].mxu0 %vm614_vm0, %v1918_v54  ;;  %v2478_v54 = vld [vmem:[#allocation3 + $0x5a] sm:$0xff] }
 0x272   : > { %5293 = vmatprep.mubr.msk.f32.mxu0 %vm6069_vm9, %v6064_v0 }
 0x275   : > { %5294 = vmatmul.mubr.msk.f32.gmra.mrb[40].mxu0 %vm614_vm0, %v1919_v55  ;;  %v2479_v55 = vld [vmem:[#allocation3 + $0x62] sm:$0xff] }
 0x276   : > { %5296 = vmatprep.mubr.msk.f32.mxu0 %vm6069_vm9, %v6064_v0 }
 0x279   : > { %5297 = vmatmul.mubr.msk.f32.gmra.mrb[42].mxu0 %vm614_vm0, %v1920_v56  ;;  %v2480_v56 = vld [vmem:[#allocation3 + $0x6a] sm:$0xff] }
 0x27a   : > { %5299 = vmatprep.mubr.msk.f32.mxu0 %vm6069_vm9, %v6064_v0 }
 0x27d   : > { %5300 = vmatmul.mubr.msk.f32.gmra.mrb[44].mxu0 %vm614_vm0, %v1921_v57  ;;  %v2481_v57 = vld [vmem:[#allocation3 + $0x72] sm:$0xff] }
 0x27e   : > { %5302 = vmatprep.mubr.msk.f32.mxu0 %vm6069_vm9, %v6064_v0 }
 0x281   : > { %5303 = vmatmul.mubr.msk.f32.gmra.mrb[46].mxu0 %vm614_vm0, %v1922_v58  ;;  %v2482_v58 = vld [vmem:[#allocation3 + $0x7a] sm:$0xff] }
 0x282   : > { %5305 = vmatprep.mubr.msk.f32.mxu0 %vm6069_vm9, %v6064_v0 }
 0x285   : > { %5306 = vmatmul.mubr.msk.f32.gmra.mrb[48].mxu0 %vm614_vm0, %v1923_v60  ;;  %v2483_v60 = vld [vmem:[#allocation3 + $0x82] sm:$0xff] }
 0x286   : > { %5332 = vmatprep.mubr.msk.f32.mxu0 %vm6069_vm9, %v6064_v0 }
 0x289   : > { %5333 = vmatmul.mubr.msk.f32.vlgmr.msra.gmra.mrb[0].mxu0 %vm614_vm0, %v1862_v6  ;;  %v2489_v6 = vld [vmem:[#allocation3 + $0xb2] sm:$0xff] }
 0x28a   : > { %5620 = vmatpush3.bf16.msra.mxu0 %v5619_v1  ;;  %5335 = vmatprep.mubr.msk.f32.mxu0 %vm6069_vm9, %v6064_v0  ;;  %v2486_v1 = vld [vmem:[#allocation3 + $0x9a] sm:$0xff] }
 0x28b   : > { %5621 = vmatprep.subr.bf16.mxu0 %v6066_v29 }
 0x28d   : > { %5336 = vmatmul.mubr.msk.f32.gmra.mrb[2].mxu0 %vm614_vm0, %v1863_v8 }
 0x28e   : > { %5338 = vmatprep.mubr.msk.f32.mxu0 %vm6069_vm9, %v6064_v0  ;;  %5623 = vmatpush3.bf16.msra.mxu0 %v5622_v2  ;;  %v2490_v2 = vld [vmem:[#allocation3 + $0xba] sm:$0xff] }
 0x28f   : > { %5624 = vmatprep.subr.bf16.mxu0 %v6066_v29 }
 0x291   : > { %5339 = vmatmul.mubr.msk.f32.gmra.mrb[4].mxu0 %vm614_vm0, %v1864_v13 }
 0x292   : > { %5341 = vmatprep.mubr.msk.f32.mxu0 %vm6069_vm9, %v6064_v0  ;;  %5626 = vmatpush3.bf16.msra.mxu0 %v5625_v10 }
 0x293   : > { %5627 = vmatprep.subr.bf16.mxu0 %v6066_v29 }
 0x295   : > { %5342 = vmatmul.mubr.msk.f32.gmra.mrb[6].mxu0 %vm614_vm0, %v1865_v17 }
 0x296   : > { %5344 = vmatprep.mubr.msk.f32.mxu0 %vm6069_vm9, %v6064_v0  ;;  %5629 = vmatpush3.bf16.msra.mxu0 %v5628_v14 }
 0x297   : > { %5630 = vmatprep.subr.bf16.mxu0 %v6066_v29 }
 0x299   : > { %5345 = vmatmul.mubr.msk.f32.gmra.mrb[8].mxu0 %vm614_vm0, %v1866_v22 }
 0x29a   : > { %5347 = vmatprep.mubr.msk.f32.mxu0 %vm6069_vm9, %v6064_v0  ;;  %5632 = vmatpush3.bf16.msra.mxu0 %v5631_v63 }
 0x29b   : > { %5633 = vmatprep.subr.bf16.mxu0 %v6066_v29 }
 0x29d   : > { %5348 = vmatmul.mubr.msk.f32.gmra.mrb[10].mxu0 %vm614_vm0, %v1867_v24 }
 0x29e   : > { %5350 = vmatprep.mubr.msk.f32.mxu0 %vm6069_vm9, %v6064_v0  ;;  %5635 = vmatpush3.bf16.msra.mxu0 %v5634_v23 }
 0x2a1   : > { %5351 = vmatmul.mubr.msk.f32.gmra.mrb[12].mxu0 %vm614_vm0, %v1868_v25 }
 0x2a2   : > { %5353 = vmatprep.mubr.msk.f32.mxu0 %vm6069_vm9, %v6064_v0 }
 0x2a5   : > { %5354 = vmatmul.mubr.msk.f32.gmra.mrb[14].mxu0 %vm614_vm0, %v1869_v26 }
 0x2a6   : > { %5356 = vmatprep.mubr.msk.f32.mxu0 %vm6069_vm9, %v6064_v0 }
 0x2a9   : > { %5357 = vmatmul.mubr.msk.f32.gmra.mrb[16].mxu0 %vm614_vm0, %v1870_v27 }
 0x2aa   : > { %5359 = vmatprep.mubr.msk.f32.mxu0 %vm6069_vm9, %v6064_v0 }
 0x2ad   : > { %5360 = vmatmul.mubr.msk.f32.gmra.mrb[18].mxu0 %vm614_vm0, %v1871_v9 }
 0x2ae   : > { %5362 = vmatprep.mubr.msk.f32.mxu0 %vm6069_vm9, %v6064_v0 }
 0x2b1   : > { %5363 = vmatmul.mubr.msk.f32.gmra.mrb[20].mxu0 %vm614_vm0, %v1872_v30 }
 0x2b2   : > { %5365 = vmatprep.mubr.msk.f32.mxu0 %vm6069_vm9, %v6064_v0 }
 0x2b5   : > { %5366 = vmatmul.mubr.msk.f32.gmra.mrb[22].mxu0 %vm614_vm0, %v1873_v32 }
 0x2b6   : > { %5368 = vmatprep.mubr.msk.f32.mxu0 %vm6069_vm9, %v6064_v0 }
 0x2b9   : > { %5369 = vmatmul.mubr.msk.f32.gmra.mrb[24].mxu0 %vm614_vm0, %v1874_v34 }
 0x2ba   : > { %5371 = vmatprep.mubr.msk.f32.mxu0 %vm6069_vm9, %v6064_v0 }
 0x2bd   : > { %5372 = vmatmul.mubr.msk.f32.gmra.mrb[26].mxu0 %vm614_vm0, %v1875_v35 }
 0x2be   : > { %5374 = vmatprep.mubr.msk.f32.mxu0 %vm6069_vm9, %v6064_v0 }
 0x2c1   : > { %5375 = vmatmul.mubr.msk.f32.gmra.mrb[28].mxu0 %vm614_vm0, %v1876_v59 }
 0x2c2   : > { %5377 = vmatprep.mubr.msk.f32.mxu0 %vm6069_vm9, %v6064_v0 }
 0x2c5   : > { %5378 = vmatmul.mubr.msk.f32.gmra.mrb[30].mxu0 %vm614_vm0, %v1877_v37 }
 0x2c6   : > { %5380 = vmatprep.mubr.msk.f32.mxu0 %vm6069_vm9, %v6064_v0 }
 0x2c9   : > { %5381 = vmatmul.mubr.msk.f32.gmra.mrb[32].mxu0 %vm614_vm0, %v1878_v38 }
 0x2ca   : > { %5383 = vmatprep.mubr.msk.f32.mxu0 %vm6069_vm9, %v6064_v0 }
 0x2cd   : > { %5384 = vmatmul.mubr.msk.f32.gmra.mrb[34].mxu0 %vm614_vm0, %v1879_v31 }
 0x2ce   : > { %5386 = vmatprep.mubr.msk.f32.mxu0 %vm6069_vm9, %v6064_v0 }
 0x2d1   : > { %5387 = vmatmul.mubr.msk.f32.gmra.mrb[36].mxu0 %vm614_vm0, %v1880_v33 }
 0x2d2   : > { %5389 = vmatprep.mubr.msk.f32.mxu0 %vm6069_vm9, %v6064_v0 }
 0x2d5   : > { %5390 = vmatmul.mubr.msk.f32.gmra.mrb[38].mxu0 %vm614_vm0, %v1881_v40 }
 0x2d6   : > { %5392 = vmatprep.mubr.msk.f32.mxu0 %vm6069_vm9, %v6064_v0 }
 0x2d9   : > { %5393 = vmatmul.mubr.msk.f32.gmra.mrb[40].mxu0 %vm614_vm0, %v1882_v41 }
 0x2da   : > { %5395 = vmatprep.mubr.msk.f32.mxu0 %vm6069_vm9, %v6064_v0 }
 0x2dd   : > { %5396 = vmatmul.mubr.msk.f32.gmra.mrb[42].mxu0 %vm614_vm0, %v1883_v42 }
 0x2de   : > { %5398 = vmatprep.mubr.msk.f32.mxu0 %vm6069_vm9, %v6064_v0 }
 0x2e1   : > { %5399 = vmatmul.mubr.msk.f32.gmra.mrb[44].mxu0 %vm614_vm0, %v1884_v43  ;;  %v4921_v43 = vld [vmem:[%s8103_s5 + $0xc0] sm:$0xff] }
 0x2e2   : > { %5401 = vmatprep.mubr.msk.f32.mxu0 %vm6069_vm9, %v6064_v0 }
 0x2e5   : > { %5402 = vmatmul.mubr.msk.f32.gmra.mrb[46].mxu0 %vm614_vm0, %v1885_v44  ;;  %v4922_v44 = vld [vmem:[%s8103_s5 + $0xc8] sm:$0xff] }
 0x2e6   : > { %5404 = vmatprep.mubr.msk.f32.mxu0 %vm6069_vm9, %v6064_v0 }
 0x2e9   : > { %5405 = vmatmul.mubr.msk.f32.gmra.mrb[48].mxu0 %vm614_vm0, %v1886_v36  ;;  %v4923_v36 = vld [vmem:[%s8103_s5 + $0xd0] sm:$0xff] }
 0x2ea   : > { %5431 = vmatprep.mubr.msk.f32.mxu0 %vm6069_vm9, %v6064_v0 }
 0x2ed   : > { %5432 = vmatmul.mubr.msk.f32.vlgmr.msra.gmra.mrb[0].mxu0 %vm614_vm0, %v2467_v39 }
 0x2ee   : > { %5434 = vmatprep.mubr.msk.f32.mxu0 %vm6069_vm9, %v6064_v0 }
 0x2f1   : > { %5435 = vmatmul.mubr.msk.f32.gmra.mrb[2].mxu0 %vm614_vm0, %v2468_v46  ;;  %v5637_v46 = vpack.c.bf16 %v4922_v44, %v4921_v43 }
 0x2f2   : > { %5437 = vmatprep.mubr.msk.f32.mxu0 %vm6069_vm9, %v6064_v0 }
 0x2f3   : > { %5638 = vmatpush1.bf16.msra.mxu1 %v5637_v46 }
 0x2f4   : > { %5639 = vmatprep.subr.bf16.mxu1 %v6066_v29 }
 0x2f5   : > { %5438 = vmatmul.mubr.msk.f32.gmra.mrb[4].mxu0 %vm614_vm0, %v2469_v45  ;;  %v4924_v45 = vld [vmem:[%s8103_s5 + $0xd8] sm:$0xff] }
 0x2f6   : > { %5440 = vmatprep.mubr.msk.f32.mxu0 %vm6069_vm9, %v6064_v0 }
 0x2f9   : > { %5441 = vmatmul.mubr.msk.f32.gmra.mrb[6].mxu0 %vm614_vm0, %v2470_v47 }
 0x2fa   : > { %5443 = vmatprep.mubr.msk.f32.mxu0 %vm6069_vm9, %v6064_v0 }
 0x2fd   : > { %5444 = vmatmul.mubr.msk.f32.gmra.mrb[8].mxu0 %vm614_vm0, %v2471_v48  ;;  %v5640_v48 = vpack.c.bf16 %v4924_v45, %v4923_v36 }
 0x2fe   : > { %5446 = vmatprep.mubr.msk.f32.mxu0 %vm6069_vm9, %v6064_v0 }
 0x2ff   : > { %5641 = vmatpush1.bf16.msra.mxu1 %v5640_v48 }
 0x300   : > { %5642 = vmatprep.subr.bf16.mxu1 %v6066_v29 }
 0x301   : > { %5447 = vmatmul.mubr.msk.f32.gmra.mrb[10].mxu0 %vm614_vm0, %v2472_v49  ;;  %v4925_v49 = vld [vmem:[%s8103_s5 + $0xe0] sm:$0xff] }
 0x302   : > { %5449 = vmatprep.mubr.msk.f32.mxu0 %vm6069_vm9, %v6064_v0 }
 0x305   : > { %5450 = vmatmul.mubr.msk.f32.gmra.mrb[12].mxu0 %vm614_vm0, %v2473_v51  ;;  %v4926_v51 = vld [vmem:[%s8103_s5 + $0xe8] sm:$0xff] }
 0x306   : > { %5452 = vmatprep.mubr.msk.f32.mxu0 %vm6069_vm9, %v6064_v0 }
 0x309   : > { %5453 = vmatmul.mubr.msk.f32.gmra.mrb[14].mxu0 %vm614_vm0, %v2474_v52 }
 0x30a   : > { %5455 = vmatprep.mubr.msk.f32.mxu0 %vm6069_vm9, %v6064_v0 }
 0x30d   : > { %5456 = vmatmul.mubr.msk.f32.gmra.mrb[16].mxu0 %vm614_vm0, %v2475_v53 }
 0x30e   : > { %5458 = vmatprep.mubr.msk.f32.mxu0 %vm6069_vm9, %v6064_v0 }
 0x311   : > { %5459 = vmatmul.mubr.msk.f32.gmra.mrb[18].mxu0 %vm614_vm0, %v2476_v28 }
 0x312   : > { %5461 = vmatprep.mubr.msk.f32.mxu0 %vm6069_vm9, %v6064_v0 }
 0x315   : > { %5462 = vmatmul.mubr.msk.f32.gmra.mrb[20].mxu0 %vm614_vm0, %v2477_v50 }
 0x316   : > { %5464 = vmatprep.mubr.msk.f32.mxu0 %vm6069_vm9, %v6064_v0 }
 0x319   : > { %5465 = vmatmul.mubr.msk.f32.gmra.mrb[22].mxu0 %vm614_vm0, %v2478_v54 }
 0x31a   : > { %5467 = vmatprep.mubr.msk.f32.mxu0 %vm6069_vm9, %v6064_v0 }
 0x31d   : > { %5468 = vmatmul.mubr.msk.f32.gmra.mrb[24].mxu0 %vm614_vm0, %v2479_v55  ;;  %v5643_v55 = vpack.c.bf16 %v4926_v51, %v4925_v49  ;;  %v4935_v51 = vld [vmem:[%s8103_s5 + $0x130] sm:$0xff] }
 0x31e   : > { %5470 = vmatprep.mubr.msk.f32.mxu0 %vm6069_vm9, %v6064_v0 }
 0x31f   : > { %5644 = vmatpush1.bf16.msra.mxu1 %v5643_v55 }
 0x320   : > { %5645 = vmatprep.subr.bf16.mxu1 %v6066_v29 }
 0x321   : > { %5471 = vmatmul.mubr.msk.f32.gmra.mrb[26].mxu0 %vm614_vm0, %v2480_v56 }
 0x322   : > { %5473 = vmatprep.mubr.msk.f32.mxu0 %vm6069_vm9, %v6064_v0 }
 0x325   : > { %5474 = vmatmul.mubr.msk.f32.gmra.mrb[28].mxu0 %vm614_vm0, %v2481_v57  ;;  %v4927_v57 = vld [vmem:[%s8103_s5 + $0xf0] sm:$0xff] }
 0x326   : > { %5476 = vmatprep.mubr.msk.f32.mxu0 %vm6069_vm9, %v6064_v0 }
 0x329   : > { %5477 = vmatmul.mubr.msk.f32.gmra.mrb[30].mxu0 %vm614_vm0, %v2482_v58  ;;  %v4928_v58 = vld [vmem:[%s8103_s5 + $0xf8] sm:$0xff] }
 0x32a   : > { %5479 = vmatprep.mubr.msk.f32.mxu0 %vm6069_vm9, %v6064_v0 }
 0x32d   : > { %5480 = vmatmul.mubr.msk.f32.gmra.mrb[32].mxu0 %vm614_vm0, %v2483_v60 }
 0x32e   : > { %5482 = vmatprep.mubr.msk.f32.mxu0 %vm6069_vm9, %v6064_v0 }
 0x331   : > { %5483 = vmatmul.mubr.msk.f32.gmra.mrb[34].mxu0 %vm614_vm0, %v2484_v61 }
 0x332   : > { %5485 = vmatprep.mubr.msk.f32.mxu0 %vm6069_vm9, %v6064_v0 }
 0x335   : > { %5486 = vmatmul.mubr.msk.f32.gmra.mrb[36].mxu0 %vm614_vm0, %v2485_v62 }
 0x336   : > { %5488 = vmatprep.mubr.msk.f32.mxu0 %vm6069_vm9, %v6064_v0 }
 0x339   : > { %5489 = vmatmul.mubr.msk.f32.gmra.mrb[38].mxu0 %vm614_vm0, %v2486_v1 }
 0x33a   : > { %5491 = vmatprep.mubr.msk.f32.mxu0 %vm6069_vm9, %v6064_v0 }
 0x33d   : > { %5492 = vmatmul.mubr.msk.f32.gmra.mrb[40].mxu0 %vm614_vm0, %v2487_v3 }
 0x33e   : > { %5494 = vmatprep.mubr.msk.f32.mxu0 %vm6069_vm9, %v6064_v0 }
 0x341   : > { %5495 = vmatmul.mubr.msk.f32.gmra.mrb[42].mxu0 %vm614_vm0, %v2488_v4 }
 0x342   : > { %5497 = vmatprep.mubr.msk.f32.mxu0 %vm6069_vm9, %v6064_v0 }
 0x345   : > { %5498 = vmatmul.mubr.msk.f32.gmra.mrb[44].mxu0 %vm614_vm0, %v2489_v6 }
 0x346   : > { %5500 = vmatprep.mubr.msk.f32.mxu0 %vm6069_vm9, %v6064_v0 }
 0x349   : > { %5501 = vmatmul.mubr.msk.f32.gmra.mrb[46].mxu0 %vm614_vm0, %v2490_v2  ;;  %v5646_v2 = vpack.c.bf16 %v4928_v58, %v4927_v57 }
 0x34a   : > { %5503 = vmatprep.mubr.msk.f32.mxu0 %vm6069_vm9, %v6064_v0 }
 0x34b   : > { %5647 = vmatpush1.bf16.msra.mxu1 %v5646_v2 }
 0x34c   : > { %5648 = vmatprep.subr.bf16.mxu1 %v6066_v29 }
 0x34d   : > { %5504 = vmatmul.mubr.msk.f32.gmra.mrb[48].mxu0 %vm614_vm0, %v2491_v5  ;;  %vm3085_vm0 = vcmask 1043456  }
 0x3c0   : > { %v2646_v7 = vpop.f32.mrb[0].mxu0 }
 0x3c1   : > { %v5433_v8 = vpop.f32.mrb[1].mxu0 }
 0x3c4   : > { %v2651_v10 = vpop.f32.mrb[2].mxu0 }
 0x3c5   : > { %2796 = vst.msk [vmem:[#allocation4 + $0x8] sm:$0xff] %vm643_vm2, %v2651_v10  ;;  %v5436_v11 = vpop.f32.mrb[3].mxu0  ;;  %v4929_v10 = vld [vmem:[%s8103_s5 + $0x100] sm:$0xff] }
 0x3c6   : > { %v4930_v11 = vld [vmem:[%s8103_s5 + $0x108] sm:$0xff] }
 0x3c8   : > { %v2656_v12 = vpop.f32.mrb[4].mxu0 }
 0x3c9   : > { %2797 = vst.msk [vmem:[#allocation4 + $0x10] sm:$0xff] %vm643_vm2, %v2656_v12  ;;  %v5439_v13 = vpop.f32.mrb[5].mxu0 }
 0x3cc   : > { %v2661_v14 = vpop.f32.mrb[6].mxu0 }
 0x3cd   : > { %2798 = vst.msk [vmem:[#allocation4 + $0x18] sm:$0xff] %vm643_vm2, %v2661_v14  ;;  %v5442_v15 = vpop.f32.mrb[7].mxu0 }
 0x3d0   : > { %v2666_v16 = vpop.f32.mrb[8].mxu0  ;;  %v2820_v50 = vld [vmem:[#allocation4 + $0xb] sm:$0xff] }
 0x3d1   : > { %2799 = vst.msk [vmem:[#allocation4 + $0x20] sm:$0xff] %vm643_vm2, %v2666_v16  ;;  %v5445_v17 = vpop.f32.mrb[9].mxu0  ;;  %v2822_v62 = vmul.f32 %v2820_v50, %v2820_v50 }
 0x3d4   : > { %v2671_v63 = vpop.f32.mrb[10].mxu0  ;;  %v2824_v52 = vld [vmem:[#allocation4 + $0x15] sm:$0xff] }
 0x3d5   : > { %2800 = vst.msk [vmem:[#allocation4 + $0x28] sm:$0xff] %vm643_vm2, %v2671_v63  ;;  %v5448_v19 = vpop.f32.mrb[11].mxu0  ;;  %v2826_v56 = vmul.f32 %v2824_v52, %v2824_v52  ;;  %v2825_v1 = vadd.f32 %v2824_v52, %v2820_v50  ;;  %v4936_v52 = vld [vmem:[%s8103_s5 + $0x138] sm:$0xff] }
 0x3d6   : > { %v5649_v19 = vpack.c.bf16 %v4930_v11, %v4929_v10  ;;  %v5658_v58 = vpack.c.bf16 %v4936_v52, %v4935_v51  ;;  %v2906_v51 = vld [vmem:[%s8102_s4 + $0x1] sm:$0x1] }
 0x3d7   : > { %v2827_v5 = vadd.f32 %v2826_v56, %v2822_v62 }
 0x3d8   : > { %v2676_v21 = vpop.f32.mrb[12].mxu0  ;;  %v2828_v54 = vld [vmem:[#allocation4 + $0x1f] sm:$0xff]  ;;  %5650 = vmatpush1.bf16.msra.mxu1 %v5649_v19 }
 0x3d9   : > { %2801 = vst.msk [vmem:[#allocation4 + $0x30] sm:$0xff] %vm643_vm2, %v2676_v21  ;;  %v5451_v22 = vpop.f32.mrb[13].mxu0  ;;  %v2830_v3 = vmul.f32 %v2828_v54, %v2828_v54  ;;  %v2829_v7 = vadd.f32 %v2828_v54, %v2825_v1  ;;  %5651 = vmatprep.subr.bf16.mxu1 %v6066_v29  ;;  %v4937_v1 = vld [vmem:[%s8103_s5 + $0x140] sm:$0xff] }
 0x3db   : > { %v2831_v14 = vadd.f32 %v2830_v3, %v2827_v5  ;;  %v4938_v3 = vld [vmem:[%s8103_s5 + $0x148] sm:$0xff] }
 0x3dc   : > { %v2681_v23 = vpop.f32.mrb[14].mxu0  ;;  %v5661_v10 = vpack.c.bf16 %v4938_v3, %v4937_v1 }
 0x3dd   : > { %2802 = vst.msk [vmem:[#allocation4 + $0x38] sm:$0xff] %vm643_vm2, %v2681_v23  ;;  %v5454_v24 = vpop.f32.mrb[15].mxu0 }
 0x3de   : > { %v4931_v24 = vld [vmem:[%s8103_s5 + $0x110] sm:$0xff] }
 0x3e0   : > { %v2686_v25 = vpop.f32.mrb[16].mxu0  ;;  %v2832_v60 = vld [vmem:[#allocation4 + $0x29] sm:$0xff] }
 0x3e1   : > { %2803 = vst.msk [vmem:[#allocation4 + $0x40] sm:$0xff] %vm643_vm2, %v2686_v25  ;;  %v5457_v26 = vpop.f32.mrb[17].mxu0  ;;  %v2834_v8 = vmul.f32 %v2832_v60, %v2832_v60  ;;  %v2833_v15 = vadd.f32 %v2832_v60, %v2829_v7  ;;  %v4932_v25 = vld [vmem:[%s8103_s5 + $0x118] sm:$0xff] }
 0x3e2   : > { %v2975_v1 = vld [vmem:[#allocation4 + $0x25] ss:$2 sm:$0xff]  ;;  %v3005_v3 = vld [vmem:[#allocation4 + $0x26] ss:$2 sm:$0xff] }
 0x3e3   : > { %v2835_v21 = vadd.f32 %v2834_v8, %v2831_v14 }
 0x3e4   : > { %v2691_v27 = vpop.f32.mrb[18].mxu0  ;;  %v2836_v6 = vld [vmem:[#allocation4 + $0x33] sm:$0xff] }
 0x3e5   : > { %2804 = vst.msk [vmem:[#allocation4 + $0x48] sm:$0xff] %vm643_vm2, %v2691_v27  ;;  %v5460_v9 = vpop.f32.mrb[19].mxu0  ;;  %v2838_v16 = vmul.f32 %v2836_v6, %v2836_v6  ;;  %v2837_v22 = vadd.f32 %v2836_v6, %v2833_v15 }
 0x3e7   : > { %v2839_v9 = vadd.f32 %v2838_v16, %v2835_v21 }
 0x3e8   : > { %v2696_v30 = vpop.f32.mrb[20].mxu0  ;;  %v2840_v12 = vld [vmem:[#allocation4 + $0x3d] sm:$0xff] }
 0x3e9   : > { %2805 = vst.msk [vmem:[#allocation4 + $0x50] sm:$0xff] %vm643_vm2, %v2696_v30  ;;  %v5463_v32 = vpop.f32.mrb[21].mxu0  ;;  %v2842_v23 = vmul.f32 %v2840_v12, %v2840_v12  ;;  %v2841_v30 = vadd.f32 %v2840_v12, %v2837_v22 }
 0x3ec   : > { %v2701_v34 = vpop.f32.mrb[22].mxu0  ;;  %v2844_v63 = vld [vmem:[#allocation4 + $0x47] sm:$0xff] }
 0x3ed   : > { %2806 = vst.msk [vmem:[#allocation4 + $0x58] sm:$0xff] %vm643_vm2, %v2701_v34  ;;  %v5466_v35 = vpop.f32.mrb[23].mxu0  ;;  %v2846_v32 = vmul.f32 %v2844_v63, %v2844_v63 }
 0x3f0   : > { %v2706_v59 = vpop.f32.mrb[24].mxu0 }
 0x3f1   : > { %v5469_v37 = vpop.f32.mrb[25].mxu0  ;;  %v5652_v59 = vpack.c.bf16 %v4932_v25, %v4931_v24 }
 0x3f2   : > { %v2843_v37 = vadd.f32 %v2842_v23, %v2839_v9 }
 0x3f3   : > { %5653 = vmatpush1.bf16.msra.mxu1 %v5652_v59 }
 0x3f4   : > { %v2711_v38 = vpop.f32.mrb[26].mxu0  ;;  %v2848_v26 = vld [vmem:[#allocation4 + $0x51] sm:$0xff]  ;;  %v2847_v43 = vadd.f32 %v2846_v32, %v2843_v37  ;;  %5654 = vmatprep.subr.bf16.mxu1 %v6066_v29 }
 0x3f5   : > { %2808 = vst.msk [vmem:[#allocation4 + $0x68] sm:$0xff] %vm643_vm2, %v2711_v38  ;;  %v5472_v31 = vpop.f32.mrb[27].mxu0  ;;  %v2845_v38 = vadd.f32 %v2844_v63, %v2841_v30 }
 0x3f6   : > { %v2850_v31 = vmul.f32 %v2848_v26, %v2848_v26 }
 0x3f7   : > { %v2849_v44 = vadd.f32 %v2848_v26, %v2845_v38 }
 0x3f8   : > { %v2716_v33 = vpop.f32.mrb[28].mxu0 }
 0x3f9   : > { %2809 = vst.msk [vmem:[#allocation4 + $0x70] sm:$0xff] %vm643_vm2, %v2716_v33  ;;  %v5475_v40 = vpop.f32.mrb[29].mxu0  ;;  %v4933_v33 = vld [vmem:[%s8103_s5 + $0x120] sm:$0xff] }
 0x3fa   : > { %v4934_v40 = vld [vmem:[%s8103_s5 + $0x128] sm:$0xff] }
 0x3fb   : > { %v5655_v45 = vpack.c.bf16 %v4934_v40, %v4933_v33 }
 0x3fc   : > { %v2721_v41 = vpop.f32.mrb[30].mxu0 }
 0x3fd   : > { %2810 = vst.msk [vmem:[#allocation4 + $0x78] sm:$0xff] %vm643_vm2, %v2721_v41  ;;  %v5478_v42 = vpop.f32.mrb[31].mxu0  ;;  %5656 = vmatpush1.bf16.msra.mxu1 %v5655_v45 }
 0x3fe   : > { %5657 = vmatprep.subr.bf16.mxu1 %v6066_v29 }
 0x400   : > { %v2726_v39 = vpop.f32.mrb[32].mxu0  ;;  %v2852_v35 = vld [vmem:[#allocation4 + $0x6f] sm:$0xff] }
 0x401   : > { %2811 = vst.msk [vmem:[#allocation4 + $0x80] sm:$0xff] %vm643_vm2, %v2726_v39  ;;  %v5481_v47 = vpop.f32.mrb[33].mxu0  ;;  %v2854_v36 = vmul.f32 %v2852_v35, %v2852_v35  ;;  %v2853_v48 = vadd.f32 %v2852_v35, %v2849_v44  ;;  %5659 = vmatpush1.bf16.msra.mxu1 %v5658_v58 }
 0x402   : > { %v2851_v47 = vadd.f32 %v2850_v31, %v2847_v43  ;;  %5660 = vmatprep.subr.bf16.mxu1 %v6066_v29 }
 0x404   : > { %v2731_v53 = vpop.f32.mrb[34].mxu0  ;;  %v2855_v50 = vadd.f32 %v2854_v36, %v2851_v47  ;;  %v2902_v47 = vld [vmem:[%s8102_s4] sm:$0x1] }
 0x405   : > { %2812 = vst.msk [vmem:[#allocation4 + $0x88] sm:$0xff] %vm643_vm2, %v2731_v53  ;;  %v5484_v28 = vpop.f32.mrb[35].mxu0  ;;  %5662 = vmatpush1.bf16.msra.mxu1 %v5661_v10  ;;  %v2977_v10 = vld [vmem:[#allocation4 + $0x35] ss:$2 sm:$0xff] }
 0x406   : > { %5663 = vmatprep.subr.bf16.mxu1 %v6066_v29 }
 0x408   : > { %v2736_v61 = vpop.f32.mrb[36].mxu0  ;;  %v2856_v41 = vld [vmem:[#allocation4 + $0x79] sm:$0xff] }
 0x409   : > { %2813 = vst.msk [vmem:[#allocation4 + $0x90] sm:$0xff] %vm643_vm2, %v2736_v61  ;;  %v5487_v4 = vpop.f32.mrb[37].mxu0  ;;  %v2858_v49 = vmul.f32 %v2856_v41, %v2856_v41  ;;  %v2857_v54 = vadd.f32 %v2856_v41, %v2853_v48 }
 0x40b   : > { %v2859_v60 = vadd.f32 %v2858_v49, %v2855_v50  ;;  %v2943_v50 = vld [vmem:[#allocation4 + $0xc] ss:$2 sm:$0xff] }
 0x40c   : > { %v2741_v13 = vpop.f32.mrb[38].mxu0  ;;  %v2860_v46 = vld [vmem:[#allocation4 + $0x83] sm:$0xff] }
 0x40d   : > { %2814 = vst.msk [vmem:[#allocation4 + $0x98] sm:$0xff] %vm643_vm2, %v2741_v13  ;;  %v5490_v17 = vpop.f32.mrb[39].mxu0  ;;  %v2862_v55 = vmul.f32 %v2860_v46, %v2860_v46  ;;  %v2861_v61 = vadd.f32 %v2860_v46, %v2857_v54  ;;  %v2973_v54 = vld [vmem:[#allocation4 + $0x15] ss:$2 sm:$0xff] }
 0x40f   : > { %v2863_v2 = vadd.f32 %v2862_v55, %v2859_v60  ;;  %v3003_v55 = vld [vmem:[#allocation4 + $0x16] ss:$2 sm:$0xff] }
 0x410   : > { %v2746_v27 = vpop.f32.mrb[40].mxu0  ;;  %v2864_v53 = vld [vmem:[#allocation4 + $0x8d] sm:$0xff] }
 0x411   : > { %2815 = vst.msk [vmem:[#allocation4 + $0xa0] sm:$0xff] %vm643_vm2, %v2746_v27  ;;  %v5493_v34 = vpop.f32.mrb[41].mxu0  ;;  %v2866_v62 = vmul.f32 %v2864_v53, %v2864_v53  ;;  %v2865_v5 = vadd.f32 %v2864_v53, %v2861_v61 }
 0x413   : > { %v2867_v11 = vadd.f32 %v2866_v62, %v2863_v2 }
 0x414   : > { %v2751_v42 = vpop.f32.mrb[42].mxu0  ;;  %v2868_v57 = vld [vmem:[#allocation4 + $0x97] sm:$0xff] }
 0x415   : > { %2816 = vst.msk [vmem:[#allocation4 + $0xa8] sm:$0xff] %vm643_vm2, %v2751_v42  ;;  %v5496_v39 = vpop.f32.mrb[43].mxu0  ;;  %v2870_v7 = vmul.f32 %v2868_v57, %v2868_v57  ;;  %v2869_v12 = vadd.f32 %v2868_v57, %v2865_v5  ;;  %v2945_v57 = vld [vmem:[#allocation4 + $0x1c] ss:$2 sm:$0xff] }
 0x417   : > { %v2871_v16 = vadd.f32 %v2870_v7, %v2867_v11  ;;  %v3007_v11 = vld [vmem:[#allocation4 + $0x36] ss:$2 sm:$0xff] }
 0x418   : > { %v2756_v28 = vpop.f32.mrb[44].mxu0 }
 0x419   : > { %2817 = vst.msk [vmem:[#allocation4 + $0xb0] sm:$0xff] %vm643_vm2, %v2756_v28  ;;  %v5499_v56 = vpop.f32.mrb[45].mxu0  ;;  %v2910_v28 = vld [vmem:[#allocation4 + $0xb] ss:$2 sm:$0xff] }
 0x41a   : > { %v2912_v56 = vld [vmem:[#allocation4 + $0x1b] ss:$2 sm:$0xff] }
 0x41c   : > { %v2872_v4 = vld [vmem:[#allocation4 + $0xa1] sm:$0xff]  ;;  %v2761_v6 = vpop.f32.mrb[46].mxu0 }
 0x41d   : > { %2818 = vst.msk [vmem:[#allocation4 + $0xb8] sm:$0xff] %vm643_vm2, %v2761_v6  ;;  %v5502_v8 = vpop.f32.mrb[47].mxu0  ;;  %v2874_v13 = vmul.f32 %v2872_v4, %v2872_v4  ;;  %v2873_v17 = vadd.f32 %v2872_v4, %v2869_v12  ;;  %v2914_v4 = vld [vmem:[#allocation4 + $0x2b] ss:$2 sm:$0xff] }
 0x41e   : > { %v2947_v8 = vld [vmem:[#allocation4 + $0x2c] ss:$2 sm:$0xff] }
 0x41f   : > { %v2875_v21 = vadd.f32 %v2874_v13, %v2871_v16  ;;  %v2916_v16 = vld [vmem:[#allocation4 + $0x3b] ss:$2 sm:$0xff] }
 0x420   : > { %v2876_v14 = vld [vmem:[#allocation4 + $0xab] sm:$0xff]  ;;  %v2766_v15 = vpop.f32.mrb[48].mxu0 }
 0x421   : > { %v2878_v63 = vmul.f32 %v2876_v14, %v2876_v14  ;;  %v5505_v19 = vpop.f32.mrb[49].mxu0  ;;  %v2877_v22 = vadd.f32 %v2876_v14, %v2873_v17  ;;  %v2918_v17 = vld [vmem:[#allocation4 + $0x4b] ss:$2 sm:$0x3] }
 0x423   : > { %v2879_v24 = vadd.f32 %v2878_v63, %v2875_v21 }
 0x424   : > { %v2880_v23 = vld [vmem:[#allocation4 + $0xb5] sm:$0xff] }
 0x425   : > { %v2881_v25 = vadd.f32 %v2880_v23, %v2877_v22  ;;  %v2882_v26 = vmul.f32 %v2880_v23, %v2880_v23 }
 0x427   : > { %v2883_v27 = vadd.f32 %v2882_v26, %v2879_v24  ;;  %v2884_v9 = vsel %vm643_vm2, %v2881_v25, 0.0 }
 0x428   : > { %v2885_v30 = vrot.slane %v2884_v9, 4 }
 0x429   : > { %v2892_v32 = vsel %vm643_vm2, %v2883_v27, 0.0 }
 0x42a   : > { %v2886_v34 = vadd.f32 %v2885_v30, %v2884_v9  ;;  %v2893_v35 = vrot.slane %v2892_v32, 4 }
 0x42c   : > { %v2887_v59 = vrot.slane %v2886_v34, 2  ;;  %v2894_v37 = vadd.f32 %v2893_v35, %v2892_v32 }
 0x42e   : > { %v2888_v38 = vadd.f32 %v2887_v59, %v2886_v34  ;;  %v2895_v31 = vrot.slane %v2894_v37, 2 }
 0x430   : > { %v2889_v33 = vrot.slane %v2888_v38, 1  ;;  %v2896_v40 = vadd.f32 %v2895_v31, %v2894_v37 }
 0x432   : > { %v2890_v41 = vadd.f32 %v2889_v33, %v2888_v38  ;;  %v2897_v42 = vrot.slane %v2896_v40, 1 }
 0x434   : > { %v2891_v43 = vmul.f32 0.0078125, %v2890_v41  ;;  %v2898_v44 = vadd.f32 %v2897_v42, %v2896_v40 }
 0x436   : > { %v2899_v36 = vmul.f32 0.0078125, %v2898_v44  ;;  %v2900_v39 = vmul.f32 %v2891_v43, %v2891_v43 }
 0x438   : > { %v2901_v46 = vsub.f32 %v2899_v36, %v2900_v39 }
 0x43a   : > { %v2903_v45 = vadd.f32 1e-05, %v2901_v46 }
 0x43c   : > { %6034 = vrsqrt.f32 %v2903_v45 }
 0x446   : > { %v6035_v48 = vpop.eup %6034 }
 0x447   : > { %v2905_v49 = vmul.f32 %v6035_v48, %v2902_v47  ;;  %v2949_v47 = vld [vmem:[#allocation4 + $0x3c] ss:$2 sm:$0xff] }
 0x449   : > { %v2907_v52 = vmul.f32 %v2905_v49, %v2891_v43  ;;  %v7137_v53 = vrot.slane %v2905_v49, %v6502_v20 }
 0x44b   : > { %v2908_v58 = vsub.f32 %v2906_v51, %v2907_v52  ;;  %v2923_v60 = vmul.f32 %v7137_v53, %v2910_v28  ;;  %v2952_v61 = vmul.f32 %v2943_v50, %v7137_v53  ;;  %v2982_v62 = vmul.f32 %v2973_v54, %v7137_v53  ;;  %v2951_v28 = vld [vmem:[#allocation4 + $0x4c] ss:$2 sm:$0x3] }
 0x44c   : > { %v3012_v6 = vmul.f32 %v3003_v55, %v7137_v53  ;;  %v2924_v2 = vmul.f32 %v7137_v53, %v2912_v56  ;;  %v2953_v5 = vmul.f32 %v2945_v57, %v7137_v53  ;;  %v2983_v7 = vmul.f32 %v2975_v1, %v7137_v53  ;;  %v2979_v57 = vld [vmem:[#allocation4 + $0x45] ss:$2 sm:$0xff]  ;;  %v2981_v1 = vld [vmem:[#allocation4 + $0x55] ss:$2 sm:$0x3] }
 0x44d   : > { %v7147_v12 = vrot.slane %v2908_v58, %v6502_v20  ;;  %v3013_v13 = vmul.f32 %v3005_v3, %v7137_v53  ;;  %v2925_v14 = vmul.f32 %v7137_v53, %v2914_v4  ;;  %v2954_v15 = vmul.f32 %v2947_v8, %v7137_v53  ;;  %v3009_v3 = vld [vmem:[#allocation4 + $0x46] ss:$2 sm:$0xff] }
 0x44e   : > { %v2984_v63 = vmul.f32 %v2977_v10, %v7137_v53  ;;  %v3014_v19 = vmul.f32 %v3007_v11, %v7137_v53  ;;  %v2926_v21 = vmul.f32 %v7137_v53, %v2916_v16  ;;  %v2927_v22 = vmul.f32 %v7137_v53, %v2918_v17  ;;  %v3011_v17 = vld [vmem:[#allocation4 + $0x56] ss:$2 sm:$0x3] }
 0x44f   : > { %v2932_v23 = vadd.f32 %v7147_v12, %v2923_v60  ;;  %v2957_v24 = vadd.f32 %v2952_v61, %v7147_v12  ;;  %v2987_v25 = vadd.f32 %v2982_v62, %v7147_v12  ;;  %v3017_v26 = vadd.f32 %v3012_v6, %v7147_v12 }
 0x450   : > { %v2933_v27 = vadd.f32 %v7147_v12, %v2924_v2  ;;  %v2958_v9 = vadd.f32 %v2953_v5, %v7147_v12  ;;  %v2988_v30 = vadd.f32 %v2983_v7, %v7147_v12  ;;  %v3018_v32 = vadd.f32 %v3013_v13, %v7147_v12 }
 0x451   : > { %v2937_v34 = vmax.f32 %v2932_v23, 0.0  ;;  %v2962_v35 = vmax.f32 %v2957_v24, 0.0  ;;  %v2992_v59 = vmax.f32 %v2987_v25, 0.0  ;;  %v3022_v37 = vmax.f32 %v3017_v26, 0.0  ;;  %v3101_v23 = vld [vmem:[#allocation4 + $0x6f] ss:$2 sm:$0xff] }
 0x452   : > { %v2938_v38 = vmax.f32 %v2933_v27, 0.0  ;;  %v2963_v31 = vmax.f32 %v2958_v9, 0.0  ;;  %v2993_v33 = vmax.f32 %v2988_v30, 0.0  ;;  %v3023_v40 = vmax.f32 %v3018_v32, 0.0 }
 0x453   : > { %v2967_v41 = vmax.f32 %v2937_v34, %v2962_v35  ;;  %v2934_v42 = vadd.f32 %v7147_v12, %v2925_v14  ;;  %v2959_v43 = vadd.f32 %v2954_v15, %v7147_v12  ;;  %v2989_v44 = vadd.f32 %v2984_v63, %v7147_v12  ;;  %v3126_v35 = vld [vmem:[#allocation4 + $0x70] ss:$2 sm:$0xff] }
 0x454   : > { %v2968_v36 = vmax.f32 %v2938_v38, %v2963_v31  ;;  %v3019_v39 = vadd.f32 %v3014_v19, %v7147_v12  ;;  %v2935_v46 = vadd.f32 %v7147_v12, %v2926_v21  ;;  %v2936_v45 = vadd.f32 %v7147_v12, %v2927_v22 }
 0x455   : > { %v2997_v48 = vmax.f32 %v2967_v41, %v2992_v59  ;;  %v2939_v49 = vmax.f32 %v2934_v42, 0.0  ;;  %v2964_v51 = vmax.f32 %v2959_v43, 0.0  ;;  %v2994_v52 = vmax.f32 %v2989_v44, 0.0  ;;  %v3156_v59 = vld [vmem:[#allocation4 + $0x79] ss:$2 sm:$0xff] }
 0x456   : > { %v2998_v50 = vmax.f32 %v2968_v36, %v2993_v33  ;;  %v3024_v54 = vmax.f32 %v3019_v39, 0.0  ;;  %v2940_v55 = vmax.f32 %v2935_v46, 0.0  ;;  %v2941_v56 = vmax.f32 %v2936_v45, 0.0  ;;  %v3103_v36 = vld [vmem:[#allocation4 + $0x7f] ss:$2 sm:$0xff] }
 0x457   : > { %v7170_v58 = vmax.f32 %v2997_v48, %v3022_v37  ;;  %v2969_v60 = vmax.f32 %v2939_v49, %v2964_v51  ;;  %v2955_v61 = vmul.f32 %v2949_v47, %v7137_v53  ;;  %v2956_v62 = vmul.f32 %v2951_v28, %v7137_v53 }
 0x458   : > { %v7174_v4 = vmax.f32 %v2998_v50, %v3023_v40  ;;  %v2985_v6 = vmul.f32 %v2979_v57, %v7137_v53  ;;  %v2986_v2 = vmul.f32 %v2981_v1, %v7137_v53  ;;  %v3015_v5 = vmul.f32 %v3009_v3, %v7137_v53  ;;  %v3186_v40 = vld [vmem:[#allocation4 + $0x7a] ss:$2 sm:$0xff] }
 0x459   : > { %3038 = vrot.lane.b32.xlu0 %v7170_v58, %s6067_s3  ;;  %v3043_v7 = vrot.slane %v7170_v58, 6  ;;  %v2999_v8 = vmax.f32 %v2969_v60, %v2994_v52  ;;  %v2960_v10 = vadd.f32 %v2955_v61, %v7147_v12  ;;  %v2961_v11 = vadd.f32 %v2956_v62, %v7147_v12  ;;  %v3128_v52 = vld [vmem:[#allocation4 + $0x80] ss:$2 sm:$0xff]  ;;  %v3158_v62 = vld [vmem:[#allocation4 + $0x89] ss:$2 sm:$0xff] }
 0x45a   : > { %v3052_v13 = vrot.slane %v7174_v4, 4  ;;  %v3060_v14 = vrot.slane %v7174_v4, 2  ;;  %v2990_v15 = vadd.f32 %v2985_v6, %v7147_v12  ;;  %v2991_v16 = vadd.f32 %v2986_v2, %v7147_v12 }
 0x45b   : > { %3046 = vst.msk [vmem:[#allocation5 + $0x8] sm:$0x3c] %vm3045_vm12, %v3043_v7  ;;  %v7189_v63 = vmax.f32 %v2999_v8, %v3024_v54  ;;  %v2965_v19 = vmax.f32 %v2960_v10, 0.0  ;;  %v2966_v21 = vmax.f32 %v2961_v11, 0.0  ;;  %v3016_v22 = vmul.f32 %v3011_v17, %v7137_v53  ;;  %v3188_v11 = vld [vmem:[#allocation4 + $0x8a] ss:$2 sm:$0xff] }
 0x45c   : > { %3063 = vst.msk [vmem:[#allocation5 + $0x18] sm:$0xf] %vm3062_vm13, %v3060_v14  ;;  %3053 = vrot.lane.b32.xlu1 %v3052_v13, %s6067_s3  ;;  %v2995_v24 = vmax.f32 %v2990_v15, 0.0  ;;  %v2996_v25 = vmax.f32 %v2991_v16, 0.0  ;;  %v3020_v26 = vadd.f32 %v3015_v5, %v7147_v12  ;;  %v3110_v27 = vmul.f32 %v3101_v23, %v7137_v53  ;;  %v3105_v13 = vld [vmem:[#allocation4 + $0x8f] ss:$2 sm:$0xff] }
 0x45d   : > { %v3073_v9 = vrot.slane %v7189_v63, 6  ;;  %3068 = vrot.lane.b32.xlu0 %v7189_v63, %s6067_s3  ;;  %v2970_v30 = vmax.f32 %v2940_v55, %v2965_v19  ;;  %v2971_v32 = vmax.f32 %v2941_v56, %v2966_v21  ;;  %v3021_v34 = vadd.f32 %v3016_v22, %v7147_v12  ;;  %v3130_v19 = vld [vmem:[#allocation4 + $0x90] ss:$2 sm:$0xff]  ;;  %v3160_v21 = vld [vmem:[#allocation4 + $0x99] ss:$2 sm:$0xff] }
 0x45e   : > { %v3025_v37 = vmax.f32 %v3020_v26, 0.0  ;;  %v3115_v38 = vadd.f32 %v3110_v27, %v7147_v12  ;;  %v3135_v31 = vmul.f32 %v3126_v35, %v7137_v53  ;;  %v3165_v33 = vmul.f32 %v3156_v59, %v7137_v53  ;;  %v3190_v22 = vld [vmem:[#allocation4 + $0x9a] ss:$2 sm:$0xff] }
 0x45f   : > { %3075 = vst.msk [vmem:[#allocation5 + $0x18] sm:$0xc0] %vm3035_vm14, %v3073_v9  ;;  %v3000_v41 = vmax.f32 %v2970_v30, %v2995_v24  ;;  %v3001_v42 = vmax.f32 %v2971_v32, %v2996_v25  ;;  %v3026_v43 = vmax.f32 %v3021_v34, 0.0  ;;  %v3195_v44 = vmul.f32 %v3186_v40, %v7137_v53 }
 0x460   : > { %3076 = vst.msk [vmem:[#allocation5 + $0x28] sm:$0x3] %vm662_vm3, %v3073_v9  ;;  %v3120_v39 = vmax.f32 %v3115_v38, 0.0  ;;  %v3140_v46 = vadd.f32 %v3135_v31, %v7147_v12  ;;  %v3170_v45 = vadd.f32 %v3165_v33, %v7147_v12  ;;  %v3111_v47 = vmul.f32 %v3103_v36, %v7137_v53 }
 0x461   : > { %v7209_v48 = vmax.f32 %v3000_v41, %v3025_v37  ;;  %v7211_v49 = vmax.f32 %v3001_v42, %v3026_v43  ;;  %v3200_v51 = vadd.f32 %v3195_v44, %v7147_v12  ;;  %v3136_v55 = vmul.f32 %v3128_v52, %v7137_v53  ;;  %v3107_v43 = vld [vmem:[#allocation4 + $0x9f] ss:$2 sm:$0xff] }
 0x462   : > { %v3145_v28 = vmax.f32 %v3140_v46, 0.0  ;;  %v3175_v50 = vmax.f32 %v3170_v45, 0.0  ;;  %v3116_v54 = vadd.f32 %v3111_v47, %v7147_v12  ;;  %v3166_v2 = vmul.f32 %v3158_v62, %v7137_v53  ;;  %v3315_v31 = vld [vmem:[#allocation5 + $0x8] sm:$0xfe]  ;;  %v3132_v45 = vld [vmem:[#allocation4 + $0xa0] ss:$2 sm:$0xff] }
 0x463   : > { %v3080_v56 = vrot.slane %v7209_v48, 6  ;;  %v3081_v57 = vrot.slane %v7211_v49, 6  ;;  %v3086_v60 = vrot.slane %v7209_v48, 4  ;;  %v3087_v61 = vrot.slane %v7211_v49, 4 }
 0x464   : > { %v3095_v1 = vrot.slane %v7209_v48, 2  ;;  %v3150_v3 = vmax.f32 %v3120_v39, %v3145_v28  ;;  %v3205_v6 = vmax.f32 %v3200_v51, 0.0  ;;  %v3121_v8 = vmax.f32 %v3116_v54, 0.0  ;;  %v3192_v54 = vld [vmem:[#allocation4 + $0xaa] ss:$2 sm:$0xff] }
 0x465   : > { %v3082_v5 = vsel %vm3079_vm15, %v3080_v56, %v3081_v57  ;;  %v3088_v7 = vsel %vm3085_vm0, %v3086_v60, %v3087_v61  ;;  %v3141_v10 = vadd.f32 %v3136_v55, %v7147_v12  ;;  %v3171_v15 = vadd.f32 %v3166_v2, %v7147_v12  ;;  %v3109_v61 = vld [vmem:[#allocation4 + $0xaf] ss:$2 sm:$0x3] }
 0x466   : > { %3084 = vst.msk [vmem:[#allocation5 + $0x40] sm:$0xf] %vm3062_vm13, %v3082_v5  ;;  %3089 = vrot.lane.b32.xlu1 %v3088_v7, %s6067_s3  ;;  %v3180_v14 = vmax.f32 %v3150_v3, %v3175_v50  ;;  %v3196_v16 = vmul.f32 %v3188_v11, %v7137_v53  ;;  %v3112_v17 = vmul.f32 %v3105_v13, %v7137_v53  ;;  %v7240_v38 = vld [vmem:[#allocation5 + $0x18] sm:$0xff]  ;;  %v3367_v47 = vrot.slane %v3315_v31, 1  ;;  %v3162_v50 = vld [vmem:[#allocation4 + $0xa9] ss:$2 sm:$0xff] }
 0x467   : > { %v3146_v23 = vmax.f32 %v3141_v10, 0.0  ;;  %v3137_v24 = vmul.f32 %v3130_v19, %v7137_v53  ;;  %v3167_v25 = vmul.f32 %v3160_v21, %v7137_v53  ;;  %v3197_v26 = vmul.f32 %v3190_v22, %v7137_v53  ;;  %v3134_v5 = vld [vmem:[#allocation4 + $0xb0] ss:$2 sm:$0x3]  ;;  %v4939_v19 = vld [vmem:[%s8103_s5 + $0x150] sm:$0xff]  ;;  %v4940_v21 = vld [vmem:[%s8103_s5 + $0x158] sm:$0xff] }
 0x468   : > { %v7233_v27 = vmax.f32 %v3180_v14, %v3205_v6  ;;  %v3176_v9 = vmax.f32 %v3171_v15, 0.0  ;;  %v3201_v30 = vadd.f32 %v3196_v16, %v7147_v12  ;;  %v3117_v32 = vadd.f32 %v3112_v17, %v7147_v12  ;;  %v3164_v13 = vld [vmem:[#allocation4 + $0xb9] ss:$2 sm:$0x3] }
 0x469   : > { %v3151_v34 = vmax.f32 %v3121_v8, %v3146_v23  ;;  %v3142_v35 = vadd.f32 %v3137_v24, %v7147_v12  ;;  %v3172_v59 = vadd.f32 %v3167_v25, %v7147_v12  ;;  %v3202_v37 = vadd.f32 %v3197_v26, %v7147_v12  ;;  %v3194_v26 = vld [vmem:[#allocation4 + $0xba] ss:$2 sm:$0x3] }
 0x46a   : > { %v3219_v33 = vrot.slane %v7233_v27, 4  ;;  %v3224_v40 = vrot.slane %v7233_v27, 2  ;;  %v3206_v41 = vmax.f32 %v3201_v30, 0.0  ;;  %v3122_v42 = vmax.f32 %v3117_v32, 0.0 }
 0x46b   : > { %v3181_v44 = vmax.f32 %v3151_v34, %v3176_v9  ;;  %v3147_v36 = vmax.f32 %v3142_v35, 0.0  ;;  %v3177_v39 = vmax.f32 %v3172_v59, 0.0  ;;  %v3207_v46 = vmax.f32 %v3202_v37, 0.0  ;;  %v4941_v35 = vld [vmem:[%s8103_s5 + $0x160] sm:$0xff] }
 0x46c   : > { %3226 = vst.msk [vmem:[#allocation5 + $0x48] sm:$0xc0] %vm3035_vm14, %v3224_v40  ;;  %3220 = vrot.lane.b32.xlu0 %v3219_v33, %s6067_s3  ;;  %v3368_v51 = vrot.slane %v7240_v38, 1  ;;  %v3113_v52 = vmul.f32 %v3107_v43, %v7137_v53  ;;  %v3138_v28 = vmul.f32 %v3132_v45, %v7137_v53  ;;  %v3168_v57 = vmul.f32 %v3162_v50, %v7137_v53 }
 0x46d   : > { %3227 = vst.msk [vmem:[#allocation5 + $0x58] sm:$0x3] %vm662_vm3, %v3224_v40  ;;  %v7250_v55 = vmax.f32 %v3181_v44, %v3206_v41  ;;  %v3152_v56 = vmax.f32 %v3122_v42, %v3147_v36  ;;  %v3198_v60 = vmul.f32 %v3192_v54, %v7137_v53  ;;  %v3114_v2 = vmul.f32 %v3109_v61, %v7137_v53 }
 0x46e   : > { %v3369_v62 = vsel %vm3363_vm1, %v3367_v47, %v3368_v51  ;;  %v3118_v3 = vadd.f32 %v3113_v52, %v7147_v12  ;;  %v3143_v6 = vadd.f32 %v3138_v28, %v7147_v12  ;;  %v3173_v10 = vadd.f32 %v3168_v57, %v7147_v12  ;;  %v4943_v47 = vld [vmem:[%s8103_s5 + $0x170] sm:$0xff] }
 0x46f   : > { %v3236_v7 = vrot.slane %v7250_v55, 6  ;;  %3232 = vrot.lane.b32.xlu1 %v7250_v55, %s6067_s3  ;;  %v3182_v8 = vmax.f32 %v3152_v56, %v3177_v39  ;;  %4945 = vmatprep.mubr.msk.f32.mxu1 %vm643_vm2, %v3369_v62  ;;  %v3203_v11 = vadd.f32 %v3198_v60, %v7147_v12  ;;  %v3119_v16 = vadd.f32 %v3114_v2, %v7147_v12  ;;  %v3314_v2 = vld [vmem:[#allocation5] sm:$0xfe] }
 0x470   : > { %v3123_v14 = vmax.f32 %v3118_v3, 0.0  ;;  %v3148_v15 = vmax.f32 %v3143_v6, 0.0  ;;  %v3139_v17 = vmul.f32 %v3134_v5, %v7137_v53  ;;  %v3096_v22 = vrot.slane %v7211_v49, 2  ;;  %v4942_v49 = vld [vmem:[%s8103_s5 + $0x168] sm:$0xff] }
 0x471   : > { %v3212_v23 = vmax.f32 %v3182_v8, %v3207_v46  ;;  %v3178_v24 = vmax.f32 %v3173_v10, 0.0  ;;  %v3169_v25 = vmul.f32 %v3164_v13, %v7137_v53  ;;  %3238 = vst.msk [vmem:[#allocation5 + $0x58] sm:$0xf0] %vm3050_vm5, %v3236_v7  ;;  %v3124_v30 = vmax.f32 %v3119_v16, 0.0  ;;  %v3290_v7 = vld [vmem:[%s8103_s5] sm:$0xff]  ;;  %v3291_v8 = vld [vmem:[%s8103_s5 + $0x8] sm:$0xff] }
 0x472   : > { %v3153_v9 = vmax.f32 %v3123_v14, %v3148_v15  ;;  %v3144_v32 = vadd.f32 %v3139_v17, %v7147_v12  ;;  %v3199_v34 = vmul.f32 %v3194_v26, %v7137_v53  ;;  %v5664_v33 = vpack.c.bf16 %v4940_v21, %v4939_v19  ;;  %v7339_v17 = vld [vmem:[#allocation5 + $0x38] sm:$0xff] }
 0x473   : > { %v3244_v59 = vrot.slane %v3212_v23, 4  ;;  %v3249_v37 = vrot.slane %v3212_v23, 2  ;;  %v3174_v31 = vadd.f32 %v3169_v25, %v7147_v12  ;;  %v3208_v41 = vmax.f32 %v3203_v11, 0.0  ;;  %v3292_v21 = vld [vmem:[%s8103_s5 + $0x10] sm:$0xff] }
 0x474   : > { %v3183_v40 = vmax.f32 %v3153_v9, %v3178_v24  ;;  %v3149_v42 = vmax.f32 %v3144_v32, 0.0  ;;  %v3204_v43 = vadd.f32 %v3199_v34, %v7147_v12  ;;  %5665 = vmatpush1.bf16.msra.mxu1 %v5664_v33  ;;  %v3033_v53 = vrot.slane %v7170_v58, 2  ;;  %v4944_v12 = vld [vmem:[%s8103_s5 + $0x178] sm:$0xff] }
 0x475   : > { %3251 = vst.msk [vmem:[#allocation5 + $0x68] sm:$0x3c] %vm3045_vm12, %v3249_v37  ;;  %3245 = vrot.lane.b32.xlu0 %v3244_v59, %s6067_s3  ;;  %v5667_v44 = vpack.c.bf16 %v4942_v49, %v4941_v35  ;;  %v3179_v46 = vmax.f32 %v3174_v31, 0.0  ;;  %5666 = vmatprep.subr.bf16.mxu1 %v6066_v29  ;;  %v3065_v45 = vrot.slane %v7189_v63, 2  ;;  %v3048_v58 = vrot.slane %v7174_v4, 6  ;;  %v3294_v35 = vld [vmem:[%s8103_s5 + $0x20] sm:$0xff] }
 0x476   : > { %v3213_v36 = vmax.f32 %v3183_v40, %v3208_v41  ;;  %v3154_v39 = vmax.f32 %v3124_v30, %v3149_v42  ;;  %3036 = vst.msk [vmem:[#allocation5 + $0x10] sm:$0xc0] %vm3035_vm14, %v3033_v53  ;;  %v3097_v52 = vsel %vm3094_vm6, %v3095_v1, %v3096_v22  ;;  %v3209_v28 = vmax.f32 %v3204_v43, 0.0  ;;  %v3293_v22 = vld [vmem:[%s8103_s5 + $0x18] sm:$0xff]  ;;  %v7370_v59 = vld [vmem:[#allocation5 + $0x48] sm:$0xff]  ;;  %v3296_v42 = vld [vmem:[%s8103_s5 + $0x30] sm:$0xff] }
 0x477   : > { %3037 = vst.msk [vmem:[#allocation5 + $0x20] sm:$0x3] %vm662_vm3, %v3033_v53  ;;  %v5670_v50 = vpack.c.bf16 %v4944_v12, %v4943_v47  ;;  %v3216_v54 = vrot.slane %v7233_v27, 6  ;;  %v3229_v4 = vrot.slane %v7250_v55, 2  ;;  %v3240_v56 = vrot.slane %v3212_v23, 6  ;;  %v3297_v43 = vld [vmem:[%s8103_s5 + $0x38] sm:$0xff] }
 0x478   : > { %3259 = vrot.lane.b32.xlu1 %v3213_v36, %s6067_s3  ;;  %v3184_v63 = vmax.f32 %v3154_v39, %v3179_v46  ;;  %3067 = vst.msk [vmem:[#allocation5 + $0x30] sm:$0x3c] %vm3045_vm12, %v3065_v45  ;;  %5668 = vmatpush1.bf16.msra.mxu1 %v5667_v44  ;;  %v3254_v48 = vrot.slane %v3213_v36, 2  ;;  %v3267_v57 = vrot.slane %v3213_v36, 6  ;;  %v3364_v10 = vrot.slane %v3314_v2, 1  ;;  %v7386_v36 = vld [vmem:[#allocation5 + $0x58] sm:$0xff] }
 0x479   : > { %3099 = vst.msk [vmem:[#allocation5 + $0x28] sm:$0xf0] %vm3050_vm5, %v3097_v52  ;;  %3051 = vst.msk [vmem:[#allocation5 + $0x20] sm:$0xf0] %vm3050_vm5, %v3048_v58  ;;  %5669 = vmatprep.subr.bf16.mxu1 %v6066_v29  ;;  %v5673_v15 = vpack.c.bf16 %v3291_v8, %v3290_v7  ;;  %v3376_v30 = vrot.slane %v7339_v17, 1  ;;  %v5676_v34 = vpack.c.bf16 %v3293_v22, %v3292_v21  ;;  %v3380_v41 = vrot.slane %v7370_v59, 1 }
 0x47a   : > { %v3214_v1 = vmax.f32 %v3184_v63, %v3209_v28  ;;  %3218 = vst.msk [vmem:[#allocation5 + $0x60] sm:$0x3c] %vm3045_vm12, %v3216_v54  ;;  %vm3092_vm12 = vcmask 1046018   ;;  %v7390_v46 = vld [vmem:[#allocation5 + $0x40] sm:$0xff]  ;;  %v5682_v47 = vpack.c.bf16 %v3297_v43, %v3296_v42  ;;  %v3384_v52 = vrot.slane %v7386_v36, 1  ;;  %v3298_v63 = vld [vmem:[%s8103_s5 + $0x40] sm:$0xff] }
 0x47b   : > { %3231 = vst.msk [vmem:[#allocation5 + $0x70] sm:$0xf] %vm3062_vm13, %v3229_v4  ;;  %v3381_v58 = vsel %vm3363_vm1, %v3376_v30, %v3380_v41  ;;  %v3299_v28 = vld [vmem:[%s8103_s5 + $0x48] sm:$0xff]  ;;  %v3306_v43 = vld [vmem:[%s8103_s5 + $0x80] sm:$0xff] }
 0x47c   : > { %3242 = vst.msk [vmem:[#allocation5 + $0x70] sm:$0xc0] %vm3035_vm14, %v3240_v56  ;;  %v3255_v60 = vrot.slane %v3214_v1, 2  ;;  %v3268_v61 = vrot.slane %v3214_v1, 6  ;;  %3261 = vrot.lane.b32.xlu0 %v3214_v1, %s6067_s3  ;;  %5671 = vmatpush1.bf16.msra.mxu1 %v5670_v50  ;;  %v3378_v50 = vrot.slane %v7390_v46, 1  ;;  %v7409_v54 = vld [vmem:[#allocation5 + $0x68] sm:$0xff]  ;;  %v5685_v1 = vpack.c.bf16 %v3299_v28, %v3298_v63 }
 0x47d   : > { %3243 = vst.msk [vmem:[#allocation5 + $0x80] sm:$0x3] %vm662_vm3, %v3240_v56  ;;  %5672 = vmatprep.subr.bf16.mxu1 %v6066_v29  ;;  %v3303_v21 = vld [vmem:[%s8103_s5 + $0x68] sm:$0xff] }
 0x47e   : > { %v3256_v27 = vsel %vm3094_vm6, %v3254_v48, %v3255_v60  ;;  %v3269_v55 = vsel %vm3079_vm15, %v3267_v57, %v3268_v61  ;;  %v3385_v60 = vsel %vm3363_vm1, %v3380_v41, %v3384_v52  ;;  %v3388_v61 = vrot.slane %v7409_v54, 1 }
 0x47f   : > { %3271 = vst.msk [vmem:[#allocation5 + $0x78] sm:$0xf] %vm3062_vm13, %v3269_v55  ;;  %v3301_v55 = vld [vmem:[%s8103_s5 + $0x58] sm:$0xff] }
 0x480   : > { %3258 = vst.msk [vmem:[#allocation5 + $0x80] sm:$0xf0] %vm3050_vm5, %v3256_v27  ;;  %v7325_v5 = vld [vmem:[#allocation5 + $0x28] sm:$0xff]  ;;  %v3300_v27 = vld [vmem:[%s8103_s5 + $0x50] sm:$0xff] }
 0x481   : > { %v3372_v13 = vrot.slane %v7325_v5, 1 }
 0x483   : > { %v3373_v9 = vsel %vm3363_vm1, %v3368_v51, %v3372_v13  ;;  %v3295_v51 = vld [vmem:[%s8103_s5 + $0x28] sm:$0xff]  ;;  %v3377_v31 = vsel %vm3363_vm1, %v3372_v13, %v3376_v30  ;;  %v5688_v13 = vpack.c.bf16 %v3301_v55, %v3300_v27  ;;  %v3310_v55 = vld [vmem:[%s8103_s5 + $0xa0] sm:$0xff] }
 0x484   : > { %v5679_v33 = vpack.c.bf16 %v3295_v51, %v3294_v35  ;;  %v3305_v35 = vld [vmem:[%s8103_s5 + $0x78] sm:$0xff]  ;;  %v3317_v51 = vld [vmem:[#allocation5 + $0x98] sm:$0x1] }
 0x485   : > { %v3400_v42 = vrot.slane %v3317_v51, 1  ;;  %v4968_v51 = vld [vmem:[%s8103_s5 + $0x1a8] sm:$0xff] }
 0x4cb   : > { %v3039_v62 = vpop.permute.xlu0 %3038 }
 0x4cc   : > { %3042 = vst.msk [vmem:[#allocation5 + $0x10] sm:$0xf] %vm3041_vm7, %v3039_v62 }
 0x4ce   : > { %v3054_v3 = vpop.permute.xlu1 %3053 }
 0x4cf   : > { %3057 = vst.msk [vmem:[#allocation5 + $0x10] sm:$0xc0] %vm3056_vm8, %v3054_v3  ;;  %v3069_v6 = vpop.permute.xlu0 %3068 }
 0x4d0   : > { %3059 = vst.msk [vmem:[#allocation5 + $0x20] sm:$0x3] %vm3058_vm10, %v3054_v3  ;;  %v7428_v3 = vld [vmem:[#allocation5 + $0x78] sm:$0xff] }
 0x4d1   : > { %3072 = vst.msk [vmem:[#allocation5 + $0x20] sm:$0xf0] %vm3071_vm11, %v3069_v6 }
 0x4d6   : > { %v7333_v11 = vld [vmem:[#allocation5 + $0x10] sm:$0xff] }
 0x4d7   : > { %v3365_v14 = vrot.slane %v7333_v11, 1  ;;  %v3702_v23 = vrot.slane %v7333_v11, 2 }
 0x4d8   : > { %v7337_v16 = vld [vmem:[#allocation5 + $0x20] sm:$0xff]  ;;  %v3090_v19 = vpop.permute.xlu1 %3089 }
 0x4d9   : > { %v3707_v24 = vrot.slane %v7337_v16, 2  ;;  %3093 = vst.msk [vmem:[#allocation5 + $0x30] sm:$0x3c] %vm3092_vm12, %v3090_v19  ;;  %v3366_v25 = vsel %vm3363_vm1, %v3364_v10, %v3365_v14  ;;  %v3370_v26 = vrot.slane %v7337_v16, 1  ;;  %v3302_v19 = vld [vmem:[%s8103_s5 + $0x60] sm:$0xff] }
 0x4da   : > { %3494 = vmatmul.mubr.f32.vlgmr.msra.gmra.mrb[0].mxu1 %v3366_v25 }
 0x4db   : > { %v7359_v32 = vsel %vm3094_vm6, %v3702_v23, %v3707_v24  ;;  %5674 = vmatpush1.bf16.msra.mxu1 %v5673_v15  ;;  %4946 = vmatprep.mubr.msk.f32.mxu1 %vm643_vm2, %v3373_v9  ;;  %v3371_v49 = vsel %vm3363_vm1, %v3365_v14, %v3370_v26  ;;  %v3389_v14 = vsel %vm3363_vm1, %v3384_v52, %v3388_v61  ;;  %v3392_v15 = vrot.slane %v7428_v3, 1  ;;  %v7452_v9 = vld [vmem:[#allocation5 + $0x88] sm:$0xff]  ;;  %v3316_v52 = vld [vmem:[#allocation5 + $0x90] sm:$0x1] }
 0x4dc   : > { %5675 = vmatprep.subr.bf16.mxu1 %v6066_v29 }
 0x4dd   : > { %v3393_v30 = vsel %vm3363_vm1, %v3388_v61, %v3392_v15 }
 0x4de   : > { %v3221_v37 = vpop.permute.xlu0 %3220  ;;  %3499 = vmatmul.mubr.f32.gmra.mrb[2].mxu1 %v3371_v49 }
 0x4df   : > { %3223 = vst.msk [vmem:[#allocation5 + $0x50] sm:$0xf0] %vm3071_vm11, %v3221_v37  ;;  %5677 = vmatpush1.bf16.msra.mxu1 %v5676_v34  ;;  %4947 = vmatprep.mubr.msk.f32.mxu1 %vm643_vm2, %v3377_v31  ;;  %v3304_v34 = vld [vmem:[%s8103_s5 + $0x70] sm:$0xff]  ;;  %v3396_v37 = vrot.slane %v7452_v9, 1 }
 0x4e0   : > { %5678 = vmatprep.subr.bf16.mxu1 %v6066_v29  ;;  %v7376_v40 = vld [vmem:[#allocation5 + $0x30] sm:$0xff] }
 0x4e1   : > { %v3233_v53 = vpop.permute.xlu1 %3232  ;;  %v3374_v44 = vrot.slane %v7376_v40, 1  ;;  %v3711_v39 = vrot.slane %v7376_v40, 2 }
 0x4e2   : > { %3235 = vst.msk [vmem:[#allocation5 + $0x60] sm:$0x3c] %vm3092_vm12, %v3233_v53  ;;  %v3307_v53 = vld [vmem:[%s8103_s5 + $0x88] sm:$0xff] }
 0x4e3   : > { %v3375_v45 = vsel %vm3363_vm1, %v3370_v26, %v3374_v44  ;;  %5680 = vmatpush1.bf16.msra.mxu1 %v5679_v33  ;;  %v7396_v12 = vsel %vm3094_vm6, %v3707_v24, %v3711_v39  ;;  %v3379_v48 = vsel %vm3363_vm1, %v3374_v44, %v3378_v50  ;;  %v5691_v26 = vpack.c.bf16 %v3303_v21, %v3302_v19  ;;  %v4963_v19 = vld [vmem:[%s8103_s5 + $0x180] sm:$0xff]  ;;  %v4964_v21 = vld [vmem:[%s8103_s5 + $0x188] sm:$0xff] }
 0x4e4   : > { %3504 = vmatmul.mubr.f32.gmra.mrb[4].mxu1 %v3375_v45  ;;  %5681 = vmatprep.subr.bf16.mxu1 %v6066_v29  ;;  %v5694_v33 = vpack.c.bf16 %v3305_v35, %v3304_v34  ;;  %v5697_v28 = vpack.c.bf16 %v3307_v53, %v3306_v43  ;;  %v4967_v35 = vld [vmem:[%s8103_s5 + $0x1a0] sm:$0xff]  ;;  %v4972_v43 = vld [vmem:[%s8103_s5 + $0x1c8] sm:$0xff]  ;;  %v4973_v53 = vld [vmem:[%s8103_s5 + $0x1d0] sm:$0xff] }
 0x4e5   : > { %4948 = vmatprep.mubr.msk.f32.mxu1 %vm643_vm2, %v3381_v58 }
 0x4e6   : > { %v7411_v4 = vld [vmem:[#allocation5 + $0x50] sm:$0xff] }
 0x4e7   : > { %v3246_v56 = vpop.permute.xlu0 %3245  ;;  %5683 = vmatpush1.bf16.msra.mxu1 %v5682_v47  ;;  %v3382_v57 = vrot.slane %v7411_v4, 1  ;;  %v3719_v2 = vrot.slane %v7411_v4, 2  ;;  %v3397_v47 = vsel %vm3363_vm1, %v3392_v15, %v3396_v37 }
 0x4e8   : > { %3248 = vst.msk [vmem:[#allocation5 + $0x70] sm:$0xf] %vm3041_vm7, %v3246_v56  ;;  %3509 = vmatmul.mubr.f32.gmra.mrb[6].mxu1 %v3379_v48  ;;  %5684 = vmatprep.subr.bf16.mxu1 %v6066_v29  ;;  %v3401_v56 = vsel %vm3363_vm1, %v3396_v37, %v3400_v42  ;;  %v3308_v48 = vld [vmem:[%s8103_s5 + $0x90] sm:$0xff]  ;;  %v5715_v37 = vpack.c.bf16 %v4968_v51, %v4967_v35  ;;  %v4971_v42 = vld [vmem:[%s8103_s5 + $0x1c0] sm:$0xff]  ;;  %v3713_v35 = vrot.slane %v7339_v17, 2 }
 0x4e9   : > { %4949 = vmatprep.mubr.msk.f32.mxu1 %vm643_vm2, %v3385_v60  ;;  %v7426_v62 = vld [vmem:[#allocation5 + $0x60] sm:$0xff]  ;;  %v3383_v8 = vsel %vm3363_vm1, %v3378_v50, %v3382_v57  ;;  %v3398_v60 = vrot.slane %v3316_v52, 1  ;;  %v4975_v52 = vld [vmem:[%s8103_s5 + $0x1e0] sm:$0xff] }
 0x4ea   : > { %v3260_v6 = vpop.permute.xlu1 %3259  ;;  %v3723_v7 = vrot.slane %v7426_v62, 2  ;;  %v3386_v10 = vrot.slane %v7426_v62, 1 }
 0x4eb   : > { %3265 = vst.msk [vmem:[#allocation5 + $0x70] sm:$0xc0] %vm3056_vm8, %v3260_v6  ;;  %5686 = vmatpush1.bf16.msra.mxu1 %v5685_v1  ;;  %v3311_v6 = vld [vmem:[%s8103_s5 + $0xa8] sm:$0xff] }
 0x4ec   : > { %3514 = vmatmul.mubr.f32.gmra.mrb[8].mxu1 %v3383_v8  ;;  %5687 = vmatprep.subr.bf16.mxu1 %v6066_v29  ;;  %v7447_v22 = vsel %vm3094_vm6, %v3719_v2, %v3723_v7  ;;  %v3387_v25 = vsel %vm3363_vm1, %v3382_v57, %v3386_v10  ;;  %v3309_v57 = vld [vmem:[%s8103_s5 + $0x98] sm:$0xff]  ;;  %v3273_v8 = vld [vmem:[#allocation5 + $0x8] sm:$0xff] }
 0x4ed   : > { %4950 = vmatprep.mubr.msk.f32.mxu1 %vm643_vm2, %v3389_v14  ;;  %v5700_v27 = vpack.c.bf16 %v3309_v57, %v3308_v48  ;;  %v3313_v14 = vld [vmem:[%s8103_s5 + $0xb8] sm:$0xff] }
 0x4ee   : > { %v3262_v24 = vpop.permute.xlu0 %3261  ;;  %v4978_v48 = vld [vmem:[%s8103_s5 + $0x1f8] sm:$0xff] }
 0x4ef   : > { %3266 = vst.msk [vmem:[#allocation5 + $0x80] sm:$0x3] %vm3058_vm10, %v3262_v24  ;;  %5689 = vmatpush1.bf16.msra.mxu1 %v5688_v13  ;;  %v3312_v13 = vld [vmem:[%s8103_s5 + $0xb0] sm:$0xff]  ;;  %v3272_v24 = vld [vmem:[#allocation5] sm:$0xff] }
 0x4f0   : > { %3519 = vmatmul.mubr.f32.gmra.mrb[10].mxu1 %v3387_v25  ;;  %5690 = vmatprep.subr.bf16.mxu1 %v6066_v29  ;;  %v5706_v15 = vpack.c.bf16 %v3313_v14, %v3312_v13  ;;  %v5709_v25 = vpack.c.bf16 %v4964_v21, %v4963_v19  ;;  %v4984_v13 = vld [vmem:[%s8103_s5 + $0x228] sm:$0xff]  ;;  %v4986_v19 = vld [vmem:[%s8103_s5 + $0x238] sm:$0xff] }
 0x4f1   : > { %4951 = vmatprep.mubr.msk.f32.mxu1 %vm643_vm2, %v3393_v30  ;;  %v4966_v30 = vld [vmem:[%s8103_s5 + $0x198] sm:$0xff] }
 0x4f2   : > { %v7463_v49 = vld [vmem:[#allocation5 + $0x70] sm:$0xff]  ;;  %v3668_v21 = vld [vmem:[#allocation5] sm:$0xfc] }
 0x4f3   : > { %v3390_v31 = vrot.slane %v7463_v49, 1  ;;  %5692 = vmatpush1.bf16.msra.mxu1 %v5691_v26  ;;  %v3727_v41 = vrot.slane %v7463_v49, 2  ;;  %v4965_v26 = vld [vmem:[%s8103_s5 + $0x190] sm:$0xff] }
 0x4f4   : > { %5693 = vmatprep.subr.bf16.mxu1 %v6066_v29  ;;  %v5712_v34 = vpack.c.bf16 %v4966_v30, %v4965_v26  ;;  %v3709_v26 = vrot.slane %v7325_v5, 2 }
 0x4f5   : > { %v3391_v44 = vsel %vm3363_vm1, %v3386_v10, %v3390_v31  ;;  %v7477_v45 = vsel %vm3094_vm6, %v3723_v7, %v3727_v41  ;;  %v5703_v10 = vpack.c.bf16 %v3311_v6, %v3310_v55 }
 0x4f6   : > { %3524 = vmatmul.mubr.f32.gmra.mrb[12].mxu1 %v3391_v44  ;;  %v7480_v58 = vld [vmem:[#allocation5 + $0x80] sm:$0xff]  ;;  %v3714_v51 = vsel %vm3094_vm6, %v3709_v26, %v3713_v35 }
 0x4f7   : > { %4952 = vmatprep.mubr.msk.f32.mxu1 %vm643_vm2, %v3397_v47  ;;  %v3394_v63 = vrot.slane %v7480_v58, 1  ;;  %5695 = vmatpush1.bf16.msra.mxu1 %v5694_v33  ;;  %v3731_v50 = vrot.slane %v7480_v58, 2  ;;  %v4970_v33 = vld [vmem:[%s8103_s5 + $0x1b8] sm:$0xff] }
 0x4f8   : > { %5696 = vmatprep.subr.bf16.mxu1 %v6066_v29  ;;  %v4974_v44 = vld [vmem:[%s8103_s5 + $0x1d8] sm:$0xff] }
 0x4f9   : > { %v3395_v1 = vsel %vm3363_vm1, %v3390_v31, %v3394_v63  ;;  %v7497_v61 = vsel %vm3094_vm6, %v3727_v41, %v3731_v50  ;;  %v3399_v7 = vsel %vm3363_vm1, %v3394_v63, %v3398_v60  ;;  %v4969_v31 = vld [vmem:[%s8103_s5 + $0x1b0] sm:$0xff]  ;;  %v5724_v47 = vpack.c.bf16 %v4974_v44, %v4973_v53  ;;  %v4976_v63 = vld [vmem:[%s8103_s5 + $0x1e8] sm:$0xff]  ;;  %v4979_v60 = vld [vmem:[%s8103_s5 + $0x200] sm:$0xff] }
 0x4fa   : > { %3529 = vmatmul.mubr.f32.gmra.mrb[14].mxu1 %v3395_v1  ;;  %v5718_v41 = vpack.c.bf16 %v4970_v33, %v4969_v31  ;;  %v3669_v1 = vld [vmem:[#allocation5 + $0x8] sm:$0xfc]  ;;  %v4052_v53 = vld [vmem:[%s8105_s7 + $0x30] sm:$0xff]  ;;  %v4053_v44 = vld [vmem:[%s8105_s7 + $0x38] sm:$0xff] }
 0x4fb   : > { %4953 = vmatprep.mubr.msk.f32.mxu1 %vm643_vm2, %v3401_v56  ;;  %5698 = vmatpush1.bf16.msra.mxu1 %v5697_v28  ;;  %v5727_v28 = vpack.c.bf16 %v4976_v63, %v4975_v52  ;;  %v4977_v56 = vld [vmem:[%s8103_s5 + $0x1f0] sm:$0xff]  ;;  %v3704_v55 = vrot.slane %v3669_v1, 2  ;;  %v4054_v52 = vld [vmem:[%s8105_s7 + $0x40] sm:$0xff]  ;;  %v4055_v63 = vld [vmem:[%s8105_s7 + $0x48] sm:$0xff] }
 0x4fc   : > { %5699 = vmatprep.subr.bf16.mxu1 %v6066_v29  ;;  %v5730_v57 = vpack.c.bf16 %v4978_v48, %v4977_v56  ;;  %v4056_v56 = vld [vmem:[%s8105_s7 + $0x50] sm:$0xff]  ;;  %v4057_v48 = vld [vmem:[%s8105_s7 + $0x58] sm:$0xff]  ;;  %v4058_v1 = vld [vmem:[%s8105_s7 + $0x60] sm:$0xff] }
 0x4fe   : > { %3534 = vmatmul.mubr.f32.gmra.mrb[16].mxu1 %v3399_v7  ;;  %v4981_v7 = vld [vmem:[%s8103_s5 + $0x210] sm:$0xff] }
 0x4ff   : > { %4954 = vmatprep.mubr.msk.f32.mxu1 %vm643_vm2, %v3273_v8  ;;  %5701 = vmatpush1.bf16.msra.mxu1 %v5700_v27  ;;  %v4980_v27 = vld [vmem:[%s8103_s5 + $0x208] sm:$0xff]  ;;  %v4982_v8 = vld [vmem:[%s8103_s5 + $0x218] sm:$0xff] }
 0x500   : > { %5702 = vmatprep.subr.bf16.mxu1 %v6066_v29  ;;  %v5733_v6 = vpack.c.bf16 %v4980_v27, %v4979_v60  ;;  %v4059_v60 = vld [vmem:[%s8105_s7 + $0x68] sm:$0xff] }
 0x501   : > { %v5763_v27 = vpack.c.bf16 %v4059_v60, %v4058_v1 }
 0x503   : > { %5704 = vmatpush1.bf16.msra.mxu1 %v5703_v10  ;;  %v4983_v10 = vld [vmem:[%s8103_s5 + $0x220] sm:$0xff] }
 0x504   : > { %5705 = vmatprep.subr.bf16.mxu1 %v6066_v29  ;;  %v5739_v14 = vpack.c.bf16 %v4984_v13, %v4983_v10 }
 0x507   : > { %5707 = vmatpush1.bf16.msra.mxu1 %v5706_v15  ;;  %v4985_v15 = vld [vmem:[%s8103_s5 + $0x230] sm:$0xff] }
 0x508   : > { %5708 = vmatprep.subr.bf16.mxu1 %v6066_v29 }
 0x50a   : > { %3623 = vmatmul.mubr.f32.vlgmr.msra.gmra.mrb[0].mxu1 %v3272_v24  ;;  %v5742_v24 = vpack.c.bf16 %v4986_v19, %v4985_v15 }
 0x50b   : > { %4955 = vmatprep.mubr.msk.f32.mxu1 %vm643_vm2, %v7240_v38  ;;  %5710 = vmatpush1.bf16.msra.mxu1 %v5709_v25  ;;  %v3701_v25 = vrot.slane %v3668_v21, 2 }
 0x50c   : > { %5711 = vmatprep.subr.bf16.mxu1 %v6066_v29 }
 0x50d   : > { %v3703_v30 = vsel %vm3094_vm6, %v3701_v25, %v3702_v23  ;;  %v3721_v23 = vrot.slane %v7386_v36, 2 }
 0x50e   : > { %3628 = vmatmul.mubr.f32.gmra.mrb[2].mxu1 %v7333_v11 }
 0x50f   : > { %4956 = vmatprep.mubr.msk.f32.mxu1 %vm643_vm2, %v7325_v5  ;;  %5713 = vmatpush1.bf16.msra.mxu1 %v5712_v34  ;;  %v3717_v5 = vrot.slane %v7370_v59, 2 }
 0x510   : > { %5714 = vmatprep.subr.bf16.mxu1 %v6066_v29 }
 0x511   : > { %v3718_v11 = vsel %vm3094_vm6, %v3713_v35, %v3717_v5 }
 0x512   : > { %3633 = vmatmul.mubr.f32.gmra.mrb[4].mxu1 %v7337_v16  ;;  %v5721_v16 = vpack.c.bf16 %v4972_v43, %v4971_v42  ;;  %v4050_v42 = vld [vmem:[%s8105_s7 + $0x20] sm:$0xff]  ;;  %v4051_v43 = vld [vmem:[%s8105_s7 + $0x28] sm:$0xff] }
 0x513   : > { %5716 = vmatpush1.bf16.msra.mxu1 %v5715_v37  ;;  %4957 = vmatprep.mubr.msk.f32.mxu1 %vm643_vm2, %v7339_v17  ;;  %v3715_v17 = vrot.slane %v7390_v46, 2  ;;  %v3722_v37 = vsel %vm3094_vm6, %v3717_v5, %v3721_v23 }
 0x514   : > { %5717 = vmatprep.subr.bf16.mxu1 %v6066_v29 }
 0x516   : > { %3638 = vmatmul.mubr.f32.gmra.mrb[6].mxu1 %v7376_v40  ;;  %v3671_v40 = vld [vmem:[#allocation5 + $0x98] sm:$0x3] }
 0x517   : > { %4958 = vmatprep.mubr.msk.f32.mxu1 %vm643_vm2, %v7370_v59  ;;  %5719 = vmatpush1.bf16.msra.mxu1 %v5718_v41  ;;  %v3725_v59 = vrot.slane %v7409_v54, 2  ;;  %v3737_v31 = vrot.slane %v3671_v40, 2 }
 0x518   : > { %5720 = vmatprep.subr.bf16.mxu1 %v6066_v29 }
 0x51a   : > { %3643 = vmatmul.mubr.f32.gmra.mrb[8].mxu1 %v7390_v46  ;;  %v3729_v46 = vrot.slane %v7428_v3, 2 }
 0x51b   : > { %4959 = vmatprep.mubr.msk.f32.mxu1 %vm643_vm2, %v7386_v36  ;;  %5722 = vmatpush1.bf16.msra.mxu1 %v5721_v16  ;;  %v3726_v36 = vsel %vm3094_vm6, %v3721_v23, %v3725_v59  ;;  %v5751_v16 = vpack.c.bf16 %v4051_v43, %v4050_v42 }
 0x51c   : > { %5723 = vmatprep.subr.bf16.mxu1 %v6066_v29 }
 0x51e   : > { %3648 = vmatmul.mubr.f32.gmra.mrb[10].mxu1 %v7411_v4 }
 0x51f   : > { %4960 = vmatprep.mubr.msk.f32.mxu1 %vm643_vm2, %v7409_v54  ;;  %5725 = vmatpush1.bf16.msra.mxu1 %v5724_v47  ;;  %v3733_v54 = vrot.slane %v7452_v9, 2  ;;  %v5754_v47 = vpack.c.bf16 %v4053_v44, %v4052_v53 }
 0x520   : > { %5726 = vmatprep.subr.bf16.mxu1 %v6066_v29 }
 0x521   : > { %v3734_v4 = vsel %vm3094_vm6, %v3729_v46, %v3733_v54 }
 0x522   : > { %3653 = vmatmul.mubr.f32.gmra.mrb[12].mxu1 %v7426_v62  ;;  %v3705_v62 = vrot.slane %v7240_v38, 2  ;;  %v5736_v38 = vpack.c.bf16 %v4982_v8, %v4981_v7 }
 0x523   : > { %4961 = vmatprep.mubr.msk.f32.mxu1 %vm643_vm2, %v7428_v3  ;;  %5728 = vmatpush1.bf16.msra.mxu1 %v5727_v28  ;;  %v3738_v3 = vsel %vm3094_vm6, %v3733_v54, %v3737_v31  ;;  %v5757_v28 = vpack.c.bf16 %v4055_v63, %v4054_v52 }
 0x524   : > { %5729 = vmatprep.subr.bf16.mxu1 %v6066_v29  ;;  %v3710_v34 = vsel %vm3094_vm6, %v3705_v62, %v3709_v26 }
 0x526   : > { %3658 = vmatmul.mubr.f32.gmra.mrb[14].mxu1 %v7463_v49  ;;  %v3706_v49 = vsel %vm3094_vm6, %v3704_v55, %v3705_v62  ;;  %v4060_v55 = vld [vmem:[%s8105_s7 + $0x70] sm:$0xff]  ;;  %v4061_v62 = vld [vmem:[%s8105_s7 + $0x78] sm:$0xff] }
 0x527   : > { %5731 = vmatpush1.bf16.msra.mxu1 %v5730_v57  ;;  %4962 = vmatprep.mubr.msk.f32.mxu1 %vm643_vm2, %v7452_v9  ;;  %v4046_v9 = vld [vmem:[%s8105_s7] sm:$0xff]  ;;  %v5760_v57 = vpack.c.bf16 %v4057_v48, %v4056_v56 }
 0x528   : > { %5732 = vmatprep.subr.bf16.mxu1 %v6066_v29 }
 0x52a   : > { %3663 = vmatmul.mubr.f32.gmra.mrb[16].mxu1 %v7480_v58  ;;  %v4049_v58 = vld [vmem:[%s8105_s7 + $0x18] sm:$0xff] }
 0x52b   : > { %5734 = vmatpush1.bf16.msra.mxu1 %v5733_v6  ;;  %4987 = vmatprep.mubr.msk.f32.mxu1 %vm643_vm2, %v3706_v49  ;;  %v5766_v6 = vpack.c.bf16 %v4061_v62, %v4060_v55 }
 0x52c   : > { %5735 = vmatprep.subr.bf16.mxu1 %v6066_v29 }
 0x52f   : > { %5737 = vmatpush1.bf16.msra.mxu1 %v5736_v38 }
 0x530   : > { %5738 = vmatprep.subr.bf16.mxu1 %v6066_v29 }
 0x533   : > { %5740 = vmatpush1.bf16.msra.mxu1 %v5739_v14 }
 0x534   : > { %5741 = vmatprep.subr.bf16.mxu1 %v6066_v29 }
 0x537   : > { %5743 = vmatpush1.bf16.msra.mxu1 %v5742_v24 }
 0x538   : > { %5744 = vmatprep.subr.bf16.mxu1 %v6066_v29 }
 0x53a   : > { %3831 = vmatmul.mubr.f32.vlgmr.msra.gmra.mrb[0].mxu1 %v3703_v30 }
 0x53b   : > { %4988 = vmatprep.mubr.msk.f32.mxu1 %vm643_vm2, %v3710_v34 }
 0x53e   : > { %3836 = vmatmul.mubr.f32.gmra.mrb[2].mxu1 %v7359_v32  ;;  %v3716_v32 = vsel %vm3094_vm6, %v3711_v39, %v3715_v17  ;;  %v3730_v39 = vsel %vm3094_vm6, %v3725_v59, %v3729_v46 }
 0x53f   : > { %4989 = vmatprep.mubr.msk.f32.mxu1 %vm643_vm2, %v3714_v51 }
 0x542   : > { %3841 = vmatmul.mubr.f32.gmra.mrb[4].mxu1 %v7396_v12  ;;  %v3720_v12 = vsel %vm3094_vm6, %v3715_v17, %v3719_v2  ;;  %v3670_v2 = vld [vmem:[#allocation5 + $0x90] sm:$0x3] }
 0x543   : > { %4990 = vmatprep.mubr.msk.f32.mxu1 %vm643_vm2, %v3718_v11  ;;  %v3735_v33 = vrot.slane %v3670_v2, 2 }
 0x546   : > { %3846 = vmatmul.mubr.f32.gmra.mrb[6].mxu1 %v3716_v32 }
 0x547   : > { %4991 = vmatprep.mubr.msk.f32.mxu1 %vm643_vm2, %v3722_v37 }
 0x54a   : > { %3851 = vmatmul.mubr.f32.gmra.mrb[8].mxu1 %v3720_v12 }
 0x54b   : > { %4992 = vmatprep.mubr.msk.f32.mxu1 %vm643_vm2, %v3726_v36 }
 0x54e   : > { %3856 = vmatmul.mubr.f32.gmra.mrb[10].mxu1 %v7447_v22  ;;  %v3736_v22 = vsel %vm3094_vm6, %v3731_v50, %v3735_v33 }
 0x54f   : > { %4993 = vmatprep.mubr.msk.f32.mxu1 %vm643_vm2, %v3730_v39 }
 0x552   : > { %3861 = vmatmul.mubr.f32.gmra.mrb[12].mxu1 %v7477_v45  ;;  %v4047_v45 = vld [vmem:[%s8105_s7 + $0x8] sm:$0xff] }
 0x553   : > { %4994 = vmatprep.mubr.msk.f32.mxu1 %vm643_vm2, %v3734_v4  ;;  %v5745_v41 = vpack.c.bf16 %v4047_v45, %v4046_v9 }
 0x555   : > { %5746 = vmatpush3.bf16.msra.mxu1 %v5745_v41 }
 0x556   : > { %3866 = vmatmul.mubr.f32.gmra.mrb[14].mxu1 %v7497_v61  ;;  %v4048_v61 = vld [vmem:[%s8105_s7 + $0x10] sm:$0xff]  ;;  %5747 = vmatprep.subr.bf16.mxu1 %v6066_v29 }
 0x557   : > { %4995 = vmatprep.mubr.msk.f32.mxu1 %vm643_vm2, %v3738_v3  ;;  %v5748_v50 = vpack.c.bf16 %v4049_v58, %v4048_v61 }
 0x559   : > { %5749 = vmatpush3.bf16.msra.mxu1 %v5748_v50 }
 0x55a   : > { %3871 = vmatmul.mubr.f32.gmra.mrb[16].mxu1 %v3736_v22  ;;  %5750 = vmatprep.subr.bf16.mxu1 %v6066_v29 }
 0x55b   : > { %5538 = vmatprep.mubr.msk.f32.mxu1 %vm6069_vm9, %v6064_v0 }
 0x55d   : > { %5752 = vmatpush3.bf16.msra.mxu1 %v5751_v16 }
 0x55e   : > { %5753 = vmatprep.subr.bf16.mxu1 %v6066_v29 }
 0x561   : > { %5755 = vmatpush3.bf16.msra.mxu1 %v5754_v47 }
 0x562   : > { %5756 = vmatprep.subr.bf16.mxu1 %v6066_v29 }
 0x565   : > { %5758 = vmatpush3.bf16.msra.mxu1 %v5757_v28 }
 0x566   : > { %5759 = vmatprep.subr.bf16.mxu1 %v6066_v29 }
 0x569   : > { %5761 = vmatpush3.bf16.msra.mxu1 %v5760_v57 }
 0x56a   : > { %5762 = vmatprep.subr.bf16.mxu1 %v6066_v29 }
 0x56d   : > { %5764 = vmatpush3.bf16.msra.mxu1 %v5763_v27 }
 0x56e   : > { %5765 = vmatprep.subr.bf16.mxu1 %v6066_v29 }
 0x571   : > { %5767 = vmatpush3.bf16.msra.mxu1 %v5766_v6 }
 0x572   : > { %5768 = vmatprep.subr.bf16.mxu1 %v6066_v29 }
 0x60d   : > { %v3832_v7 = vpop.f32.mrb[0].mxu1 }
 0x60e   : > { %3885 = vst [vmem:[#allocation6] sm:$0xff] %v3832_v7  ;;  %v3834_v8 = vpop.f32.mrb[1].mxu1 }
 0x611   : > { %v3837_v49 = vpop.f32.mrb[2].mxu1 }
 0x612   : > { %3886 = vst [vmem:[#allocation6 + $0x8] sm:$0xff] %v3837_v49  ;;  %v3839_v38 = vpop.f32.mrb[3].mxu1 }
 0x615   : > { %v3842_v10 = vpop.f32.mrb[4].mxu1 }
 0x616   : > { %3887 = vst [vmem:[#allocation6 + $0x10] sm:$0xff] %v3842_v10  ;;  %v3844_v13 = vpop.f32.mrb[5].mxu1 }
 0x619   : > { %v3847_v14 = vpop.f32.mrb[6].mxu1  ;;  %v3894_v30 = vld [vmem:[#allocation6 + $0x7] sm:$0xf] }
 0x61a   : > { %3888 = vst [vmem:[#allocation6 + $0x18] sm:$0xff] %v3847_v14  ;;  %v3849_v15 = vpop.f32.mrb[7].mxu1  ;;  %v3896_v51 = vmul.f32 %v3894_v30, %v3894_v30 }
 0x61b   : > { %v3944_v15 = vld [vmem:[%s8104_s6] sm:$0x1] }
 0x61d   : > { %v3852_v19 = vpop.f32.mrb[8].mxu1  ;;  %v3898_v24 = vld [vmem:[#allocation6 + $0xd] sm:$0xf]  ;;  %v3902_v23 = vld [vmem:[#allocation6 + $0x13] sm:$0xf] }
 0x61e   : > { %v3854_v21 = vpop.f32.mrb[9].mxu1  ;;  %v3900_v34 = vmul.f32 %v3898_v24, %v3898_v24  ;;  %v3899_v5 = vadd.f32 %v3898_v24, %v3894_v30  ;;  %v3904_v12 = vmul.f32 %v3902_v23, %v3902_v23  ;;  %v3948_v24 = vld [vmem:[%s8104_s6 + $0x1] sm:$0x1] }
 0x620   : > { %v3901_v17 = vadd.f32 %v3900_v34, %v3896_v51  ;;  %v3903_v59 = vadd.f32 %v3902_v23, %v3899_v5  ;;  %v3952_v34 = vld [vmem:[#allocation6 + $0x7] ss:$2 sm:$0xff] }
 0x621   : > { %v3857_v25 = vpop.f32.mrb[10].mxu1  ;;  %v3906_v32 = vld [vmem:[#allocation6 + $0x19] sm:$0xf] }
 0x622   : > { %3890 = vst [vmem:[#allocation6 + $0x28] sm:$0xff] %v3857_v25  ;;  %v3859_v26 = vpop.f32.mrb[11].mxu1  ;;  %v3905_v40 = vadd.f32 %v3904_v12, %v3901_v17  ;;  %v3908_v39 = vmul.f32 %v3906_v32, %v3906_v32  ;;  %v3907_v4 = vadd.f32 %v3906_v32, %v3903_v59  ;;  %v3971_v51 = vld [vmem:[#allocation6 + $0xd] ss:$2 sm:$0xff]  ;;  %v3977_v12 = vld [vmem:[#allocation6 + $0xe] ss:$2 sm:$0xff] }
 0x624   : > { %v3909_v33 = vadd.f32 %v3908_v39, %v3905_v40 }
 0x625   : > { %v3862_v35 = vpop.f32.mrb[12].mxu1 }
 0x626   : > { %3891 = vst [vmem:[#allocation6 + $0x30] sm:$0xff] %v3862_v35  ;;  %v3864_v11 = vpop.f32.mrb[13].mxu1  ;;  %v3965_v35 = vld [vmem:[#allocation6 + $0x8] ss:$2 sm:$0xff] }
 0x629   : > { %v3867_v37 = vpop.f32.mrb[14].mxu1  ;;  %v3910_v46 = vld [vmem:[#allocation6 + $0x2b] sm:$0xf] }
 0x62a   : > { %3892 = vst [vmem:[#allocation6 + $0x38] sm:$0xff] %v3867_v37  ;;  %v3869_v36 = vpop.f32.mrb[15].mxu1  ;;  %v3912_v2 = vmul.f32 %v3910_v46, %v3910_v46  ;;  %v3911_v22 = vadd.f32 %v3910_v46, %v3907_v4 }
 0x62c   : > { %v3913_v61 = vadd.f32 %v3912_v2, %v3909_v33 }
 0x62d   : > { %v3914_v54 = vld [vmem:[#allocation6 + $0x31] sm:$0xf]  ;;  %v3872_v31 = vpop.f32.mrb[16].mxu1 }
 0x62e   : > { %3893 = vst [vmem:[#allocation6 + $0x40] sm:$0xff] %v3872_v31  ;;  %v3874_v3 = vpop.f32.mrb[17].mxu1  ;;  %v3916_v9 = vmul.f32 %v3914_v54, %v3914_v54  ;;  %v3915_v41 = vadd.f32 %v3914_v54, %v3911_v22 }
 0x630   : > { %v3917_v50 = vadd.f32 %v3916_v9, %v3913_v61 }
 0x631   : > { %v3918_v45 = vld [vmem:[#allocation6 + $0x37] sm:$0xf] }
 0x632   : > { %v3920_v58 = vmul.f32 %v3918_v45, %v3918_v45  ;;  %v3919_v42 = vadd.f32 %v3918_v45, %v3915_v41  ;;  %v4002_v32 = vld [vmem:[#allocation6 + $0x2b] ss:$2 sm:$0xff]  ;;  %v4007_v37 = vld [vmem:[#allocation6 + $0x2c] ss:$2 sm:$0xff] }
 0x633   : > { %v4013_v59 = vld [vmem:[#allocation6 + $0x31] ss:$2 sm:$0xff] }
 0x634   : > { %v3921_v16 = vadd.f32 %v3920_v58, %v3917_v50 }
 0x635   : > { %v3922_v43 = vld [vmem:[#allocation6 + $0x3d] sm:$0xf] }
 0x636   : > { %v3923_v53 = vadd.f32 %v3922_v43, %v3919_v42  ;;  %v3924_v44 = vmul.f32 %v3922_v43, %v3922_v43  ;;  %v4019_v2 = vld [vmem:[#allocation6 + $0x32] ss:$2 sm:$0xff] }
 0x638   : > { %v3925_v47 = vadd.f32 %v3924_v44, %v3921_v16  ;;  %v3926_v52 = vsel %vm3085_vm0, %v3923_v53, 0.0 }
 0x639   : > { %v3927_v63 = vrot.slane %v3926_v52, 4 }
 0x63a   : > { %v3934_v28 = vsel %vm3085_vm0, %v3925_v47, 0.0 }
 0x63b   : > { %v3928_v56 = vadd.f32 %v3927_v63, %v3926_v52  ;;  %v3935_v48 = vrot.slane %v3934_v28, 4 }
 0x63d   : > { %v3929_v57 = vrot.slane %v3928_v56, 2  ;;  %v3936_v1 = vadd.f32 %v3935_v48, %v3934_v28 }
 0x63f   : > { %v3930_v60 = vadd.f32 %v3929_v57, %v3928_v56  ;;  %v3937_v27 = vrot.slane %v3936_v1, 2 }
 0x641   : > { %v3931_v55 = vrot.slane %v3930_v60, 1  ;;  %v3938_v62 = vadd.f32 %v3937_v27, %v3936_v1 }
 0x643   : > { %v3932_v6 = vadd.f32 %v3931_v55, %v3930_v60  ;;  %v3939_v7 = vrot.slane %v3938_v62, 1 }
 0x645   : > { %v3933_v8 = vmul.f32 0.03125, %v3932_v6  ;;  %v3940_v49 = vadd.f32 %v3939_v7, %v3938_v62 }
 0x647   : > { %v3941_v38 = vmul.f32 0.03125, %v3940_v49  ;;  %v3942_v10 = vmul.f32 %v3933_v8, %v3933_v8 }
 0x649   : > { %v3943_v13 = vsub.f32 %v3941_v38, %v3942_v10 }
 0x64b   : > { %v3945_v14 = vadd.f32 1e-05, %v3943_v13 }
 0x64d   : > { %6036 = vrsqrt.f32 %v3945_v14 }
 0x657   : > { %v6037_v19 = vpop.eup %6036 }
 0x658   : > { %v3947_v21 = vmul.f32 %v6037_v19, %v3944_v15 }
 0x65a   : > { %v3949_v25 = vmul.f32 %v3947_v21, %v3933_v8  ;;  %v3956_v26 = vrot.slane %v3947_v21, %v6502_v20 }
 0x65c   : > { %v3950_v30 = vsub.f32 %v3948_v24, %v3949_v25  ;;  %v3957_v11 = vmul.f32 %v3956_v26, %v3952_v34  ;;  %v3966_v23 = vmul.f32 %v3965_v35, %v3956_v26  ;;  %v3972_v17 = vmul.f32 %v3971_v51, %v3956_v26 }
 0x65d   : > { %v4003_v36 = vmul.f32 %v4002_v32, %v3956_v26  ;;  %v4008_v46 = vmul.f32 %v4007_v37, %v3956_v26  ;;  %v4014_v40 = vmul.f32 %v4013_v59, %v3956_v26  ;;  %v3978_v4 = vmul.f32 %v3977_v12, %v3956_v26 }
 0x65e   : > { %v3961_v5 = vrot.slane %v3950_v30, %v6502_v20  ;;  %v4020_v9 = vmul.f32 %v4019_v2, %v3956_v26  ;;  %v4172_v2 = vld [vmem:[%s8107_s9 + $0x18] sm:$0xff] }
 0x660   : > { %v3962_v39 = vadd.f32 %v3961_v5, %v3957_v11  ;;  %v3967_v54 = vadd.f32 %v3966_v23, %v3961_v5  ;;  %v3973_v31 = vadd.f32 %v3972_v17, %v3961_v5  ;;  %v4004_v3 = vadd.f32 %v4003_v36, %v3961_v5 }
 0x661   : > { %v4009_v33 = vadd.f32 %v4008_v46, %v3961_v5  ;;  %v4015_v22 = vadd.f32 %v4014_v40, %v3961_v5  ;;  %v3979_v41 = vadd.f32 %v3978_v4, %v3961_v5  ;;  %v4021_v42 = vadd.f32 %v4020_v9, %v3961_v5 }
 0x662   : > { %v3963_v45 = vmax.f32 %v3962_v39, 0.0  ;;  %v3968_v61 = vmax.f32 %v3967_v54, 0.0  ;;  %v4005_v58 = vmax.f32 %v4004_v3, 0.0  ;;  %v3974_v16 = vmax.f32 %v3973_v31, 0.0  ;;  %v4169_v39 = vld [vmem:[%s8107_s9] sm:$0xff]  ;;  %v4170_v54 = vld [vmem:[%s8107_s9 + $0x8] sm:$0xff] }
 0x663   : > { %v4010_v50 = vmax.f32 %v4009_v33, 0.0  ;;  %v4016_v44 = vmax.f32 %v4015_v22, 0.0  ;;  %v3980_v52 = vmax.f32 %v3979_v41, 0.0  ;;  %v4022_v28 = vmax.f32 %v4021_v42, 0.0  ;;  %v4171_v31 = vld [vmem:[%s8107_s9 + $0x10] sm:$0xff]  ;;  %v4173_v33 = vld [vmem:[%s8107_s9 + $0x20] sm:$0xff] }
 0x664   : > { %v3969_v43 = vmax.f32 %v3963_v45, %v3968_v61  ;;  %v5769_v4 = vpack.c.bf16 %v4170_v54, %v4169_v39  ;;  %v5772_v3 = vpack.c.bf16 %v4172_v2, %v4171_v31  ;;  %v4174_v22 = vld [vmem:[%s8107_s9 + $0x28] sm:$0xff]  ;;  %v4175_v45 = vld [vmem:[%s8107_s9 + $0x30] sm:$0xff]  ;;  %v4176_v61 = vld [vmem:[%s8107_s9 + $0x38] sm:$0xff] }
 0x665   : > { %v4011_v53 = vmax.f32 %v4005_v58, %v4010_v50  ;;  %v5775_v9 = vpack.c.bf16 %v4174_v22, %v4173_v33  ;;  %v5778_v41 = vpack.c.bf16 %v4176_v61, %v4175_v45  ;;  %v4177_v58 = vld [vmem:[%s8107_s9 + $0x40] sm:$0xff]  ;;  %v4178_v50 = vld [vmem:[%s8107_s9 + $0x48] sm:$0xff]  ;;  %v4298_v54 = vld [vmem:[%s8109_s11 + $0x38] sm:$0xff] }
 0x666   : > { %v3975_v47 = vmax.f32 %v3969_v43, %v3974_v16  ;;  %v5781_v42 = vpack.c.bf16 %v4178_v50, %v4177_v58  ;;  %v4179_v43 = vld [vmem:[%s8107_s9 + $0x50] sm:$0xff]  ;;  %v4180_v16 = vld [vmem:[%s8107_s9 + $0x58] sm:$0xff]  ;;  %v4296_v39 = vld [vmem:[%s8109_s11 + $0x28] sm:$0xff] }
 0x667   : > { %v4017_v63 = vmax.f32 %v4011_v53, %v4016_v44  ;;  %v5784_v53 = vpack.c.bf16 %v4180_v16, %v4179_v43  ;;  %v4181_v44 = vld [vmem:[%s8107_s9 + $0x60] sm:$0xff]  ;;  %v4300_v33 = vld [vmem:[%s8109_s11 + $0x48] sm:$0xff]  ;;  %v4302_v22 = vld [vmem:[%s8109_s11 + $0x58] sm:$0xff] }
 0x668   : > { %v3981_v56 = vmax.f32 %v3975_v47, %v3980_v52  ;;  %v4182_v47 = vld [vmem:[%s8107_s9 + $0x68] sm:$0xff]  ;;  %v4295_v2 = vld [vmem:[%s8109_s11 + $0x20] sm:$0xff]  ;;  %v5800_v45 = vpack.c.bf16 %v4302_v22, %v4300_v33  ;;  %v4306_v50 = vld [vmem:[%s8109_s11 + $0x78] sm:$0xff] }
 0x669   : > { %v4023_v48 = vmax.f32 %v4017_v63, %v4022_v28  ;;  %v5787_v52 = vpack.c.bf16 %v4182_v47, %v4181_v44  ;;  %v4183_v63 = vld [vmem:[%s8107_s9 + $0x70] sm:$0xff]  ;;  %v4184_v28 = vld [vmem:[%s8107_s9 + $0x78] sm:$0xff]  ;;  %v4299_v61 = vld [vmem:[%s8109_s11 + $0x40] sm:$0xff] }
 0x66a   : > { %v3982_v57 = vsel %vm3079_vm15, %v3981_v56, 0.0  ;;  %v3990_v1 = vrot.slane %v3981_v56, 6  ;;  %v5790_v56 = vpack.c.bf16 %v4184_v28, %v4183_v63  ;;  %v4304_v58 = vld [vmem:[%s8109_s11 + $0x68] sm:$0xff]  ;;  %v4303_v16 = vld [vmem:[%s8109_s11 + $0x60] sm:$0xff]  ;;  %v4310_v47 = vld [vmem:[%s8109_s11 + $0x98] sm:$0xff] }
 0x66b   : > { %v3983_v60 = vrot.slane %v3982_v57, 4  ;;  %v4024_v27 = vsel %vm3079_vm15, %v4023_v48, 0.0  ;;  %v4032_v55 = vrot.slane %v4023_v48, 6  ;;  %v5804_v43 = vpack.c.bf16 %v4306_v50, %v4304_v58  ;;  %v4308_v44 = vld [vmem:[%s8109_s11 + $0x88] sm:$0xff]  ;;  %v4307_v28 = vld [vmem:[%s8109_s11 + $0x80] sm:$0xff] }
 0x66c   : > { %v3992_v62 = vsel %vm3079_vm15, %v3990_v1, 0.0  ;;  %v4025_v6 = vrot.slane %v4024_v27, 4  ;;  %v5808_v63 = vpack.c.bf16 %v4310_v47, %v4308_v44  ;;  %v4256_v33 = vld [vmem:[%s8108_s10 + $0x1] sm:$0x1]  ;;  %v4449_v44 = vld [vmem:[%s8111_s13 + $0x8] sm:$0xff]  ;;  %v4466_v47 = vld [vmem:[%s8111_s13 + $0x90] sm:$0xff] }
 0x66d   : > { %v3984_v7 = vadd.f32 %v3983_v60, %v3982_v57  ;;  %v3993_v8 = vrot.slane %v3992_v62, 4  ;;  %v4034_v49 = vsel %vm3079_vm15, %v4032_v55, 0.0 }
 0x66e   : > { %v4026_v38 = vadd.f32 %v4025_v6, %v4024_v27  ;;  %v4035_v10 = vrot.slane %v4034_v49, 4 }
 0x66f   : > { %v3985_v13 = vrot.slane %v3984_v7, 2  ;;  %v3994_v14 = vadd.f32 %v3993_v8, %v3992_v62 }
 0x670   : > { %v4027_v15 = vrot.slane %v4026_v38, 2  ;;  %v4036_v19 = vadd.f32 %v4035_v10, %v4034_v49 }
 0x671   : > { %v3986_v21 = vadd.f32 %v3985_v13, %v3984_v7  ;;  %v3995_v24 = vrot.slane %v3994_v14, 2 }
 0x672   : > { %v4028_v25 = vadd.f32 %v4027_v15, %v4026_v38  ;;  %v4037_v26 = vrot.slane %v4036_v19, 2 }
 0x673   : > { %v3987_v30 = vrot.slane %v3986_v21, 1  ;;  %v3996_v34 = vadd.f32 %v3995_v24, %v3994_v14 }
 0x674   : > { %v4029_v35 = vrot.slane %v4028_v25, 1  ;;  %v4038_v51 = vadd.f32 %v4037_v26, %v4036_v19  ;;  %v4132_v26 = vld [vmem:[%s8106_s8] sm:$0x1] }
 0x675   : > { %v3997_v5 = vrot.slane %v3996_v34, 1  ;;  %v3988_v23 = vadd.f32 %v3987_v30, %v3986_v21 }
 0x676   : > { %v4039_v11 = vrot.slane %v4038_v51, 1  ;;  %v4030_v32 = vadd.f32 %v4029_v35, %v4028_v25  ;;  %v4133_v35 = vld [vmem:[%s8106_s8 + $0x1] sm:$0x1] }
 0x677   : > { %v3998_v17 = vadd.f32 %v3997_v5, %v3996_v34 }
 0x678   : > { %v4040_v37 = vadd.f32 %v4039_v11, %v4038_v51 }
 0x679   : > { %v3999_v59 = vadd.f32 %v3998_v17, %v3988_v23 }
 0x67a   : > { %v4041_v12 = vadd.f32 %v4040_v37, %v4030_v32 }
 0x67b   : > { %v4000_v36 = vmul.f32 0.25, %v3999_v59  ;;  %v4292_v59 = vld [vmem:[%s8109_s11 + $0x8] sm:$0xff] }
 0x67c   : > { %v4042_v46 = vmul.f32 0.25, %v4041_v12  ;;  %v4294_v12 = vld [vmem:[%s8109_s11 + $0x18] sm:$0xff] }
 0x67e   : > { %v4044_v40 = vsel %vm707_vm4, %v4000_v36, %v4042_v46  ;;  %v4291_v36 = vld [vmem:[%s8109_s11] sm:$0xff]  ;;  %v5792_v46 = vpack.c.bf16 %v4294_v12, %v4292_v59 }
 0x67f   : > { %4045 = vst [vmem:[%s6278_s26] sm:$0x3] %v4044_v40  ;;  %5539 = vmatmul.mubr.f32.vlgmr.msra.gmra.mrb[18].mxu1 %v4044_v40  ;;  %v4293_v40 = vld [vmem:[%s8109_s11 + $0x10] sm:$0xff] }
 0x680   : > { %5573 = vmatprep.mubr.msk.f32.mxu1 %vm6069_vm9, %v6064_v0  ;;  %5770 = vmatpush3.bf16.msra.mxu1 %v5769_v4  ;;  %v5794_v31 = vpack.c.bf16 %v4293_v40, %v4291_v36  ;;  %v5796_v4 = vpack.c.bf16 %v4298_v54, %v4296_v39 }
 0x681   : > { %5771 = vmatprep.subr.bf16.mxu1 %v6066_v29 }
 0x684   : > { %5773 = vmatpush3.bf16.msra.mxu1 %v5772_v3  ;;  %v4297_v3 = vld [vmem:[%s8109_s11 + $0x30] sm:$0xff] }
 0x685   : > { %5774 = vmatprep.subr.bf16.mxu1 %v6066_v29 }
 0x688   : > { %5776 = vmatpush3.bf16.msra.mxu1 %v5775_v9  ;;  %v5798_v9 = vpack.c.bf16 %v4297_v3, %v4295_v2 }
 0x689   : > { %5777 = vmatprep.subr.bf16.mxu1 %v6066_v29 }
 0x68c   : > { %5779 = vmatpush3.bf16.msra.mxu1 %v5778_v41  ;;  %v4301_v41 = vld [vmem:[%s8109_s11 + $0x50] sm:$0xff] }
 0x68d   : > { %5780 = vmatprep.subr.bf16.mxu1 %v6066_v29 }
 0x690   : > { %5782 = vmatpush3.bf16.msra.mxu1 %v5781_v42  ;;  %v5802_v42 = vpack.c.bf16 %v4301_v41, %v4299_v61 }
 0x691   : > { %5783 = vmatprep.subr.bf16.mxu1 %v6066_v29 }
 0x694   : > { %5785 = vmatpush3.bf16.msra.mxu1 %v5784_v53  ;;  %v4305_v53 = vld [vmem:[%s8109_s11 + $0x70] sm:$0xff] }
 0x695   : > { %5786 = vmatprep.subr.bf16.mxu1 %v6066_v29 }
 0x698   : > { %5788 = vmatpush3.bf16.msra.mxu1 %v5787_v52  ;;  %v5806_v52 = vpack.c.bf16 %v4305_v53, %v4303_v16  ;;  %v4448_v16 = vld [vmem:[%s8111_s13] sm:$0xff] }
 0x699   : > { %5789 = vmatprep.subr.bf16.mxu1 %v6066_v29 }
 0x69c   : > { %5791 = vmatpush3.bf16.msra.mxu1 %v5790_v56  ;;  %v4309_v56 = vld [vmem:[%s8109_s11 + $0x90] sm:$0xff] }
 0x69d   : > { %5793 = vmatprep.subr.bf16.mxu1 %v5792_v46 }
 0x752   : > { %v4128_v48 = vpop.f32.mrb[18].mxu1 }
 0x753   : > { %v4134_v57 = vsel %vm3079_vm15, %v4128_v48, 0.0  ;;  %v5540_v1 = vpop.f32.mrb[19].mxu1 }
 0x754   : > { %v4135_v60 = vrot.slane %v4134_v57, 4  ;;  %v5810_v1 = vpack.c.bf16 %v4309_v56, %v4307_v28  ;;  %v4450_v56 = vld [vmem:[%s8111_s13 + $0x10] sm:$0xff] }
 0x756   : > { %v4136_v27 = vadd.f32 %v4135_v60, %v4134_v57  ;;  %v4314_v57 = vld [vmem:[%s8109_s11 + $0xb8] sm:$0xff] }
 0x758   : > { %v4137_v55 = vrot.slane %v4136_v27, 2 }
 0x75a   : > { %v4138_v62 = vadd.f32 %v4137_v55, %v4136_v27  ;;  %v4311_v27 = vld [vmem:[%s8109_s11 + $0xa0] sm:$0xff]  ;;  %v4313_v55 = vld [vmem:[%s8109_s11 + $0xb0] sm:$0xff] }
 0x75c   : > { %v4139_v6 = vrot.slane %v4138_v62, 1 }
 0x75e   : > { %v4140_v7 = vadd.f32 %v4139_v6, %v4138_v62  ;;  %v4316_v62 = vld [vmem:[%s8109_s11 + $0xc8] sm:$0xff]  ;;  %v4318_v6 = vld [vmem:[%s8109_s11 + $0xd8] sm:$0xff] }
 0x760   : > { %v4142_v8 = vmul.f32 0.5, %v4140_v7  ;;  %v5814_v7 = vpack.c.bf16 %v4313_v55, %v4311_v27  ;;  %v4452_v55 = vld [vmem:[%s8111_s13 + $0x20] sm:$0xff] }
 0x762   : > { %v4143_v49 = vsub.f32 %v4128_v48, %v4142_v8 }
 0x764   : > { %v4144_v38 = vmul.f32 %v4143_v49, %v4143_v49  ;;  %v4315_v49 = vld [vmem:[%s8109_s11 + $0xc0] sm:$0xff] }
 0x766   : > { %v4145_v10 = vsel %vm3079_vm15, %v4144_v38, 0.0  ;;  %v4317_v38 = vld [vmem:[%s8109_s11 + $0xd0] sm:$0xff] }
 0x767   : > { %v4146_v13 = vrot.slane %v4145_v10, 4 }
 0x769   : > { %v4147_v14 = vadd.f32 %v4146_v13, %v4145_v10  ;;  %v4320_v10 = vld [vmem:[%s8109_s11 + $0xe8] sm:$0xff]  ;;  %v4322_v13 = vld [vmem:[%s8109_s11 + $0xf8] sm:$0xff] }
 0x76b   : > { %v4148_v15 = vrot.slane %v4147_v14, 2 }
 0x76d   : > { %v4149_v29 = vadd.f32 %v4148_v15, %v4147_v14  ;;  %v5818_v14 = vpack.c.bf16 %v4317_v38, %v4315_v49  ;;  %v5820_v15 = vpack.c.bf16 %v4322_v13, %v4320_v10  ;;  %v4454_v38 = vld [vmem:[%s8111_s13 + $0x30] sm:$0xff]  ;;  %v4455_v10 = vld [vmem:[%s8111_s13 + $0x38] sm:$0xff]  ;;  %v4472_v13 = vld [vmem:[%s8111_s13 + $0xc0] sm:$0xff] }
 0x76f   : > { %v4150_v19 = vrot.slane %v4149_v29, 1 }
 0x771   : > { %v4151_v21 = vadd.f32 %v4150_v19, %v4149_v29  ;;  %v4319_v29 = vld [vmem:[%s8109_s11 + $0xe0] sm:$0xff]  ;;  %v4321_v19 = vld [vmem:[%s8109_s11 + $0xf0] sm:$0xff] }
 0x773   : > { %v4152_v24 = vmul.f32 0.5, %v4151_v21  ;;  %v5822_v21 = vpack.c.bf16 %v4321_v19, %v4319_v29  ;;  %v4456_v19 = vld [vmem:[%s8111_s13 + $0x40] sm:$0xff] }
 0x775   : > { %v4153_v25 = vadd.f32 1e-05, %v4152_v24 }
 0x777   : > { %6038 = vrsqrt.f32 %v4153_v25 }
 0x781   : > { %v6039_v30 = vpop.eup %6038 }
 0x782   : > { %v4155_v34 = vmul.f32 %v6039_v30, %v4132_v26 }
 0x784   : > { %v4159_v51 = vrot.slane %v4155_v34, %v6502_v20  ;;  %v4161_v5 = vmul.f32 %v4155_v34, %v4142_v8  ;;  %v5816_v8 = vpack.c.bf16 %v4318_v6, %v4316_v62  ;;  %v4453_v62 = vld [vmem:[%s8111_s13 + $0x28] sm:$0xff]  ;;  %v4470_v6 = vld [vmem:[%s8111_s13 + $0xb0] sm:$0xff] }
 0x786   : > { %v4162_v11 = vsub.f32 %v4133_v35, %v4161_v5  ;;  %v4160_v23 = vmul.f32 %v4159_v51, %v4128_v48  ;;  %v4312_v48 = vld [vmem:[%s8109_s11 + $0xa8] sm:$0xff] }
 0x787   : > { %v5812_v60 = vpack.c.bf16 %v4314_v57, %v4312_v48  ;;  %v4451_v48 = vld [vmem:[%s8111_s13 + $0x18] sm:$0xff]  ;;  %v4468_v57 = vld [vmem:[%s8111_s13 + $0xa0] sm:$0xff] }
 0x788   : > { %v4166_v17 = vrot.slane %v4162_v11, %v6502_v20 }
 0x78a   : > { %v4167_v32 = vadd.f32 %v4166_v17, %v4160_v23 }
 0x78c   : > { %v4168_v37 = vmax.f32 %v4167_v32, 0.0 }
 0x78e   : > { %5574 = vmatmul.mubr.f32.vlgmr.msra.gmra.mrb[20].mxu1 %v4168_v37 }
 0x78f   : > { %4399 = vmatprep.mubr.f32.mxu1 %v6064_v0  ;;  %5795 = vmatpush1.bf16.msra.mxu1 %v5794_v31 }
 0x790   : > { %5797 = vmatprep.subr.bf16.mxu1 %v5796_v4  ;;  %v4255_v4 = vld [vmem:[%s8108_s10] sm:$0x1] }
 0x793   : > { %5799 = vmatpush1.bf16.msra.mxu1 %v5798_v9 }
 0x794   : > { %5801 = vmatprep.subr.bf16.mxu1 %v5800_v45 }
 0x797   : > { %5803 = vmatpush1.bf16.msra.mxu1 %v5802_v42  ;;  %v4464_v42 = vld [vmem:[%s8111_s13 + $0x80] sm:$0xff] }
 0x798   : > { %5805 = vmatprep.subr.bf16.mxu1 %v5804_v43  ;;  %v4465_v43 = vld [vmem:[%s8111_s13 + $0x88] sm:$0xff] }
 0x799   : > { %v5824_v53 = vpack.c.bf16 %v4465_v43, %v4464_v42 }
 0x79b   : > { %5807 = vmatpush1.bf16.msra.mxu1 %v5806_v52  ;;  %v4467_v52 = vld [vmem:[%s8111_s13 + $0x98] sm:$0xff] }
 0x79c   : > { %5809 = vmatprep.subr.bf16.mxu1 %v5808_v63  ;;  %v5826_v63 = vpack.c.bf16 %v4449_v44, %v4448_v16  ;;  %v5828_v28 = vpack.c.bf16 %v4467_v52, %v4466_v47 }
 0x79f   : > { %5811 = vmatpush1.bf16.msra.mxu1 %v5810_v1  ;;  %v4469_v1 = vld [vmem:[%s8111_s13 + $0xa8] sm:$0xff] }
 0x7a0   : > { %5813 = vmatprep.subr.bf16.mxu1 %v5812_v60  ;;  %v5830_v60 = vpack.c.bf16 %v4451_v48, %v4450_v56  ;;  %v5832_v27 = vpack.c.bf16 %v4469_v1, %v4468_v57 }
 0x7a3   : > { %5815 = vmatpush1.bf16.msra.mxu1 %v5814_v7  ;;  %v4471_v7 = vld [vmem:[%s8111_s13 + $0xb8] sm:$0xff] }
 0x7a4   : > { %5817 = vmatprep.subr.bf16.mxu1 %v5816_v8  ;;  %v5834_v8 = vpack.c.bf16 %v4453_v62, %v4452_v55  ;;  %v5836_v49 = vpack.c.bf16 %v4471_v7, %v4470_v6 }
 0x7a7   : > { %5819 = vmatpush1.bf16.msra.mxu1 %v5818_v14  ;;  %v4473_v14 = vld [vmem:[%s8111_s13 + $0xc8] sm:$0xff] }
 0x7a8   : > { %5821 = vmatprep.subr.bf16.mxu1 %v5820_v15  ;;  %v5838_v15 = vpack.c.bf16 %v4455_v10, %v4454_v38  ;;  %v5840_v29 = vpack.c.bf16 %v4473_v14, %v4472_v13 }
 0x7ab   : > { %5823 = vmatpush1.bf16.msra.mxu1 %v5822_v21  ;;  %v4457_v21 = vld [vmem:[%s8111_s13 + $0x48] sm:$0xff] }
 0x7ac   : > { %5825 = vmatprep.subr.bf16.mxu1 %v5824_v53 }
 0x861   : > { %v4251_v24 = vpop.f32.mrb[20].mxu1 }
 0x862   : > { %v4257_v25 = vsel %vm3079_vm15, %v4251_v24, 0.0  ;;  %v5575_v26 = vpop.f32.mrb[21].mxu1 }
 0x863   : > { %v4258_v30 = vrot.slane %v4257_v25, 4  ;;  %v5842_v26 = vpack.c.bf16 %v4457_v21, %v4456_v19 }
 0x865   : > { %v4259_v34 = vadd.f32 %v4258_v30, %v4257_v25  ;;  %v4475_v25 = vld [vmem:[%s8111_s13 + $0xd8] sm:$0xff] }
 0x867   : > { %v4260_v35 = vrot.slane %v4259_v34, 2 }
 0x869   : > { %v4261_v51 = vadd.f32 %v4260_v35, %v4259_v34  ;;  %v4458_v34 = vld [vmem:[%s8111_s13 + $0x50] sm:$0xff]  ;;  %v4459_v35 = vld [vmem:[%s8111_s13 + $0x58] sm:$0xff] }
 0x86b   : > { %v4262_v5 = vrot.slane %v4261_v51, 1 }
 0x86d   : > { %v4263_v11 = vadd.f32 %v4262_v5, %v4261_v51  ;;  %v4476_v51 = vld [vmem:[%s8111_s13 + $0xe0] sm:$0xff]  ;;  %v4477_v5 = vld [vmem:[%s8111_s13 + $0xe8] sm:$0xff] }
 0x86f   : > { %v4264_v23 = vmul.f32 0.5, %v4263_v11  ;;  %v5846_v11 = vpack.c.bf16 %v4459_v35, %v4458_v34 }
 0x871   : > { %v4265_v17 = vsub.f32 %v4251_v24, %v4264_v23 }
 0x873   : > { %v4266_v32 = vmul.f32 %v4265_v17, %v4265_v17  ;;  %v4460_v17 = vld [vmem:[%s8111_s13 + $0x60] sm:$0xff] }
 0x875   : > { %v4267_v37 = vsel %vm3079_vm15, %v4266_v32, 0.0  ;;  %v4461_v32 = vld [vmem:[%s8111_s13 + $0x68] sm:$0xff] }
 0x876   : > { %v4268_v59 = vrot.slane %v4267_v37, 4 }
 0x878   : > { %v4269_v12 = vadd.f32 %v4268_v59, %v4267_v37  ;;  %v4478_v37 = vld [vmem:[%s8111_s13 + $0xf0] sm:$0xff]  ;;  %v4479_v59 = vld [vmem:[%s8111_s13 + $0xf8] sm:$0xff] }
 0x87a   : > { %v4270_v36 = vrot.slane %v4269_v12, 2 }
 0x87c   : > { %v4271_v46 = vadd.f32 %v4270_v36, %v4269_v12  ;;  %v5850_v12 = vpack.c.bf16 %v4461_v32, %v4460_v17  ;;  %v5852_v36 = vpack.c.bf16 %v4479_v59, %v4478_v37  ;;  %v4593_v17 = vld [vmem:[%s8114_s16] sm:$0xff]  ;;  %v4595_v37 = vld [vmem:[%s8114_s16 + $0x10] sm:$0xff]  ;;  %v4600_v59 = vld [vmem:[%s8114_s16 + $0x38] sm:$0xff] }
 0x87e   : > { %v4272_v40 = vrot.slane %v4271_v46, 1 }
 0x880   : > { %v4273_v39 = vadd.f32 %v4272_v40, %v4271_v46  ;;  %v4462_v46 = vld [vmem:[%s8111_s13 + $0x70] sm:$0xff]  ;;  %v4463_v40 = vld [vmem:[%s8111_s13 + $0x78] sm:$0xff] }
 0x882   : > { %v4274_v54 = vmul.f32 0.5, %v4273_v39  ;;  %v5854_v39 = vpack.c.bf16 %v4463_v40, %v4462_v46  ;;  %v4597_v46 = vld [vmem:[%s8114_s16 + $0x20] sm:$0xff]  ;;  %v4599_v40 = vld [vmem:[%s8114_s16 + $0x30] sm:$0xff] }
 0x884   : > { %v4275_v31 = vadd.f32 1e-05, %v4274_v54  ;;  %v4323_v54 = vld [vmem:[%s8110_s12] sm:$0x3] }
 0x886   : > { %6040 = vrsqrt.f32 %v4275_v31  ;;  %v4331_v31 = vsub.s32 1, %v6496_v18 }
 0x890   : > { %v6041_v2 = vpop.eup %6040 }
 0x891   : > { %v4277_v3 = vmul.f32 %v6041_v2, %v4255_v4  ;;  %v4328_v4 = vrot.slane %v4323_v54, %v6502_v20  ;;  %v4332_v2 = vrot.slane %v4323_v54, %v4331_v31  ;;  %v4604_v54 = vld [vmem:[%s8114_s16 + $0x58] sm:$0xff] }
 0x893   : > { %v4281_v22 = vrot.slane %v4277_v3, %v6502_v20  ;;  %v4283_v9 = vmul.f32 %v4277_v3, %v4264_v23  ;;  %v5848_v23 = vpack.c.bf16 %v4477_v5, %v4476_v51 }
 0x895   : > { %v4284_v45 = vsub.f32 %v4256_v33, %v4283_v9  ;;  %v4282_v61 = vmul.f32 %v4281_v22, %v4251_v24  ;;  %v4474_v24 = vld [vmem:[%s8111_s13 + $0xd0] sm:$0xff] }
 0x896   : > { %v5844_v30 = vpack.c.bf16 %v4475_v25, %v4474_v24 }
 0x897   : > { %v4288_v41 = vrot.slane %v4284_v45, %v6502_v20 }
 0x899   : > { %v4289_v58 = vadd.f32 %v4288_v41, %v4282_v61 }
 0x89b   : > { %v4290_v50 = vmax.f32 %v4289_v58, 0.0 }
 0x89d   : > { %4400 = vmatmul.mubr.f32.vlgmr.msra.gmra.mrb[22].mxu1 %v4290_v50 }
 0x89e   : > { %5827 = vmatpush3.bf16.msra.mxu1 %v5826_v63 }
 0x89f   : > { %5829 = vmatprep.subr.bf16.mxu1 %v5828_v28 }
 0x8a2   : > { %5831 = vmatpush3.bf16.msra.mxu1 %v5830_v60 }
 0x8a3   : > { %5833 = vmatprep.subr.bf16.mxu1 %v5832_v27 }
 0x8a6   : > { %5835 = vmatpush3.bf16.msra.mxu1 %v5834_v8 }
 0x8a7   : > { %5837 = vmatprep.subr.bf16.mxu1 %v5836_v49 }
 0x8aa   : > { %5839 = vmatpush3.bf16.msra.mxu1 %v5838_v15 }
 0x8ab   : > { %5841 = vmatprep.subr.bf16.mxu1 %v5840_v29 }
 0x8ae   : > { %5843 = vmatpush3.bf16.msra.mxu1 %v5842_v26 }
 0x8af   : > { %5845 = vmatprep.subr.bf16.mxu1 %v5844_v30 }
 0x8b2   : > { %5847 = vmatpush3.bf16.msra.mxu1 %v5846_v11  ;;  %v4594_v11 = vld [vmem:[%s8114_s16 + $0x8] sm:$0xff] }
 0x8b3   : > { %5849 = vmatprep.subr.bf16.mxu1 %v5848_v23  ;;  %v4596_v23 = vld [vmem:[%s8114_s16 + $0x18] sm:$0xff] }
 0x8b4   : > { %v5856_v32 = vpack.c.bf16 %v4596_v23, %v4594_v11 }
 0x8b6   : > { %5851 = vmatpush3.bf16.msra.mxu1 %v5850_v12  ;;  %v5858_v12 = vpack.c.bf16 %v4595_v37, %v4593_v17 }
 0x8b7   : > { %5853 = vmatprep.subr.bf16.mxu1 %v5852_v36 }
 0x8ba   : > { %5855 = vmatpush3.bf16.msra.mxu1 %v5854_v39  ;;  %v4602_v39 = vld [vmem:[%s8114_s16 + $0x48] sm:$0xff] }
 0x8bb   : > { %5857 = vmatprep.subr.bf16.mxu1 %v5856_v32 }
 0x970   : > { %v4401_v3 = vpop.f32.mrb[22].mxu1 }
 0x971   : > { %v4402_v33 = vadd.f32 %v4401_v3, %v4328_v4  ;;  %v4403_v22 = vpop.f32.mrb[23].mxu1  ;;  %v5862_v4 = vpack.c.bf16 %v4599_v40, %v4597_v46  ;;  %v4601_v3 = vld [vmem:[%s8114_s16 + $0x40] sm:$0xff] }
 0x972   : > { %v4404_v9 = vadd.f32 %v4403_v22, %v4332_v2  ;;  %v5864_v2 = vpack.c.bf16 %v4604_v54, %v4602_v39  ;;  %v4606_v22 = vld [vmem:[%s8114_s16 + $0x68] sm:$0xff] }
 0x973   : > { %v4406_v45 = vsel %vm3079_vm15, %v4402_v33, 0.0 }
 0x974   : > { %v4407_v61 = vrot.slane %v4406_v45, 4  ;;  %v4413_v41 = vsel %vm3079_vm15, %v4404_v9, 0.0 }
 0x975   : > { %v4414_v58 = vrot.slane %v4413_v41, 4 }
 0x976   : > { %v4408_v50 = vadd.f32 %v4407_v61, %v4406_v45 }
 0x977   : > { %v4415_v42 = vadd.f32 %v4414_v58, %v4413_v41  ;;  %v4605_v41 = vld [vmem:[%s8114_s16 + $0x60] sm:$0xff]  ;;  %v4607_v58 = vld [vmem:[%s8114_s16 + $0x70] sm:$0xff] }
 0x978   : > { %v4409_v43 = vrot.slane %v4408_v50, 2 }
 0x979   : > { %v4416_v16 = vrot.slane %v4415_v42, 2 }
 0x97a   : > { %v4410_v53 = vadd.f32 %v4409_v43, %v4408_v50  ;;  %v5870_v50 = vpack.c.bf16 %v4607_v58, %v4605_v41  ;;  %v4996_v43 = vld [vmem:[%s8112_s14] ss:$0 sm:$0xff] }
 0x97b   : > { %v4417_v44 = vadd.f32 %v4416_v16, %v4415_v42 }
 0x97c   : > { %v4411_v47 = vrot.slane %v4410_v53, 1 }
 0x97d   : > { %v4418_v52 = vrot.slane %v4417_v44, 1 }
 0x97e   : > { %v4412_v63 = vadd.f32 %v4411_v47, %v4410_v53 }
 0x97f   : > { %v4419_v28 = vadd.f32 %v4418_v52, %v4417_v44 }
 0x980   : > { %v4420_v56 = vmul.f32 0.5, %v4412_v63 }
 0x981   : > { %v4421_v48 = vmul.f32 0.5, %v4419_v28 }
 0x982   : > { %v4422_v57 = vsub.f32 %v4402_v33, %v4420_v56  ;;  %v4603_v33 = vld [vmem:[%s8114_s16 + $0x50] sm:$0xff] }
 0x983   : > { %v4423_v1 = vsub.f32 %v4404_v9, %v4421_v48  ;;  %v4608_v9 = vld [vmem:[%s8114_s16 + $0x78] sm:$0xff]  ;;  %v5866_v45 = vpack.c.bf16 %v4603_v33, %v4601_v3 }
 0x984   : > { %v4424_v60 = vmul.f32 %v4422_v57, %v4422_v57  ;;  %v5868_v61 = vpack.c.bf16 %v4608_v9, %v4606_v22 }
 0x985   : > { %v4425_v27 = vmul.f32 %v4423_v1, %v4423_v1 }
 0x986   : > { %v4426_v55 = vsel %vm3079_vm15, %v4424_v60, 0.0 }
 0x987   : > { %v4427_v62 = vrot.slane %v4426_v55, 4  ;;  %v4433_v6 = vsel %vm3079_vm15, %v4425_v27, 0.0 }
 0x988   : > { %v4434_v7 = vrot.slane %v4433_v6, 4 }
 0x989   : > { %v4428_v8 = vadd.f32 %v4427_v62, %v4426_v55 }
 0x98a   : > { %v4435_v49 = vadd.f32 %v4434_v7, %v4433_v6 }
 0x98b   : > { %v4429_v38 = vrot.slane %v4428_v8, 2 }
 0x98c   : > { %v4436_v10 = vrot.slane %v4435_v49, 2 }
 0x98d   : > { %v4430_v13 = vadd.f32 %v4429_v38, %v4428_v8 }
 0x98e   : > { %v4437_v14 = vadd.f32 %v4436_v10, %v4435_v49 }
 0x98f   : > { %v4431_v15 = vrot.slane %v4430_v13, 1 }
 0x990   : > { %v4438_v29 = vrot.slane %v4437_v14, 1 }
 0x991   : > { %v4432_v19 = vadd.f32 %v4431_v15, %v4430_v13 }
 0x992   : > { %v4439_v21 = vadd.f32 %v4438_v29, %v4437_v14  ;;  %v4557_v14 = vld [vmem:[%s8113_s15] sm:$0x1] }
 0x993   : > { %v4440_v24 = vmul.f32 0.5, %v4432_v19  ;;  %v4558_v19 = vld [vmem:[%s8113_s15 + $0x1] sm:$0x1] }
 0x994   : > { %v4441_v25 = vmul.f32 0.5, %v4439_v21 }
 0x995   : > { %v4442_v26 = vadd.f32 1e-05, %v4440_v24 }
 0x996   : > { %v4443_v30 = vadd.f32 1e-05, %v4441_v25 }
 0x997   : > { %6042 = vrsqrt.f32 %v4442_v26 }
 0x998   : > { %6044 = vrsqrt.f32 %v4443_v30 }
 0x9a1   : > { %v6043_v34 = vpop.eup %6042 }
 0x9a2   : > { %v6045_v35 = vpop.eup %6044  ;;  %v4446_v5 = vmul.f32 %v6043_v34, %v4422_v57 }
 0x9a3   : > { %v4447_v51 = vmul.f32 %v6045_v35, %v4423_v1 }
 0x9a5   : > { %4551 = vmatprep.mubr.f32.mxu1 %v4447_v51  ;;  %v4609_v51 = vld [vmem:[%s8115_s17] sm:$0x3] }
 0x9a6   : > { %4552 = vmatmul.mubr.f32.vlgmr.msra.gmra.mrb[24].mxu1 %v4446_v5  ;;  %v4614_v5 = vrot.slane %v4609_v51, %v6502_v20  ;;  %v4618_v11 = vrot.slane %v4609_v51, %v4331_v31 }
 0x9a7   : > { %4688 = vmatprep.mubr.f32.mxu1 %v6064_v0  ;;  %v4598_v0 = vld [vmem:[%s8114_s16 + $0x28] sm:$0xff]  ;;  %5859 = vmatpush1.bf16.msra.mxu1 %v5858_v12 }
 0x9a8   : > { %v5860_v36 = vpack.c.bf16 %v4600_v59, %v4598_v0 }
 0x9aa   : > { %5861 = vmatprep.subr.bf16.mxu1 %v5860_v36 }
 0x9ab   : > { %5863 = vmatpush1.bf16.msra.mxu1 %v5862_v4 }
 0x9ac   : > { %5865 = vmatprep.subr.bf16.mxu1 %v5864_v2 }
 0x9af   : > { %5867 = vmatpush1.bf16.msra.mxu1 %v5866_v45 }
 0x9b0   : > { %5869 = vmatprep.subr.bf16.mxu1 %v5868_v61 }
 0x9b3   : > { %5871 = vmatpush1.bf16.msra.mxu1 %v5870_v50 }
 0xa79   : > { %v5190_v42 = vpop.f32.mrb[24].mxu1 }
 0xa7a   : > { %v5191_v16 = vpop.f32.mrb[25].mxu1 }
 0xa7b   : > { %v5192_v53 = vadd.f32 %v5191_v16, %v5190_v42 }
 0xa7d   : > { %v4554_v44 = vadd.f32 %v5192_v53, %v4996_v43 }
 0xa7f   : > { %v4559_v47 = vsel %vm662_vm3, %v4554_v44, 0.0 }
 0xa80   : > { %v4560_v52 = vrot.slane %v4559_v47, 4 }
 0xa82   : > { %v4561_v63 = vadd.f32 %v4560_v52, %v4559_v47 }
 0xa84   : > { %v4562_v28 = vrot.slane %v4561_v63, 2 }
 0xa86   : > { %v4563_v56 = vadd.f32 %v4562_v28, %v4561_v63 }
 0xa88   : > { %v4564_v48 = vrot.slane %v4563_v56, 1 }
 0xa8a   : > { %v4565_v57 = vadd.f32 %v4564_v48, %v4563_v56 }
 0xa8c   : > { %v4566_v1 = vmul.f32 0.5, %v4565_v57 }
 0xa8e   : > { %v4567_v60 = vsub.f32 %v4554_v44, %v4566_v1 }
 0xa90   : > { %v4568_v27 = vmul.f32 %v4567_v60, %v4567_v60 }
 0xa92   : > { %v4569_v55 = vsel %vm662_vm3, %v4568_v27, 0.0 }
 0xa93   : > { %v4570_v62 = vrot.slane %v4569_v55, 4 }
 0xa95   : > { %v4571_v6 = vadd.f32 %v4570_v62, %v4569_v55 }
 0xa97   : > { %v4572_v7 = vrot.slane %v4571_v6, 2 }
 0xa99   : > { %v4573_v8 = vadd.f32 %v4572_v7, %v4571_v6 }
 0xa9b   : > { %v4574_v49 = vrot.slane %v4573_v8, 1 }
 0xa9d   : > { %v4575_v38 = vadd.f32 %v4574_v49, %v4573_v8 }
 0xa9f   : > { %v4576_v10 = vmul.f32 0.5, %v4575_v38 }
 0xaa1   : > { %v4577_v13 = vadd.f32 1e-05, %v4576_v10 }
 0xaa3   : > { %6046 = vrsqrt.f32 %v4577_v13 }
 0xaad   : > { %v6047_v15 = vpop.eup %6046 }
 0xaae   : > { %v4579_v29 = vmul.f32 %v6047_v15, %v4557_v14 }
 0xab0   : > { %v4583_v21 = vrot.slane %v4579_v29, %v6502_v20  ;;  %v4585_v24 = vmul.f32 %v4579_v29, %v4566_v1 }
 0xab2   : > { %v4586_v25 = vsub.f32 %v4558_v19, %v4585_v24  ;;  %v4584_v26 = vmul.f32 %v4583_v21, %v4554_v44 }
 0xab4   : > { %v4590_v30 = vrot.slane %v4586_v25, %v6502_v20 }
 0xab6   : > { %v4591_v34 = vadd.f32 %v4590_v30, %v4584_v26 }
 0xab8   : > { %v4592_v35 = vmax.f32 %v4591_v34, 0.0 }
 0xaba   : > { %4997 = vmatmul.mubr.msk.f32.vlgmr.msra.gmra.mrb[26].mxu1 %vm643_vm2, %v4592_v35 }
 0xb8d   : > { %v4690_v23 = vpop.f32.mrb[26].mxu1 }
 0xb8e   : > { %v4691_v17 = vadd.f32 %v4690_v23, %v4614_v5  ;;  %v4692_v32 = vpop.f32.mrb[27].mxu1 }
 0xb8f   : > { %v4693_v37 = vadd.f32 %v4692_v32, %v4618_v11 }
 0xb91   : > { %v4697_v0 = vcombine.low %v4691_v17, %v4693_v37 }
 0xb93   : > { %4998 = vst.sshfl [vmem:[%s6283_s20] sm:$0x33 pattern:$0x76325410] %v4697_v0 }
 0xb94 PF: > { %s8132_s21 = sld [smem:[#allocation7_spill]] }
 0xb9a   : > { %s30_s0 = sadd.s32 1, %s8132_s21  }
 0xb9b   : > { %p27_p5 = scmp.ge.s32.totalorder %s30_s0, 5  }
 0xb9d   :  { %29 = sbr.rel (!%p27_p5) target bundleno = 5 (0x5), region = 276 }

</bundles_post_ra>
